<compile_context>
chip_gen: v5e
topology: v5e:2x2
jax: 0.10.0
libtpu: 0.0.40
codegen_flags: <defaults>
</compile_context>

<pallas_src>
import functools

import jax
import jax.numpy as jnp
import numpy as np
from jax import lax
from jax.experimental import pallas as pl
from jax.experimental.pallas import tpu as pltpu

EMBED = 64
HIDDEN = 128
NUM_TAGS = 17
TAGS_PAD = 128          # lane-dense output width (multiple of 128)
NEG_BIG = -1e30         # padded-tag bias -> exp() underflows to exactly 0


def _bilstm_kernel(x_ref,                 # (T*Bt, E)   embeddings, time-major rows
                   wih_ref,               # (E, 8H)     [fwd i,f,g,o | bwd i,f,g,o]
                   ball_ref,              # (1, 8H)     b_ih + b_hh, both directions
                   whhf_ref, whhb_ref,    # (H, 4H) each
                   wout_ref,              # (2H, TAGS_PAD)
                   bout_ref,              # (1, TAGS_PAD)  (padded cols = -1e30)
                   out_ref,               # (T*Bt, TAGS_PAD) log-softmax scores
                   zin_scr,               # (T*Bt, 8H)  VMEM scratch: hoisted input proj
                   hcat_scr,              # (T*Bt, 2H)  VMEM scratch: [h_fwd | h_bwd]
                   *, seq_len, batch_tile):
    T, Bt, H = seq_len, batch_tile, HIDDEN
    H4, H8 = 4 * H, 8 * H

    # ---- Phase 1: one big input-projection matmul (fills the MXU), biases folded. ----
    zin_scr[...] = (jnp.dot(x_ref[...], wih_ref[...],
                            preferred_element_type=jnp.float32) + ball_ref[...])

    # Hoist recurrent weights out of the time loop (loaded once into vregs/VMEM view).
    whh_f = whhf_ref[...]
    whh_b = whhb_ref[...]

    # ---- Phase 2: interleaved fwd/bwd recurrence (two independent serial chains). ----
    def step(s, carry):
        h_f, c_f, h_b, c_b = carry
        t_f = s
        t_b = T - 1 - s
        row_f = pl.multiple_of(t_f * Bt, Bt)
        row_b = pl.multiple_of(t_b * Bt, Bt)

        z_f = zin_scr[pl.ds(row_f, Bt), 0:H4] + jnp.dot(
            h_f, whh_f, preferred_element_type=jnp.float32)
        z_b = zin_scr[pl.ds(row_b, Bt), H4:H8] + jnp.dot(
            h_b, whh_b, preferred_element_type=jnp.float32)

        # PyTorch gate order: i, f, g, o (f32 gate math: v5e-safe, matches reference).
        i_f = jax.nn.sigmoid(z_f[:, 0:H])
        f_f = jax.nn.sigmoid(z_f[:, H:2 * H])
        g_f = jnp.tanh(z_f[:, 2 * H:3 * H])
        o_f = jax.nn.sigmoid(z_f[:, 3 * H:4 * H])
        c_f = f_f * c_f + i_f * g_f
        h_f = o_f * jnp.tanh(c_f)

        i_b = jax.nn.sigmoid(z_b[:, 0:H])
        f_b = jax.nn.sigmoid(z_b[:, H:2 * H])
        g_b = jnp.tanh(z_b[:, 2 * H:3 * H])
        o_b = jax.nn.sigmoid(z_b[:, 3 * H:4 * H])
        c_b = f_b * c_b + i_b * g_b
        h_b = o_b * jnp.tanh(c_b)

        # Write into halves of one hidden slab -> no per-t concat later.
        hcat_scr[pl.ds(row_f, Bt), 0:H] = h_f
        hcat_scr[pl.ds(row_b, Bt), H:2 * H] = h_b
        return h_f, c_f, h_b, c_b

    zero = jnp.zeros((Bt, H), jnp.float32)
    unroll = True if T <= 32 else 4
    lax.fori_loop(0, T, step, (zero, zero, zero, zero), unroll=unroll)

    # ---- Phase 3: one slab output projection + slab log_softmax (lane-dense store). ----
    logits = (jnp.dot(hcat_scr[...], wout_ref[...],
                      preferred_element_type=jnp.float32) + bout_ref[...])
    m = jnp.max(logits, axis=-1, keepdims=True)
    lse = jnp.log(jnp.sum(jnp.exp(logits - m), axis=-1, keepdims=True)) + m
    out_ref[...] = logits - lse


def _batch_tile(batch):
    bp = ((batch + 7) // 8) * 8        # f32 sublane granularity
    return min(bp, 128)


def bilstm_forward(sentences, params):
    """sentences: (B, T) int32 token ids -> (B, T, NUM_TAGS) log-probs (batch-first)."""
    B, T = sentences.shape
    H = HIDDEN

    # Glue: embedding gather + time-major layout (XLA handles gather/transpose well).
    emb = jnp.take(params["embedding"], sentences, axis=0)          # (B, T, E)
    x = jnp.transpose(emb, (1, 0, 2)).astype(jnp.float32)           # (T, B, E)

    Bt = _batch_tile(B)
    B_pad = ((B + Bt - 1) // Bt) * Bt
    if B_pad != B:
        x = jnp.pad(x, ((0, 0), (0, B_pad - B), (0, 0)))
    G = B_pad // Bt

    # Per-tile, time-major 2-D layout: (G, T*Bt, E); rows within a tile are t-major.
    x_tiled = (x.reshape(T, G, Bt, EMBED)
                 .transpose(1, 0, 2, 3)
                 .reshape(G, T * Bt, EMBED))

    # Pack weights: [fwd | bwd] input proj, folded biases, lane-padded output head.
    wih_all = jnp.concatenate([params["wih_f"], params["wih_b"]], axis=1)   # (E, 8H)
    b_all = jnp.concatenate([params["b_f"], params["b_b"]], axis=1)         # (1, 8H)
    wout_pad = jnp.zeros((2 * H, TAGS_PAD), jnp.float32).at[:, :NUM_TAGS].set(
        params["wout"])
    bout_pad = jnp.full((1, TAGS_PAD), NEG_BIG, jnp.float32).at[:, :NUM_TAGS].set(
        params["bout"])

    kernel = functools.partial(_bilstm_kernel, seq_len=T, batch_tile=Bt)

    out_tiled = pl.pallas_call(
        kernel,
        grid=(G,),
        out_shape=jax.ShapeDtypeStruct((G, T * Bt, TAGS_PAD), jnp.float32),
        in_specs=[
            pl.BlockSpec((None, T * Bt, EMBED), lambda g: (g, 0, 0)),
            pl.BlockSpec((EMBED, 8 * H), lambda g: (0, 0)),
            pl.BlockSpec((1, 8 * H), lambda g: (0, 0)),
            pl.BlockSpec((H, 4 * H), lambda g: (0, 0)),
            pl.BlockSpec((H, 4 * H), lambda g: (0, 0)),
            pl.BlockSpec((2 * H, TAGS_PAD), lambda g: (0, 0)),
            pl.BlockSpec((1, TAGS_PAD), lambda g: (0, 0)),
        ],
        out_specs=pl.BlockSpec((None, T * Bt, TAGS_PAD), lambda g: (g, 0, 0)),
        scratch_shapes=[
            pltpu.VMEM((T * Bt, 8 * H), jnp.float32),   # hoisted input projection
            pltpu.VMEM((T * Bt, 2 * H), jnp.float32),   # [h_fwd | h_bwd] slab
        ],
        compiler_params=pltpu.CompilerParams(dimension_semantics=("parallel",)),
    )(x_tiled, wih_all, b_all, params["whh_f"], params["whh_b"], wout_pad, bout_pad)

    # Undo tiling, drop batch padding and padded tag lanes, back to batch-first.
    out = (out_tiled.reshape(G, T, Bt, TAGS_PAD)
                     .transpose(1, 0, 2, 3)
                     .reshape(T, B_pad, TAGS_PAD))[:, :B, :NUM_TAGS]
    return jnp.transpose(out, (1, 0, 2))                            # (B, T, C)


def init_params(key, vocab_size):
    ks = jax.random.split(key, 11)
    bound = 1.0 / np.sqrt(HIDDEN)

    def u(k, shape, b=bound):
        return jax.random.uniform(k, shape, jnp.float32, -b, b)

    return {
        "embedding": jax.random.normal(ks[0], (vocab_size, EMBED), jnp.float32),
        # PyTorch stores W_ih as (4H, E) / W_hh as (4H, H); we keep them transposed.
        "wih_f": u(ks[1], (EMBED, 4 * HIDDEN)),
        "whh_f": u(ks[2], (HIDDEN, 4 * HIDDEN)),
        "b_f":   u(ks[3], (1, 4 * HIDDEN)) + u(ks[4], (1, 4 * HIDDEN)),   # b_ih + b_hh
        "wih_b": u(ks[5], (EMBED, 4 * HIDDEN)),
        "whh_b": u(ks[6], (HIDDEN, 4 * HIDDEN)),
        "b_b":   u(ks[7], (1, 4 * HIDDEN)) + u(ks[8], (1, 4 * HIDDEN)),
        "wout":  u(ks[9], (2 * HIDDEN, NUM_TAGS), 1.0 / np.sqrt(2 * HIDDEN)),
        "bout":  u(ks[10], (1, NUM_TAGS), 1.0 / np.sqrt(2 * HIDDEN)),
    }


def reference_forward(sentences, params):
    """Pure-JAX reference matching torch semantics (batch-first bi-LSTM + linear + log_softmax)."""
    embeds = jnp.take(params["embedding"], sentences, axis=0)       # (B, T, E)
    B, T, _ = embeds.shape

    def run(wih, whh, b, reverse):
        h = jnp.zeros((B, HIDDEN), jnp.float32)
        c = jnp.zeros((B, HIDDEN), jnp.float32)
        outs = [None] * T
        order = range(T - 1, -1, -1) if reverse else range(T)
        for t in order:
            z = embeds[:, t, :] @ wih + h @ whh + b
            i = jax.nn.sigmoid(z[:, :HIDDEN])
            f = jax.nn.sigmoid(z[:, HIDDEN:2 * HIDDEN])
            g = jnp.tanh(z[:, 2 * HIDDEN:3 * HIDDEN])
            o = jax.nn.sigmoid(z[:, 3 * HIDDEN:4 * HIDDEN])
            c = f * c + i * g
            h = o * jnp.tanh(c)
            outs[t] = h
        return jnp.stack(outs, axis=1)                              # (B, T, H)

    hf = run(params["wih_f"], params["whh_f"], params["b_f"], reverse=False)
    hb = run(params["wih_b"], params["whh_b"], params["b_b"], reverse=True)
    hcat = jnp.concatenate([hf, hb], axis=-1)                       # (B, T, 2H)
    logits = hcat @ params["wout"] + params["bout"]                 # (B, T, C)
    return jax.nn.log_softmax(logits, axis=2)


if __name__ == "__main__":
    vocab_size = 50
    B, T = 2, 8

    key = jax.random.PRNGKey(0)
    k_tok, k_par = jax.random.split(key)
    sentences = jax.random.randint(k_tok, (B, T), 0, vocab_size, dtype=jnp.int32)
    params = init_params(k_par, vocab_size)

    out = bilstm_forward(sentences, params)
    out = jax.block_until_ready(out)

    ref = reference_forward(sentences, params)
    assert out.shape == (B, T, NUM_TAGS)
    np.testing.assert_allclose(np.asarray(out), np.asarray(ref), rtol=1e-4, atol=1e-4)

    print("KERNEL_OK")
</pallas_src>

<mosaic_0001>
module attributes {stable_mosaic.version = 11 : i64} {
  func.func @_bilstm_kernel(%arg0: i32, %arg1: memref<1x64x64xf32, #tpu.memory_space<vmem>>, %arg2: memref<64x1024xf32, #tpu.memory_space<vmem>>, %arg3: memref<1x1024xf32, #tpu.memory_space<vmem>>, %arg4: memref<128x512xf32, #tpu.memory_space<vmem>>, %arg5: memref<128x512xf32, #tpu.memory_space<vmem>>, %arg6: memref<256x128xf32, #tpu.memory_space<vmem>>, %arg7: memref<1x128xf32, #tpu.memory_space<vmem>>, %arg8: memref<1x64x128xf32, #tpu.memory_space<vmem>>, %arg9: memref<64x1024xf32, #tpu.memory_space<vmem>>, %arg10: memref<64x256xf32, #tpu.memory_space<vmem>>) attributes {dimension_semantics = [#tpu.dimension_semantics<parallel>], iteration_bounds = array<i64: 1>, scalar_prefetch = 0 : i64, scratch_operands = 2 : i64, tpu.core_type = #tpu.core_type<tc>, window_params = [{transform_indices = @transform_0, window_bounds = array<i64: 1, 64, 64>}, {pipeline_mode = #tpu.pipeline_mode<synchronous>, transform_indices = @transform_1, window_bounds = array<i64: 64, 1024>}, {pipeline_mode = #tpu.pipeline_mode<synchronous>, transform_indices = @transform_2, window_bounds = array<i64: 1, 1024>}, {pipeline_mode = #tpu.pipeline_mode<synchronous>, transform_indices = @transform_3, window_bounds = array<i64: 128, 512>}, {pipeline_mode = #tpu.pipeline_mode<synchronous>, transform_indices = @transform_4, window_bounds = array<i64: 128, 512>}, {pipeline_mode = #tpu.pipeline_mode<synchronous>, transform_indices = @transform_5, window_bounds = array<i64: 256, 128>}, {pipeline_mode = #tpu.pipeline_mode<synchronous>, transform_indices = @transform_6, window_bounds = array<i64: 1, 128>}, {transform_indices = @transform_7, window_bounds = array<i64: 1, 64, 128>}]} {
    %c0 = arith.constant 0 : index
    %c0_0 = arith.constant 0 : index
    %c0_1 = arith.constant 0 : index
    %0 = vector.load %arg1[%c0, %c0_0, %c0_1] : memref<1x64x64xf32, #tpu.memory_space<vmem>>, vector<1x64x64xf32>
    %1 = vector.shape_cast %0 : vector<1x64x64xf32> to vector<64x64xf32>
    %c0_2 = arith.constant 0 : index
    %c0_3 = arith.constant 0 : index
    %2 = vector.load %arg2[%c0_2, %c0_3] : memref<64x1024xf32, #tpu.memory_space<vmem>>, vector<64x1024xf32>
    %cst = arith.constant dense<0.000000e+00> : vector<64x1024xf32>
    %3 = tpu.matmul %1, %2, %cst {dimension_numbers = #tpu.dot_dimension_numbers<[1], [0], [0], [1], [0, 0, 1, 1], [], []>} : vector<64x64xf32>, vector<64x1024xf32>, vector<64x1024xf32> -> vector<64x1024xf32>
    %c0_4 = arith.constant 0 : index
    %c0_5 = arith.constant 0 : index
    %4 = vector.load %arg3[%c0_4, %c0_5] : memref<1x1024xf32, #tpu.memory_space<vmem>>, vector<1x1024xf32>
    %5 = vector.broadcast %4 : vector<1x1024xf32> to vector<64x1024xf32>
    %6 = arith.addf %3, %5 : vector<64x1024xf32>
    %c0_6 = arith.constant 0 : index
    %c0_7 = arith.constant 0 : index
    %7 = vector.load %arg9[%c0_6, %c0_7] : memref<64x1024xf32, #tpu.memory_space<vmem>>, vector<64x1024xf32>
    tpu.vector_store %arg9[%c0_6, %c0_7], %6 {strides = array<i32>} : memref<64x1024xf32, #tpu.memory_space<vmem>>, vector<64x1024xf32>,
    %c0_8 = arith.constant 0 : index
    %c0_9 = arith.constant 0 : index
    %8 = vector.load %arg4[%c0_8, %c0_9] : memref<128x512xf32, #tpu.memory_space<vmem>>, vector<128x512xf32>
    %c0_10 = arith.constant 0 : index
    %c0_11 = arith.constant 0 : index
    %9 = vector.load %arg5[%c0_10, %c0_11] : memref<128x512xf32, #tpu.memory_space<vmem>>, vector<128x512xf32>
    %cst_12 = arith.constant 0.000000e+00 : f32
    %10 = vector.broadcast %cst_12 : f32 to vector<8x128xf32>
    %c0_i32 = arith.constant 0 : i32
    %c7_i32 = arith.constant 7 : i32
    %11 = arith.subi %c7_i32, %c0_i32 : i32
    %c8_i32 = arith.constant 8 : i32
    %12 = arith.muli %c0_i32, %c8_i32 : i32
    %13 = tpu.assume_multiple %12, 8 : i32
    %c8_i32_13 = arith.constant 8 : i32
    %14 = arith.muli %11, %c8_i32_13 : i32
    %15 = tpu.assume_multiple %14, 8 : i32
    %16 = arith.index_cast %13 : i32 to index
    %c0_14 = arith.constant 0 : index
    %17 = vector.load %arg9[%16, %c0_14] : memref<64x1024xf32, #tpu.memory_space<vmem>>, vector<8x512xf32>
    %cst_15 = arith.constant dense<0.000000e+00> : vector<8x512xf32>
    %18 = tpu.matmul %10, %8, %cst_15 {dimension_numbers = #tpu.dot_dimension_numbers<[1], [0], [0], [1], [0, 0, 1, 1], [], []>} : vector<8x128xf32>, vector<128x512xf32>, vector<8x512xf32> -> vector<8x512xf32>
    %19 = arith.addf %17, %18 : vector<8x512xf32>
    %20 = arith.index_cast %15 : i32 to index
    %c512 = arith.constant 512 : index
    %21 = vector.load %arg9[%20, %c512] : memref<64x1024xf32, #tpu.memory_space<vmem>>, vector<8x512xf32>
    %cst_16 = arith.constant dense<0.000000e+00> : vector<8x512xf32>
    %22 = tpu.matmul %10, %9, %cst_16 {dimension_numbers = #tpu.dot_dimension_numbers<[1], [0], [0], [1], [0, 0, 1, 1], [], []>} : vector<8x128xf32>, vector<128x512xf32>, vector<8x512xf32> -> vector<8x512xf32>
    %23 = arith.addf %21, %22 : vector<8x512xf32>
    %24 = vector.extract_strided_slice %19 {offsets = [0, 0], sizes = [8, 128], strides = [1, 1]} : vector<8x512xf32> to vector<8x128xf32>
    %25 = arith.negf %24 : vector<8x128xf32>
    %26 = math.exp %25 : vector<8x128xf32>
    %cst_17 = arith.constant 1.000000e+00 : f32
    %27 = vector.broadcast %cst_17 : f32 to vector<8x128xf32>
    %28 = arith.addf %27, %26 : vector<8x128xf32>
    %29 = arith.divf %27, %28 : vector<8x128xf32>
    %30 = vector.extract_strided_slice %19 {offsets = [0, 128], sizes = [8, 128], strides = [1, 1]} : vector<8x512xf32> to vector<8x128xf32>
    %31 = arith.negf %30 : vector<8x128xf32>
    %32 = math.exp %31 : vector<8x128xf32>
    %cst_18 = arith.constant 1.000000e+00 : f32
    %33 = vector.broadcast %cst_18 : f32 to vector<8x128xf32>
    %34 = arith.addf %33, %32 : vector<8x128xf32>
    %35 = arith.divf %33, %34 : vector<8x128xf32>
    %36 = vector.extract_strided_slice %19 {offsets = [0, 256], sizes = [8, 128], strides = [1, 1]} : vector<8x512xf32> to vector<8x128xf32>
    %37 = math.tanh %36 : vector<8x128xf32>
    %38 = vector.extract_strided_slice %19 {offsets = [0, 384], sizes = [8, 128], strides = [1, 1]} : vector<8x512xf32> to vector<8x128xf32>
    %39 = arith.negf %38 : vector<8x128xf32>
    %40 = math.exp %39 : vector<8x128xf32>
    %cst_19 = arith.constant 1.000000e+00 : f32
    %41 = vector.broadcast %cst_19 : f32 to vector<8x128xf32>
    %42 = arith.addf %41, %40 : vector<8x128xf32>
    %43 = arith.divf %41, %42 : vector<8x128xf32>
    %44 = arith.mulf %35, %10 : vector<8x128xf32>
    %45 = arith.mulf %29, %37 : vector<8x128xf32>
    %46 = arith.addf %44, %45 : vector<8x128xf32>
    %47 = math.tanh %46 : vector<8x128xf32>
    %48 = arith.mulf %43, %47 : vector<8x128xf32>
    %49 = vector.extract_strided_slice %23 {offsets = [0, 0], sizes = [8, 128], strides = [1, 1]} : vector<8x512xf32> to vector<8x128xf32>
    %50 = arith.negf %49 : vector<8x128xf32>
    %51 = math.exp %50 : vector<8x128xf32>
    %cst_20 = arith.constant 1.000000e+00 : f32
    %52 = vector.broadcast %cst_20 : f32 to vector<8x128xf32>
    %53 = arith.addf %52, %51 : vector<8x128xf32>
    %54 = arith.divf %52, %53 : vector<8x128xf32>
    %55 = vector.extract_strided_slice %23 {offsets = [0, 128], sizes = [8, 128], strides = [1, 1]} : vector<8x512xf32> to vector<8x128xf32>
    %56 = arith.negf %55 : vector<8x128xf32>
    %57 = math.exp %56 : vector<8x128xf32>
    %cst_21 = arith.constant 1.000000e+00 : f32
    %58 = vector.broadcast %cst_21 : f32 to vector<8x128xf32>
    %59 = arith.addf %58, %57 : vector<8x128xf32>
    %60 = arith.divf %58, %59 : vector<8x128xf32>
    %61 = vector.extract_strided_slice %23 {offsets = [0, 256], sizes = [8, 128], strides = [1, 1]} : vector<8x512xf32> to vector<8x128xf32>
    %62 = math.tanh %61 : vector<8x128xf32>
    %63 = vector.extract_strided_slice %23 {offsets = [0, 384], sizes = [8, 128], strides = [1, 1]} : vector<8x512xf32> to vector<8x128xf32>
    %64 = arith.negf %63 : vector<8x128xf32>
    %65 = math.exp %64 : vector<8x128xf32>
    %cst_22 = arith.constant 1.000000e+00 : f32
    %66 = vector.broadcast %cst_22 : f32 to vector<8x128xf32>
    %67 = arith.addf %66, %65 : vector<8x128xf32>
    %68 = arith.divf %66, %67 : vector<8x128xf32>
    %69 = arith.mulf %60, %10 : vector<8x128xf32>
    %70 = arith.mulf %54, %62 : vector<8x128xf32>
    %71 = arith.addf %69, %70 : vector<8x128xf32>
    %72 = math.tanh %71 : vector<8x128xf32>
    %73 = arith.mulf %68, %72 : vector<8x128xf32>
    %74 = arith.index_cast %13 : i32 to index
    %c0_23 = arith.constant 0 : index
    %75 = vector.load %arg10[%74, %c0_23] : memref<64x256xf32, #tpu.memory_space<vmem>>, vector<8x128xf32>
    tpu.vector_store %arg10[%74, %c0_23], %48 {strides = array<i32>} : memref<64x256xf32, #tpu.memory_space<vmem>>, vector<8x128xf32>,
    %76 = arith.index_cast %15 : i32 to index
    %c128 = arith.constant 128 : index
    %77 = vector.load %arg10[%76, %c128] : memref<64x256xf32, #tpu.memory_space<vmem>>, vector<8x128xf32>
    tpu.vector_store %arg10[%76, %c128], %73 {strides = array<i32>} : memref<64x256xf32, #tpu.memory_space<vmem>>, vector<8x128xf32>,
    %c1_i32 = arith.constant 1 : i32
    %c7_i32_24 = arith.constant 7 : i32
    %78 = arith.subi %c7_i32_24, %c1_i32 : i32
    %c8_i32_25 = arith.constant 8 : i32
    %79 = arith.muli %c1_i32, %c8_i32_25 : i32
    %80 = tpu.assume_multiple %79, 8 : i32
    %c8_i32_26 = arith.constant 8 : i32
    %81 = arith.muli %78, %c8_i32_26 : i32
    %82 = tpu.assume_multiple %81, 8 : i32
    %83 = arith.index_cast %80 : i32 to index
    %c0_27 = arith.constant 0 : index
    %84 = vector.load %arg9[%83, %c0_27] : memref<64x1024xf32, #tpu.memory_space<vmem>>, vector<8x512xf32>
    %cst_28 = arith.constant dense<0.000000e+00> : vector<8x512xf32>
    %85 = tpu.matmul %48, %8, %cst_28 {dimension_numbers = #tpu.dot_dimension_numbers<[1], [0], [0], [1], [0, 0, 1, 1], [], []>} : vector<8x128xf32>, vector<128x512xf32>, vector<8x512xf32> -> vector<8x512xf32>
    %86 = arith.addf %84, %85 : vector<8x512xf32>
    %87 = arith.index_cast %82 : i32 to index
    %c512_29 = arith.constant 512 : index
    %88 = vector.load %arg9[%87, %c512_29] : memref<64x1024xf32, #tpu.memory_space<vmem>>, vector<8x512xf32>
    %cst_30 = arith.constant dense<0.000000e+00> : vector<8x512xf32>
    %89 = tpu.matmul %73, %9, %cst_30 {dimension_numbers = #tpu.dot_dimension_numbers<[1], [0], [0], [1], [0, 0, 1, 1], [], []>} : vector<8x128xf32>, vector<128x512xf32>, vector<8x512xf32> -> vector<8x512xf32>
    %90 = arith.addf %88, %89 : vector<8x512xf32>
    %91 = vector.extract_strided_slice %86 {offsets = [0, 0], sizes = [8, 128], strides = [1, 1]} : vector<8x512xf32> to vector<8x128xf32>
    %92 = arith.negf %91 : vector<8x128xf32>
    %93 = math.exp %92 : vector<8x128xf32>
    %cst_31 = arith.constant 1.000000e+00 : f32
    %94 = vector.broadcast %cst_31 : f32 to vector<8x128xf32>
    %95 = arith.addf %94, %93 : vector<8x128xf32>
    %96 = arith.divf %94, %95 : vector<8x128xf32>
    %97 = vector.extract_strided_slice %86 {offsets = [0, 128], sizes = [8, 128], strides = [1, 1]} : vector<8x512xf32> to vector<8x128xf32>
    %98 = arith.negf %97 : vector<8x128xf32>
    %99 = math.exp %98 : vector<8x128xf32>
    %cst_32 = arith.constant 1.000000e+00 : f32
    %100 = vector.broadcast %cst_32 : f32 to vector<8x128xf32>
    %101 = arith.addf %100, %99 : vector<8x128xf32>
    %102 = arith.divf %100, %101 : vector<8x128xf32>
    %103 = vector.extract_strided_slice %86 {offsets = [0, 256], sizes = [8, 128], strides = [1, 1]} : vector<8x512xf32> to vector<8x128xf32>
    %104 = math.tanh %103 : vector<8x128xf32>
    %105 = vector.extract_strided_slice %86 {offsets = [0, 384], sizes = [8, 128], strides = [1, 1]} : vector<8x512xf32> to vector<8x128xf32>
    %106 = arith.negf %105 : vector<8x128xf32>
    %107 = math.exp %106 : vector<8x128xf32>
    %cst_33 = arith.constant 1.000000e+00 : f32
    %108 = vector.broadcast %cst_33 : f32 to vector<8x128xf32>
    %109 = arith.addf %108, %107 : vector<8x128xf32>
    %110 = arith.divf %108, %109 : vector<8x128xf32>
    %111 = arith.mulf %102, %46 : vector<8x128xf32>
    %112 = arith.mulf %96, %104 : vector<8x128xf32>
    %113 = arith.addf %111, %112 : vector<8x128xf32>
    %114 = math.tanh %113 : vector<8x128xf32>
    %115 = arith.mulf %110, %114 : vector<8x128xf32>
    %116 = vector.extract_strided_slice %90 {offsets = [0, 0], sizes = [8, 128], strides = [1, 1]} : vector<8x512xf32> to vector<8x128xf32>
    %117 = arith.negf %116 : vector<8x128xf32>
    %118 = math.exp %117 : vector<8x128xf32>
    %cst_34 = arith.constant 1.000000e+00 : f32
    %119 = vector.broadcast %cst_34 : f32 to vector<8x128xf32>
    %120 = arith.addf %119, %118 : vector<8x128xf32>
    %121 = arith.divf %119, %120 : vector<8x128xf32>
    %122 = vector.extract_strided_slice %90 {offsets = [0, 128], sizes = [8, 128], strides = [1, 1]} : vector<8x512xf32> to vector<8x128xf32>
    %123 = arith.negf %122 : vector<8x128xf32>
    %124 = math.exp %123 : vector<8x128xf32>
    %cst_35 = arith.constant 1.000000e+00 : f32
    %125 = vector.broadcast %cst_35 : f32 to vector<8x128xf32>
    %126 = arith.addf %125, %124 : vector<8x128xf32>
    %127 = arith.divf %125, %126 : vector<8x128xf32>
    %128 = vector.extract_strided_slice %90 {offsets = [0, 256], sizes = [8, 128], strides = [1, 1]} : vector<8x512xf32> to vector<8x128xf32>
    %129 = math.tanh %128 : vector<8x128xf32>
    %130 = vector.extract_strided_slice %90 {offsets = [0, 384], sizes = [8, 128], strides = [1, 1]} : vector<8x512xf32> to vector<8x128xf32>
    %131 = arith.negf %130 : vector<8x128xf32>
    %132 = math.exp %131 : vector<8x128xf32>
    %cst_36 = arith.constant 1.000000e+00 : f32
    %133 = vector.broadcast %cst_36 : f32 to vector<8x128xf32>
    %134 = arith.addf %133, %132 : vector<8x128xf32>
    %135 = arith.divf %133, %134 : vector<8x128xf32>
    %136 = arith.mulf %127, %71 : vector<8x128xf32>
    %137 = arith.mulf %121, %129 : vector<8x128xf32>
    %138 = arith.addf %136, %137 : vector<8x128xf32>
    %139 = math.tanh %138 : vector<8x128xf32>
    %140 = arith.mulf %135, %139 : vector<8x128xf32>
    %141 = arith.index_cast %80 : i32 to index
    %c0_37 = arith.constant 0 : index
    %142 = vector.load %arg10[%141, %c0_37] : memref<64x256xf32, #tpu.memory_space<vmem>>, vector<8x128xf32>
    tpu.vector_store %arg10[%141, %c0_37], %115 {strides = array<i32>} : memref<64x256xf32, #tpu.memory_space<vmem>>, vector<8x128xf32>,
    %143 = arith.index_cast %82 : i32 to index
    %c128_38 = arith.constant 128 : index
    %144 = vector.load %arg10[%143, %c128_38] : memref<64x256xf32, #tpu.memory_space<vmem>>, vector<8x128xf32>
    tpu.vector_store %arg10[%143, %c128_38], %140 {strides = array<i32>} : memref<64x256xf32, #tpu.memory_space<vmem>>, vector<8x128xf32>,
    %c2_i32 = arith.constant 2 : i32
    %c7_i32_39 = arith.constant 7 : i32
    %145 = arith.subi %c7_i32_39, %c2_i32 : i32
    %c8_i32_40 = arith.constant 8 : i32
    %146 = arith.muli %c2_i32, %c8_i32_40 : i32
    %147 = tpu.assume_multiple %146, 8 : i32
    %c8_i32_41 = arith.constant 8 : i32
    %148 = arith.muli %145, %c8_i32_41 : i32
    %149 = tpu.assume_multiple %148, 8 : i32
    %150 = arith.index_cast %147 : i32 to index
    %c0_42 = arith.constant 0 : index
    %151 = vector.load %arg9[%150, %c0_42] : memref<64x1024xf32, #tpu.memory_space<vmem>>, vector<8x512xf32>
    %cst_43 = arith.constant dense<0.000000e+00> : vector<8x512xf32>
    %152 = tpu.matmul %115, %8, %cst_43 {dimension_numbers = #tpu.dot_dimension_numbers<[1], [0], [0], [1], [0, 0, 1, 1], [], []>} : vector<8x128xf32>, vector<128x512xf32>, vector<8x512xf32> -> vector<8x512xf32>
    %153 = arith.addf %151, %152 : vector<8x512xf32>
    %154 = arith.index_cast %149 : i32 to index
    %c512_44 = arith.constant 512 : index
    %155 = vector.load %arg9[%154, %c512_44] : memref<64x1024xf32, #tpu.memory_space<vmem>>, vector<8x512xf32>
    %cst_45 = arith.constant dense<0.000000e+00> : vector<8x512xf32>
    %156 = tpu.matmul %140, %9, %cst_45 {dimension_numbers = #tpu.dot_dimension_numbers<[1], [0], [0], [1], [0, 0, 1, 1], [], []>} : vector<8x128xf32>, vector<128x512xf32>, vector<8x512xf32> -> vector<8x512xf32>
    %157 = arith.addf %155, %156 : vector<8x512xf32>
    %158 = vector.extract_strided_slice %153 {offsets = [0, 0], sizes = [8, 128], strides = [1, 1]} : vector<8x512xf32> to vector<8x128xf32>
    %159 = arith.negf %158 : vector<8x128xf32>
    %160 = math.exp %159 : vector<8x128xf32>
    %cst_46 = arith.constant 1.000000e+00 : f32
    %161 = vector.broadcast %cst_46 : f32 to vector<8x128xf32>
    %162 = arith.addf %161, %160 : vector<8x128xf32>
    %163 = arith.divf %161, %162 : vector<8x128xf32>
    %164 = vector.extract_strided_slice %153 {offsets = [0, 128], sizes = [8, 128], strides = [1, 1]} : vector<8x512xf32> to vector<8x128xf32>
    %165 = arith.negf %164 : vector<8x128xf32>
    %166 = math.exp %165 : vector<8x128xf32>
    %cst_47 = arith.constant 1.000000e+00 : f32
    %167 = vector.broadcast %cst_47 : f32 to vector<8x128xf32>
    %168 = arith.addf %167, %166 : vector<8x128xf32>
    %169 = arith.divf %167, %168 : vector<8x128xf32>
    %170 = vector.extract_strided_slice %153 {offsets = [0, 256], sizes = [8, 128], strides = [1, 1]} : vector<8x512xf32> to vector<8x128xf32>
    %171 = math.tanh %170 : vector<8x128xf32>
    %172 = vector.extract_strided_slice %153 {offsets = [0, 384], sizes = [8, 128], strides = [1, 1]} : vector<8x512xf32> to vector<8x128xf32>
    %173 = arith.negf %172 : vector<8x128xf32>
    %174 = math.exp %173 : vector<8x128xf32>
    %cst_48 = arith.constant 1.000000e+00 : f32
    %175 = vector.broadcast %cst_48 : f32 to vector<8x128xf32>
    %176 = arith.addf %175, %174 : vector<8x128xf32>
    %177 = arith.divf %175, %176 : vector<8x128xf32>
    %178 = arith.mulf %169, %113 : vector<8x128xf32>
    %179 = arith.mulf %163, %171 : vector<8x128xf32>
    %180 = arith.addf %178, %179 : vector<8x128xf32>
    %181 = math.tanh %180 : vector<8x128xf32>
    %182 = arith.mulf %177, %181 : vector<8x128xf32>
    %183 = vector.extract_strided_slice %157 {offsets = [0, 0], sizes = [8, 128], strides = [1, 1]} : vector<8x512xf32> to vector<8x128xf32>
    %184 = arith.negf %183 : vector<8x128xf32>
    %185 = math.exp %184 : vector<8x128xf32>
    %cst_49 = arith.constant 1.000000e+00 : f32
    %186 = vector.broadcast %cst_49 : f32 to vector<8x128xf32>
    %187 = arith.addf %186, %185 : vector<8x128xf32>
    %188 = arith.divf %186, %187 : vector<8x128xf32>
    %189 = vector.extract_strided_slice %157 {offsets = [0, 128], sizes = [8, 128], strides = [1, 1]} : vector<8x512xf32> to vector<8x128xf32>
    %190 = arith.negf %189 : vector<8x128xf32>
    %191 = math.exp %190 : vector<8x128xf32>
    %cst_50 = arith.constant 1.000000e+00 : f32
    %192 = vector.broadcast %cst_50 : f32 to vector<8x128xf32>
    %193 = arith.addf %192, %191 : vector<8x128xf32>
    %194 = arith.divf %192, %193 : vector<8x128xf32>
    %195 = vector.extract_strided_slice %157 {offsets = [0, 256], sizes = [8, 128], strides = [1, 1]} : vector<8x512xf32> to vector<8x128xf32>
    %196 = math.tanh %195 : vector<8x128xf32>
    %197 = vector.extract_strided_slice %157 {offsets = [0, 384], sizes = [8, 128], strides = [1, 1]} : vector<8x512xf32> to vector<8x128xf32>
    %198 = arith.negf %197 : vector<8x128xf32>
    %199 = math.exp %198 : vector<8x128xf32>
    %cst_51 = arith.constant 1.000000e+00 : f32
    %200 = vector.broadcast %cst_51 : f32 to vector<8x128xf32>
    %201 = arith.addf %200, %199 : vector<8x128xf32>
    %202 = arith.divf %200, %201 : vector<8x128xf32>
    %203 = arith.mulf %194, %138 : vector<8x128xf32>
    %204 = arith.mulf %188, %196 : vector<8x128xf32>
    %205 = arith.addf %203, %204 : vector<8x128xf32>
    %206 = math.tanh %205 : vector<8x128xf32>
    %207 = arith.mulf %202, %206 : vector<8x128xf32>
    %208 = arith.index_cast %147 : i32 to index
    %c0_52 = arith.constant 0 : index
    %209 = vector.load %arg10[%208, %c0_52] : memref<64x256xf32, #tpu.memory_space<vmem>>, vector<8x128xf32>
    tpu.vector_store %arg10[%208, %c0_52], %182 {strides = array<i32>} : memref<64x256xf32, #tpu.memory_space<vmem>>, vector<8x128xf32>,
    %210 = arith.index_cast %149 : i32 to index
    %c128_53 = arith.constant 128 : index
    %211 = vector.load %arg10[%210, %c128_53] : memref<64x256xf32, #tpu.memory_space<vmem>>, vector<8x128xf32>
    tpu.vector_store %arg10[%210, %c128_53], %207 {strides = array<i32>} : memref<64x256xf32, #tpu.memory_space<vmem>>, vector<8x128xf32>,
    %c3_i32 = arith.constant 3 : i32
    %c7_i32_54 = arith.constant 7 : i32
    %212 = arith.subi %c7_i32_54, %c3_i32 : i32
    %c8_i32_55 = arith.constant 8 : i32
    %213 = arith.muli %c3_i32, %c8_i32_55 : i32
    %214 = tpu.assume_multiple %213, 8 : i32
    %c8_i32_56 = arith.constant 8 : i32
    %215 = arith.muli %212, %c8_i32_56 : i32
    %216 = tpu.assume_multiple %215, 8 : i32
    %217 = arith.index_cast %214 : i32 to index
    %c0_57 = arith.constant 0 : index
    %218 = vector.load %arg9[%217, %c0_57] : memref<64x1024xf32, #tpu.memory_space<vmem>>, vector<8x512xf32>
    %cst_58 = arith.constant dense<0.000000e+00> : vector<8x512xf32>
    %219 = tpu.matmul %182, %8, %cst_58 {dimension_numbers = #tpu.dot_dimension_numbers<[1], [0], [0], [1], [0, 0, 1, 1], [], []>} : vector<8x128xf32>, vector<128x512xf32>, vector<8x512xf32> -> vector<8x512xf32>
    %220 = arith.addf %218, %219 : vector<8x512xf32>
    %221 = arith.index_cast %216 : i32 to index
    %c512_59 = arith.constant 512 : index
    %222 = vector.load %arg9[%221, %c512_59] : memref<64x1024xf32, #tpu.memory_space<vmem>>, vector<8x512xf32>
    %cst_60 = arith.constant dense<0.000000e+00> : vector<8x512xf32>
    %223 = tpu.matmul %207, %9, %cst_60 {dimension_numbers = #tpu.dot_dimension_numbers<[1], [0], [0], [1], [0, 0, 1, 1], [], []>} : vector<8x128xf32>, vector<128x512xf32>, vector<8x512xf32> -> vector<8x512xf32>
    %224 = arith.addf %222, %223 : vector<8x512xf32>
    %225 = vector.extract_strided_slice %220 {offsets = [0, 0], sizes = [8, 128], strides = [1, 1]} : vector<8x512xf32> to vector<8x128xf32>
    %226 = arith.negf %225 : vector<8x128xf32>
    %227 = math.exp %226 : vector<8x128xf32>
    %cst_61 = arith.constant 1.000000e+00 : f32
    %228 = vector.broadcast %cst_61 : f32 to vector<8x128xf32>
    %229 = arith.addf %228, %227 : vector<8x128xf32>
    %230 = arith.divf %228, %229 : vector<8x128xf32>
    %231 = vector.extract_strided_slice %220 {offsets = [0, 128], sizes = [8, 128], strides = [1, 1]} : vector<8x512xf32> to vector<8x128xf32>
    %232 = arith.negf %231 : vector<8x128xf32>
    %233 = math.exp %232 : vector<8x128xf32>
    %cst_62 = arith.constant 1.000000e+00 : f32
    %234 = vector.broadcast %cst_62 : f32 to vector<8x128xf32>
    %235 = arith.addf %234, %233 : vector<8x128xf32>
    %236 = arith.divf %234, %235 : vector<8x128xf32>
    %237 = vector.extract_strided_slice %220 {offsets = [0, 256], sizes = [8, 128], strides = [1, 1]} : vector<8x512xf32> to vector<8x128xf32>
    %238 = math.tanh %237 : vector<8x128xf32>
    %239 = vector.extract_strided_slice %220 {offsets = [0, 384], sizes = [8, 128], strides = [1, 1]} : vector<8x512xf32> to vector<8x128xf32>
    %240 = arith.negf %239 : vector<8x128xf32>
    %241 = math.exp %240 : vector<8x128xf32>
    %cst_63 = arith.constant 1.000000e+00 : f32
    %242 = vector.broadcast %cst_63 : f32 to vector<8x128xf32>
    %243 = arith.addf %242, %241 : vector<8x128xf32>
    %244 = arith.divf %242, %243 : vector<8x128xf32>
    %245 = arith.mulf %236, %180 : vector<8x128xf32>
    %246 = arith.mulf %230, %238 : vector<8x128xf32>
    %247 = arith.addf %245, %246 : vector<8x128xf32>
    %248 = math.tanh %247 : vector<8x128xf32>
    %249 = arith.mulf %244, %248 : vector<8x128xf32>
    %250 = vector.extract_strided_slice %224 {offsets = [0, 0], sizes = [8, 128], strides = [1, 1]} : vector<8x512xf32> to vector<8x128xf32>
    %251 = arith.negf %250 : vector<8x128xf32>
    %252 = math.exp %251 : vector<8x128xf32>
    %cst_64 = arith.constant 1.000000e+00 : f32
    %253 = vector.broadcast %cst_64 : f32 to vector<8x128xf32>
    %254 = arith.addf %253, %252 : vector<8x128xf32>
    %255 = arith.divf %253, %254 : vector<8x128xf32>
    %256 = vector.extract_strided_slice %224 {offsets = [0, 128], sizes = [8, 128], strides = [1, 1]} : vector<8x512xf32> to vector<8x128xf32>
    %257 = arith.negf %256 : vector<8x128xf32>
    %258 = math.exp %257 : vector<8x128xf32>
    %cst_65 = arith.constant 1.000000e+00 : f32
    %259 = vector.broadcast %cst_65 : f32 to vector<8x128xf32>
    %260 = arith.addf %259, %258 : vector<8x128xf32>
    %261 = arith.divf %259, %260 : vector<8x128xf32>
    %262 = vector.extract_strided_slice %224 {offsets = [0, 256], sizes = [8, 128], strides = [1, 1]} : vector<8x512xf32> to vector<8x128xf32>
    %263 = math.tanh %262 : vector<8x128xf32>
    %264 = vector.extract_strided_slice %224 {offsets = [0, 384], sizes = [8, 128], strides = [1, 1]} : vector<8x512xf32> to vector<8x128xf32>
    %265 = arith.negf %264 : vector<8x128xf32>
    %266 = math.exp %265 : vector<8x128xf32>
    %cst_66 = arith.constant 1.000000e+00 : f32
    %267 = vector.broadcast %cst_66 : f32 to vector<8x128xf32>
    %268 = arith.addf %267, %266 : vector<8x128xf32>
    %269 = arith.divf %267, %268 : vector<8x128xf32>
    %270 = arith.mulf %261, %205 : vector<8x128xf32>
    %271 = arith.mulf %255, %263 : vector<8x128xf32>
    %272 = arith.addf %270, %271 : vector<8x128xf32>
    %273 = math.tanh %272 : vector<8x128xf32>
    %274 = arith.mulf %269, %273 : vector<8x128xf32>
    %275 = arith.index_cast %214 : i32 to index
    %c0_67 = arith.constant 0 : index
    %276 = vector.load %arg10[%275, %c0_67] : memref<64x256xf32, #tpu.memory_space<vmem>>, vector<8x128xf32>
    tpu.vector_store %arg10[%275, %c0_67], %249 {strides = array<i32>} : memref<64x256xf32, #tpu.memory_space<vmem>>, vector<8x128xf32>,
    %277 = arith.index_cast %216 : i32 to index
    %c128_68 = arith.constant 128 : index
    %278 = vector.load %arg10[%277, %c128_68] : memref<64x256xf32, #tpu.memory_space<vmem>>, vector<8x128xf32>
    tpu.vector_store %arg10[%277, %c128_68], %274 {strides = array<i32>} : memref<64x256xf32, #tpu.memory_space<vmem>>, vector<8x128xf32>,
    %c4_i32 = arith.constant 4 : i32
    %c7_i32_69 = arith.constant 7 : i32
    %279 = arith.subi %c7_i32_69, %c4_i32 : i32
    %c8_i32_70 = arith.constant 8 : i32
    %280 = arith.muli %c4_i32, %c8_i32_70 : i32
    %281 = tpu.assume_multiple %280, 8 : i32
    %c8_i32_71 = arith.constant 8 : i32
    %282 = arith.muli %279, %c8_i32_71 : i32
    %283 = tpu.assume_multiple %282, 8 : i32
    %284 = arith.index_cast %281 : i32 to index
    %c0_72 = arith.constant 0 : index
    %285 = vector.load %arg9[%284, %c0_72] : memref<64x1024xf32, #tpu.memory_space<vmem>>, vector<8x512xf32>
    %cst_73 = arith.constant dense<0.000000e+00> : vector<8x512xf32>
    %286 = tpu.matmul %249, %8, %cst_73 {dimension_numbers = #tpu.dot_dimension_numbers<[1], [0], [0], [1], [0, 0, 1, 1], [], []>} : vector<8x128xf32>, vector<128x512xf32>, vector<8x512xf32> -> vector<8x512xf32>
    %287 = arith.addf %285, %286 : vector<8x512xf32>
    %288 = arith.index_cast %283 : i32 to index
    %c512_74 = arith.constant 512 : index
    %289 = vector.load %arg9[%288, %c512_74] : memref<64x1024xf32, #tpu.memory_space<vmem>>, vector<8x512xf32>
    %cst_75 = arith.constant dense<0.000000e+00> : vector<8x512xf32>
    %290 = tpu.matmul %274, %9, %cst_75 {dimension_numbers = #tpu.dot_dimension_numbers<[1], [0], [0], [1], [0, 0, 1, 1], [], []>} : vector<8x128xf32>, vector<128x512xf32>, vector<8x512xf32> -> vector<8x512xf32>
    %291 = arith.addf %289, %290 : vector<8x512xf32>
    %292 = vector.extract_strided_slice %287 {offsets = [0, 0], sizes = [8, 128], strides = [1, 1]} : vector<8x512xf32> to vector<8x128xf32>
    %293 = arith.negf %292 : vector<8x128xf32>
    %294 = math.exp %293 : vector<8x128xf32>
    %cst_76 = arith.constant 1.000000e+00 : f32
    %295 = vector.broadcast %cst_76 : f32 to vector<8x128xf32>
    %296 = arith.addf %295, %294 : vector<8x128xf32>
    %297 = arith.divf %295, %296 : vector<8x128xf32>
    %298 = vector.extract_strided_slice %287 {offsets = [0, 128], sizes = [8, 128], strides = [1, 1]} : vector<8x512xf32> to vector<8x128xf32>
    %299 = arith.negf %298 : vector<8x128xf32>
    %300 = math.exp %299 : vector<8x128xf32>
    %cst_77 = arith.constant 1.000000e+00 : f32
    %301 = vector.broadcast %cst_77 : f32 to vector<8x128xf32>
    %302 = arith.addf %301, %300 : vector<8x128xf32>
    %303 = arith.divf %301, %302 : vector<8x128xf32>
    %304 = vector.extract_strided_slice %287 {offsets = [0, 256], sizes = [8, 128], strides = [1, 1]} : vector<8x512xf32> to vector<8x128xf32>
    %305 = math.tanh %304 : vector<8x128xf32>
    %306 = vector.extract_strided_slice %287 {offsets = [0, 384], sizes = [8, 128], strides = [1, 1]} : vector<8x512xf32> to vector<8x128xf32>
    %307 = arith.negf %306 : vector<8x128xf32>
    %308 = math.exp %307 : vector<8x128xf32>
    %cst_78 = arith.constant 1.000000e+00 : f32
    %309 = vector.broadcast %cst_78 : f32 to vector<8x128xf32>
    %310 = arith.addf %309, %308 : vector<8x128xf32>
    %311 = arith.divf %309, %310 : vector<8x128xf32>
    %312 = arith.mulf %303, %247 : vector<8x128xf32>
    %313 = arith.mulf %297, %305 : vector<8x128xf32>
    %314 = arith.addf %312, %313 : vector<8x128xf32>
    %315 = math.tanh %314 : vector<8x128xf32>
    %316 = arith.mulf %311, %315 : vector<8x128xf32>
    %317 = vector.extract_strided_slice %291 {offsets = [0, 0], sizes = [8, 128], strides = [1, 1]} : vector<8x512xf32> to vector<8x128xf32>
    %318 = arith.negf %317 : vector<8x128xf32>
    %319 = math.exp %318 : vector<8x128xf32>
    %cst_79 = arith.constant 1.000000e+00 : f32
    %320 = vector.broadcast %cst_79 : f32 to vector<8x128xf32>
    %321 = arith.addf %320, %319 : vector<8x128xf32>
    %322 = arith.divf %320, %321 : vector<8x128xf32>
    %323 = vector.extract_strided_slice %291 {offsets = [0, 128], sizes = [8, 128], strides = [1, 1]} : vector<8x512xf32> to vector<8x128xf32>
    %324 = arith.negf %323 : vector<8x128xf32>
    %325 = math.exp %324 : vector<8x128xf32>
    %cst_80 = arith.constant 1.000000e+00 : f32
    %326 = vector.broadcast %cst_80 : f32 to vector<8x128xf32>
    %327 = arith.addf %326, %325 : vector<8x128xf32>
    %328 = arith.divf %326, %327 : vector<8x128xf32>
    %329 = vector.extract_strided_slice %291 {offsets = [0, 256], sizes = [8, 128], strides = [1, 1]} : vector<8x512xf32> to vector<8x128xf32>
    %330 = math.tanh %329 : vector<8x128xf32>
    %331 = vector.extract_strided_slice %291 {offsets = [0, 384], sizes = [8, 128], strides = [1, 1]} : vector<8x512xf32> to vector<8x128xf32>
    %332 = arith.negf %331 : vector<8x128xf32>
    %333 = math.exp %332 : vector<8x128xf32>
    %cst_81 = arith.constant 1.000000e+00 : f32
    %334 = vector.broadcast %cst_81 : f32 to vector<8x128xf32>
    %335 = arith.addf %334, %333 : vector<8x128xf32>
    %336 = arith.divf %334, %335 : vector<8x128xf32>
    %337 = arith.mulf %328, %272 : vector<8x128xf32>
    %338 = arith.mulf %322, %330 : vector<8x128xf32>
    %339 = arith.addf %337, %338 : vector<8x128xf32>
    %340 = math.tanh %339 : vector<8x128xf32>
    %341 = arith.mulf %336, %340 : vector<8x128xf32>
    %342 = arith.index_cast %281 : i32 to index
    %c0_82 = arith.constant 0 : index
    %343 = vector.load %arg10[%342, %c0_82] : memref<64x256xf32, #tpu.memory_space<vmem>>, vector<8x128xf32>
    tpu.vector_store %arg10[%342, %c0_82], %316 {strides = array<i32>} : memref<64x256xf32, #tpu.memory_space<vmem>>, vector<8x128xf32>,
    %344 = arith.index_cast %283 : i32 to index
    %c128_83 = arith.constant 128 : index
    %345 = vector.load %arg10[%344, %c128_83] : memref<64x256xf32, #tpu.memory_space<vmem>>, vector<8x128xf32>
    tpu.vector_store %arg10[%344, %c128_83], %341 {strides = array<i32>} : memref<64x256xf32, #tpu.memory_space<vmem>>, vector<8x128xf32>,
    %c5_i32 = arith.constant 5 : i32
    %c7_i32_84 = arith.constant 7 : i32
    %346 = arith.subi %c7_i32_84, %c5_i32 : i32
    %c8_i32_85 = arith.constant 8 : i32
    %347 = arith.muli %c5_i32, %c8_i32_85 : i32
    %348 = tpu.assume_multiple %347, 8 : i32
    %c8_i32_86 = arith.constant 8 : i32
    %349 = arith.muli %346, %c8_i32_86 : i32
    %350 = tpu.assume_multiple %349, 8 : i32
    %351 = arith.index_cast %348 : i32 to index
    %c0_87 = arith.constant 0 : index
    %352 = vector.load %arg9[%351, %c0_87] : memref<64x1024xf32, #tpu.memory_space<vmem>>, vector<8x512xf32>
    %cst_88 = arith.constant dense<0.000000e+00> : vector<8x512xf32>
    %353 = tpu.matmul %316, %8, %cst_88 {dimension_numbers = #tpu.dot_dimension_numbers<[1], [0], [0], [1], [0, 0, 1, 1], [], []>} : vector<8x128xf32>, vector<128x512xf32>, vector<8x512xf32> -> vector<8x512xf32>
    %354 = arith.addf %352, %353 : vector<8x512xf32>
    %355 = arith.index_cast %350 : i32 to index
    %c512_89 = arith.constant 512 : index
    %356 = vector.load %arg9[%355, %c512_89] : memref<64x1024xf32, #tpu.memory_space<vmem>>, vector<8x512xf32>
    %cst_90 = arith.constant dense<0.000000e+00> : vector<8x512xf32>
    %357 = tpu.matmul %341, %9, %cst_90 {dimension_numbers = #tpu.dot_dimension_numbers<[1], [0], [0], [1], [0, 0, 1, 1], [], []>} : vector<8x128xf32>, vector<128x512xf32>, vector<8x512xf32> -> vector<8x512xf32>
    %358 = arith.addf %356, %357 : vector<8x512xf32>
    %359 = vector.extract_strided_slice %354 {offsets = [0, 0], sizes = [8, 128], strides = [1, 1]} : vector<8x512xf32> to vector<8x128xf32>
    %360 = arith.negf %359 : vector<8x128xf32>
    %361 = math.exp %360 : vector<8x128xf32>
    %cst_91 = arith.constant 1.000000e+00 : f32
    %362 = vector.broadcast %cst_91 : f32 to vector<8x128xf32>
    %363 = arith.addf %362, %361 : vector<8x128xf32>
    %364 = arith.divf %362, %363 : vector<8x128xf32>
    %365 = vector.extract_strided_slice %354 {offsets = [0, 128], sizes = [8, 128], strides = [1, 1]} : vector<8x512xf32> to vector<8x128xf32>
    %366 = arith.negf %365 : vector<8x128xf32>
    %367 = math.exp %366 : vector<8x128xf32>
    %cst_92 = arith.constant 1.000000e+00 : f32
    %368 = vector.broadcast %cst_92 : f32 to vector<8x128xf32>
    %369 = arith.addf %368, %367 : vector<8x128xf32>
    %370 = arith.divf %368, %369 : vector<8x128xf32>
    %371 = vector.extract_strided_slice %354 {offsets = [0, 256], sizes = [8, 128], strides = [1, 1]} : vector<8x512xf32> to vector<8x128xf32>
    %372 = math.tanh %371 : vector<8x128xf32>
    %373 = vector.extract_strided_slice %354 {offsets = [0, 384], sizes = [8, 128], strides = [1, 1]} : vector<8x512xf32> to vector<8x128xf32>
    %374 = arith.negf %373 : vector<8x128xf32>
    %375 = math.exp %374 : vector<8x128xf32>
    %cst_93 = arith.constant 1.000000e+00 : f32
    %376 = vector.broadcast %cst_93 : f32 to vector<8x128xf32>
    %377 = arith.addf %376, %375 : vector<8x128xf32>
    %378 = arith.divf %376, %377 : vector<8x128xf32>
    %379 = arith.mulf %370, %314 : vector<8x128xf32>
    %380 = arith.mulf %364, %372 : vector<8x128xf32>
    %381 = arith.addf %379, %380 : vector<8x128xf32>
    %382 = math.tanh %381 : vector<8x128xf32>
    %383 = arith.mulf %378, %382 : vector<8x128xf32>
    %384 = vector.extract_strided_slice %358 {offsets = [0, 0], sizes = [8, 128], strides = [1, 1]} : vector<8x512xf32> to vector<8x128xf32>
    %385 = arith.negf %384 : vector<8x128xf32>
    %386 = math.exp %385 : vector<8x128xf32>
    %cst_94 = arith.constant 1.000000e+00 : f32
    %387 = vector.broadcast %cst_94 : f32 to vector<8x128xf32>
    %388 = arith.addf %387, %386 : vector<8x128xf32>
    %389 = arith.divf %387, %388 : vector<8x128xf32>
    %390 = vector.extract_strided_slice %358 {offsets = [0, 128], sizes = [8, 128], strides = [1, 1]} : vector<8x512xf32> to vector<8x128xf32>
    %391 = arith.negf %390 : vector<8x128xf32>
    %392 = math.exp %391 : vector<8x128xf32>
    %cst_95 = arith.constant 1.000000e+00 : f32
    %393 = vector.broadcast %cst_95 : f32 to vector<8x128xf32>
    %394 = arith.addf %393, %392 : vector<8x128xf32>
    %395 = arith.divf %393, %394 : vector<8x128xf32>
    %396 = vector.extract_strided_slice %358 {offsets = [0, 256], sizes = [8, 128], strides = [1, 1]} : vector<8x512xf32> to vector<8x128xf32>
    %397 = math.tanh %396 : vector<8x128xf32>
    %398 = vector.extract_strided_slice %358 {offsets = [0, 384], sizes = [8, 128], strides = [1, 1]} : vector<8x512xf32> to vector<8x128xf32>
    %399 = arith.negf %398 : vector<8x128xf32>
    %400 = math.exp %399 : vector<8x128xf32>
    %cst_96 = arith.constant 1.000000e+00 : f32
    %401 = vector.broadcast %cst_96 : f32 to vector<8x128xf32>
    %402 = arith.addf %401, %400 : vector<8x128xf32>
    %403 = arith.divf %401, %402 : vector<8x128xf32>
    %404 = arith.mulf %395, %339 : vector<8x128xf32>
    %405 = arith.mulf %389, %397 : vector<8x128xf32>
    %406 = arith.addf %404, %405 : vector<8x128xf32>
    %407 = math.tanh %406 : vector<8x128xf32>
    %408 = arith.mulf %403, %407 : vector<8x128xf32>
    %409 = arith.index_cast %348 : i32 to index
    %c0_97 = arith.constant 0 : index
    %410 = vector.load %arg10[%409, %c0_97] : memref<64x256xf32, #tpu.memory_space<vmem>>, vector<8x128xf32>
    tpu.vector_store %arg10[%409, %c0_97], %383 {strides = array<i32>} : memref<64x256xf32, #tpu.memory_space<vmem>>, vector<8x128xf32>,
    %411 = arith.index_cast %350 : i32 to index
    %c128_98 = arith.constant 128 : index
    %412 = vector.load %arg10[%411, %c128_98] : memref<64x256xf32, #tpu.memory_space<vmem>>, vector<8x128xf32>
    tpu.vector_store %arg10[%411, %c128_98], %408 {strides = array<i32>} : memref<64x256xf32, #tpu.memory_space<vmem>>, vector<8x128xf32>,
    %c6_i32 = arith.constant 6 : i32
    %c7_i32_99 = arith.constant 7 : i32
    %413 = arith.subi %c7_i32_99, %c6_i32 : i32
    %c8_i32_100 = arith.constant 8 : i32
    %414 = arith.muli %c6_i32, %c8_i32_100 : i32
    %415 = tpu.assume_multiple %414, 8 : i32
    %c8_i32_101 = arith.constant 8 : i32
    %416 = arith.muli %413, %c8_i32_101 : i32
    %417 = tpu.assume_multiple %416, 8 : i32
    %418 = arith.index_cast %415 : i32 to index
    %c0_102 = arith.constant 0 : index
    %419 = vector.load %arg9[%418, %c0_102] : memref<64x1024xf32, #tpu.memory_space<vmem>>, vector<8x512xf32>
    %cst_103 = arith.constant dense<0.000000e+00> : vector<8x512xf32>
    %420 = tpu.matmul %383, %8, %cst_103 {dimension_numbers = #tpu.dot_dimension_numbers<[1], [0], [0], [1], [0, 0, 1, 1], [], []>} : vector<8x128xf32>, vector<128x512xf32>, vector<8x512xf32> -> vector<8x512xf32>
    %421 = arith.addf %419, %420 : vector<8x512xf32>
    %422 = arith.index_cast %417 : i32 to index
    %c512_104 = arith.constant 512 : index
    %423 = vector.load %arg9[%422, %c512_104] : memref<64x1024xf32, #tpu.memory_space<vmem>>, vector<8x512xf32>
    %cst_105 = arith.constant dense<0.000000e+00> : vector<8x512xf32>
    %424 = tpu.matmul %408, %9, %cst_105 {dimension_numbers = #tpu.dot_dimension_numbers<[1], [0], [0], [1], [0, 0, 1, 1], [], []>} : vector<8x128xf32>, vector<128x512xf32>, vector<8x512xf32> -> vector<8x512xf32>
    %425 = arith.addf %423, %424 : vector<8x512xf32>
    %426 = vector.extract_strided_slice %421 {offsets = [0, 0], sizes = [8, 128], strides = [1, 1]} : vector<8x512xf32> to vector<8x128xf32>
    %427 = arith.negf %426 : vector<8x128xf32>
    %428 = math.exp %427 : vector<8x128xf32>
    %cst_106 = arith.constant 1.000000e+00 : f32
    %429 = vector.broadcast %cst_106 : f32 to vector<8x128xf32>
    %430 = arith.addf %429, %428 : vector<8x128xf32>
    %431 = arith.divf %429, %430 : vector<8x128xf32>
    %432 = vector.extract_strided_slice %421 {offsets = [0, 128], sizes = [8, 128], strides = [1, 1]} : vector<8x512xf32> to vector<8x128xf32>
    %433 = arith.negf %432 : vector<8x128xf32>
    %434 = math.exp %433 : vector<8x128xf32>
    %cst_107 = arith.constant 1.000000e+00 : f32
    %435 = vector.broadcast %cst_107 : f32 to vector<8x128xf32>
    %436 = arith.addf %435, %434 : vector<8x128xf32>
    %437 = arith.divf %435, %436 : vector<8x128xf32>
    %438 = vector.extract_strided_slice %421 {offsets = [0, 256], sizes = [8, 128], strides = [1, 1]} : vector<8x512xf32> to vector<8x128xf32>
    %439 = math.tanh %438 : vector<8x128xf32>
    %440 = vector.extract_strided_slice %421 {offsets = [0, 384], sizes = [8, 128], strides = [1, 1]} : vector<8x512xf32> to vector<8x128xf32>
    %441 = arith.negf %440 : vector<8x128xf32>
    %442 = math.exp %441 : vector<8x128xf32>
    %cst_108 = arith.constant 1.000000e+00 : f32
    %443 = vector.broadcast %cst_108 : f32 to vector<8x128xf32>
    %444 = arith.addf %443, %442 : vector<8x128xf32>
    %445 = arith.divf %443, %444 : vector<8x128xf32>
    %446 = arith.mulf %437, %381 : vector<8x128xf32>
    %447 = arith.mulf %431, %439 : vector<8x128xf32>
    %448 = arith.addf %446, %447 : vector<8x128xf32>
    %449 = math.tanh %448 : vector<8x128xf32>
    %450 = arith.mulf %445, %449 : vector<8x128xf32>
    %451 = vector.extract_strided_slice %425 {offsets = [0, 0], sizes = [8, 128], strides = [1, 1]} : vector<8x512xf32> to vector<8x128xf32>
    %452 = arith.negf %451 : vector<8x128xf32>
    %453 = math.exp %452 : vector<8x128xf32>
    %cst_109 = arith.constant 1.000000e+00 : f32
    %454 = vector.broadcast %cst_109 : f32 to vector<8x128xf32>
    %455 = arith.addf %454, %453 : vector<8x128xf32>
    %456 = arith.divf %454, %455 : vector<8x128xf32>
    %457 = vector.extract_strided_slice %425 {offsets = [0, 128], sizes = [8, 128], strides = [1, 1]} : vector<8x512xf32> to vector<8x128xf32>
    %458 = arith.negf %457 : vector<8x128xf32>
    %459 = math.exp %458 : vector<8x128xf32>
    %cst_110 = arith.constant 1.000000e+00 : f32
    %460 = vector.broadcast %cst_110 : f32 to vector<8x128xf32>
    %461 = arith.addf %460, %459 : vector<8x128xf32>
    %462 = arith.divf %460, %461 : vector<8x128xf32>
    %463 = vector.extract_strided_slice %425 {offsets = [0, 256], sizes = [8, 128], strides = [1, 1]} : vector<8x512xf32> to vector<8x128xf32>
    %464 = math.tanh %463 : vector<8x128xf32>
    %465 = vector.extract_strided_slice %425 {offsets = [0, 384], sizes = [8, 128], strides = [1, 1]} : vector<8x512xf32> to vector<8x128xf32>
    %466 = arith.negf %465 : vector<8x128xf32>
    %467 = math.exp %466 : vector<8x128xf32>
    %cst_111 = arith.constant 1.000000e+00 : f32
    %468 = vector.broadcast %cst_111 : f32 to vector<8x128xf32>
    %469 = arith.addf %468, %467 : vector<8x128xf32>
    %470 = arith.divf %468, %469 : vector<8x128xf32>
    %471 = arith.mulf %462, %406 : vector<8x128xf32>
    %472 = arith.mulf %456, %464 : vector<8x128xf32>
    %473 = arith.addf %471, %472 : vector<8x128xf32>
    %474 = math.tanh %473 : vector<8x128xf32>
    %475 = arith.mulf %470, %474 : vector<8x128xf32>
    %476 = arith.index_cast %415 : i32 to index
    %c0_112 = arith.constant 0 : index
    %477 = vector.load %arg10[%476, %c0_112] : memref<64x256xf32, #tpu.memory_space<vmem>>, vector<8x128xf32>
    tpu.vector_store %arg10[%476, %c0_112], %450 {strides = array<i32>} : memref<64x256xf32, #tpu.memory_space<vmem>>, vector<8x128xf32>,
    %478 = arith.index_cast %417 : i32 to index
    %c128_113 = arith.constant 128 : index
    %479 = vector.load %arg10[%478, %c128_113] : memref<64x256xf32, #tpu.memory_space<vmem>>, vector<8x128xf32>
    tpu.vector_store %arg10[%478, %c128_113], %475 {strides = array<i32>} : memref<64x256xf32, #tpu.memory_space<vmem>>, vector<8x128xf32>,
    %c7_i32_114 = arith.constant 7 : i32
    %c7_i32_115 = arith.constant 7 : i32
    %480 = arith.subi %c7_i32_115, %c7_i32_114 : i32
    %c8_i32_116 = arith.constant 8 : i32
    %481 = arith.muli %c7_i32_114, %c8_i32_116 : i32
    %482 = tpu.assume_multiple %481, 8 : i32
    %c8_i32_117 = arith.constant 8 : i32
    %483 = arith.muli %480, %c8_i32_117 : i32
    %484 = tpu.assume_multiple %483, 8 : i32
    %485 = arith.index_cast %482 : i32 to index
    %c0_118 = arith.constant 0 : index
    %486 = vector.load %arg9[%485, %c0_118] : memref<64x1024xf32, #tpu.memory_space<vmem>>, vector<8x512xf32>
    %cst_119 = arith.constant dense<0.000000e+00> : vector<8x512xf32>
    %487 = tpu.matmul %450, %8, %cst_119 {dimension_numbers = #tpu.dot_dimension_numbers<[1], [0], [0], [1], [0, 0, 1, 1], [], []>} : vector<8x128xf32>, vector<128x512xf32>, vector<8x512xf32> -> vector<8x512xf32>
    %488 = arith.addf %486, %487 : vector<8x512xf32>
    %489 = arith.index_cast %484 : i32 to index
    %c512_120 = arith.constant 512 : index
    %490 = vector.load %arg9[%489, %c512_120] : memref<64x1024xf32, #tpu.memory_space<vmem>>, vector<8x512xf32>
    %cst_121 = arith.constant dense<0.000000e+00> : vector<8x512xf32>
    %491 = tpu.matmul %475, %9, %cst_121 {dimension_numbers = #tpu.dot_dimension_numbers<[1], [0], [0], [1], [0, 0, 1, 1], [], []>} : vector<8x128xf32>, vector<128x512xf32>, vector<8x512xf32> -> vector<8x512xf32>
    %492 = arith.addf %490, %491 : vector<8x512xf32>
    %493 = vector.extract_strided_slice %488 {offsets = [0, 0], sizes = [8, 128], strides = [1, 1]} : vector<8x512xf32> to vector<8x128xf32>
    %494 = arith.negf %493 : vector<8x128xf32>
    %495 = math.exp %494 : vector<8x128xf32>
    %cst_122 = arith.constant 1.000000e+00 : f32
    %496 = vector.broadcast %cst_122 : f32 to vector<8x128xf32>
    %497 = arith.addf %496, %495 : vector<8x128xf32>
    %498 = arith.divf %496, %497 : vector<8x128xf32>
    %499 = vector.extract_strided_slice %488 {offsets = [0, 128], sizes = [8, 128], strides = [1, 1]} : vector<8x512xf32> to vector<8x128xf32>
    %500 = arith.negf %499 : vector<8x128xf32>
    %501 = math.exp %500 : vector<8x128xf32>
    %cst_123 = arith.constant 1.000000e+00 : f32
    %502 = vector.broadcast %cst_123 : f32 to vector<8x128xf32>
    %503 = arith.addf %502, %501 : vector<8x128xf32>
    %504 = arith.divf %502, %503 : vector<8x128xf32>
    %505 = vector.extract_strided_slice %488 {offsets = [0, 256], sizes = [8, 128], strides = [1, 1]} : vector<8x512xf32> to vector<8x128xf32>
    %506 = math.tanh %505 : vector<8x128xf32>
    %507 = vector.extract_strided_slice %488 {offsets = [0, 384], sizes = [8, 128], strides = [1, 1]} : vector<8x512xf32> to vector<8x128xf32>
    %508 = arith.negf %507 : vector<8x128xf32>
    %509 = math.exp %508 : vector<8x128xf32>
    %cst_124 = arith.constant 1.000000e+00 : f32
    %510 = vector.broadcast %cst_124 : f32 to vector<8x128xf32>
    %511 = arith.addf %510, %509 : vector<8x128xf32>
    %512 = arith.divf %510, %511 : vector<8x128xf32>
    %513 = arith.mulf %504, %448 : vector<8x128xf32>
    %514 = arith.mulf %498, %506 : vector<8x128xf32>
    %515 = arith.addf %513, %514 : vector<8x128xf32>
    %516 = math.tanh %515 : vector<8x128xf32>
    %517 = arith.mulf %512, %516 : vector<8x128xf32>
    %518 = vector.extract_strided_slice %492 {offsets = [0, 0], sizes = [8, 128], strides = [1, 1]} : vector<8x512xf32> to vector<8x128xf32>
    %519 = arith.negf %518 : vector<8x128xf32>
    %520 = math.exp %519 : vector<8x128xf32>
    %cst_125 = arith.constant 1.000000e+00 : f32
    %521 = vector.broadcast %cst_125 : f32 to vector<8x128xf32>
    %522 = arith.addf %521, %520 : vector<8x128xf32>
    %523 = arith.divf %521, %522 : vector<8x128xf32>
    %524 = vector.extract_strided_slice %492 {offsets = [0, 128], sizes = [8, 128], strides = [1, 1]} : vector<8x512xf32> to vector<8x128xf32>
    %525 = arith.negf %524 : vector<8x128xf32>
    %526 = math.exp %525 : vector<8x128xf32>
    %cst_126 = arith.constant 1.000000e+00 : f32
    %527 = vector.broadcast %cst_126 : f32 to vector<8x128xf32>
    %528 = arith.addf %527, %526 : vector<8x128xf32>
    %529 = arith.divf %527, %528 : vector<8x128xf32>
    %530 = vector.extract_strided_slice %492 {offsets = [0, 256], sizes = [8, 128], strides = [1, 1]} : vector<8x512xf32> to vector<8x128xf32>
    %531 = math.tanh %530 : vector<8x128xf32>
    %532 = vector.extract_strided_slice %492 {offsets = [0, 384], sizes = [8, 128], strides = [1, 1]} : vector<8x512xf32> to vector<8x128xf32>
    %533 = arith.negf %532 : vector<8x128xf32>
    %534 = math.exp %533 : vector<8x128xf32>
    %cst_127 = arith.constant 1.000000e+00 : f32
    %535 = vector.broadcast %cst_127 : f32 to vector<8x128xf32>
    %536 = arith.addf %535, %534 : vector<8x128xf32>
    %537 = arith.divf %535, %536 : vector<8x128xf32>
    %538 = arith.mulf %529, %473 : vector<8x128xf32>
    %539 = arith.mulf %523, %531 : vector<8x128xf32>
    %540 = arith.addf %538, %539 : vector<8x128xf32>
    %541 = math.tanh %540 : vector<8x128xf32>
    %542 = arith.mulf %537, %541 : vector<8x128xf32>
    %543 = arith.index_cast %482 : i32 to index
    %c0_128 = arith.constant 0 : index
    %544 = vector.load %arg10[%543, %c0_128] : memref<64x256xf32, #tpu.memory_space<vmem>>, vector<8x128xf32>
    tpu.vector_store %arg10[%543, %c0_128], %517 {strides = array<i32>} : memref<64x256xf32, #tpu.memory_space<vmem>>, vector<8x128xf32>,
    %545 = arith.index_cast %484 : i32 to index
    %c128_129 = arith.constant 128 : index
    %546 = vector.load %arg10[%545, %c128_129] : memref<64x256xf32, #tpu.memory_space<vmem>>, vector<8x128xf32>
    tpu.vector_store %arg10[%545, %c128_129], %542 {strides = array<i32>} : memref<64x256xf32, #tpu.memory_space<vmem>>, vector<8x128xf32>,
    %c8_i32_130 = arith.constant 8 : i32
    %c0_131 = arith.constant 0 : index
    %c0_132 = arith.constant 0 : index
    %547 = vector.load %arg10[%c0_131, %c0_132] : memref<64x256xf32, #tpu.memory_space<vmem>>, vector<64x256xf32>
    %c0_133 = arith.constant 0 : index
    %c0_134 = arith.constant 0 : index
    %548 = vector.load %arg6[%c0_133, %c0_134] : memref<256x128xf32, #tpu.memory_space<vmem>>, vector<256x128xf32>
    %cst_135 = arith.constant dense<0.000000e+00> : vector<64x128xf32>
    %549 = tpu.matmul %547, %548, %cst_135 {dimension_numbers = #tpu.dot_dimension_numbers<[1], [0], [0], [1], [0, 0, 1, 1], [], []>} : vector<64x256xf32>, vector<256x128xf32>, vector<64x128xf32> -> vector<64x128xf32>
    %c0_136 = arith.constant 0 : index
    %c0_137 = arith.constant 0 : index
    %550 = vector.load %arg7[%c0_136, %c0_137] : memref<1x128xf32, #tpu.memory_space<vmem>>, vector<1x128xf32>
    %551 = vector.broadcast %550 : vector<1x128xf32> to vector<64x128xf32>
    %552 = arith.addf %549, %551 : vector<64x128xf32>
    %cst_138 = arith.constant dense<0xFF800000> : vector<64xf32>
    %553 = vector.multi_reduction <maximumf>, %552, %cst_138 [1] : vector<64x128xf32> to vector<64xf32>
    %554 = vector.shape_cast %553 : vector<64xf32> to vector<64x1xf32>
    %555 = vector.broadcast %554 : vector<64x1xf32> to vector<64x128xf32>
    %556 = arith.subf %552, %555 : vector<64x128xf32>
    %557 = math.exp %556 : vector<64x128xf32>
    %cst_139 = arith.constant dense<0.000000e+00> : vector<64xf32>
    %558 = vector.multi_reduction <add>, %557, %cst_139 [1] : vector<64x128xf32> to vector<64xf32>
    %559 = vector.shape_cast %558 : vector<64xf32> to vector<64x1xf32>
    %560 = math.log %559 : vector<64x1xf32>
    %561 = arith.addf %560, %554 : vector<64x1xf32>
    %562 = vector.broadcast %561 : vector<64x1xf32> to vector<64x128xf32>
    %563 = arith.subf %552, %562 : vector<64x128xf32>
    %c0_140 = arith.constant 0 : index
    %c0_141 = arith.constant 0 : index
    %c0_142 = arith.constant 0 : index
    %564 = vector.load %arg8[%c0_140, %c0_141, %c0_142] : memref<1x64x128xf32, #tpu.memory_space<vmem>>, vector<1x64x128xf32>
    %565 = vector.shape_cast %564 : vector<1x64x128xf32> to vector<64x128xf32>
    %566 = vector.shape_cast %563 : vector<64x128xf32> to vector<1x64x128xf32>
    tpu.vector_store %arg8[%c0_140, %c0_141, %c0_142], %566 {strides = array<i32>} : memref<1x64x128xf32, #tpu.memory_space<vmem>>, vector<1x64x128xf32>,
    return
  }
  func.func @transform_0(%arg0: i32) -> (i32, i32, i32) {
    %c0_i32 = arith.constant 0 : i32
    %c0_i32_0 = arith.constant 0 : i32
    %c0_i32_1 = arith.constant 0 : i32
    return %arg0, %c0_i32, %c0_i32_0 : i32, i32, i32
  }
  func.func @transform_1(%arg0: i32) -> (i32, i32) {
    %c0_i32 = arith.constant 0 : i32
    %c0_i32_0 = arith.constant 0 : i32
    %c0_i32_1 = arith.constant 0 : i32
    return %c0_i32, %c0_i32_0 : i32, i32
  }
  func.func @transform_2(%arg0: i32) -> (i32, i32) {
    %c0_i32 = arith.constant 0 : i32
    %c0_i32_0 = arith.constant 0 : i32
    %c0_i32_1 = arith.constant 0 : i32
    return %c0_i32, %c0_i32_0 : i32, i32
  }
  func.func @transform_3(%arg0: i32) -> (i32, i32) {
    %c0_i32 = arith.constant 0 : i32
    %c0_i32_0 = arith.constant 0 : i32
    %c0_i32_1 = arith.constant 0 : i32
    return %c0_i32, %c0_i32_0 : i32, i32
  }
  func.func @transform_4(%arg0: i32) -> (i32, i32) {
    %c0_i32 = arith.constant 0 : i32
    %c0_i32_0 = arith.constant 0 : i32
    %c0_i32_1 = arith.constant 0 : i32
    return %c0_i32, %c0_i32_0 : i32, i32
  }
  func.func @transform_5(%arg0: i32) -> (i32, i32) {
    %c0_i32 = arith.constant 0 : i32
    %c0_i32_0 = arith.constant 0 : i32
    %c0_i32_1 = arith.constant 0 : i32
    return %c0_i32, %c0_i32_0 : i32, i32
  }
  func.func @transform_6(%arg0: i32) -> (i32, i32) {
    %c0_i32 = arith.constant 0 : i32
    %c0_i32_0 = arith.constant 0 : i32
    %c0_i32_1 = arith.constant 0 : i32
    return %c0_i32, %c0_i32_0 : i32, i32
  }
  func.func @transform_7(%arg0: i32) -> (i32, i32, i32) {
    %c0_i32 = arith.constant 0 : i32
    %c0_i32_0 = arith.constant 0 : i32
    %c0_i32_1 = arith.constant 0 : i32
    return %arg0, %c0_i32, %c0_i32_0 : i32, i32, i32
  }
}

</mosaic_0001>

<bundles_post_ra>
// kernel: tpu_custom_call.1
= control target key start
LH: loop header
LB: loop body
LE: loop exit
PB: predicated region body
PF: predicated region fallthrough
CT: control target
= control target key end

     0   :  { %12 = vsyncpa [#allocation5], 0  ;;  %s7527_s0 = inlined_call_operand.hbm [shape: f32[1,64,64], index: 0, kind: input, shape index: {}]   ;;  %s7528_s1 = inlined_call_operand.hbm [shape: f32[64,1024], index: 1, kind: input, shape index: {}]   ;;  %s7529_s2 = inlined_call_operand.hbm [shape: f32[1,1024], index: 2, kind: input, shape index: {}]   ;;  %s7530_s3 = inlined_call_operand.hbm [shape: f32[128,512], index: 3, kind: input, shape index: {}]   ;;  %s7531_s4 = inlined_call_operand.hbm [shape: f32[128,512], index: 4, kind: input, shape index: {}]   ;;  %s7532_s5 = inlined_call_operand.hbm [shape: f32[256,128], index: 5, kind: input, shape index: {}]   ;;  %s7533_s6 = inlined_call_operand.vmem [shape: f32[1,128], index: 6, kind: input, shape index: {}]   ;;  %s7534_s7 = inlined_call_operand.hbm [shape: f32[1,64,128], index: 7, kind: output, shape index: {}]  }
   0x1   :  { %13 = vsyncpa [#allocation8], 0 }
   0x2   :  { %14 = vsyncpa [#allocation11], 0 }
   0x3   :  { %15 = vsyncpa [#allocation14], 0  ;;  %s34_s26 = sshll.u32 %s7528_s1, 4  ;;  %s35_s26 = int_to_ptr.hbm [resolvable:$true] %s34_s26 }
   0x4   :  { %16 = vsyncpa [#allocation6], 0  ;;  %s4493_s27 = smov [#allocation7]   ;;  %s58_s8 = sshll.u32 %s7530_s3, 4  ;;  %s59_s8 = int_to_ptr.hbm [resolvable:$true] %s58_s8 }
   0x5   :  { %s36_s28 = sshll.u32 %s4493_s27, 4  ;;  %s4494_s9 = smov 1024   ;;  %s37_s28 = int_to_ptr.vmem [resolvable:$true] %s36_s28 }
   0x6   :  { %s4495_s10 = smov 64   ;;  %s4496_s11 = smov [#allocation10]  }
   0x7   :  { %42 = dma.hbm_to_vmem [thread:$0]  %s35_s26, 8192, %s37_s28, [#allocation8], %s4494_s9, %s4494_s9, %s4495_s10  }
   0x8   :  { %s60_s12 = sshll.u32 %s4496_s11, 4  ;;  %s4497_s13 = smov 512   ;;  %s61_s12 = int_to_ptr.vmem [resolvable:$true] %s60_s12 }
   0x9   :  { %s4498_s14 = smov 32   ;;  %s21_s16 = sshll.u32 %s7527_s0, 4  ;;  %s22_s16 = int_to_ptr.hbm [resolvable:$true] %s21_s16 }
   0xa   :  { %66 = dma.hbm_to_vmem [thread:$0]  %s59_s8, 8192, %s61_s12, [#allocation11], %s4497_s13, %s4497_s13, %s4498_s14  }
   0xb   :  { %s4499_s17 = smov [#allocation4]   ;;  %s48_s20 = sshll.u32 %s7529_s2, 4  ;;  %s49_s20 = int_to_ptr.hbm [resolvable:$true] %s48_s20 }
   0xc   :  { %s23_s18 = sshll.u32 %s4499_s17, 4  ;;  %s4500_s21 = smov 128   ;;  %s24_s18 = int_to_ptr.vmem [resolvable:$true] %s23_s18 }
   0xd   :  { %s4501_s22 = smov 8   ;;  %s4502_s23 = smov [#allocation9]  }
   0xe   :  { %29 = dma.hbm_to_vmem [thread:$0]  %s22_s16, 1024, %s24_s18, [#allocation5], %s4500_s21, %s4500_s21, %s4501_s22  }
   0xf   :  { %s50_s24 = sshll.u32 %s4502_s23, 4  ;;  %s71_s0 = sshll.u32 %s7531_s4, 4  ;;  %s51_s24 = int_to_ptr.vmem [resolvable:$true] %s50_s24  ;;  %s72_s0 = int_to_ptr.hbm [resolvable:$true] %s71_s0 }
  0x10   :  { %53 = dma.hbm_to_vmem [thread:$0]  %s49_s20, 128, %s51_s24, [#allocation8]  }
  0x11   :  { %s84_s2 = sshll.u32 %s7532_s5, 4  ;;  %s4503_s29 = smov [#allocation12]   ;;  %s85_s2 = int_to_ptr.hbm [resolvable:$true] %s84_s2 }
  0x12   :  { %s73_s30 = sshll.u32 %s4503_s29, 4  ;;  %s4504_s8 = smov [#allocation13]   ;;  %s74_s30 = int_to_ptr.vmem [resolvable:$true] %s73_s30 }
  0x13   :  { %79 = dma.hbm_to_vmem [thread:$0]  %s72_s0, 8192, %s74_s30, [#allocation11], %s4497_s13, %s4497_s13, %s4498_s14  }
  0x14   :  { %s86_s9 = sshll.u32 %s4504_s8, 4  ;;  %s87_s9 = int_to_ptr.vmem [resolvable:$true] %s86_s9 }
  0x15   :  { %92 = dma.hbm_to_vmem [thread:$0]  %s85_s2, 4096, %s87_s9, [#allocation14], %s4500_s21, %s4500_s21, %s4501_s22  }
  0x16   :  { %4483 = dma.done.wait [#allocation5], 1024  }
  0x17   :  { %4484 = vsyncadd [#allocation5], 4294966272 }
  0x18   :  { %4485 = dma.done.wait [#allocation8], 8320  }
  0x19   :  { %4486 = vsyncadd [#allocation8], 4294958976 }
  0x1a   :  { %4487 = dma.done.wait [#allocation11], 16384  }
  0x1b   :  { %4488 = vsyncadd [#allocation11], 4294950912 }
  0x1c   :  { %4489 = dma.done.wait [#allocation14], 4096  }
  0x1d   :  { %4490 = vsyncadd [#allocation14], 4294963200  ;;  %v183_v0 = vld [vmem:[#allocation7 + $0x1c0] sm:$0xff]  ;;  %v184_v1 = vld [vmem:[#allocation7 + $0x1c8] sm:$0xff]  ;;  %vm209_vm0 = vcmask 523264   ;;  %s3470_s13 = sshll.u32 %s7534_s7, 4  ;;  %s3471_s13 = int_to_ptr.hbm [resolvable:$true] %s3470_s13 }
  0x1e   :  { %v175_v2 = vld [vmem:[#allocation7 + $0x180] sm:$0xff]  ;;  %242 = vmatpush.msra.mxu0 %v183_v0  ;;  %3612 = vmatpush.msra.mxu2 %v183_v0  ;;  %v176_v3 = vld [vmem:[#allocation7 + $0x188] sm:$0xff]  ;;  %v4573_v17 = vld [vmem:[#allocation4 + $0x10] sm:$0xff] }
  0x1f   :  { %283 = vmatpush.msra.mxu1 %v184_v1  ;;  %3620 = vmatpush.msra.mxu3 %v184_v1  ;;  %v167_v4 = vld [vmem:[#allocation7 + $0x140] sm:$0xff]  ;;  %v168_v5 = vld [vmem:[#allocation7 + $0x148] sm:$0xff]  ;;  %v186_v18 = vld [vmem:[#allocation7 + $0x1d8] sm:$0xff] }
  0x20   :  { %243 = vmatpush.msra.mxu0 %v175_v2  ;;  %3613 = vmatpush.msra.mxu2 %v175_v2  ;;  %v159_v6 = vld [vmem:[#allocation7 + $0x100] sm:$0xff]  ;;  %v160_v7 = vld [vmem:[#allocation7 + $0x108] sm:$0xff]  ;;  %v185_v21 = vld [vmem:[#allocation7 + $0x1d0] sm:$0xff] }
  0x21   :  { %284 = vmatpush.msra.mxu1 %v176_v3  ;;  %3621 = vmatpush.msra.mxu3 %v176_v3  ;;  %v151_v8 = vld [vmem:[#allocation7 + $0xc0] sm:$0xff]  ;;  %v152_v9 = vld [vmem:[#allocation7 + $0xc8] sm:$0xff]  ;;  %v178_v23 = vld [vmem:[#allocation7 + $0x198] sm:$0xff] }
  0x22   :  { %244 = vmatpush.msra.mxu0 %v167_v4  ;;  %3614 = vmatpush.msra.mxu2 %v167_v4  ;;  %v143_v10 = vld [vmem:[#allocation7 + $0x80] sm:$0xff]  ;;  %v144_v11 = vld [vmem:[#allocation7 + $0x88] sm:$0xff]  ;;  %v177_v25 = vld [vmem:[#allocation7 + $0x190] sm:$0xff] }
  0x23   :  { %285 = vmatpush.msra.mxu1 %v168_v5  ;;  %3622 = vmatpush.msra.mxu3 %v168_v5  ;;  %v135_v12 = vld [vmem:[#allocation7 + $0x40] sm:$0xff]  ;;  %v136_v13 = vld [vmem:[#allocation7 + $0x48] sm:$0xff]  ;;  %v170_v27 = vld [vmem:[#allocation7 + $0x158] sm:$0xff] }
  0x24   :  { %245 = vmatpush.msra.mxu0 %v159_v6  ;;  %3615 = vmatpush.msra.mxu2 %v159_v6  ;;  %v127_v14 = vld [vmem:[#allocation7] sm:$0xff]  ;;  %v128_v15 = vld [vmem:[#allocation7 + $0x8] sm:$0xff]  ;;  %v169_v29 = vld [vmem:[#allocation7 + $0x150] sm:$0xff] }
  0x25   :  { %286 = vmatpush.msra.mxu1 %v160_v7  ;;  %3623 = vmatpush.msra.mxu3 %v160_v7  ;;  %v4571_v16 = vld [vmem:[#allocation4] sm:$0xff]  ;;  %v188_v20 = vld [vmem:[#allocation7 + $0x1e8] sm:$0xff]  ;;  %v4583_v31 = vld [vmem:[#allocation4 + $0x18] sm:$0xff] }
  0x26   :  { %246 = vmatpush.msra.mxu0 %v151_v8  ;;  %3616 = vmatpush.msra.mxu2 %v151_v8  ;;  %v187_v19 = vld [vmem:[#allocation7 + $0x1e0] sm:$0xff]  ;;  %v180_v24 = vld [vmem:[#allocation7 + $0x1a8] sm:$0xff]  ;;  %v162_v36 = vld [vmem:[#allocation7 + $0x118] sm:$0xff] }
  0x27   :  { %287 = vmatpush.msra.mxu1 %v152_v9  ;;  %3624 = vmatpush.msra.mxu3 %v152_v9  ;;  %v179_v22 = vld [vmem:[#allocation7 + $0x1a0] sm:$0xff]  ;;  %v172_v28 = vld [vmem:[#allocation7 + $0x168] sm:$0xff]  ;;  %v161_v37 = vld [vmem:[#allocation7 + $0x110] sm:$0xff] }
  0x28   :  { %247 = vmatpush.msra.mxu0 %v143_v10  ;;  %3617 = vmatpush.msra.mxu2 %v143_v10  ;;  %v171_v26 = vld [vmem:[#allocation7 + $0x160] sm:$0xff]  ;;  %v164_v32 = vld [vmem:[#allocation7 + $0x128] sm:$0xff]  ;;  %v154_v40 = vld [vmem:[#allocation7 + $0xd8] sm:$0xff] }
  0x29   :  { %288 = vmatpush.msra.mxu1 %v144_v11  ;;  %3625 = vmatpush.msra.mxu3 %v144_v11  ;;  %v163_v30 = vld [vmem:[#allocation7 + $0x120] sm:$0xff]  ;;  %v4585_v33 = vld [vmem:[#allocation4 + $0x8] sm:$0xff]  ;;  %v153_v41 = vld [vmem:[#allocation7 + $0xd0] sm:$0xff] }
  0x2a   :  { %248 = vmatpush.msra.mxu0 %v135_v12  ;;  %3618 = vmatpush.msra.mxu2 %v135_v12  ;;  %v155_v34 = vld [vmem:[#allocation7 + $0xe0] sm:$0xff]  ;;  %v156_v35 = vld [vmem:[#allocation7 + $0xe8] sm:$0xff]  ;;  %v146_v45 = vld [vmem:[#allocation7 + $0x98] sm:$0xff] }
  0x2b   :  { %289 = vmatpush.msra.mxu1 %v136_v13  ;;  %3626 = vmatpush.msra.mxu3 %v136_v13  ;;  %v147_v38 = vld [vmem:[#allocation7 + $0xa0] sm:$0xff]  ;;  %v148_v39 = vld [vmem:[#allocation7 + $0xa8] sm:$0xff]  ;;  %v138_v48 = vld [vmem:[#allocation7 + $0x58] sm:$0xff] }
  0x2c   :  { %249 = vmatpush.msra.mxu0 %v127_v14  ;;  %3619 = vmatpush.msra.mxu2 %v127_v14  ;;  %v139_v42 = vld [vmem:[#allocation7 + $0x60] sm:$0xff]  ;;  %v140_v43 = vld [vmem:[#allocation7 + $0x68] sm:$0xff]  ;;  %v145_v49 = vld [vmem:[#allocation7 + $0x90] sm:$0xff] }
  0x2d   :  { %290 = vmatpush.msra.mxu1 %v128_v15  ;;  %3627 = vmatpush.msra.mxu3 %v128_v15  ;;  %v4595_v44 = vld [vmem:[#allocation4 + $0x20] sm:$0xff]  ;;  %v132_v47 = vld [vmem:[#allocation7 + $0x28] sm:$0xff]  ;;  %v130_v50 = vld [vmem:[#allocation7 + $0x18] sm:$0xff] }
  0x2e   :  { %3500 = vmatmul.msk.f32.vlgmr.msra.gmra.mxu0 %vm209_vm0, %v4571_v16  ;;  %3502 = vmatmul.msk.f32.vlgmr.msra.gmra.mxu2 %vm209_vm0, %v4573_v17  ;;  %v131_v46 = vld [vmem:[#allocation7 + $0x20] sm:$0xff]  ;;  %v137_v51 = vld [vmem:[#allocation7 + $0x50] sm:$0xff]  ;;  %v190_v52 = vld [vmem:[#allocation7 + $0x1f8] sm:$0xff] }
  0x2f   :  { %3508 = vmatmul.msk.f32.vlgmr.msra.gmra.mxu1 %vm209_vm0, %v4571_v16  ;;  %3510 = vmatmul.msk.f32.vlgmr.msra.gmra.mxu3 %vm209_vm0, %v4573_v17  ;;  %v4605_v53 = vld [vmem:[#allocation10 + $0x1e0] sm:$0xff]  ;;  %v4607_v54 = vld [vmem:[#allocation10 + $0x1e8] sm:$0xff]  ;;  %v182_v63 = vld [vmem:[#allocation7 + $0x1b8] sm:$0xff] }
  0x30   :  { %365 = vmatpush.msrb.mxu3 %v186_v18  ;;  %406 = vmatpush.msrb.mxu0 %v187_v19  ;;  %v4610_v55 = vld [vmem:[#allocation10 + $0x1c0] sm:$0xff]  ;;  %v4612_v56 = vld [vmem:[#allocation10 + $0x1c8] sm:$0xff]  ;;  %v174_v9 = vld [vmem:[#allocation7 + $0x178] sm:$0xff] }
  0x31   :  { %447 = vmatpush.msrb.mxu1 %v188_v20  ;;  %324 = vmatpush.msrb.mxu2 %v185_v21  ;;  %v4614_v57 = vld [vmem:[#allocation4 + $0x28] sm:$0xff]  ;;  %v129_v58 = vld [vmem:[#allocation7 + $0x10] sm:$0xff]  ;;  %v4673_v13 = vld [vmem:[#allocation4 + $0x38] sm:$0xff] }
  0x32   :  { %407 = vmatpush.msrb.mxu0 %v179_v22  ;;  %366 = vmatpush.msrb.mxu3 %v178_v23  ;;  %v4617_v59 = vld [vmem:[#allocation10 + $0x1a0] sm:$0xff]  ;;  %v4626_v61 = vld [vmem:[#allocation10 + $0x1a8] sm:$0xff]  ;;  %v166_v21 = vld [vmem:[#allocation7 + $0x138] sm:$0xff] }
  0x33   :  { %448 = vmatpush.msrb.mxu1 %v180_v24  ;;  %325 = vmatpush.msrb.mxu2 %v177_v25  ;;  %v4623_v60 = vld [vmem:[#allocation10 + $0x180] sm:$0xff]  ;;  %v4635_v62 = vld [vmem:[#allocation10 + $0x188] sm:$0xff] }
  0x34   :  { %408 = vmatpush.msrb.mxu0 %v171_v26  ;;  %367 = vmatpush.msrb.mxu3 %v170_v27  ;;  %v4637_v0 = vld [vmem:[#allocation10 + $0x160] sm:$0xff]  ;;  %v189_v1 = vld [vmem:[#allocation7 + $0x1f0] sm:$0xff] }
  0x35   :  { %449 = vmatpush.msrb.mxu1 %v172_v28  ;;  %326 = vmatpush.msrb.mxu2 %v169_v29  ;;  %v4640_v2 = vld [vmem:[#allocation10 + $0x140] sm:$0xff]  ;;  %v4642_v3 = vld [vmem:[#allocation4 + $0x30] sm:$0xff]  ;;  %v158_v29 = vld [vmem:[#allocation7 + $0xf8] sm:$0xff] }
  0x36   :  { %409 = vmatpush.msrb.mxu0 %v163_v30  ;;  %3503 = vmatmul.msk.f32.gmra.mxu2 %vm209_vm0, %v4583_v31  ;;  %v4645_v4 = vld [vmem:[#allocation10 + $0x168] sm:$0xff]  ;;  %v4648_v5 = vld [vmem:[#allocation10 + $0x120] sm:$0xff] }
  0x37   :  { %450 = vmatpush.msrb.mxu1 %v164_v32  ;;  %3501 = vmatmul.msk.f32.gmra.mxu0 %vm209_vm0, %v4585_v33  ;;  %v4654_v6 = vld [vmem:[#allocation10 + $0x100] sm:$0xff]  ;;  %v4656_v7 = vld [vmem:[#allocation10 + $0x148] sm:$0xff] }
  0x38   :  { %3509 = vmatmul.msk.f32.gmra.mxu1 %vm209_vm0, %v4585_v33  ;;  %3511 = vmatmul.msk.f32.gmra.mxu3 %vm209_vm0, %v4583_v31  ;;  %v4665_v8 = vld [vmem:[#allocation10 + $0x128] sm:$0xff]  ;;  %v4668_v10 = vld [vmem:[#allocation10 + $0xe0] sm:$0xff] }
  0x39   :  { %410 = vmatpush.msrb.mxu0 %v155_v34  ;;  %451 = vmatpush.msrb.mxu1 %v156_v35  ;;  %v181_v11 = vld [vmem:[#allocation7 + $0x1b0] sm:$0xff]  ;;  %v4671_v12 = vld [vmem:[#allocation10 + $0xc0] sm:$0xff] }
  0x3a   :  { %368 = vmatpush.msrb.mxu3 %v162_v36  ;;  %327 = vmatpush.msrb.mxu2 %v161_v37  ;;  %v4675_v14 = vld [vmem:[#allocation10 + $0x108] sm:$0xff]  ;;  %v4679_v15 = vld [vmem:[#allocation10 + $0xa0] sm:$0xff]  ;;  %v150_v36 = vld [vmem:[#allocation7 + $0xb8] sm:$0xff] }
  0x3b   :  { %411 = vmatpush.msrb.mxu0 %v147_v38  ;;  %452 = vmatpush.msrb.mxu1 %v148_v39  ;;  %v4685_v18 = vld [vmem:[#allocation10 + $0x80] sm:$0xff]  ;;  %v4687_v19 = vld [vmem:[#allocation10 + $0xe8] sm:$0xff]  ;;  %v142_v39 = vld [vmem:[#allocation7 + $0x78] sm:$0xff] }
  0x3c   :  { %369 = vmatpush.msrb.mxu3 %v154_v40  ;;  %328 = vmatpush.msrb.mxu2 %v153_v41  ;;  %v4696_v20 = vld [vmem:[#allocation10 + $0xc8] sm:$0xff]  ;;  %v4699_v22 = vld [vmem:[#allocation10 + $0x60] sm:$0xff]  ;;  %v134_v41 = vld [vmem:[#allocation7 + $0x38] sm:$0xff] }
  0x3d   :  { %412 = vmatpush.msrb.mxu0 %v139_v42  ;;  %453 = vmatpush.msrb.mxu1 %v140_v43  ;;  %v173_v23 = vld [vmem:[#allocation7 + $0x170] sm:$0xff]  ;;  %v4702_v24 = vld [vmem:[#allocation10 + $0x40] sm:$0xff] }
  0x3e   :  { %3504 = vmatmul.msk.f32.gmra.mxu2 %vm209_vm0, %v4595_v44  ;;  %370 = vmatpush.msrb.mxu3 %v146_v45  ;;  %v4704_v25 = vld [vmem:[#allocation10 + $0xa8] sm:$0xff]  ;;  %v4708_v26 = vld [vmem:[#allocation10 + $0x20] sm:$0xff]  ;;  %v7535_v45 = vmov 0.0  }
  0x3f   :  { %413 = vmatpush.msrb.mxu0 %v131_v46  ;;  %454 = vmatpush.msrb.mxu1 %v132_v47  ;;  %v4714_v27 = vld [vmem:[#allocation10] sm:$0xff]  ;;  %v4716_v28 = vld [vmem:[#allocation10 + $0x88] sm:$0xff]  ;;  %v4768_v46 = vld [vmem:[#allocation10 + $0x1f8] sm:$0xff] }
  0x40   :  { %3512 = vmatmul.msk.f32.gmra.mxu3 %vm209_vm0, %v4595_v44  ;;  %3532 = vmatmul.msk.f32.vlgmr.msrb.gmra.mxu0 %vm209_vm0, %v4571_v16  ;;  %v4725_v30 = vld [vmem:[#allocation10 + $0x68] sm:$0xff]  ;;  %v4770_v47 = vld [vmem:[#allocation10 + $0x1d8] sm:$0xff] }
  0x41   :  { %3540 = vmatmul.msk.f32.vlgmr.msrb.gmra.mxu1 %vm209_vm0, %v4571_v16  ;;  %371 = vmatpush.msrb.mxu3 %v138_v48  ;;  %v165_v32 = vld [vmem:[#allocation7 + $0x130] sm:$0xff]  ;;  %7852 = vst [vmem:[#allocation21_spill] sm:$0xff] %v4770_v47  ;;  %v4779_v48 = vld [vmem:[#allocation10 + $0x1b8] sm:$0xff] }
  0x42   :  { %329 = vmatpush.msrb.mxu2 %v145_v49  ;;  %761 = vmatpush.msra.mxu0 %v4605_v53  ;;  %v4729_v34 = vld [vmem:[#allocation10 + $0x48] sm:$0xff]  ;;  %7853 = vst [vmem:[#allocation22_spill] sm:$0xff] %v4779_v48  ;;  %v4781_v49 = vld [vmem:[#allocation12 + $0x1e0] sm:$0xff] }
  0x43   :  { %372 = vmatpush.msrb.mxu3 %v130_v50  ;;  %781 = vmatpush.msra.mxu1 %v4607_v54  ;;  %v4735_v35 = vld [vmem:[#allocation10 + $0x28] sm:$0xff] }
  0x44   :  { %330 = vmatpush.msrb.mxu2 %v137_v51  ;;  %762 = vmatpush.msra.mxu0 %v4610_v55  ;;  %v157_v37 = vld [vmem:[#allocation7 + $0xf0] sm:$0xff]  ;;  %v4787_v51 = vld [vmem:[#allocation10 + $0x1f0] sm:$0xff] }
  0x45   :  { %529 = vmatpush.msra.mxu3 %v190_v52  ;;  %782 = vmatpush.msra.mxu1 %v4612_v56  ;;  %v4743_v38 = vld [vmem:[#allocation10 + $0x8] sm:$0xff]  ;;  %v4789_v52 = vld [vmem:[#allocation12 + $0x1c0] sm:$0xff] }
  0x46   :  { %3505 = vmatmul.msk.f32.gmra.mxu2 %vm209_vm0, %v4614_v57  ;;  %763 = vmatpush.msra.mxu0 %v4617_v59  ;;  %v149_v40 = vld [vmem:[#allocation7 + $0xb0] sm:$0xff] }
  0x47   :  { %331 = vmatpush.msrb.mxu2 %v129_v58  ;;  %783 = vmatpush.msra.mxu1 %v4626_v61  ;;  %v141_v42 = vld [vmem:[#allocation7 + $0x70] sm:$0xff] }
  0x48   :  { %3513 = vmatmul.msk.f32.gmra.mxu3 %vm209_vm0, %v4614_v57  ;;  %3533 = vmatmul.msk.f32.gmra.mxu0 %vm209_vm0, %v4585_v33  ;;  %v133_v43 = vld [vmem:[#allocation7 + $0x30] sm:$0xff] }
  0x49   :  { %3541 = vmatmul.msk.f32.gmra.mxu1 %vm209_vm0, %v4585_v33  ;;  %764 = vmatpush.msra.mxu0 %v4623_v60  ;;  %v4783_v50 = vld [vmem:[#allocation12 + $0x1e8] sm:$0xff] }
  0x4a   :  { %530 = vmatpush.msra.mxu3 %v182_v63  ;;  %488 = vmatpush.msra.mxu2 %v189_v1  ;;  %v4791_v58 = vld [vmem:[#allocation12 + $0x1c8] sm:$0xff]  ;;  %v4795_v63 = vld [vmem:[#allocation10 + $0x1d0] sm:$0xff]  ;;  %v4797_v1 = vld [vmem:[#allocation10 + $0x198] sm:$0xff] }
  0x4b   :  { %765 = vmatpush.msra.mxu0 %v4637_v0  ;;  %784 = vmatpush.msra.mxu1 %v4635_v62  ;;  %7854 = vst [vmem:[#allocation23_spill] sm:$0xff] %v4797_v1 }
  0x4c   :  { %531 = vmatpush.msra.mxu3 %v174_v9  ;;  %489 = vmatpush.msra.mxu2 %v181_v11  ;;  %v4803_v9 = vld [vmem:[#allocation12 + $0x1a0] sm:$0xff]  ;;  %v4805_v11 = vld [vmem:[#allocation12 + $0x1a8] sm:$0xff] }
  0x4d   :  { %766 = vmatpush.msra.mxu0 %v4640_v2  ;;  %785 = vmatpush.msra.mxu1 %v4645_v4 }
  0x4e   :  { %3506 = vmatmul.msk.f32.gmra.mxu2 %vm209_vm0, %v4642_v3  ;;  %532 = vmatpush.msra.mxu3 %v166_v21  ;;  %v4807_v21 = vld [vmem:[#allocation10 + $0x1b0] sm:$0xff] }
  0x4f   :  { %767 = vmatpush.msra.mxu0 %v4648_v5  ;;  %786 = vmatpush.msra.mxu1 %v4656_v7  ;;  %7855 = vst [vmem:[#allocation24_spill] sm:$0xff] %v4807_v21 }
  0x50   :  { %3514 = vmatmul.msk.f32.gmra.mxu3 %vm209_vm0, %v4642_v3  ;;  %3534 = vmatmul.msk.f32.gmra.mxu0 %vm209_vm0, %v4573_v17 }
  0x51   :  { %3542 = vmatmul.msk.f32.gmra.mxu1 %vm209_vm0, %v4573_v17  ;;  %768 = vmatpush.msra.mxu0 %v4654_v6 }
  0x52   :  { %787 = vmatpush.msra.mxu1 %v4665_v8  ;;  %490 = vmatpush.msra.mxu2 %v173_v23  ;;  %v4812_v23 = vld [vmem:[#allocation12 + $0x180] sm:$0xff] }
  0x53   :  { %769 = vmatpush.msra.mxu0 %v4668_v10  ;;  %533 = vmatpush.msra.mxu3 %v158_v29  ;;  %v4814_v29 = vld [vmem:[#allocation12 + $0x188] sm:$0xff] }
  0x54   :  { %788 = vmatpush.msra.mxu1 %v4675_v14  ;;  %491 = vmatpush.msra.mxu2 %v165_v32  ;;  %v4821_v32 = vld [vmem:[#allocation10 + $0x190] sm:$0xff] }
  0x55   :  { %770 = vmatpush.msra.mxu0 %v4671_v12  ;;  %534 = vmatpush.msra.mxu3 %v150_v36  ;;  %7856 = vst [vmem:[#allocation25_spill] sm:$0xff] %v4821_v32  ;;  %v4823_v36 = vld [vmem:[#allocation10 + $0x178] sm:$0xff] }
  0x56   :  { %3507 = vmatmul.msk.f32.gmra.mxu2 %vm209_vm0, %v4673_v13  ;;  %789 = vmatpush.msra.mxu1 %v4687_v19  ;;  %7857 = vst [vmem:[#allocation26_spill] sm:$0xff] %v4823_v36 }
  0x57   :  { %771 = vmatpush.msra.mxu0 %v4679_v15  ;;  %492 = vmatpush.msra.mxu2 %v157_v37  ;;  %v4825_v37 = vld [vmem:[#allocation12 + $0x160] sm:$0xff] }
  0x58   :  { %3515 = vmatmul.msk.f32.gmra.mxu3 %vm209_vm0, %v4673_v13  ;;  %3535 = vmatmul.msk.f32.gmra.mxu0 %vm209_vm0, %v4583_v31 }
  0x59   :  { %3543 = vmatmul.msk.f32.gmra.mxu1 %vm209_vm0, %v4583_v31  ;;  %772 = vmatpush.msra.mxu0 %v4685_v18 }
  0x5a   :  { %790 = vmatpush.msra.mxu1 %v4696_v20  ;;  %535 = vmatpush.msra.mxu3 %v142_v39  ;;  %v4829_v39 = vld [vmem:[#allocation12 + $0x168] sm:$0xff] }
  0x5b   :  { %773 = vmatpush.msra.mxu0 %v4699_v22  ;;  %493 = vmatpush.msra.mxu2 %v149_v40  ;;  %v4831_v40 = vld [vmem:[#allocation10 + $0x170] sm:$0xff] }
  0x5c   :  { %791 = vmatpush.msra.mxu1 %v4704_v25  ;;  %536 = vmatpush.msra.mxu3 %v134_v41  ;;  %7858 = vst [vmem:[#allocation27_spill] sm:$0xff] %v4831_v40  ;;  %v4837_v41 = vld [vmem:[#allocation12 + $0x140] sm:$0xff] }
  0x5d   :  { %774 = vmatpush.msra.mxu0 %v4702_v24  ;;  %494 = vmatpush.msra.mxu2 %v141_v42  ;;  %7859 = vst [vmem:[#allocation28_spill] sm:$0xff] %v4837_v41  ;;  %v4839_v42 = vld [vmem:[#allocation12 + $0x148] sm:$0xff] }
  0x5e   :  { %3516 = vmatmul.msk.f32.vlgmr.msrb.gmra.mxu2 %vm209_vm0, %v4571_v16  ;;  %792 = vmatpush.msra.mxu1 %v4716_v28  ;;  %7860 = vst [vmem:[#allocation29_spill] sm:$0xff] %v4839_v42 }
  0x5f   :  { %775 = vmatpush.msra.mxu0 %v4708_v26  ;;  %495 = vmatpush.msra.mxu2 %v133_v43  ;;  %v4841_v43 = vld [vmem:[#allocation10 + $0x150] sm:$0xff] }
  0x60   :  { %3524 = vmatmul.msk.f32.vlgmr.msrb.gmra.mxu3 %vm209_vm0, %v4571_v16  ;;  %3536 = vmatmul.msk.f32.gmra.mxu0 %vm209_vm0, %v4595_v44  ;;  %7861 = vst [vmem:[#allocation30_spill] sm:$0xff] %v4841_v43 }
  0x61   :  { %3544 = vmatmul.msk.f32.gmra.mxu1 %vm209_vm0, %v4595_v44  ;;  %776 = vmatpush.msra.mxu0 %v4714_v27 }
  0x62   :  { %793 = vmatpush.msra.mxu1 %v4725_v30  ;;  %821 = vmatpush.msrb.mxu3 %v4768_v46 }
  0x63   :  { %852 = vmatpush.msrb.mxu0 %v4781_v49  ;;  %801 = vmatpush.msrb.mxu2 %v4787_v51 }
  0x64   :  { %794 = vmatpush.msra.mxu1 %v4729_v34  ;;  %822 = vmatpush.msrb.mxu3 %v4770_v47  ;;  %v4872_v47 = vld [vmem:[#allocation12 + $0xe0] sm:$0xff] }
  0x65   :  { %853 = vmatpush.msrb.mxu0 %v4789_v52  ;;  %802 = vmatpush.msrb.mxu2 %v4795_v63  ;;  %7870 = vst [vmem:[#allocation39_spill] sm:$0xff] %v4872_v47 }
  0x66   :  { %3517 = vmatmul.msk.f32.gmra.mxu2 %vm209_vm0, %v4585_v33  ;;  %795 = vmatpush.msra.mxu1 %v4735_v35 }
  0x67   :  { %823 = vmatpush.msrb.mxu3 %v4779_v48  ;;  %854 = vmatpush.msrb.mxu0 %v4803_v9  ;;  %v4859_v48 = vld [vmem:[#allocation12 + $0x100] sm:$0xff] }
  0x68   :  { %3525 = vmatmul.msk.f32.gmra.mxu3 %vm209_vm0, %v4585_v33  ;;  %3537 = vmatmul.msk.f32.gmra.mxu0 %vm209_vm0, %v4614_v57  ;;  %7867 = vst [vmem:[#allocation36_spill] sm:$0xff] %v4859_v48 }
  0x69   :  { %3545 = vmatmul.msk.f32.gmra.mxu1 %vm209_vm0, %v4614_v57  ;;  %824 = vmatpush.msrb.mxu3 %v4797_v1  ;;  %v4850_v1 = vld [vmem:[#allocation12 + $0x128] sm:$0xff] }
  0x6a   :  { %796 = vmatpush.msra.mxu1 %v4743_v38  ;;  %803 = vmatpush.msrb.mxu2 %v4807_v21  ;;  %7864 = vst [vmem:[#allocation33_spill] sm:$0xff] %v4850_v1  ;;  %v4868_v21 = vld [vmem:[#allocation10 + $0x110] sm:$0xff] }
  0x6b   :  { %855 = vmatpush.msrb.mxu0 %v4812_v23  ;;  %825 = vmatpush.msrb.mxu3 %v4823_v36  ;;  %v4848_v36 = vld [vmem:[#allocation12 + $0x120] sm:$0xff]  ;;  %7868 = vst [vmem:[#allocation37_spill] sm:$0xff] %v4868_v21 }
  0x6c   :  { %872 = vmatpush.msrb.mxu1 %v4783_v50  ;;  %804 = vmatpush.msrb.mxu2 %v4821_v32  ;;  %7863 = vst [vmem:[#allocation32_spill] sm:$0xff] %v4848_v36  ;;  %v4857_v32 = vld [vmem:[#allocation10 + $0x138] sm:$0xff] }
  0x6d   :  { %856 = vmatpush.msrb.mxu0 %v4825_v37  ;;  %7866 = vst [vmem:[#allocation35_spill] sm:$0xff] %v4857_v32 }
  0x6e   :  { %3518 = vmatmul.msk.f32.gmra.mxu2 %vm209_vm0, %v4573_v17  ;;  %873 = vmatpush.msrb.mxu1 %v4791_v58 }
  0x6f   :  { %805 = vmatpush.msrb.mxu2 %v4831_v40  ;;  %857 = vmatpush.msrb.mxu0 %v4837_v41  ;;  %v4855_v40 = vld [vmem:[#allocation10 + $0x130] sm:$0xff]  ;;  %v4888_v41 = vld [vmem:[#allocation12 + $0xc8] sm:$0xff] }
  0x70   :  { %3526 = vmatmul.msk.f32.gmra.mxu3 %vm209_vm0, %v4573_v17  ;;  %3538 = vmatmul.msk.f32.gmra.mxu0 %vm209_vm0, %v4642_v3  ;;  %7865 = vst [vmem:[#allocation34_spill] sm:$0xff] %v4855_v40 }
  0x71   :  { %3546 = vmatmul.msk.f32.gmra.mxu1 %vm209_vm0, %v4642_v3  ;;  %806 = vmatpush.msrb.mxu2 %v4841_v43  ;;  %v4863_v43 = vld [vmem:[#allocation12 + $0x108] sm:$0xff]  ;;  %7875 = vst [vmem:[#allocation44_spill] sm:$0xff] %v4888_v41 }
  0x72   :  { %874 = vmatpush.msrb.mxu1 %v4805_v11  ;;  %858 = vmatpush.msrb.mxu0 %v4848_v36  ;;  %v4876_v36 = vld [vmem:[#allocation12 + $0xe8] sm:$0xff] }
  0x73   :  { %807 = vmatpush.msrb.mxu2 %v4855_v40  ;;  %7871 = vst [vmem:[#allocation40_spill] sm:$0xff] %v4876_v36  ;;  %v4886_v40 = vld [vmem:[#allocation12 + $0xc0] sm:$0xff] }
  0x74   :  { %875 = vmatpush.msrb.mxu1 %v4814_v29  ;;  %859 = vmatpush.msrb.mxu0 %v4859_v48  ;;  %7874 = vst [vmem:[#allocation43_spill] sm:$0xff] %v4886_v40  ;;  %v4894_v48 = vld [vmem:[#allocation10 + $0xd8] sm:$0xff] }
  0x75   :  { %808 = vmatpush.msrb.mxu2 %v4868_v21  ;;  %7877 = vst [vmem:[#allocation46_spill] sm:$0xff] %v4894_v48  ;;  %v4898_v21 = vld [vmem:[#allocation12 + $0xa0] sm:$0xff] }
  0x76   :  { %3519 = vmatmul.msk.f32.gmra.mxu2 %vm209_vm0, %v4583_v31  ;;  %876 = vmatpush.msrb.mxu1 %v4829_v39  ;;  %7878 = vst [vmem:[#allocation47_spill] sm:$0xff] %v4898_v21 }
  0x77   :  { %860 = vmatpush.msrb.mxu0 %v4872_v47  ;;  %v4928_v47 = vld [vmem:[#allocation12 + $0x68] sm:$0xff] }
  0x78   :  { %3527 = vmatmul.msk.f32.gmra.mxu3 %vm209_vm0, %v4583_v31  ;;  %3539 = vmatmul.msk.f32.gmra.mxu0 %vm209_vm0, %v4673_v13  ;;  %7886 = vst [vmem:[#allocation55_spill] sm:$0xff] %v4928_v47 }
  0x79   :  { %3547 = vmatmul.msk.f32.gmra.mxu1 %vm209_vm0, %v4673_v13  ;;  %861 = vmatpush.msrb.mxu0 %v4886_v40  ;;  %v4916_v40 = vld [vmem:[#allocation12 + $0x88] sm:$0xff] }
  0x7a   :  { %877 = vmatpush.msrb.mxu1 %v4839_v42  ;;  %v4882_v42 = vld [vmem:[#allocation10 + $0xf8] sm:$0xff]  ;;  %7882 = vst [vmem:[#allocation51_spill] sm:$0xff] %v4916_v40 }
  0x7b   :  { %7873 = vst [vmem:[#allocation42_spill] sm:$0xff] %v4882_v42  ;;  %862 = vmatpush.msrb.mxu0 %v4898_v21  ;;  %v4934_v21 = vld [vmem:[#allocation10 + $0x78] sm:$0xff] }
  0x7c   :  { %878 = vmatpush.msrb.mxu1 %v4850_v1  ;;  %v4878_v1 = vld [vmem:[#allocation10 + $0xf0] sm:$0xff]  ;;  %7888 = vst [vmem:[#allocation57_spill] sm:$0xff] %v4934_v21 }
  0x7d   :  { %7872 = vst [vmem:[#allocation41_spill] sm:$0xff] %v4878_v1  ;;  %809 = vmatpush.msrb.mxu2 %v4878_v1  ;;  %v4909_v1 = vld [vmem:[#allocation10 + $0xb8] sm:$0xff] }
  0x7e   :  { %3520 = vmatmul.msk.f32.gmra.mxu2 %vm209_vm0, %v4595_v44  ;;  %879 = vmatpush.msrb.mxu1 %v4863_v43  ;;  %7881 = vst [vmem:[#allocation50_spill] sm:$0xff] %v4909_v1 }
  0x80   :  { %3528 = vmatmul.msk.f32.gmra.mxu3 %vm209_vm0, %v4595_v44  ;;  %777 = vmatmul.f32.vlgmr.msra.gmra.mxu0 %v7535_v45 }
  0x81   :  { %797 = vmatmul.f32.vlgmr.msra.gmra.mxu1 %v7535_v45  ;;  %v4844_v45 = vld [vmem:[#allocation10 + $0x158] sm:$0xff] }
  0x82   :  { %7862 = vst [vmem:[#allocation31_spill] sm:$0xff] %v4844_v45  ;;  %826 = vmatpush.msrb.mxu3 %v4844_v45  ;;  %v4870_v45 = vld [vmem:[#allocation10 + $0x118] sm:$0xff]  ;;  %880 = vmatpush.msrb.mxu1 %v4876_v36  ;;  %v4905_v36 = vld [vmem:[#allocation10 + $0xb0] sm:$0xff] }
  0x83   :  { %7869 = vst [vmem:[#allocation38_spill] sm:$0xff] %v4870_v45 }
  0x84   :  { %827 = vmatpush.msrb.mxu3 %v4857_v32  ;;  %v4892_v32 = vld [vmem:[#allocation10 + $0xd0] sm:$0xff]  ;;  %881 = vmatpush.msrb.mxu1 %v4888_v41  ;;  %7880 = vst [vmem:[#allocation49_spill] sm:$0xff] %v4905_v36 }
  0x85   :  { %7876 = vst [vmem:[#allocation45_spill] sm:$0xff] %v4892_v32  ;;  %810 = vmatpush.msrb.mxu2 %v4892_v32  ;;  %v4918_v41 = vld [vmem:[#allocation10 + $0x90] sm:$0xff]  ;;  %v4922_v32 = vld [vmem:[#allocation10 + $0x98] sm:$0xff] }
  0x86   :  { %3521 = vmatmul.msk.f32.gmra.mxu2 %vm209_vm0, %v4614_v57  ;;  %828 = vmatpush.msrb.mxu3 %v4870_v45  ;;  %v4903_v45 = vld [vmem:[#allocation12 + $0xa8] sm:$0xff]  ;;  %7883 = vst [vmem:[#allocation52_spill] sm:$0xff] %v4918_v41 }
  0x87   :  { %7879 = vst [vmem:[#allocation48_spill] sm:$0xff] %v4903_v45  ;;  %882 = vmatpush.msrb.mxu1 %v4903_v45  ;;  %811 = vmatpush.msrb.mxu2 %v4905_v36  ;;  %v4938_v36 = vld [vmem:[#allocation12 + $0x40] sm:$0xff]  ;;  %v4940_v45 = vld [vmem:[#allocation12 + $0x48] sm:$0xff] }
  0x88   :  { %3529 = vmatmul.msk.f32.gmra.mxu3 %vm209_vm0, %v4614_v57  ;;  %7884 = vst [vmem:[#allocation53_spill] sm:$0xff] %v4922_v32 }
  0x89   :  { %829 = vmatpush.msrb.mxu3 %v4882_v42  ;;  %v4911_v42 = vld [vmem:[#allocation12 + $0x80] sm:$0xff]  ;;  %883 = vmatpush.msrb.mxu1 %v4916_v40  ;;  %7889 = vst [vmem:[#allocation58_spill] sm:$0xff] %v4938_v36  ;;  %v4974_v40 = vld [vmem:[#allocation10 + $0x18] sm:$0xff] }
  0x8a   :  { %863 = vmatpush.msrb.mxu0 %v4911_v42  ;;  %812 = vmatpush.msrb.mxu2 %v4918_v41  ;;  %7890 = vst [vmem:[#allocation59_spill] sm:$0xff] %v4940_v45  ;;  %v4949_v41 = vld [vmem:[#allocation10 + $0x58] sm:$0xff] }
  0x8b   :  { %830 = vmatpush.msrb.mxu3 %v4894_v48  ;;  %v4924_v48 = vld [vmem:[#allocation12 + $0x60] sm:$0xff]  ;;  %884 = vmatpush.msrb.mxu1 %v4928_v47  ;;  %7892 = vst [vmem:[#allocation61_spill] sm:$0xff] %v4949_v41  ;;  %v4957_v47 = vld [vmem:[#allocation10 + $0x30] sm:$0xff] }
  0x8c   :  { %7885 = vst [vmem:[#allocation54_spill] sm:$0xff] %v4924_v48  ;;  %864 = vmatpush.msrb.mxu0 %v4924_v48  ;;  %v4955_v48 = vld [vmem:[#allocation12 + $0x28] sm:$0xff] }
  0x8d   :  { %831 = vmatpush.msrb.mxu3 %v4909_v1  ;;  %v4944_v1 = vld [vmem:[#allocation10 + $0x50] sm:$0xff]  ;;  %885 = vmatpush.msrb.mxu1 %v4940_v45  ;;  %7893 = vst [vmem:[#allocation62_spill] sm:$0xff] %v4957_v47 }
  0x8e   :  { %3522 = vmatmul.msk.f32.gmra.mxu2 %vm209_vm0, %v4642_v3  ;;  %7891 = vst [vmem:[#allocation60_spill] sm:$0xff] %v4944_v1  ;;  %865 = vmatpush.msrb.mxu0 %v4938_v36  ;;  %v4968_v36 = vld [vmem:[#allocation12 + $0x8] sm:$0xff]  ;;  %v4970_v45 = vld [vmem:[#allocation10 + $0x10] sm:$0xff] }
  0x8f   :  { %832 = vmatpush.msrb.mxu3 %v4922_v32  ;;  %v4951_v32 = vld [vmem:[#allocation12 + $0x20] sm:$0xff]  ;;  %7896 = vst [vmem:[#allocation65_spill] sm:$0xff] %v4968_v36  ;;  %886 = vmatpush.msrb.mxu1 %v4955_v48 }
  0x90   :  { %3530 = vmatmul.msk.f32.gmra.mxu3 %vm209_vm0, %v4642_v3  ;;  %866 = vmatpush.msrb.mxu0 %v4951_v32  ;;  %7897 = vst [vmem:[#allocation66_spill] sm:$0xff] %v4970_v45 }
  0x91   :  { %833 = vmatpush.msrb.mxu3 %v4934_v21  ;;  %v4964_v21 = vld [vmem:[#allocation12] sm:$0xff]  ;;  %7898 = vst [vmem:[#allocation67_spill] sm:$0xff] %v4974_v40  ;;  %887 = vmatpush.msrb.mxu1 %v4968_v36 }
  0x92   :  { %7895 = vst [vmem:[#allocation64_spill] sm:$0xff] %v4964_v21  ;;  %867 = vmatpush.msrb.mxu0 %v4964_v21 }
  0x93   :  { %834 = vmatpush.msrb.mxu3 %v4949_v41  ;;  %v4982_v41 = vld [vmem:[#allocation12 + $0x1f8] sm:$0xff]  ;;  %1097 = vmatpush.msra.mxu1 %v4607_v54  ;;  %v5026_v54 = vld [vmem:[#allocation12 + $0x150] sm:$0xff] }
  0x94   :  { %7900 = vst [vmem:[#allocation69_spill] sm:$0xff] %v4982_v41  ;;  %1077 = vmatpush.msra.mxu0 %v4605_v53  ;;  %v5018_v53 = vld [vmem:[#allocation12 + $0x178] sm:$0xff] }
  0x95   :  { %1098 = vmatpush.msra.mxu1 %v4612_v56  ;;  %v5035_v56 = vld [vmem:[#allocation12 + $0x130] sm:$0xff] }
  0x96   :  { %3523 = vmatmul.msk.f32.gmra.mxu2 %vm209_vm0, %v4673_v13  ;;  %1078 = vmatpush.msra.mxu0 %v4610_v55  ;;  %v5028_v55 = vld [vmem:[#allocation12 + $0x158] sm:$0xff] }
  0x97   :  { %1099 = vmatpush.msra.mxu1 %v4626_v61  ;;  %v5044_v61 = vld [vmem:[#allocation12 + $0x110] sm:$0xff] }
  0x98   :  { %3531 = vmatmul.msk.f32.gmra.mxu3 %vm209_vm0, %v4673_v13  ;;  %1079 = vmatpush.msra.mxu0 %v4617_v59  ;;  %v5037_v59 = vld [vmem:[#allocation12 + $0x138] sm:$0xff] }
  0x99   :  { %1100 = vmatpush.msra.mxu1 %v4635_v62  ;;  %v5064_v62 = vld [vmem:[#allocation12 + $0xd0] sm:$0xff] }
  0x9a   :  { %1080 = vmatpush.msra.mxu0 %v4623_v60  ;;  %v5054_v60 = vld [vmem:[#allocation12 + $0xf0] sm:$0xff] }
  0x9b   :  { %7906 = vst [vmem:[#allocation74_spill] sm:$0xff] %v5054_v60  ;;  %1101 = vmatpush.msra.mxu1 %v4645_v4  ;;  %v5075_v4 = vld [vmem:[#allocation12 + $0xb8] sm:$0xff] }
  0x9c   :  { %1081 = vmatpush.msra.mxu0 %v4637_v0  ;;  %v5066_v0 = vld [vmem:[#allocation12 + $0xd8] sm:$0xff] }
  0x9d   :  { %1102 = vmatpush.msra.mxu1 %v4656_v7  ;;  %v5082_v7 = vld [vmem:[#allocation12 + $0x90] sm:$0xff] }
  0x9e   :  { %3548 = vmatmul.msk.f32.vlgmr.msra.gmra.mxu2 %vm209_vm0, %v4571_v16  ;;  %1082 = vmatpush.msra.mxu0 %v4640_v2  ;;  %v5073_v2 = vld [vmem:[#allocation12 + $0xb0] sm:$0xff] }
  0x9f   :  { %1103 = vmatpush.msra.mxu1 %v4665_v8  ;;  %v5104_v8 = vld [vmem:[#allocation12 + $0x58] sm:$0xff] }
  0xa0   :  { %3556 = vmatmul.msk.f32.vlgmr.msra.gmra.mxu3 %vm209_vm0, %v4571_v16  ;;  %v4930_v16 = vld [vmem:[#allocation10 + $0x70] sm:$0xff]  ;;  %1083 = vmatpush.msra.mxu0 %v4648_v5 }
  0xa1   :  { %7887 = vst [vmem:[#allocation56_spill] sm:$0xff] %v4930_v16  ;;  %813 = vmatpush.msrb.mxu2 %v4930_v16  ;;  %v4962_v16 = vld [vmem:[#allocation10 + $0x38] sm:$0xff]  ;;  %v5092_v5 = vld [vmem:[#allocation12 + $0x70] sm:$0xff]  ;;  %1104 = vmatpush.msra.mxu1 %v4675_v14 }
  0xa2   :  { %7894 = vst [vmem:[#allocation63_spill] sm:$0xff] %v4962_v16  ;;  %835 = vmatpush.msrb.mxu3 %v4962_v16  ;;  %v4989_v16 = vld [vmem:[#allocation12 + $0x1d0] sm:$0xff]  ;;  %1084 = vmatpush.msra.mxu0 %v4654_v6  ;;  %v5113_v14 = vld [vmem:[#allocation12 + $0x38] sm:$0xff] }
  0xa3   :  { %814 = vmatpush.msrb.mxu2 %v4944_v1  ;;  %v7901_v1 = vmov 0.0   ;;  %7909 = vst [vmem:[#allocation77_spill] sm:$0xff] %v5092_v5  ;;  %v5102_v6 = vld [vmem:[#allocation12 + $0x50] sm:$0xff]  ;;  %1105 = vmatpush.msra.mxu1 %v4687_v19 }
  0xa4   :  { %836 = vmatpush.msrb.mxu3 %v4974_v40  ;;  %868 = vmatmul.f32.vlgmr.msrb.gmra.mxu0 %v7901_v1  ;;  %v4999_v40 = vld [vmem:[#allocation12 + $0x1b8] sm:$0xff]  ;;  %v5120_v19 = vld [vmem:[#allocation12 + $0x10] sm:$0xff] }
  0xa5   :  { %815 = vmatpush.msrb.mxu2 %v4957_v47  ;;  %888 = vmatmul.f32.vlgmr.msrb.gmra.mxu1 %v7901_v1  ;;  %v4991_v47 = vld [vmem:[#allocation12 + $0x1d8] sm:$0xff] }
  0xa6   :  { %3549 = vmatmul.msk.f32.gmra.mxu2 %vm209_vm0, %v4585_v33  ;;  %912 = vmatpush.msra.mxu3 %v4982_v41  ;;  %v5010_v41 = vld [vmem:[#allocation12 + $0x198] sm:$0xff] }
  0xa7   :  { %816 = vmatpush.msrb.mxu2 %v4970_v45  ;;  %v4997_v45 = vld [vmem:[#allocation12 + $0x1b0] sm:$0xff]  ;;  %1085 = vmatpush.msra.mxu0 %v4668_v10 }
  0xa8   :  { %3557 = vmatmul.msk.f32.gmra.mxu3 %vm209_vm0, %v4585_v33  ;;  %v4980_v33 = vld [vmem:[#allocation12 + $0x1f0] sm:$0xff]  ;;  %1106 = vmatpush.msra.mxu1 %v4696_v20 }
  0xa9   :  { %7899 = vst [vmem:[#allocation68_spill] sm:$0xff] %v4980_v33  ;;  %892 = vmatpush.msra.mxu2 %v4980_v33  ;;  %913 = vmatpush.msra.mxu3 %v4991_v47  ;;  %v5008_v33 = vld [vmem:[#allocation12 + $0x190] sm:$0xff] }
  0xaa   :  { %v5111_v10 = vld [vmem:[#allocation12 + $0x30] sm:$0xff]  ;;  %1086 = vmatpush.msra.mxu0 %v4671_v12  ;;  %1107 = vmatpush.msra.mxu1 %v4704_v25 }
  0xab   :  { %893 = vmatpush.msra.mxu2 %v4989_v16  ;;  %914 = vmatpush.msra.mxu3 %v4999_v40 }
  0xac   :  { %1087 = vmatpush.msra.mxu0 %v4679_v15  ;;  %1108 = vmatpush.msra.mxu1 %v4716_v28 }
  0xad   :  { %894 = vmatpush.msra.mxu2 %v4997_v45  ;;  %915 = vmatpush.msra.mxu3 %v5010_v41 }
  0xae   :  { %3550 = vmatmul.msk.f32.gmra.mxu2 %vm209_vm0, %v4573_v17  ;;  %1088 = vmatpush.msra.mxu0 %v4685_v18  ;;  %v5157_v18 = vpop.f32.mrf.mxu1 }
  0xaf   :  { %895 = vmatpush.msra.mxu2 %v5008_v33  ;;  %916 = vmatpush.msra.mxu3 %v5018_v53 }
  0xb0   :  { %3558 = vmatmul.msk.f32.gmra.mxu3 %vm209_vm0, %v4573_v17  ;;  %v5016_v17 = vld [vmem:[#allocation12 + $0x170] sm:$0xff]  ;;  %1089 = vmatpush.msra.mxu0 %v4699_v22 }
  0xb1   :  { %v5002_v36 = vpop.f32.mrf.mxu2  ;;  %896 = vmatpush.msra.mxu2 %v5016_v17  ;;  %917 = vmatpush.msra.mxu3 %v5028_v55 }
  0xb2   :  { %7902 = vst [vmem:[#allocation70_spill] sm:$0xff] %v5002_v36  ;;  %v5006_v21 = vpop.f32.mrf.mxu3  ;;  %v5046_v36 = vld [vmem:[#allocation12 + $0x118] sm:$0xff]  ;;  %1109 = vmatpush.msra.mxu1 %v4725_v30  ;;  %1090 = vmatpush.msra.mxu0 %v4702_v24  ;;  %v7918_v30 = vld [vmem:[#allocation21_spill] sm:$0xff] }
  0xb3   :  { %7903 = vst [vmem:[#allocation71_spill] sm:$0xff] %v5006_v21  ;;  %897 = vmatpush.msra.mxu2 %v5026_v54  ;;  %918 = vmatpush.msra.mxu3 %v5037_v59 }
  0xb4   :  { %1110 = vmatpush.msra.mxu1 %v4729_v34  ;;  %1091 = vmatpush.msra.mxu0 %v4708_v26  ;;  %v7916_v26 = vld [vmem:[#allocation28_spill] sm:$0xff] }
  0xb5   :  { %898 = vmatpush.msra.mxu2 %v5035_v56  ;;  %919 = vmatpush.msra.mxu3 %v5046_v36  ;;  %v7919_v34 = vld [vmem:[#allocation24_spill] sm:$0xff] }
  0xb6   :  { %3551 = vmatmul.msk.f32.gmra.mxu2 %vm209_vm0, %v4583_v31  ;;  %1111 = vmatpush.msra.mxu1 %v4735_v35  ;;  %v5182_v25 = vpop.f32.mrf.mxu1  ;;  %v7920_v35 = vld [vmem:[#allocation32_spill] sm:$0xff] }
  0xb7   :  { %899 = vmatpush.msra.mxu2 %v5044_v61  ;;  %1092 = vmatpush.msra.mxu0 %v4714_v27  ;;  %v7917_v27 = vld [vmem:[#allocation29_spill] sm:$0xff] }
  0xb8   :  { %3559 = vmatmul.msk.f32.gmra.mxu3 %vm209_vm0, %v4583_v31  ;;  %1112 = vmatpush.msra.mxu1 %v4743_v38  ;;  %v7921_v38 = vld [vmem:[#allocation33_spill] sm:$0xff] }
  0xb9   :  { %v5040_v21 = vpop.f32.mrf.mxu2  ;;  %900 = vmatpush.msra.mxu2 %v5054_v60  ;;  %v5084_v60 = vld [vmem:[#allocation12 + $0x98] sm:$0xff]  ;;  %1168 = vmatpush.msrb.mxu0 %v4781_v49  ;;  %v7922_v49 = vld [vmem:[#allocation22_spill] sm:$0xff] }
  0xba   :  { %7904 = vst [vmem:[#allocation72_spill] sm:$0xff] %v5040_v21  ;;  %v5056_v21 = vld [vmem:[#allocation12 + $0xf8] sm:$0xff]  ;;  %1188 = vmatpush.msrb.mxu1 %v4783_v50 }
  0xbb   :  { %v5050_v31 = vpop.f32.mrf.mxu3  ;;  %920 = vmatpush.msra.mxu3 %v5056_v21  ;;  %901 = vmatpush.msra.mxu2 %v5064_v62  ;;  %v7924_v50 = vld [vmem:[#allocation36_spill] sm:$0xff] }
  0xbc   :  { %7905 = vst [vmem:[#allocation73_spill] sm:$0xff] %v5050_v31  ;;  %1169 = vmatpush.msrb.mxu0 %v4789_v52  ;;  %1189 = vmatpush.msrb.mxu1 %v4791_v58  ;;  %v7926_v52 = vld [vmem:[#allocation27_spill] sm:$0xff] }
  0xbd   :  { %921 = vmatpush.msra.mxu3 %v5066_v0  ;;  %902 = vmatpush.msra.mxu2 %v5073_v2 }
  0xbe   :  { %3552 = vmatmul.msk.f32.gmra.mxu2 %vm209_vm0, %v4595_v44  ;;  %1170 = vmatpush.msrb.mxu0 %v4803_v9  ;;  %v7928_v9 = vld [vmem:[#allocation30_spill] sm:$0xff] }
  0xbf   :  { %922 = vmatpush.msra.mxu3 %v5075_v4  ;;  %903 = vmatpush.msra.mxu2 %v5082_v7 }
  0xc0   :  { %3560 = vmatmul.msk.f32.gmra.mxu3 %vm209_vm0, %v4595_v44  ;;  %1190 = vmatpush.msrb.mxu1 %v4805_v11  ;;  %v7929_v11 = vld [vmem:[#allocation39_spill] sm:$0xff] }
  0xc1   :  { %v5078_v31 = vpop.f32.mrf.mxu2  ;;  %923 = vmatpush.msra.mxu3 %v5084_v60  ;;  %904 = vmatpush.msra.mxu2 %v5092_v5  ;;  %v5122_v5 = vld [vmem:[#allocation12 + $0x18] sm:$0xff] }
  0xc2   :  { %7907 = vst [vmem:[#allocation75_spill] sm:$0xff] %v5078_v31  ;;  %v5094_v31 = vld [vmem:[#allocation12 + $0x78] sm:$0xff]  ;;  %1171 = vmatpush.msrb.mxu0 %v4812_v23  ;;  %1191 = vmatpush.msrb.mxu1 %v4814_v29 }
  0xc3   :  { %v5088_v44 = vpop.f32.mrf.mxu3  ;;  %924 = vmatpush.msra.mxu3 %v5094_v31  ;;  %905 = vmatpush.msra.mxu2 %v5102_v6  ;;  %v7930_v23 = vld [vmem:[#allocation40_spill] sm:$0xff] }
  0xc4   :  { %7908 = vst [vmem:[#allocation76_spill] sm:$0xff] %v5088_v44  ;;  %1172 = vmatpush.msrb.mxu0 %v4825_v37  ;;  %1192 = vmatpush.msrb.mxu1 %v4829_v39  ;;  %v7932_v39 = vld [vmem:[#allocation31_spill] sm:$0xff] }
  0xc5   :  { %925 = vmatpush.msra.mxu3 %v5104_v8  ;;  %906 = vmatpush.msra.mxu2 %v5111_v10 }
  0xc6   :  { %3553 = vmatmul.msk.f32.gmra.mxu2 %vm209_vm0, %v4614_v57  ;;  %1173 = vmatpush.msrb.mxu0 %v7916_v26  ;;  %v7933_v26 = vld [vmem:[#allocation34_spill] sm:$0xff] }
  0xc7   :  { %926 = vmatpush.msra.mxu3 %v5113_v14  ;;  %907 = vmatpush.msra.mxu2 %v5120_v19 }
  0xc8   :  { %3561 = vmatmul.msk.f32.gmra.mxu3 %vm209_vm0, %v4614_v57  ;;  %1193 = vmatpush.msrb.mxu1 %v7917_v27  ;;  %v7936_v27 = vld [vmem:[#allocation44_spill] sm:$0xff] }
  0xc9   :  { %v5116_v44 = vpop.f32.mrf.mxu2  ;;  %927 = vmatpush.msra.mxu3 %v5122_v5  ;;  %1174 = vmatpush.msrb.mxu0 %v7920_v35  ;;  %v7939_v35 = vld [vmem:[#allocation47_spill] sm:$0xff] }
  0xca   :  { %7910 = vst [vmem:[#allocation78_spill] sm:$0xff] %v5116_v44  ;;  %1194 = vmatpush.msrb.mxu1 %v7921_v38  ;;  %v7940_v38 = vld [vmem:[#allocation48_spill] sm:$0xff] }
  0xcb   :  { %v5126_v57 = vpop.f32.mrf.mxu3  ;;  %1175 = vmatpush.msrb.mxu0 %v7924_v50  ;;  %v7943_v50 = vld [vmem:[#allocation51_spill] sm:$0xff] }
  0xcc   :  { %7911 = vst [vmem:[#allocation79_spill] sm:$0xff] %v5126_v57  ;;  %1195 = vmatpush.msrb.mxu1 %v4863_v43  ;;  %v7935_v43 = vld [vmem:[#allocation43_spill] sm:$0xff] }
  0xcd   :  { %1176 = vmatpush.msrb.mxu0 %v7929_v11  ;;  %v7948_v11 = vld [vmem:[#allocation55_spill] sm:$0xff] }
  0xce   :  { %3554 = vmatmul.msk.f32.gmra.mxu2 %vm209_vm0, %v4642_v3  ;;  %1196 = vmatpush.msrb.mxu1 %v7930_v23 }
  0xcf   :  { %1177 = vmatpush.msrb.mxu0 %v7935_v43  ;;  %v7952_v43 = vld [vmem:[#allocation58_spill] sm:$0xff] }
  0xd0   :  { %3562 = vmatmul.msk.f32.gmra.mxu3 %vm209_vm0, %v4642_v3  ;;  %v5153_v3 = vpop.f32.mrf.mxu0  ;;  %1197 = vmatpush.msrb.mxu1 %v7936_v27 }
  0xd1   :  { %v5141_v12 = vpop.f32.mrf.mxu2  ;;  %1178 = vmatpush.msrb.mxu0 %v7939_v35 }
  0xd2   :  { %7912 = vst [vmem:[#allocation80_spill] sm:$0xff] %v5141_v12  ;;  %1198 = vmatpush.msrb.mxu1 %v7940_v38  ;;  %v7958_v38 = vld [vmem:[#allocation53_spill] sm:$0xff] }
  0xd3   :  { %v5145_v15 = vpop.f32.mrf.mxu3  ;;  %1179 = vmatpush.msrb.mxu0 %v4911_v42  ;;  %v7953_v42 = vld [vmem:[#allocation59_spill] sm:$0xff] }
  0xd4   :  { %7913 = vst [vmem:[#allocation81_spill] sm:$0xff] %v5145_v15  ;;  %1199 = vmatpush.msrb.mxu1 %v7943_v50  ;;  %v7961_v50 = vld [vmem:[#allocation65_spill] sm:$0xff] }
  0xd6   :  { %3555 = vmatmul.msk.f32.gmra.mxu2 %vm209_vm0, %v4673_v13  ;;  %1200 = vmatpush.msrb.mxu1 %v7948_v11 }
  0xd8   :  { %3563 = vmatmul.msk.f32.gmra.mxu3 %vm209_vm0, %v4673_v13  ;;  %v5176_v13 = vpop.f32.mrf.mxu0  ;;  %1201 = vmatpush.msrb.mxu1 %v7953_v42 }
  0xd9   :  { %v5161_v20 = vpop.f32.mrf.mxu2 }
  0xda   :  { %7914 = vst [vmem:[#allocation82_spill] sm:$0xff] %v5161_v20  ;;  %1202 = vmatpush.msrb.mxu1 %v4955_v48  ;;  %v7968_v48 = vld [vmem:[#allocation63_spill] sm:$0xff] }
  0xdb   :  { %v5165_v22 = vpop.f32.mrf.mxu3 }
  0xdc   :  { %7915 = vst [vmem:[#allocation83_spill] sm:$0xff] %v5165_v22  ;;  %1203 = vmatpush.msrb.mxu1 %v7961_v50 }
  0xde   :  { %817 = vmatmul.f32.vlgmr.msrb.gmra.mxu2 %v7901_v1 }
  0xdf   :  { %1117 = vmatpush.msrb.mxu2 %v4787_v51  ;;  %v7925_v51 = vld [vmem:[#allocation23_spill] sm:$0xff] }
  0xe0   :  { %837 = vmatmul.f32.vlgmr.msrb.gmra.mxu3 %v7901_v1  ;;  %v5206_v29 = vpop.f32.mrf.mxu0 }
  0xe1   :  { %v5178_v24 = vpop.f32.mrf.mxu2  ;;  %1137 = vmatpush.msrb.mxu3 %v4768_v46  ;;  %1118 = vmatpush.msrb.mxu2 %v4795_v63  ;;  %v7923_v46 = vld [vmem:[#allocation25_spill] sm:$0xff]  ;;  %v7927_v63 = vld [vmem:[#allocation26_spill] sm:$0xff]  ;;  %7931 = vst [vmem:[#allocation28_spill] sm:$0xff] %v5206_v29 }
  0xe3   :  { %v5186_v28 = vpop.f32.mrf.mxu3  ;;  %1138 = vmatpush.msrb.mxu3 %v7918_v30  ;;  %1119 = vmatpush.msrb.mxu2 %v7919_v34  ;;  %v7937_v30 = vld [vmem:[#allocation35_spill] sm:$0xff]  ;;  %v7938_v34 = vld [vmem:[#allocation37_spill] sm:$0xff] }
  0xe5   :  { %1139 = vmatpush.msrb.mxu3 %v7922_v49  ;;  %1120 = vmatpush.msrb.mxu2 %v7923_v46  ;;  %v7941_v49 = vld [vmem:[#allocation38_spill] sm:$0xff]  ;;  %v7942_v46 = vld [vmem:[#allocation41_spill] sm:$0xff] }
  0xe6   :  { %908 = vmatmul.f32.vlgmr.msra.gmra.mxu2 %v7901_v1 }
  0xe7   :  { %1140 = vmatpush.msrb.mxu3 %v7925_v51  ;;  %1121 = vmatpush.msrb.mxu2 %v7926_v52  ;;  %v7945_v52 = vld [vmem:[#allocation42_spill] sm:$0xff] }
  0xe8   :  { %928 = vmatmul.f32.vlgmr.msra.gmra.mxu3 %v7901_v1  ;;  %v5212_v1 = vpop.f32.mrf.mxu1  ;;  %v5236_v27 = vpop.f32.mrf.mxu0 }
  0xe9   :  { %v5200_v58 = vpop.f32.mrf.mxu2  ;;  %1141 = vmatpush.msrb.mxu3 %v7927_v63  ;;  %1122 = vmatpush.msrb.mxu2 %v7928_v9  ;;  %7934 = vst [vmem:[#allocation29_spill] sm:$0xff] %v5212_v1  ;;  %v7946_v63 = vld [vmem:[#allocation45_spill] sm:$0xff]  ;;  %v7947_v9 = vld [vmem:[#allocation54_spill] sm:$0xff] }
  0xea   :  { %1180 = vmatpush.msrb.mxu0 %v7947_v9  ;;  %7954 = vst [vmem:[#allocation32_spill] sm:$0xff] %v5236_v27  ;;  %v7964_v9 = vld [vmem:[#allocation60_spill] sm:$0xff] }
  0xeb   :  { %v5208_v37 = vpop.f32.mrf.mxu3  ;;  %1142 = vmatpush.msrb.mxu3 %v7932_v39  ;;  %1123 = vmatpush.msrb.mxu2 %v7933_v26  ;;  %v7950_v39 = vld [vmem:[#allocation46_spill] sm:$0xff]  ;;  %v7951_v26 = vld [vmem:[#allocation49_spill] sm:$0xff] }
  0xec   :  { %1181 = vmatpush.msrb.mxu0 %v7952_v43  ;;  %v7970_v43 = vld [vmem:[#allocation68_spill] sm:$0xff] }
  0xed   :  { %1143 = vmatpush.msrb.mxu3 %v7937_v30  ;;  %1124 = vmatpush.msrb.mxu2 %v7938_v34  ;;  %v7955_v30 = vld [vmem:[#allocation50_spill] sm:$0xff]  ;;  %v7956_v34 = vld [vmem:[#allocation52_spill] sm:$0xff] }
  0xee   :  { %1182 = vmatpush.msrb.mxu0 %v4951_v32  ;;  %v7967_v32 = vld [vmem:[#allocation62_spill] sm:$0xff] }
  0xef   :  { %1144 = vmatpush.msrb.mxu3 %v7941_v49  ;;  %1125 = vmatpush.msrb.mxu2 %v7942_v46  ;;  %v7959_v49 = vld [vmem:[#allocation56_spill] sm:$0xff] }
  0xf0   :  { %v5240_v35 = vpop.f32.mrf.mxu1  ;;  %v7960_v46 = vld [vmem:[#allocation64_spill] sm:$0xff]  ;;  %v5259_v42 = vpop.f32.mrf.mxu0 }
  0xf1   :  { %v5224_v51 = vpop.f32.mrf.mxu2  ;;  %1145 = vmatpush.msrb.mxu3 %v7945_v52  ;;  %1126 = vmatpush.msrb.mxu2 %v7946_v63  ;;  %7957 = vst [vmem:[#allocation33_spill] sm:$0xff] %v5240_v35  ;;  %v7963_v63 = vld [vmem:[#allocation57_spill] sm:$0xff] }
  0xf2   :  { %7944 = vst [vmem:[#allocation21_spill] sm:$0xff] %v5224_v51  ;;  %1183 = vmatpush.msrb.mxu0 %v7960_v46 }
  0xf3   :  { %v5230_v23 = vpop.f32.mrf.mxu3  ;;  %1146 = vmatpush.msrb.mxu3 %v7950_v39  ;;  %1127 = vmatpush.msrb.mxu2 %v7951_v26  ;;  %v7966_v39 = vld [vmem:[#allocation61_spill] sm:$0xff]  ;;  %v7969_v26 = vld [vmem:[#allocation66_spill] sm:$0xff]  ;;  %7971 = vst [vmem:[#allocation36_spill] sm:$0xff] %v5259_v42 }
  0xf4   :  { %7949 = vst [vmem:[#allocation24_spill] sm:$0xff] %v5230_v23 }
  0xf5   :  { %1147 = vmatpush.msrb.mxu3 %v7955_v30  ;;  %1128 = vmatpush.msrb.mxu2 %v7956_v34  ;;  %v7972_v30 = vld [vmem:[#allocation67_spill] sm:$0xff] }
  0xf7   :  { %1148 = vmatpush.msrb.mxu3 %v7958_v38  ;;  %1129 = vmatpush.msrb.mxu2 %v7959_v49  ;;  %v7974_v38 = vld [vmem:[#allocation69_spill] sm:$0xff] }
  0xf8   :  { %v5262_v34 = vpop.f32.mrf.mxu1 }
  0xf9   :  { %v5248_v52 = vpop.f32.mrf.mxu2  ;;  %1149 = vmatpush.msrb.mxu3 %v7963_v63  ;;  %1130 = vmatpush.msrb.mxu2 %v7964_v9  ;;  %7973 = vst [vmem:[#allocation23_spill] sm:$0xff] %v5262_v34 }
  0xfa   :  { %7962 = vst [vmem:[#allocation22_spill] sm:$0xff] %v5248_v52 }
  0xfb   :  { %v5252_v11 = vpop.f32.mrf.mxu3  ;;  %1150 = vmatpush.msrb.mxu3 %v7966_v39  ;;  %1131 = vmatpush.msrb.mxu2 %v7967_v32 }
  0xfc   :  { %7965 = vst [vmem:[#allocation25_spill] sm:$0xff] %v5252_v11 }
  0xfd   :  { %1151 = vmatpush.msrb.mxu3 %v7968_v48  ;;  %1132 = vmatpush.msrb.mxu2 %v7969_v26 }
  0xff   :  { %1208 = vmatpush.msra.mxu2 %v7970_v43  ;;  %1152 = vmatpush.msrb.mxu3 %v7972_v30 }
 0x101   :  { %1228 = vmatpush.msra.mxu3 %v7974_v38  ;;  %1209 = vmatpush.msra.mxu2 %v4989_v16  ;;  %v5266_v49 = vpop.f32.mrf.mxu2  ;;  %v5278_v16 = vpop.f32.mrf.mxu0 }
 0x102   :  { %7975 = vst [vmem:[#allocation27_spill] sm:$0xff] %v5266_v49 }
 0x103   :  { %1229 = vmatpush.msra.mxu3 %v4991_v47  ;;  %1210 = vmatpush.msra.mxu2 %v4997_v45  ;;  %v5270_v46 = vpop.f32.mrf.mxu3  ;;  %7977 = vst [vmem:[#allocation30_spill] sm:$0xff] %v5278_v16  ;;  %v5282_v47 = vpop.f32.mrf.mxu1 }
 0x104   :  { %7976 = vst [vmem:[#allocation26_spill] sm:$0xff] %v5270_v46 }
 0x105   :  { %1230 = vmatpush.msra.mxu3 %v4999_v40  ;;  %1211 = vmatpush.msra.mxu2 %v5008_v33  ;;  %7979 = vst [vmem:[#allocation40_spill] sm:$0xff] %v5282_v47  ;;  %v7981_v40 = vld [vmem:[#allocation74_spill] sm:$0xff] }
 0x107   :  { %1231 = vmatpush.msra.mxu3 %v5010_v41  ;;  %1212 = vmatpush.msra.mxu2 %v5016_v17 }
 0x109   :  { %1232 = vmatpush.msra.mxu3 %v5018_v53  ;;  %1213 = vmatpush.msra.mxu2 %v5026_v54  ;;  %v5280_v50 = vpop.f32.mrf.mxu2  ;;  %v5298_v33 = vpop.f32.mrf.mxu0  ;;  %v7986_v54 = vld [vmem:[#allocation77_spill] sm:$0xff] }
 0x10a   :  { %7978 = vst [vmem:[#allocation39_spill] sm:$0xff] %v5280_v50 }
 0x10b   :  { %1233 = vmatpush.msra.mxu3 %v5028_v55  ;;  %1214 = vmatpush.msra.mxu2 %v5035_v56  ;;  %v5286_v45 = vpop.f32.mrf.mxu3  ;;  %7983 = vst [vmem:[#allocation43_spill] sm:$0xff] %v5298_v33  ;;  %v5302_v53 = vpop.f32.mrf.mxu1 }
 0x10c   :  { %7980 = vst [vmem:[#allocation31_spill] sm:$0xff] %v5286_v45 }
 0x10d   :  { %1234 = vmatpush.msra.mxu3 %v5037_v59  ;;  %1215 = vmatpush.msra.mxu2 %v5044_v61  ;;  %7985 = vst [vmem:[#allocation35_spill] sm:$0xff] %v5302_v53  ;;  %v5318_v59 = vld [vmem:[#allocation9] sm:$0xff] }
 0x10e   :  { %v5325_v39 = vperm.slane %v5318_v59, 6  ;;  %v5329_v32 = vperm.slane %v5318_v59, 7  ;;  %v5354_v35 = vperm.slane %v5318_v59, 0  ;;  %v5370_v50 = vperm.slane %v5318_v59, 4 }
 0x10f   :  { %1235 = vmatpush.msra.mxu3 %v5046_v36  ;;  %1216 = vmatpush.msra.mxu2 %v7981_v40 }
 0x110   :  { %7997 = vst [vmem:[#allocation46_spill] sm:$0xff] %v5354_v35 }
 0x111   :  { %1236 = vmatpush.msra.mxu3 %v5056_v21  ;;  %1217 = vmatpush.msra.mxu2 %v5064_v62  ;;  %v5294_v41 = vpop.f32.mrf.mxu2  ;;  %v5320_v63 = vpop.f32.mrf.mxu0  ;;  %8001 = vst [vmem:[#allocation50_spill] sm:$0xff] %v5370_v50 }
 0x112   :  { %7982 = vst [vmem:[#allocation34_spill] sm:$0xff] %v5294_v41 }
 0x113   :  { %1237 = vmatpush.msra.mxu3 %v5066_v0  ;;  %1218 = vmatpush.msra.mxu2 %v5073_v2  ;;  %v5300_v17 = vpop.f32.mrf.mxu3  ;;  %7989 = vst [vmem:[#allocation48_spill] sm:$0xff] %v5320_v63  ;;  %v5322_v9 = vpop.f32.mrf.mxu1 }
 0x114   :  { %7984 = vst [vmem:[#allocation44_spill] sm:$0xff] %v5300_v17 }
 0x115   :  { %1238 = vmatpush.msra.mxu3 %v5075_v4  ;;  %1219 = vmatpush.msra.mxu2 %v5082_v7  ;;  %7990 = vst [vmem:[#allocation38_spill] sm:$0xff] %v5322_v9 }
 0x117   :  { %1239 = vmatpush.msra.mxu3 %v5084_v60  ;;  %1220 = vmatpush.msra.mxu2 %v7986_v54 }
 0x119   :  { %1240 = vmatpush.msra.mxu3 %v5094_v31  ;;  %1221 = vmatpush.msra.mxu2 %v5102_v6  ;;  %v5310_v55 = vpop.f32.mrf.mxu2  ;;  %v5337_v38 = vpop.f32.mrf.mxu0 }
 0x11a   :  { %7987 = vst [vmem:[#allocation37_spill] sm:$0xff] %v5310_v55 }
 0x11b   :  { %1241 = vmatpush.msra.mxu3 %v5104_v8  ;;  %1222 = vmatpush.msra.mxu2 %v5111_v10  ;;  %v5314_v56 = vpop.f32.mrf.mxu3  ;;  %v5339_v55 = vpop.f32.mrf.mxu1 }
 0x11c   :  { %7988 = vst [vmem:[#allocation47_spill] sm:$0xff] %v5314_v56 }
 0x11d   :  { %1242 = vmatpush.msra.mxu3 %v5113_v14  ;;  %1223 = vmatpush.msra.mxu2 %v5120_v19 }
 0x11f   :  { %1243 = vmatpush.msra.mxu3 %v5122_v5 }
 0x121   :  { %v497_v48 = vpop.f32.mrf.mxu2  ;;  %v436_v20 = vpop.f32.mrf.mxu0 }
 0x122   :  { %v5332_v26 = vadd.f32 %v497_v48, %v5325_v39  ;;  %v437_v45 = vadd.f32 %v436_v20, %v5370_v50 }
 0x123   :  { %v538_v43 = vpop.f32.mrf.mxu3  ;;  %v477_v48 = vpop.f32.mrf.mxu1 }
 0x124   :  { %7991 = vst [vmem:[#allocation41_spill] sm:$0xff] %v5332_v26  ;;  %v5335_v30 = vadd.f32 %v538_v43, %v5329_v32 }
 0x126   :  { %7992 = vst [vmem:[#allocation51_spill] sm:$0xff] %v5335_v30 }
 0x129   :  { %v500_v1 = vpop.f32.mrf.mxu2  ;;  %v778_v27 = vpop.f32.mrf.mxu0 }
 0x12a   :  { %v5342_v29 = vadd.f32 %v500_v1, %v5325_v39  ;;  %v5357_v1 = vperm.slane %v5318_v59, 1 }
 0x12b   :  { %v541_v56 = vpop.f32.mrf.mxu3 }
 0x12c   :  { %7993 = vst [vmem:[#allocation42_spill] sm:$0xff] %v5342_v29  ;;  %v5345_v22 = vadd.f32 %v541_v56, %v5329_v32  ;;  %v252_v56 = vadd.f32 %v5153_v3, %v5354_v35 }
 0x12d   :  { %7998 = vst [vmem:[#allocation49_spill] sm:$0xff] %v5357_v1 }
 0x12e   :  { %7994 = vst [vmem:[#allocation45_spill] sm:$0xff] %v5345_v22  ;;  %v841_v12 = vadd.f32 %v778_v27, %v252_v56 }
 0x130   :  { %v3564_v34 = vmul.f32 -1.442695, %v841_v12 }
 0x131   :  { %v503_v41 = vpop.f32.mrf.mxu2  ;;  %v869_v56 = vpop.f32.mrf.mxu0 }
 0x132   :  { %v5348_v26 = vadd.f32 %v503_v41, %v5325_v39  ;;  %v293_v41 = vadd.f32 %v5157_v18, %v5357_v1  ;;  %3643 = vpow2.f32 %v3564_v34  ;;  %v932_v12 = vadd.f32 %v869_v56, %v437_v45 }
 0x133   :  { %v544_v43 = vpop.f32.mrf.mxu3 }
 0x134   :  { %7995 = vst [vmem:[#allocation54_spill] sm:$0xff] %v5348_v26  ;;  %v5351_v30 = vadd.f32 %v544_v43, %v5329_v32  ;;  %v798_v43 = vpop.f32.mrf.mxu1 }
 0x135   :  { %v842_v26 = vadd.f32 %v798_v43, %v293_v41 }
 0x136   :  { %7996 = vst [vmem:[#allocation55_spill] sm:$0xff] %v5351_v30 }
 0x137   :  { %v3565_v18 = vmul.f32 -1.442695, %v842_v26 }
 0x138   :  { %v3644_v26 = vpop.eup %3643 }
 0x139   :  { %v506_v29 = vpop.f32.mrf.mxu2  ;;  %3645 = vpow2.f32 %v3565_v18  ;;  %v939_v49 = vadd.f32 1.0, %v3644_v26 }
 0x13a   :  { %v5362_v22 = vadd.f32 %v506_v29, %v5325_v39  ;;  %v5376_v29 = vperm.slane %v5318_v59, 5 }
 0x13b   :  { %v547_v17 = vpop.f32.mrf.mxu3  ;;  %vm945_vm1 = vweird.f32 %v939_v49 }
 0x13c   :  { %7999 = vst [vmem:[#allocation58_spill] sm:$0xff] %v5362_v22  ;;  %v5367_v15 = vadd.f32 %v547_v17, %v5329_v32  ;;  %v478_v27 = vadd.f32 %v477_v48, %v5376_v29  ;;  %v889_v41 = vpop.f32.mrf.mxu1  ;;  %v3567_v22 = vmul.f32 -1.442695, %v932_v12 }
 0x13d   :  { %8003 = vst [vmem:[#allocation53_spill] sm:$0xff] %v5376_v29 }
 0x13e   :  { %8000 = vst [vmem:[#allocation59_spill] sm:$0xff] %v5367_v15  ;;  %v933_v43 = vadd.f32 %v889_v41, %v478_v27  ;;  %3647 = vpow2.f32 %v3567_v22 }
 0x140   :  { %v3568_v15 = vmul.f32 -1.442695, %v933_v43 }
 0x141   :  { %v509_v30 = vpop.f32.mrf.mxu2 }
 0x142   :  { %v5373_v3 = vadd.f32 %v509_v30, %v5325_v39  ;;  %3649 = vpow2.f32 %v3568_v15 }
 0x143   :  { %v550_v42 = vpop.f32.mrf.mxu3  ;;  %3651 = vrcp.f32 %v939_v49 }
 0x144   :  { %8002 = vst [vmem:[#allocation52_spill] sm:$0xff] %v5373_v3  ;;  %v5380_v17 = vadd.f32 %v550_v42, %v5329_v32  ;;  %v3646_v42 = vpop.eup %3645 }
 0x145   :  { %v5389_v48 = vadd.f32 1.0, %v3646_v42 }
 0x146   :  { %8004 = vst [vmem:[#allocation56_spill] sm:$0xff] %v5380_v17 }
 0x147   :  { %3653 = vrcp.f32 %v5389_v48  ;;  %vm964_vm3 = vweird.f32 %v5389_v48 }
 0x149   :  { %v512_v30 = vpop.f32.mrf.mxu2 }
 0x14a   :  { %v5384_v57 = vadd.f32 %v512_v30, %v5325_v39 }
 0x14b   :  { %v553_v44 = vpop.f32.mrf.mxu3 }
 0x14c   :  { %8005 = vst [vmem:[#allocation64_spill] sm:$0xff] %v5384_v57  ;;  %v5387_v20 = vadd.f32 %v553_v44, %v5329_v32  ;;  %v3648_v44 = vpop.eup %3647 }
 0x14d   :  { %v3650_v56 = vpop.eup %3649  ;;  %v5398_v12 = vadd.f32 1.0, %v3648_v44 }
 0x14e   :  { %8006 = vst [vmem:[#allocation65_spill] sm:$0xff] %v5387_v20  ;;  %v3652_v41 = vpop.eup %3651  ;;  %v5400_v22 = vadd.f32 1.0, %v3650_v56 }
 0x14f   :  { %v3654_v30 = vpop.eup %3653  ;;  %v941_v26 = vmul.f32 %v3652_v41, %v939_v49  ;;  %3655 = vrcp.f32 %v5398_v12  ;;  %vm946_vm2 = vweird.f32 %v3652_v41  ;;  %vm1008_vm9 = vweird.f32 %v5398_v12 }
 0x150   :  { %v960_v42 = vmul.f32 %v3654_v30, %v5389_v48  ;;  %3657 = vrcp.f32 %v5400_v22  ;;  %vm965_vm4 = vweird.f32 %v3654_v30  ;;  %vm5425_vm5 = vmor %vm945_vm1, %vm946_vm2  ;;  %vm1027_vm11 = vweird.f32 %v5400_v22 }
 0x151   :  { %v515_v34 = vpop.f32.mrf.mxu2  ;;  %v942_v44 = vsub.f32 1.0, %v941_v26  ;;  %v951_v26 = vand.u32 2147483648, %v939_v49  ;;  %vm5431_vm6 = vmor %vm964_vm3, %vm965_vm4 }
 0x152   :  { %v5392_v45 = vadd.f32 %v515_v34, %v5325_v39  ;;  %v5405_v34 = vperm.slane %v5318_v59, 3  ;;  %v961_v47 = vsub.f32 1.0, %v960_v42 }
 0x153   :  { %v556_v18 = vpop.f32.mrf.mxu3  ;;  %v943_v53 = vmul.f32 %v3652_v41, %v942_v44  ;;  %v952_v51 = vor.u32 1.1754944e-38, %v951_v26 }
 0x154   :  { %8007 = vst [vmem:[#allocation57_spill] sm:$0xff] %v5392_v45  ;;  %v5396_v27 = vadd.f32 %v556_v18, %v5329_v32  ;;  %v5409_v18 = vperm.slane %v5318_v59, 2  ;;  %v375_v56 = vadd.f32 %v5186_v28, %v5405_v34  ;;  %v962_v11 = vmul.f32 %v3654_v30, %v961_v47 }
 0x155   :  { %8008 = vst [vmem:[#allocation60_spill] sm:$0xff] %v5405_v34  ;;  %v5413_v46 = vpop.eup %3655  ;;  %v949_v59 = vand.u32 2147483647, %v939_v49  ;;  %v944_v44 = vadd.f32 %v3652_v41, %v943_v53  ;;  %v968_v49 = vand.u32 2147483647, %v5389_v48 }
 0x156   :  { %8009 = vst [vmem:[#allocation61_spill] sm:$0xff] %v5409_v18  ;;  %v5415_v17 = vpop.eup %3657  ;;  %v334_v52 = vadd.f32 %v5178_v24, %v5409_v18  ;;  %v1004_v28 = vmul.f32 %v5413_v46, %v5398_v12  ;;  %v970_v24 = vand.u32 2147483648, %v5389_v48  ;;  %vm1009_vm10 = vweird.f32 %v5413_v46 }
 0x157   :  { %v1023_v20 = vmul.f32 %v5415_v17, %v5400_v22  ;;  %vm950_vm7 = vcmp.eq.f32.partialorder %v949_v59, 8.507059e+37  ;;  %vm969_vm8 = vcmp.eq.f32.partialorder %v968_v49, 8.507059e+37  ;;  %vm1028_vm12 = vweird.f32 %v5415_v17  ;;  %vm5451_vm13 = vmor %vm1008_vm9, %vm1009_vm10 }
 0x158   :  { %v971_v9 = vor.u32 1.1754944e-38, %v970_v24  ;;  %vm5456_vm14 = vmor %vm1027_vm11, %vm1028_vm12 }
 0x159   :  { %v518_v43 = vpop.f32.mrf.mxu2 }
 0x15a   :  { %v519_v63 = vadd.f32 %v518_v43, %v5325_v39  ;;  %v1033_v39 = vand.u32 2147483648, %v5400_v22 }
 0x15b   :  { %v559_v15 = vpop.f32.mrf.mxu3 }
 0x161   :  { %v818_v16 = vpop.f32.mrf.mxu2 }
 0x162   :  { %v843_v57 = vadd.f32 %v818_v16, %v334_v52  ;;  %v963_v52 = vadd.f32 %v3654_v30, %v962_v11  ;;  %v560_v16 = vadd.f32 %v559_v15, %v5329_v32  ;;  %v948_v11 = vsel %vm5425_vm5, %v3652_v41, %v944_v44 }
 0x163   :  { %v838_v3 = vpop.f32.mrf.mxu3  ;;  %v953_v59 = vsel %vm950_vm7, %v952_v51, %v948_v11  ;;  %v1014_v51 = vand.u32 2147483648, %v5398_v12  ;;  %v1031_v41 = vand.u32 2147483647, %v5400_v22 }
 0x164   :  { %v844_v33 = vadd.f32 %v838_v3, %v375_v56  ;;  %v1005_v3 = vsub.f32 1.0, %v1004_v28  ;;  %v1024_v56 = vsub.f32 1.0, %v1023_v20  ;;  %v967_v32 = vsel %vm5431_vm6, %v3654_v30, %v963_v52 }
 0x165   :  { %v972_v45 = vsel %vm969_vm8, %v971_v9, %v967_v32  ;;  %vm1032_vm0 = vcmp.eq.f32.partialorder %v1031_v41, 8.507059e+37 }
 0x166   :  { %v3566_v42 = vmul.f32 -1.442695, %v844_v33  ;;  %v1025_v20 = vmul.f32 %v5415_v17, %v1024_v56  ;;  %v1006_v28 = vmul.f32 %v5413_v46, %v1005_v3  ;;  %v994_v52 = vmul.f32 0.0, %v972_v45 }
 0x168   :  { %3659 = vpow2.f32 %v3566_v42  ;;  %v1007_v43 = vadd.f32 %v5413_v46, %v1006_v28  ;;  %v1026_v44 = vadd.f32 %v5415_v17, %v1025_v20 }
 0x169   :  { %3661 = vtanh.f32 %v843_v57  ;;  %v909_v53 = vpop.f32.mrf.mxu2 }
 0x16a   :  { %v934_v23 = vadd.f32 %v909_v53, %v519_v63  ;;  %v1012_v63 = vand.u32 2147483647, %v5398_v12  ;;  %v1015_v12 = vor.u32 1.1754944e-38, %v1014_v51  ;;  %v1011_v33 = vsel %vm5451_vm13, %v5413_v46, %v1007_v43 }
 0x16b   :  { %v929_v42 = vpop.f32.mrf.mxu3  ;;  %v1030_v3 = vsel %vm5456_vm14, %v5415_v17, %v1026_v44 }
 0x16c   :  { %v935_v48 = vadd.f32 %v929_v42, %v560_v16  ;;  %v1034_v16 = vor.u32 1.1754944e-38, %v1033_v39  ;;  %vm1013_vm15 = vcmp.eq.f32.partialorder %v1012_v63, 8.507059e+37 }
 0x16d   :  { %v1016_v11 = vsel %vm1013_vm15, %v1015_v12, %v1011_v33  ;;  %v5484_v12 = vld [vmem:[#allocation10 + $0x1f0] sm:$0xff] }
 0x16e   :  { %v3660_v15 = vpop.eup %3659  ;;  %v3569_v57 = vmul.f32 -1.442695, %v935_v48  ;;  %v1035_v48 = vsel %vm1032_vm0, %v1034_v16, %v1030_v3  ;;  %v5490_v3 = vld [vmem:[#allocation10 + $0x1c0] sm:$0xff] }
 0x16f   :  { %v978_v26 = vadd.f32 1.0, %v3660_v15  ;;  %v3662_v24 = vpop.eup %3661 }
 0x170   :  { %3663 = vpow2.f32 %v3569_v57  ;;  %v995_v9 = vmul.f32 %v3662_v24, %v953_v59  ;;  %v1057_v59 = vmul.f32 0.0, %v1035_v48 }
 0x171   :  { %3665 = vrcp.f32 %v978_v26  ;;  %v990_v32 = vand.u32 2147483648, %v978_v26  ;;  %v988_v20 = vand.u32 2147483647, %v978_v26  ;;  %vm984_vm2 = vweird.f32 %v978_v26 }
 0x172   :  { %3667 = vtanh.f32 %v934_v23  ;;  %v5460_v22 = vadd.f32 %v995_v9, %v994_v52  ;;  %v5478_v52 = vld [vmem:[#allocation10 + $0x1e0] sm:$0xff] }
 0x173   :  { %v991_v17 = vor.u32 1.1754944e-38, %v990_v32  ;;  %vm989_vm4 = vcmp.eq.f32.partialorder %v988_v20, 8.507059e+37  ;;  %v5504_v32 = vld [vmem:[#allocation10 + $0x1a0] sm:$0xff]  ;;  %v5513_v20 = vld [vmem:[#allocation10 + $0x1b8] sm:$0xff] }
 0x176   :  { %v3664_v49 = vpop.eup %3663 }
 0x177   :  { %v3666_v23 = vpop.eup %3665  ;;  %v1041_v56 = vadd.f32 1.0, %v3664_v49  ;;  %v5481_v49 = vld [vmem:[#allocation10 + $0x1e8] sm:$0xff] }
 0x178   :  { %v3668_v53 = vpop.eup %3667  ;;  %v980_v42 = vmul.f32 %v3666_v23, %v978_v26  ;;  %vm985_vm1 = vweird.f32 %v3666_v23 }
 0x179   :  { %3669 = vrcp.f32 %v1041_v56  ;;  %v1058_v15 = vmul.f32 %v3668_v53, %v1016_v11  ;;  %vm986_vm3 = vmor %vm984_vm2, %vm985_vm1  ;;  %v1053_v30 = vand.u32 2147483648, %v1041_v56  ;;  %v1051_v26 = vand.u32 2147483647, %v1041_v56  ;;  %v5499_v11 = vld [vmem:[#allocation10 + $0x1d8] sm:$0xff] }
 0x17a   :  { %v981_v45 = vsub.f32 1.0, %v980_v42  ;;  %3671 = vtanh.f32 %v5460_v22  ;;  %vm1047_vm6 = vweird.f32 %v1041_v56 }
 0x17b   :  { %v5469_v24 = vadd.f32 %v1058_v15, %v1057_v59  ;;  %v1054_v16 = vor.u32 1.1754944e-38, %v1053_v30  ;;  %vm1052_vm8 = vcmp.eq.f32.partialorder %v1051_v26, 8.507059e+37  ;;  %v5507_v15 = vld [vmem:[#allocation10 + $0x1a8] sm:$0xff]  ;;  %v5520_v59 = vld [vmem:[#allocation10 + $0x180] sm:$0xff]  ;;  %v5553_v26 = vld [vmem:[#allocation10 + $0x158] sm:$0xff] }
 0x17c   :  { %v982_v57 = vmul.f32 %v3666_v23, %v981_v45  ;;  %v5496_v45 = vld [vmem:[#allocation10 + $0x1d0] sm:$0xff]  ;;  %v5547_v30 = vld [vmem:[#allocation10 + $0x148] sm:$0xff] }
 0x17d   :  { %3673 = vtanh.f32 %v5469_v24 }
 0x17e   :  { %v983_v46 = vadd.f32 %v3666_v23, %v982_v57  ;;  %v5510_v57 = vld [vmem:[#allocation10 + $0x1b0] sm:$0xff] }
 0x17f   :  { %v3670_v28 = vpop.eup %3669 }
 0x180   :  { %v1043_v39 = vmul.f32 %v3670_v28, %v1041_v56  ;;  %v987_v63 = vsel %vm986_vm3, %v3666_v23, %v983_v46  ;;  %v3672_v51 = vpop.eup %3671  ;;  %vm1048_vm5 = vweird.f32 %v3670_v28  ;;  %v5487_v23 = vld [vmem:[#allocation10 + $0x1f8] sm:$0xff]  ;;  %v5493_v56 = vld [vmem:[#allocation10 + $0x1c8] sm:$0xff] }
 0x181   :  { %v992_v41 = vsel %vm989_vm4, %v991_v17, %v987_v63  ;;  %vm1049_vm7 = vmor %vm1047_vm6, %vm1048_vm5  ;;  %v5523_v46 = vld [vmem:[#allocation10 + $0x188] sm:$0xff]  ;;  %v5529_v17 = vld [vmem:[#allocation10 + $0x198] sm:$0xff] }
 0x182   :  { %v1044_v9 = vsub.f32 1.0, %v1043_v39  ;;  %v5471_v43 = vmul.f32 %v3672_v51, %v992_v41  ;;  %v5532_v39 = vld [vmem:[#allocation10 + $0x160] sm:$0xff]  ;;  %v5535_v63 = vld [vmem:[#allocation10 + $0x168] sm:$0xff]  ;;  %v5538_v51 = vld [vmem:[#allocation10 + $0x170] sm:$0xff] }
 0x183   :  { %v3674_v53 = vpop.eup %3673  ;;  %v5541_v41 = vld [vmem:[#allocation10 + $0x178] sm:$0xff] }
 0x184   :  { %8018 = vst [vmem:[#allocation62_spill] sm:$0xff] %v5471_v43  ;;  %v1045_v44 = vmul.f32 %v3670_v28, %v1044_v9  ;;  %1093 = vmatmul.f32.vlgmr.msra.gmra.mxu0 %v5471_v43  ;;  %1113 = vmatmul.f32.vlgmr.msra.gmra.mxu1 %v5471_v43  ;;  %v5544_v9 = vld [vmem:[#allocation10 + $0x140] sm:$0xff] }
 0x185   :  { %1133 = vmatmul.f32.vlgmr.msrb.gmra.mxu2 %v5471_v43  ;;  %1153 = vmatmul.f32.vlgmr.msrb.gmra.mxu3 %v5471_v43  ;;  %v5574_v43 = vld [vmem:[#allocation10 + $0x110] sm:$0xff] }
 0x186   :  { %v1046_v47 = vadd.f32 %v3670_v28, %v1045_v44  ;;  %1393 = vmatpush.msra.mxu0 %v5478_v52  ;;  %1413 = vmatpush.msra.mxu1 %v5481_v49  ;;  %v5550_v44 = vld [vmem:[#allocation10 + $0x150] sm:$0xff]  ;;  %8025 = vst [vmem:[#allocation77_spill] sm:$0xff] %v5574_v43 }
 0x187   :  { %1433 = vmatpush.msrb.mxu2 %v5484_v12  ;;  %1453 = vmatpush.msrb.mxu3 %v5487_v23 }
 0x188   :  { %v1050_v33 = vsel %vm1049_vm7, %v3670_v28, %v1046_v47  ;;  %1394 = vmatpush.msra.mxu0 %v5490_v3  ;;  %1414 = vmatpush.msra.mxu1 %v5493_v56  ;;  %v5526_v28 = vld [vmem:[#allocation10 + $0x190] sm:$0xff]  ;;  %v5556_v47 = vld [vmem:[#allocation10 + $0x120] sm:$0xff] }
 0x189   :  { %v1055_v42 = vsel %vm1052_vm8, %v1054_v16, %v1050_v33  ;;  %1434 = vmatpush.msrb.mxu2 %v5496_v45  ;;  %1454 = vmatpush.msrb.mxu3 %v5499_v11  ;;  %v5559_v16 = vld [vmem:[#allocation10 + $0x128] sm:$0xff]  ;;  %v5562_v33 = vld [vmem:[#allocation10 + $0x130] sm:$0xff] }
 0x18a   :  { %v5502_v48 = vmul.f32 %v3674_v53, %v1055_v42  ;;  %1395 = vmatpush.msra.mxu0 %v5504_v32  ;;  %1415 = vmatpush.msra.mxu1 %v5507_v15  ;;  %8020 = vst [vmem:[#allocation66_spill] sm:$0xff] %v5559_v16  ;;  %v5565_v53 = vld [vmem:[#allocation10 + $0x138] sm:$0xff]  ;;  %v5568_v42 = vld [vmem:[#allocation10 + $0x100] sm:$0xff] }
 0x18b   :  { %1435 = vmatpush.msrb.mxu2 %v5510_v57  ;;  %1455 = vmatpush.msrb.mxu3 %v5513_v20  ;;  %8021 = vst [vmem:[#allocation68_spill] sm:$0xff] %v5562_v33 }
 0x18c   :  { %8019 = vst [vmem:[#allocation63_spill] sm:$0xff] %v5502_v48  ;;  %1184 = vmatmul.f32.vlgmr.msrb.gmra.mxu0 %v5502_v48  ;;  %1204 = vmatmul.f32.vlgmr.msrb.gmra.mxu1 %v5502_v48 }
 0x18d   :  { %1224 = vmatmul.f32.vlgmr.msra.gmra.mxu2 %v5502_v48  ;;  %1244 = vmatmul.f32.vlgmr.msra.gmra.mxu3 %v5502_v48  ;;  %8022 = vst [vmem:[#allocation67_spill] sm:$0xff] %v5565_v53  ;;  %v5571_v48 = vld [vmem:[#allocation10 + $0x108] sm:$0xff] }
 0x18e   :  { %1396 = vmatpush.msra.mxu0 %v5520_v59  ;;  %1416 = vmatpush.msra.mxu1 %v5523_v46  ;;  %8023 = vst [vmem:[#allocation69_spill] sm:$0xff] %v5568_v42 }
 0x18f   :  { %1436 = vmatpush.msrb.mxu2 %v5526_v28  ;;  %1456 = vmatpush.msrb.mxu3 %v5529_v17  ;;  %8024 = vst [vmem:[#allocation74_spill] sm:$0xff] %v5571_v48 }
 0x190   :  { %1397 = vmatpush.msra.mxu0 %v5532_v39  ;;  %1417 = vmatpush.msra.mxu1 %v5535_v63 }
 0x191   :  { %1437 = vmatpush.msrb.mxu2 %v5538_v51  ;;  %1457 = vmatpush.msrb.mxu3 %v5541_v41 }
 0x192   :  { %1398 = vmatpush.msra.mxu0 %v5544_v9  ;;  %1418 = vmatpush.msra.mxu1 %v5547_v30 }
 0x193   :  { %1438 = vmatpush.msrb.mxu2 %v5550_v44  ;;  %1458 = vmatpush.msrb.mxu3 %v5553_v26 }
 0x194   :  { %1399 = vmatpush.msra.mxu0 %v5556_v47  ;;  %1419 = vmatpush.msra.mxu1 %v5559_v16  ;;  %v5577_v16 = vld [vmem:[#allocation10 + $0x118] sm:$0xff] }
 0x195   :  { %1439 = vmatpush.msrb.mxu2 %v5562_v33  ;;  %1459 = vmatpush.msrb.mxu3 %v5565_v53  ;;  %8026 = vst [vmem:[#allocation84_spill] sm:$0xff] %v5577_v16  ;;  %v5580_v33 = vld [vmem:[#allocation10 + $0xe0] sm:$0xff]  ;;  %v5583_v53 = vld [vmem:[#allocation10 + $0xe8] sm:$0xff] }
 0x196   :  { %1400 = vmatpush.msra.mxu0 %v5568_v42  ;;  %1420 = vmatpush.msra.mxu1 %v5571_v48  ;;  %8027 = vst [vmem:[#allocation85_spill] sm:$0xff] %v5580_v33  ;;  %v5586_v42 = vld [vmem:[#allocation10 + $0xf0] sm:$0xff]  ;;  %v5589_v48 = vld [vmem:[#allocation10 + $0xf8] sm:$0xff] }
 0x197   :  { %1440 = vmatpush.msrb.mxu2 %v5574_v43  ;;  %1460 = vmatpush.msrb.mxu3 %v5577_v16  ;;  %8028 = vst [vmem:[#allocation86_spill] sm:$0xff] %v5583_v53  ;;  %v5592_v43 = vld [vmem:[#allocation10 + $0xc0] sm:$0xff]  ;;  %v5595_v16 = vld [vmem:[#allocation10 + $0xc8] sm:$0xff] }
 0x198   :  { %1401 = vmatpush.msra.mxu0 %v5580_v33  ;;  %1421 = vmatpush.msra.mxu1 %v5583_v53  ;;  %8029 = vst [vmem:[#allocation87_spill] sm:$0xff] %v5586_v42  ;;  %v5598_v33 = vld [vmem:[#allocation10 + $0xd0] sm:$0xff]  ;;  %v5601_v53 = vld [vmem:[#allocation10 + $0xd8] sm:$0xff] }
 0x199   :  { %1441 = vmatpush.msrb.mxu2 %v5586_v42  ;;  %8030 = vst [vmem:[#allocation88_spill] sm:$0xff] %v5589_v48  ;;  %1461 = vmatpush.msrb.mxu3 %v5589_v48  ;;  %v5604_v42 = vld [vmem:[#allocation10 + $0xa0] sm:$0xff]  ;;  %v5607_v48 = vld [vmem:[#allocation10 + $0xa8] sm:$0xff] }
 0x19a   :  { %8031 = vst [vmem:[#allocation89_spill] sm:$0xff] %v5592_v43  ;;  %1402 = vmatpush.msra.mxu0 %v5592_v43  ;;  %1422 = vmatpush.msra.mxu1 %v5595_v16  ;;  %v5610_v43 = vld [vmem:[#allocation10 + $0xb0] sm:$0xff] }
 0x19b   :  { %8032 = vst [vmem:[#allocation90_spill] sm:$0xff] %v5595_v16  ;;  %1442 = vmatpush.msrb.mxu2 %v5598_v33  ;;  %1462 = vmatpush.msrb.mxu3 %v5601_v53  ;;  %v5613_v16 = vld [vmem:[#allocation10 + $0xb8] sm:$0xff] }
 0x19c   :  { %8033 = vst [vmem:[#allocation91_spill] sm:$0xff] %v5598_v33  ;;  %1403 = vmatpush.msra.mxu0 %v5604_v42  ;;  %1423 = vmatpush.msra.mxu1 %v5607_v48  ;;  %v5616_v33 = vld [vmem:[#allocation10 + $0x80] sm:$0xff] }
 0x19d   :  { %8034 = vst [vmem:[#allocation92_spill] sm:$0xff] %v5601_v53  ;;  %1443 = vmatpush.msrb.mxu2 %v5610_v43  ;;  %1463 = vmatpush.msrb.mxu3 %v5613_v16  ;;  %v5619_v53 = vld [vmem:[#allocation10 + $0x88] sm:$0xff] }
 0x19e   :  { %8035 = vst [vmem:[#allocation93_spill] sm:$0xff] %v5604_v42  ;;  %1404 = vmatpush.msra.mxu0 %v5616_v33  ;;  %1424 = vmatpush.msra.mxu1 %v5619_v53  ;;  %v5622_v42 = vld [vmem:[#allocation10 + $0x90] sm:$0xff] }
 0x19f   :  { %8036 = vst [vmem:[#allocation94_spill] sm:$0xff] %v5607_v48  ;;  %1444 = vmatpush.msrb.mxu2 %v5622_v42  ;;  %v5625_v48 = vld [vmem:[#allocation10 + $0x98] sm:$0xff] }
 0x1a0   :  { %8037 = vst [vmem:[#allocation95_spill] sm:$0xff] %v5610_v43  ;;  %1464 = vmatpush.msrb.mxu3 %v5625_v48  ;;  %v5628_v43 = vld [vmem:[#allocation10 + $0x60] sm:$0xff] }
 0x1a1   :  { %8038 = vst [vmem:[#allocation96_spill] sm:$0xff] %v5613_v16  ;;  %1405 = vmatpush.msra.mxu0 %v5628_v43  ;;  %v5631_v16 = vld [vmem:[#allocation10 + $0x68] sm:$0xff] }
 0x1a2   :  { %8039 = vst [vmem:[#allocation97_spill] sm:$0xff] %v5616_v33  ;;  %1425 = vmatpush.msra.mxu1 %v5631_v16  ;;  %v5634_v33 = vld [vmem:[#allocation10 + $0x70] sm:$0xff] }
 0x1a3   :  { %8040 = vst [vmem:[#allocation98_spill] sm:$0xff] %v5619_v53  ;;  %1445 = vmatpush.msrb.mxu2 %v5634_v33  ;;  %v5637_v53 = vld [vmem:[#allocation10 + $0x78] sm:$0xff] }
 0x1a4   :  { %8041 = vst [vmem:[#allocation99_spill] sm:$0xff] %v5622_v42  ;;  %1465 = vmatpush.msrb.mxu3 %v5637_v53  ;;  %v5640_v42 = vld [vmem:[#allocation10 + $0x40] sm:$0xff] }
 0x1a5   :  { %8042 = vst [vmem:[#allocation100_spill] sm:$0xff] %v5625_v48  ;;  %1406 = vmatpush.msra.mxu0 %v5640_v42  ;;  %v5643_v48 = vld [vmem:[#allocation10 + $0x48] sm:$0xff] }
 0x1a6   :  { %8043 = vst [vmem:[#allocation101_spill] sm:$0xff] %v5628_v43  ;;  %1426 = vmatpush.msra.mxu1 %v5643_v48  ;;  %v5646_v43 = vld [vmem:[#allocation10 + $0x50] sm:$0xff] }
 0x1a7   :  { %8044 = vst [vmem:[#allocation102_spill] sm:$0xff] %v5631_v16  ;;  %1446 = vmatpush.msrb.mxu2 %v5646_v43  ;;  %v5649_v16 = vld [vmem:[#allocation10 + $0x58] sm:$0xff] }
 0x1a8   :  { %8045 = vst [vmem:[#allocation103_spill] sm:$0xff] %v5634_v33  ;;  %1466 = vmatpush.msrb.mxu3 %v5649_v16  ;;  %v5652_v33 = vld [vmem:[#allocation10 + $0x20] sm:$0xff] }
 0x1a9   :  { %8046 = vst [vmem:[#allocation104_spill] sm:$0xff] %v5637_v53  ;;  %1407 = vmatpush.msra.mxu0 %v5652_v33  ;;  %v5655_v53 = vld [vmem:[#allocation10 + $0x28] sm:$0xff] }
 0x1aa   :  { %8047 = vst [vmem:[#allocation105_spill] sm:$0xff] %v5640_v42  ;;  %1427 = vmatpush.msra.mxu1 %v5655_v53  ;;  %v5658_v42 = vld [vmem:[#allocation10 + $0x30] sm:$0xff] }
 0x1ab   :  { %8048 = vst [vmem:[#allocation106_spill] sm:$0xff] %v5643_v48  ;;  %1447 = vmatpush.msrb.mxu2 %v5658_v42  ;;  %v5661_v48 = vld [vmem:[#allocation10 + $0x38] sm:$0xff] }
 0x1ac   :  { %8049 = vst [vmem:[#allocation107_spill] sm:$0xff] %v5646_v43  ;;  %1467 = vmatpush.msrb.mxu3 %v5661_v48  ;;  %v5664_v43 = vld [vmem:[#allocation10] sm:$0xff] }
 0x1ad   :  { %8050 = vst [vmem:[#allocation108_spill] sm:$0xff] %v5649_v16  ;;  %1408 = vmatpush.msra.mxu0 %v5664_v43  ;;  %v5667_v16 = vld [vmem:[#allocation10 + $0x8] sm:$0xff] }
 0x1ae   :  { %8051 = vst [vmem:[#allocation109_spill] sm:$0xff] %v5652_v33  ;;  %1428 = vmatpush.msra.mxu1 %v5667_v16  ;;  %v5670_v33 = vld [vmem:[#allocation10 + $0x10] sm:$0xff] }
 0x1af   :  { %8052 = vst [vmem:[#allocation110_spill] sm:$0xff] %v5655_v53  ;;  %1448 = vmatpush.msrb.mxu2 %v5670_v33  ;;  %v5673_v53 = vld [vmem:[#allocation10 + $0x18] sm:$0xff] }
 0x1b0   :  { %8053 = vst [vmem:[#allocation111_spill] sm:$0xff] %v5658_v42  ;;  %1468 = vmatpush.msrb.mxu3 %v5673_v53  ;;  %v5676_v42 = vld [vmem:[#allocation12 + $0x1e0] sm:$0xff] }
 0x1b1   :  { %8054 = vst [vmem:[#allocation112_spill] sm:$0xff] %v5661_v48  ;;  %1484 = vmatpush.msrb.mxu0 %v5676_v42  ;;  %v5679_v48 = vld [vmem:[#allocation12 + $0x1e8] sm:$0xff] }
 0x1b2   :  { %8055 = vst [vmem:[#allocation113_spill] sm:$0xff] %v5664_v43  ;;  %1504 = vmatpush.msrb.mxu1 %v5679_v48  ;;  %v5682_v43 = vld [vmem:[#allocation12 + $0x1f0] sm:$0xff] }
 0x1b3   :  { %8056 = vst [vmem:[#allocation114_spill] sm:$0xff] %v5667_v16  ;;  %1524 = vmatpush.msra.mxu2 %v5682_v43  ;;  %v5685_v16 = vld [vmem:[#allocation12 + $0x1f8] sm:$0xff] }
 0x1b4   :  { %8057 = vst [vmem:[#allocation115_spill] sm:$0xff] %v5670_v33  ;;  %1544 = vmatpush.msra.mxu3 %v5685_v16  ;;  %v5688_v33 = vld [vmem:[#allocation12 + $0x1c0] sm:$0xff] }
 0x1b5   :  { %8058 = vst [vmem:[#allocation116_spill] sm:$0xff] %v5673_v53  ;;  %1485 = vmatpush.msrb.mxu0 %v5688_v33  ;;  %v5691_v53 = vld [vmem:[#allocation12 + $0x1c8] sm:$0xff] }
 0x1b6   :  { %8059 = vst [vmem:[#allocation117_spill] sm:$0xff] %v5676_v42  ;;  %1505 = vmatpush.msrb.mxu1 %v5691_v53  ;;  %v5694_v42 = vld [vmem:[#allocation12 + $0x1d0] sm:$0xff] }
 0x1b7   :  { %8060 = vst [vmem:[#allocation118_spill] sm:$0xff] %v5679_v48  ;;  %1525 = vmatpush.msra.mxu2 %v5694_v42  ;;  %v5697_v48 = vld [vmem:[#allocation12 + $0x1d8] sm:$0xff] }
 0x1b8   :  { %8061 = vst [vmem:[#allocation119_spill] sm:$0xff] %v5682_v43  ;;  %1545 = vmatpush.msra.mxu3 %v5697_v48  ;;  %v5700_v43 = vld [vmem:[#allocation12 + $0x1a0] sm:$0xff] }
 0x1b9   :  { %8062 = vst [vmem:[#allocation120_spill] sm:$0xff] %v5685_v16  ;;  %1486 = vmatpush.msrb.mxu0 %v5700_v43  ;;  %v5703_v16 = vld [vmem:[#allocation12 + $0x1a8] sm:$0xff] }
 0x1ba   :  { %8063 = vst [vmem:[#allocation121_spill] sm:$0xff] %v5688_v33  ;;  %1506 = vmatpush.msrb.mxu1 %v5703_v16  ;;  %v5706_v33 = vld [vmem:[#allocation12 + $0x1b0] sm:$0xff] }
 0x1bb   :  { %8064 = vst [vmem:[#allocation122_spill] sm:$0xff] %v5691_v53  ;;  %1526 = vmatpush.msra.mxu2 %v5706_v33  ;;  %v5709_v53 = vld [vmem:[#allocation12 + $0x1b8] sm:$0xff] }
 0x1bc   :  { %8065 = vst [vmem:[#allocation123_spill] sm:$0xff] %v5694_v42  ;;  %1546 = vmatpush.msra.mxu3 %v5709_v53  ;;  %v5712_v42 = vld [vmem:[#allocation12 + $0x180] sm:$0xff] }
 0x1bd   :  { %8066 = vst [vmem:[#allocation124_spill] sm:$0xff] %v5697_v48  ;;  %1487 = vmatpush.msrb.mxu0 %v5712_v42  ;;  %v5715_v48 = vld [vmem:[#allocation12 + $0x188] sm:$0xff] }
 0x1be   :  { %8067 = vst [vmem:[#allocation125_spill] sm:$0xff] %v5700_v43  ;;  %1507 = vmatpush.msrb.mxu1 %v5715_v48  ;;  %v5718_v43 = vld [vmem:[#allocation12 + $0x190] sm:$0xff] }
 0x1bf   :  { %8068 = vst [vmem:[#allocation126_spill] sm:$0xff] %v5703_v16  ;;  %1527 = vmatpush.msra.mxu2 %v5718_v43  ;;  %v5721_v16 = vld [vmem:[#allocation12 + $0x198] sm:$0xff] }
 0x1c0   :  { %8069 = vst [vmem:[#allocation127_spill] sm:$0xff] %v5706_v33  ;;  %1547 = vmatpush.msra.mxu3 %v5721_v16  ;;  %v5724_v33 = vld [vmem:[#allocation12 + $0x160] sm:$0xff] }
 0x1c1   :  { %8070 = vst [vmem:[#allocation128_spill] sm:$0xff] %v5709_v53  ;;  %1488 = vmatpush.msrb.mxu0 %v5724_v33  ;;  %v5727_v53 = vld [vmem:[#allocation12 + $0x168] sm:$0xff] }
 0x1c2   :  { %8071 = vst [vmem:[#allocation129_spill] sm:$0xff] %v5712_v42  ;;  %1508 = vmatpush.msrb.mxu1 %v5727_v53  ;;  %v5730_v42 = vld [vmem:[#allocation12 + $0x170] sm:$0xff] }
 0x1c3   :  { %8072 = vst [vmem:[#allocation130_spill] sm:$0xff] %v5715_v48  ;;  %1528 = vmatpush.msra.mxu2 %v5730_v42  ;;  %v5733_v48 = vld [vmem:[#allocation12 + $0x178] sm:$0xff] }
 0x1c4   :  { %8073 = vst [vmem:[#allocation131_spill] sm:$0xff] %v5718_v43  ;;  %1548 = vmatpush.msra.mxu3 %v5733_v48  ;;  %v5736_v43 = vld [vmem:[#allocation12 + $0x140] sm:$0xff] }
 0x1c5   :  { %8074 = vst [vmem:[#allocation132_spill] sm:$0xff] %v5721_v16  ;;  %1489 = vmatpush.msrb.mxu0 %v5736_v43  ;;  %v5739_v16 = vld [vmem:[#allocation12 + $0x148] sm:$0xff] }
 0x1c6   :  { %8075 = vst [vmem:[#allocation133_spill] sm:$0xff] %v5724_v33  ;;  %1509 = vmatpush.msrb.mxu1 %v5739_v16  ;;  %v5742_v33 = vld [vmem:[#allocation12 + $0x150] sm:$0xff] }
 0x1c7   :  { %8076 = vst [vmem:[#allocation134_spill] sm:$0xff] %v5727_v53  ;;  %1529 = vmatpush.msra.mxu2 %v5742_v33  ;;  %v5745_v53 = vld [vmem:[#allocation12 + $0x158] sm:$0xff] }
 0x1c8   :  { %8077 = vst [vmem:[#allocation135_spill] sm:$0xff] %v5730_v42  ;;  %1549 = vmatpush.msra.mxu3 %v5745_v53  ;;  %v5748_v42 = vld [vmem:[#allocation12 + $0x120] sm:$0xff] }
 0x1c9   :  { %8078 = vst [vmem:[#allocation136_spill] sm:$0xff] %v5733_v48  ;;  %1490 = vmatpush.msrb.mxu0 %v5748_v42  ;;  %v5751_v48 = vld [vmem:[#allocation12 + $0x128] sm:$0xff] }
 0x1ca   :  { %8079 = vst [vmem:[#allocation137_spill] sm:$0xff] %v5736_v43  ;;  %1510 = vmatpush.msrb.mxu1 %v5751_v48  ;;  %v5754_v43 = vld [vmem:[#allocation12 + $0x130] sm:$0xff] }
 0x1cb   :  { %8080 = vst [vmem:[#allocation138_spill] sm:$0xff] %v5739_v16  ;;  %1530 = vmatpush.msra.mxu2 %v5754_v43  ;;  %v5757_v16 = vld [vmem:[#allocation12 + $0x138] sm:$0xff] }
 0x1cc   :  { %8081 = vst [vmem:[#allocation139_spill] sm:$0xff] %v5742_v33  ;;  %1550 = vmatpush.msra.mxu3 %v5757_v16  ;;  %v5760_v33 = vld [vmem:[#allocation12 + $0x100] sm:$0xff] }
 0x1cd   :  { %8082 = vst [vmem:[#allocation140_spill] sm:$0xff] %v5745_v53  ;;  %1491 = vmatpush.msrb.mxu0 %v5760_v33  ;;  %v5763_v53 = vld [vmem:[#allocation12 + $0x108] sm:$0xff]  ;;  %1531 = vmatpush.msra.mxu2 %v5044_v61 }
 0x1ce   :  { %8083 = vst [vmem:[#allocation141_spill] sm:$0xff] %v5751_v48  ;;  %1511 = vmatpush.msrb.mxu1 %v5763_v53  ;;  %1551 = vmatpush.msra.mxu3 %v5046_v36  ;;  %v5768_v48 = vld [vmem:[#allocation12 + $0xe0] sm:$0xff]  ;;  %v5787_v61 = vld [vmem:[#allocation12 + $0xa8] sm:$0xff] }
 0x1cf   :  { %8084 = vst [vmem:[#allocation142_spill] sm:$0xff] %v5754_v43  ;;  %1492 = vmatpush.msrb.mxu0 %v5768_v48  ;;  %v5771_v43 = vld [vmem:[#allocation12 + $0xe8] sm:$0xff]  ;;  %1532 = vmatpush.msra.mxu2 %v7981_v40  ;;  %v5784_v36 = vld [vmem:[#allocation12 + $0xa0] sm:$0xff] }
 0x1d0   :  { %8085 = vst [vmem:[#allocation143_spill] sm:$0xff] %v5760_v33  ;;  %1512 = vmatpush.msrb.mxu1 %v5771_v43  ;;  %1552 = vmatpush.msra.mxu3 %v5056_v21  ;;  %v5776_v33 = vld [vmem:[#allocation12 + $0xc0] sm:$0xff]  ;;  %v5795_v40 = vld [vmem:[#allocation12 + $0x88] sm:$0xff] }
 0x1d1   :  { %8086 = vst [vmem:[#allocation144_spill] sm:$0xff] %v5763_v53  ;;  %1493 = vmatpush.msrb.mxu0 %v5776_v33  ;;  %v5779_v53 = vld [vmem:[#allocation12 + $0xc8] sm:$0xff]  ;;  %1533 = vmatpush.msra.mxu2 %v5064_v62  ;;  %v5792_v21 = vld [vmem:[#allocation12 + $0x80] sm:$0xff] }
 0x1d2   :  { %1513 = vmatpush.msrb.mxu1 %v5779_v53  ;;  %1553 = vmatpush.msra.mxu3 %v5066_v0  ;;  %8087 = vst [vmem:[#allocation145_spill] sm:$0xff] %v5795_v40  ;;  %v5800_v62 = vld [vmem:[#allocation12 + $0x60] sm:$0xff]  ;;  %v5803_v0 = vld [vmem:[#allocation12 + $0x68] sm:$0xff] }
 0x1d3   :  { %1494 = vmatpush.msrb.mxu0 %v5784_v36  ;;  %1534 = vmatpush.msra.mxu2 %v5073_v2  ;;  %8088 = vst [vmem:[#allocation146_spill] sm:$0xff] %v5800_v62  ;;  %v5808_v2 = vld [vmem:[#allocation12 + $0x40] sm:$0xff] }
 0x1d4   :  { %1514 = vmatpush.msrb.mxu1 %v5787_v61  ;;  %1554 = vmatpush.msra.mxu3 %v5075_v4  ;;  %8089 = vst [vmem:[#allocation147_spill] sm:$0xff] %v5803_v0  ;;  %v5811_v4 = vld [vmem:[#allocation12 + $0x48] sm:$0xff] }
 0x1d5   :  { %1495 = vmatpush.msrb.mxu0 %v5792_v21  ;;  %1535 = vmatpush.msra.mxu2 %v5082_v7  ;;  %8090 = vst [vmem:[#allocation148_spill] sm:$0xff] %v5808_v2  ;;  %v5819_v7 = vld [vmem:[#allocation12 + $0x28] sm:$0xff] }
 0x1d6   :  { %1515 = vmatpush.msrb.mxu1 %v5795_v40  ;;  %1555 = vmatpush.msra.mxu3 %v5084_v60  ;;  %8091 = vst [vmem:[#allocation149_spill] sm:$0xff] %v5811_v4  ;;  %v5816_v60 = vld [vmem:[#allocation12 + $0x20] sm:$0xff] }
 0x1d7   :  { %1496 = vmatpush.msrb.mxu0 %v5800_v62  ;;  %1536 = vmatpush.msra.mxu2 %v7986_v54  ;;  %8092 = vst [vmem:[#allocation150_spill] sm:$0xff] %v5816_v60  ;;  %v5827_v54 = vld [vmem:[#allocation12 + $0x8] sm:$0xff] }
 0x1d8   :  { %1516 = vmatpush.msrb.mxu1 %v5803_v0  ;;  %1556 = vmatpush.msra.mxu3 %v5094_v31  ;;  %8093 = vst [vmem:[#allocation151_spill] sm:$0xff] %v5819_v7  ;;  %v5824_v31 = vld [vmem:[#allocation12] sm:$0xff] }
 0x1d9   :  { %1497 = vmatpush.msrb.mxu0 %v5808_v2  ;;  %1537 = vmatpush.msra.mxu2 %v5102_v6  ;;  %8094 = vst [vmem:[#allocation152_spill] sm:$0xff] %v5824_v31  ;;  %v255_v6 = vadd.f32 %v5176_v13, %v5354_v35 }
 0x1da   :  { %1517 = vmatpush.msrb.mxu1 %v5811_v4  ;;  %1557 = vmatpush.msra.mxu3 %v5104_v8  ;;  %8095 = vst [vmem:[#allocation153_spill] sm:$0xff] %v5827_v54  ;;  %v296_v8 = vadd.f32 %v5182_v25, %v5357_v1 }
 0x1db   :  { %1498 = vmatpush.msrb.mxu0 %v5816_v60  ;;  %1538 = vmatpush.msra.mxu2 %v5111_v10 }
 0x1dc   :  { %1518 = vmatpush.msrb.mxu1 %v5819_v7  ;;  %1558 = vmatpush.msra.mxu3 %v5113_v14 }
 0x1dd   :  { %1499 = vmatpush.msrb.mxu0 %v5824_v31  ;;  %1539 = vmatpush.msra.mxu2 %v5120_v19  ;;  %v475_v19 = vadd.f32 %v5339_v55, %v5376_v29 }
 0x1de   :  { %1519 = vmatpush.msrb.mxu1 %v5827_v54  ;;  %1559 = vmatpush.msra.mxu3 %v5122_v5  ;;  %v378_v54 = vadd.f32 %v5208_v37, %v5405_v34  ;;  %v434_v5 = vadd.f32 %v5337_v38, %v5370_v50  ;;  %v337_v38 = vadd.f32 %v5200_v58, %v5409_v18 }
 0x201   :  { %v1094_v10 = vpop.f32.mrf.mxu0  ;;  %v1114_v14 = vpop.f32.mrf.mxu1 }
 0x202   :  { %v1157_v7 = vadd.f32 %v1094_v10, %v255_v6  ;;  %v1158_v60 = vadd.f32 %v1114_v14, %v296_v8 }
 0x204   :  { %v3570_v4 = vmul.f32 -1.442695, %v1157_v7  ;;  %v3571_v31 = vmul.f32 -1.442695, %v1158_v60 }
 0x206   :  { %3675 = vpow2.f32 %v3570_v4 }
 0x207   :  { %3677 = vpow2.f32 %v3571_v31 }
 0x208   :  { %v1154_v13 = vpop.f32.mrf.mxu3  ;;  %v1134_v14 = vpop.f32.mrf.mxu2 }
 0x209   :  { %v1160_v35 = vadd.f32 %v1154_v13, %v378_v54  ;;  %v1185_v25 = vpop.f32.mrf.mxu0  ;;  %v1205_v1 = vpop.f32.mrf.mxu1  ;;  %v1159_v54 = vadd.f32 %v1134_v14, %v337_v38 }
 0x20a   :  { %v1248_v2 = vadd.f32 %v1185_v25, %v434_v5  ;;  %v1249_v6 = vadd.f32 %v1205_v1, %v475_v19 }
 0x20b   :  { %v3572_v8 = vmul.f32 -1.442695, %v1160_v35 }
 0x20c   :  { %v3676_v7 = vpop.eup %3675  ;;  %v3573_v60 = vmul.f32 -1.442695, %v1248_v2  ;;  %v3574_v37 = vmul.f32 -1.442695, %v1249_v6 }
 0x20d   :  { %v3678_v4 = vpop.eup %3677  ;;  %v1255_v10 = vadd.f32 1.0, %v3676_v7  ;;  %3679 = vpow2.f32 %v3572_v8 }
 0x20e   :  { %v1274_v31 = vadd.f32 1.0, %v3678_v4  ;;  %3681 = vpow2.f32 %v3573_v60 }
 0x20f   :  { %3683 = vrcp.f32 %v1255_v10  ;;  %v1267_v14 = vand.u32 2147483648, %v1255_v10  ;;  %vm1261_vm12 = vweird.f32 %v1255_v10 }
 0x210   :  { %3685 = vrcp.f32 %v1274_v31  ;;  %v1245_v55 = vpop.f32.mrf.mxu3  ;;  %v1225_v60 = vpop.f32.mrf.mxu2  ;;  %vm1280_vm11 = vweird.f32 %v1274_v31 }
 0x211   :  { %3687 = vpow2.f32 %v3574_v37  ;;  %v1251_v1 = vadd.f32 %v1245_v55, %v5396_v27  ;;  %v1265_v27 = vand.u32 2147483647, %v1255_v10  ;;  %v1286_v55 = vand.u32 2147483648, %v1274_v31 }
 0x212   :  { %3689 = vtanh.f32 %v1159_v54  ;;  %v1284_v54 = vand.u32 2147483647, %v1274_v31  ;;  %v1268_v34 = vor.u32 1.1754944e-38, %v1267_v14 }
 0x213   :  { %v3680_v35 = vpop.eup %3679  ;;  %v3575_v25 = vmul.f32 -1.442695, %v1251_v1  ;;  %v8096_v1 = vld [vmem:[#allocation57_spill] sm:$0xff]  ;;  %vm1266_vm13 = vcmp.eq.f32.partialorder %v1265_v27, 8.507059e+37 }
 0x214   :  { %v3682_v5 = vpop.eup %3681  ;;  %v5845_v2 = vadd.f32 1.0, %v3680_v35  ;;  %vm1285_vm0 = vcmp.eq.f32.partialorder %v1284_v54, 8.507059e+37 }
 0x215   :  { %v3684_v19 = vpop.eup %3683  ;;  %v5847_v13 = vadd.f32 1.0, %v3682_v5  ;;  %v1250_v5 = vadd.f32 %v1225_v60, %v8096_v1 }
 0x216   :  { %v3686_v6 = vpop.eup %3685  ;;  %v1257_v8 = vmul.f32 %v3684_v19, %v1255_v10  ;;  %3691 = vrcp.f32 %v5845_v2  ;;  %vm1262_vm9 = vweird.f32 %v3684_v19  ;;  %v1306_v54 = vand.u32 2147483648, %v5845_v2 }
 0x217   :  { %v3688_v58 = vpop.eup %3687  ;;  %v1276_v7 = vmul.f32 %v3686_v6, %v1274_v31  ;;  %3693 = vrcp.f32 %v5847_v13  ;;  %vm1281_vm10 = vweird.f32 %v3686_v6  ;;  %vm1263_vm14 = vmor %vm1261_vm12, %vm1262_vm9  ;;  %v1330_v10 = vand.u32 2147483648, %v5847_v13 }
 0x218   :  { %v1258_v4 = vsub.f32 1.0, %v1257_v8  ;;  %v5851_v37 = vadd.f32 1.0, %v3688_v58  ;;  %3695 = vpow2.f32 %v3575_v25  ;;  %v3690_v18 = vpop.eup %3689  ;;  %vm1282_vm15 = vmor %vm1280_vm11, %vm1281_vm10  ;;  %vm1324_vm2 = vweird.f32 %v5847_v13 }
 0x219   :  { %v1277_v38 = vsub.f32 1.0, %v1276_v7  ;;  %v1287_v7 = vor.u32 1.1754944e-38, %v1286_v55  ;;  %vm1300_vm6 = vweird.f32 %v5845_v2 }
 0x21a   :  { %v1259_v35 = vmul.f32 %v3684_v19, %v1258_v4  ;;  %3697 = vrcp.f32 %v5851_v37  ;;  %vm1343_vm9 = vweird.f32 %v5851_v37 }
 0x21b   :  { %v1278_v29 = vmul.f32 %v3686_v6, %v1277_v38  ;;  %3699 = vtanh.f32 %v1250_v5 }
 0x21c   :  { %v5855_v50 = vpop.eup %3691  ;;  %v1260_v8 = vadd.f32 %v3684_v19, %v1259_v35 }
 0x21d   :  { %v3694_v58 = vpop.eup %3693  ;;  %v1279_v25 = vadd.f32 %v3686_v6, %v1278_v29  ;;  %v1296_v4 = vmul.f32 %v5855_v50, %v5845_v2  ;;  %vm1301_vm3 = vweird.f32 %v5855_v50 }
 0x21e   :  { %v1264_v0 = vsel %vm1263_vm14, %v3684_v19, %v1260_v8  ;;  %v1320_v60 = vmul.f32 %v3694_v58, %v5847_v13  ;;  %v3696_v38 = vpop.eup %3695  ;;  %vm1325_vm1 = vweird.f32 %v3694_v58  ;;  %vm5880_vm8 = vmor %vm1300_vm6, %vm1301_vm3 }
 0x21f   :  { %v1269_v1 = vsel %vm1266_vm13, %v1268_v34, %v1264_v0  ;;  %v1283_v31 = vsel %vm1282_vm15, %v3686_v6, %v1279_v25  ;;  %v1297_v35 = vsub.f32 1.0, %v1296_v4  ;;  %v5861_v29 = vadd.f32 1.0, %v3696_v38  ;;  %vm1326_vm5 = vmor %vm1324_vm2, %vm1325_vm1  ;;  %v8129_v38 = vld [vmem:[#allocation106_spill] sm:$0xff] }
 0x220   :  { %v3698_v27 = vpop.eup %3697  ;;  %v1288_v55 = vsel %vm1285_vm0, %v1287_v7, %v1283_v31  ;;  %v1311_v62 = vmul.f32 %v3690_v18, %v1269_v1  ;;  %v1321_v14 = vsub.f32 1.0, %v1320_v60  ;;  %v1328_v34 = vand.u32 2147483647, %v5847_v13 }
 0x221   :  { %v1310_v40 = vmul.f32 %v1288_v55, %v5460_v22  ;;  %v1298_v19 = vmul.f32 %v5855_v50, %v1297_v35  ;;  %v1339_v5 = vmul.f32 %v3698_v27, %v5851_v37  ;;  %3701 = vrcp.f32 %v5861_v29  ;;  %v3700_v22 = vpop.eup %3699 }
 0x222   :  { %v1322_v8 = vmul.f32 %v3694_v58, %v1321_v14  ;;  %v1349_v6 = vand.u32 2147483648, %v5851_v37  ;;  %v1331_v25 = vor.u32 1.1754944e-38, %v1330_v10  ;;  %vm1344_vm4 = vweird.f32 %v3698_v27 }
 0x223   :  { %v5869_v0 = vadd.f32 %v1311_v62, %v1310_v40  ;;  %v1340_v18 = vsub.f32 1.0, %v1339_v5  ;;  %v1299_v4 = vadd.f32 %v5855_v50, %v1298_v19  ;;  %v1347_v40 = vand.u32 2147483647, %v5851_v37  ;;  %vm1345_vm10 = vmor %vm1343_vm9, %vm1344_vm4 }
 0x224   :  { %v1323_v7 = vadd.f32 %v3694_v58, %v1322_v8  ;;  %vm1329_vm7 = vcmp.eq.f32.partialorder %v1328_v34, 8.507059e+37  ;;  %v1304_v13 = vand.u32 2147483647, %v5845_v2  ;;  %v1350_v10 = vor.u32 1.1754944e-38, %v1349_v6 }
 0x225   :  { %3703 = vtanh.f32 %v5869_v0  ;;  %v1341_v60 = vmul.f32 %v3698_v27, %v1340_v18  ;;  %v1303_v14 = vsel %vm5880_vm8, %v5855_v50, %v1299_v4  ;;  %vm1348_vm11 = vcmp.eq.f32.partialorder %v1347_v40, 8.507059e+37  ;;  %v8124_v4 = vld [vmem:[#allocation101_spill] sm:$0xff]  ;;  %v8126_v40 = vld [vmem:[#allocation103_spill] sm:$0xff] }
 0x226   :  { %v1327_v62 = vsel %vm1326_vm5, %v3694_v58, %v1323_v7  ;;  %v1307_v58 = vor.u32 1.1754944e-38, %v1306_v54  ;;  %vm1305_vm12 = vcmp.eq.f32.partialorder %v1304_v13, 8.507059e+37  ;;  %v1369_v50 = vand.u32 2147483648, %v5861_v29  ;;  %v8128_v13 = vld [vmem:[#allocation105_spill] sm:$0xff] }
 0x227   :  { %v1332_v1 = vsel %vm1329_vm7, %v1331_v25, %v1327_v62  ;;  %v1342_v31 = vadd.f32 %v3698_v27, %v1341_v60  ;;  %v3702_v35 = vpop.eup %3701  ;;  %vm1363_vm14 = vweird.f32 %v5861_v29  ;;  %v8125_v60 = vld [vmem:[#allocation102_spill] sm:$0xff]  ;;  %v8127_v62 = vld [vmem:[#allocation104_spill] sm:$0xff] }
 0x228   :  { %v1374_v55 = vmul.f32 %v3700_v22, %v1332_v1  ;;  %v1359_v2 = vmul.f32 %v3702_v35, %v5861_v29  ;;  %v1308_v18 = vsel %vm1305_vm12, %v1307_v58, %v1303_v14  ;;  %vm1364_vm13 = vweird.f32 %v3702_v35  ;;  %v8130_v1 = vld [vmem:[#allocation107_spill] sm:$0xff]  ;;  %v8135_v14 = vld [vmem:[#allocation112_spill] sm:$0xff]  ;;  %v8136_v58 = vld [vmem:[#allocation113_spill] sm:$0xff] }
 0x229   :  { %v1346_v19 = vsel %vm1345_vm10, %v3698_v27, %v1342_v31  ;;  %v1367_v27 = vand.u32 2147483647, %v5861_v29  ;;  %vm1365_vm15 = vmor %vm1363_vm14, %vm1364_vm13  ;;  %v1370_v25 = vor.u32 1.1754944e-38, %v1369_v50  ;;  %v8123_v29 = vld [vmem:[#allocation100_spill] sm:$0xff]  ;;  %v8145_v50 = vld [vmem:[#allocation122_spill] sm:$0xff] }
 0x22a   :  { %v1351_v5 = vsel %vm1348_vm11, %v1350_v10, %v1346_v19  ;;  %v1360_v34 = vsub.f32 1.0, %v1359_v2  ;;  %v8131_v31 = vld [vmem:[#allocation108_spill] sm:$0xff]  ;;  %v8133_v10 = vld [vmem:[#allocation110_spill] sm:$0xff]  ;;  %v8138_v2 = vld [vmem:[#allocation115_spill] sm:$0xff] }
 0x22b   :  { %v3704_v8 = vpop.eup %3703  ;;  %v1373_v37 = vmul.f32 %v1351_v5, %v5469_v24  ;;  %vm1368_vm0 = vcmp.eq.f32.partialorder %v1367_v27, 8.507059e+37  ;;  %v8137_v19 = vld [vmem:[#allocation114_spill] sm:$0xff]  ;;  %v8139_v5 = vld [vmem:[#allocation116_spill] sm:$0xff] }
 0x22c   :  { %v5890_v7 = vmul.f32 %v3704_v8, %v1308_v18  ;;  %v1361_v22 = vmul.f32 %v3702_v35, %v1360_v34  ;;  %v8140_v8 = vld [vmem:[#allocation117_spill] sm:$0xff]  ;;  %v8142_v34 = vld [vmem:[#allocation119_spill] sm:$0xff]  ;;  %v8143_v18 = vld [vmem:[#allocation120_spill] sm:$0xff] }
 0x22d   :  { %v5892_v6 = vadd.f32 %v1374_v55, %v1373_v37  ;;  %v8134_v55 = vld [vmem:[#allocation111_spill] sm:$0xff]  ;;  %v8141_v37 = vld [vmem:[#allocation118_spill] sm:$0xff]  ;;  %v8147_v27 = vld [vmem:[#allocation124_spill] sm:$0xff] }
 0x22e   :  { %8099 = vst [vmem:[#allocation57_spill] sm:$0xff] %v5890_v7  ;;  %1409 = vmatmul.f32.vlgmr.msra.gmra.mxu0 %v5890_v7  ;;  %1429 = vmatmul.f32.vlgmr.msra.gmra.mxu1 %v5890_v7  ;;  %v1362_v24 = vadd.f32 %v3702_v35, %v1361_v22  ;;  %v8144_v22 = vld [vmem:[#allocation121_spill] sm:$0xff] }
 0x22f   :  { %3705 = vtanh.f32 %v5892_v6  ;;  %1449 = vmatmul.f32.vlgmr.msrb.gmra.mxu2 %v5890_v7  ;;  %1469 = vmatmul.f32.vlgmr.msrb.gmra.mxu3 %v5890_v7  ;;  %v6276_v7 = vld [vmem:[#allocation10 + $0xc8] sm:$0xff] }
 0x230   :  { %1709 = vmatpush.msra.mxu0 %v5478_v52  ;;  %1729 = vmatpush.msra.mxu1 %v5481_v49  ;;  %v1366_v54 = vsel %vm1365_vm15, %v3702_v35, %v1362_v24  ;;  %v8132_v35 = vld [vmem:[#allocation109_spill] sm:$0xff]  ;;  %v8146_v24 = vld [vmem:[#allocation123_spill] sm:$0xff] }
 0x231   :  { %1749 = vmatpush.msrb.mxu2 %v5484_v12  ;;  %1769 = vmatpush.msrb.mxu3 %v5487_v23  ;;  %v1371_v49 = vsel %vm1368_vm0, %v1370_v25, %v1366_v54  ;;  %v8101_v23 = vld [vmem:[#allocation66_spill] sm:$0xff]  ;;  %v8148_v54 = vld [vmem:[#allocation125_spill] sm:$0xff] }
 0x232   :  { %1710 = vmatpush.msra.mxu0 %v5490_v3  ;;  %1730 = vmatpush.msra.mxu1 %v5493_v56  ;;  %v8102_v3 = vld [vmem:[#allocation68_spill] sm:$0xff]  ;;  %v8103_v56 = vld [vmem:[#allocation67_spill] sm:$0xff]  ;;  %v8149_v25 = vld [vmem:[#allocation126_spill] sm:$0xff] }
 0x233   :  { %1750 = vmatpush.msrb.mxu2 %v5496_v45  ;;  %1770 = vmatpush.msrb.mxu3 %v5499_v11  ;;  %v8104_v45 = vld [vmem:[#allocation69_spill] sm:$0xff]  ;;  %v8105_v11 = vld [vmem:[#allocation74_spill] sm:$0xff] }
 0x234   :  { %1711 = vmatpush.msra.mxu0 %v5504_v32  ;;  %1731 = vmatpush.msra.mxu1 %v5507_v15  ;;  %v8106_v32 = vld [vmem:[#allocation77_spill] sm:$0xff]  ;;  %v8107_v15 = vld [vmem:[#allocation84_spill] sm:$0xff] }
 0x235   :  { %v3706_v52 = vpop.eup %3705  ;;  %1751 = vmatpush.msrb.mxu2 %v5510_v57  ;;  %1771 = vmatpush.msrb.mxu3 %v5513_v20  ;;  %v8108_v57 = vld [vmem:[#allocation85_spill] sm:$0xff]  ;;  %v8109_v20 = vld [vmem:[#allocation86_spill] sm:$0xff] }
 0x236   :  { %v5914_v12 = vmul.f32 %v3706_v52, %v1371_v49  ;;  %1712 = vmatpush.msra.mxu0 %v5520_v59  ;;  %1732 = vmatpush.msra.mxu1 %v5523_v46  ;;  %v8110_v59 = vld [vmem:[#allocation87_spill] sm:$0xff]  ;;  %v8111_v46 = vld [vmem:[#allocation88_spill] sm:$0xff]  ;;  %8202 = vst [vmem:[#allocation85_spill] sm:$0xff] %v6276_v7 }
 0x237   :  { %1752 = vmatpush.msrb.mxu2 %v5526_v28  ;;  %1772 = vmatpush.msrb.mxu3 %v5529_v17  ;;  %v8112_v28 = vld [vmem:[#allocation89_spill] sm:$0xff]  ;;  %v8113_v17 = vld [vmem:[#allocation90_spill] sm:$0xff]  ;;  %v8150_v52 = vld [vmem:[#allocation127_spill] sm:$0xff] }
 0x238   :  { %8100 = vst [vmem:[#allocation154_spill] sm:$0xff] %v5914_v12  ;;  %1500 = vmatmul.f32.vlgmr.msrb.gmra.mxu0 %v5914_v12  ;;  %1520 = vmatmul.f32.vlgmr.msrb.gmra.mxu1 %v5914_v12  ;;  %v8151_v49 = vld [vmem:[#allocation128_spill] sm:$0xff] }
 0x239   :  { %1540 = vmatmul.f32.vlgmr.msra.gmra.mxu2 %v5914_v12  ;;  %1560 = vmatmul.f32.vlgmr.msra.gmra.mxu3 %v5914_v12  ;;  %v6267_v12 = vld [vmem:[#allocation10 + $0xf0] sm:$0xff] }
 0x23a   :  { %1713 = vmatpush.msra.mxu0 %v5532_v39  ;;  %1733 = vmatpush.msra.mxu1 %v5535_v63  ;;  %v8114_v39 = vld [vmem:[#allocation91_spill] sm:$0xff]  ;;  %v8115_v63 = vld [vmem:[#allocation92_spill] sm:$0xff]  ;;  %8199 = vst [vmem:[#allocation74_spill] sm:$0xff] %v6267_v12 }
 0x23b   :  { %1753 = vmatpush.msrb.mxu2 %v5538_v51  ;;  %1773 = vmatpush.msrb.mxu3 %v5541_v41  ;;  %v8116_v51 = vld [vmem:[#allocation93_spill] sm:$0xff]  ;;  %v8117_v41 = vld [vmem:[#allocation94_spill] sm:$0xff] }
 0x23c   :  { %1714 = vmatpush.msra.mxu0 %v5544_v9  ;;  %1734 = vmatpush.msra.mxu1 %v5547_v30  ;;  %v8118_v9 = vld [vmem:[#allocation95_spill] sm:$0xff]  ;;  %v8119_v30 = vld [vmem:[#allocation96_spill] sm:$0xff] }
 0x23d   :  { %1754 = vmatpush.msrb.mxu2 %v5550_v44  ;;  %1774 = vmatpush.msrb.mxu3 %v5553_v26  ;;  %v8120_v44 = vld [vmem:[#allocation97_spill] sm:$0xff]  ;;  %v8121_v26 = vld [vmem:[#allocation98_spill] sm:$0xff] }
 0x23e   :  { %1715 = vmatpush.msra.mxu0 %v5556_v47  ;;  %1735 = vmatpush.msra.mxu1 %v8101_v23  ;;  %v8122_v47 = vld [vmem:[#allocation99_spill] sm:$0xff]  ;;  %v8152_v23 = vld [vmem:[#allocation129_spill] sm:$0xff] }
 0x23f   :  { %1755 = vmatpush.msrb.mxu2 %v8102_v3  ;;  %1775 = vmatpush.msrb.mxu3 %v8103_v56  ;;  %v8153_v3 = vld [vmem:[#allocation130_spill] sm:$0xff]  ;;  %v8154_v56 = vld [vmem:[#allocation131_spill] sm:$0xff] }
 0x240   :  { %1716 = vmatpush.msra.mxu0 %v8104_v45  ;;  %1736 = vmatpush.msra.mxu1 %v8105_v11  ;;  %v8155_v45 = vld [vmem:[#allocation132_spill] sm:$0xff]  ;;  %v8156_v11 = vld [vmem:[#allocation133_spill] sm:$0xff] }
 0x241   :  { %1756 = vmatpush.msrb.mxu2 %v8106_v32  ;;  %1776 = vmatpush.msrb.mxu3 %v8107_v15  ;;  %v8157_v32 = vld [vmem:[#allocation134_spill] sm:$0xff]  ;;  %v8158_v15 = vld [vmem:[#allocation135_spill] sm:$0xff] }
 0x242   :  { %1717 = vmatpush.msra.mxu0 %v8108_v57  ;;  %1737 = vmatpush.msra.mxu1 %v8109_v20  ;;  %v8159_v57 = vld [vmem:[#allocation136_spill] sm:$0xff]  ;;  %v8160_v20 = vld [vmem:[#allocation137_spill] sm:$0xff] }
 0x243   :  { %1757 = vmatpush.msrb.mxu2 %v8110_v59  ;;  %1777 = vmatpush.msrb.mxu3 %v8111_v46  ;;  %v8161_v59 = vld [vmem:[#allocation138_spill] sm:$0xff]  ;;  %v8162_v46 = vld [vmem:[#allocation139_spill] sm:$0xff] }
 0x244   :  { %1718 = vmatpush.msra.mxu0 %v8112_v28  ;;  %1738 = vmatpush.msra.mxu1 %v8113_v17  ;;  %v8163_v28 = vld [vmem:[#allocation140_spill] sm:$0xff]  ;;  %v8164_v17 = vld [vmem:[#allocation141_spill] sm:$0xff] }
 0x245   :  { %1758 = vmatpush.msrb.mxu2 %v8114_v39  ;;  %1778 = vmatpush.msrb.mxu3 %v8115_v63  ;;  %v8165_v39 = vld [vmem:[#allocation142_spill] sm:$0xff]  ;;  %v8166_v63 = vld [vmem:[#allocation143_spill] sm:$0xff] }
 0x246   :  { %1719 = vmatpush.msra.mxu0 %v8116_v51  ;;  %1739 = vmatpush.msra.mxu1 %v8117_v41  ;;  %v8167_v51 = vld [vmem:[#allocation144_spill] sm:$0xff]  ;;  %v6002_v41 = vld [vmem:[#allocation12 + $0x110] sm:$0xff] }
 0x247   :  { %1759 = vmatpush.msrb.mxu2 %v8118_v9  ;;  %1779 = vmatpush.msrb.mxu3 %v8119_v30  ;;  %v6005_v9 = vld [vmem:[#allocation12 + $0x118] sm:$0xff]  ;;  %v6018_v30 = vld [vmem:[#allocation12 + $0xd0] sm:$0xff] }
 0x248   :  { %1720 = vmatpush.msra.mxu0 %v8120_v44  ;;  %1740 = vmatpush.msra.mxu1 %v8121_v26  ;;  %v6021_v44 = vld [vmem:[#allocation12 + $0xd8] sm:$0xff] }
 0x249   :  { %1760 = vmatpush.msrb.mxu2 %v8122_v47  ;;  %1780 = vmatpush.msrb.mxu3 %v8123_v29  ;;  %v6037_v26 = vld [vmem:[#allocation12 + $0x98] sm:$0xff]  ;;  %v6042_v47 = vld [vmem:[#allocation12 + $0x70] sm:$0xff] }
 0x24a   :  { %1721 = vmatpush.msra.mxu0 %v8124_v4  ;;  %1741 = vmatpush.msra.mxu1 %v8125_v60  ;;  %v6045_v29 = vld [vmem:[#allocation12 + $0x78] sm:$0xff]  ;;  %v8172_v4 = vld [vmem:[#allocation149_spill] sm:$0xff]  ;;  %v6050_v60 = vld [vmem:[#allocation12 + $0x50] sm:$0xff] }
 0x24b   :  { %1761 = vmatpush.msrb.mxu2 %v8126_v40  ;;  %1781 = vmatpush.msrb.mxu3 %v8127_v62  ;;  %v6053_v40 = vld [vmem:[#allocation12 + $0x58] sm:$0xff]  ;;  %v8173_v62 = vld [vmem:[#allocation150_spill] sm:$0xff] }
 0x24c   :  { %1722 = vmatpush.msra.mxu0 %v8128_v13  ;;  %1742 = vmatpush.msra.mxu1 %v8129_v38  ;;  %v8174_v13 = vld [vmem:[#allocation151_spill] sm:$0xff] }
 0x24d   :  { %1762 = vmatpush.msrb.mxu2 %v8130_v1  ;;  %1782 = vmatpush.msrb.mxu3 %v8131_v31  ;;  %v6058_v38 = vld [vmem:[#allocation12 + $0x30] sm:$0xff]  ;;  %v6061_v1 = vld [vmem:[#allocation12 + $0x38] sm:$0xff] }
 0x24e   :  { %1723 = vmatpush.msra.mxu0 %v8132_v35  ;;  %1743 = vmatpush.msra.mxu1 %v8133_v10  ;;  %v8175_v31 = vld [vmem:[#allocation152_spill] sm:$0xff]  ;;  %v8176_v35 = vld [vmem:[#allocation153_spill] sm:$0xff]  ;;  %v6066_v10 = vld [vmem:[#allocation12 + $0x10] sm:$0xff] }
 0x24f   :  { %1763 = vmatpush.msrb.mxu2 %v8134_v55  ;;  %1783 = vmatpush.msrb.mxu3 %v8135_v14  ;;  %v6069_v55 = vld [vmem:[#allocation12 + $0x18] sm:$0xff]  ;;  %v8177_v14 = vld [vmem:[#allocation46_spill] sm:$0xff] }
 0x250   :  { %1724 = vmatpush.msra.mxu0 %v8136_v58  ;;  %1744 = vmatpush.msra.mxu1 %v8137_v19  ;;  %v8178_v58 = vld [vmem:[#allocation70_spill] sm:$0xff] }
 0x251   :  { %1764 = vmatpush.msrb.mxu2 %v8138_v2  ;;  %1784 = vmatpush.msrb.mxu3 %v8139_v5  ;;  %v258_v19 = vadd.f32 %v8178_v58, %v8177_v14  ;;  %v8179_v2 = vld [vmem:[#allocation49_spill] sm:$0xff]  ;;  %v8180_v5 = vld [vmem:[#allocation71_spill] sm:$0xff] }
 0x252   :  { %1800 = vmatpush.msrb.mxu0 %v8140_v8  ;;  %1820 = vmatpush.msrb.mxu1 %v8141_v37  ;;  %v299_v8 = vadd.f32 %v8180_v5, %v8179_v2 }
 0x253   :  { %1840 = vmatpush.msra.mxu2 %v8142_v34  ;;  %1860 = vmatpush.msra.mxu3 %v8143_v18 }
 0x254   :  { %1801 = vmatpush.msrb.mxu0 %v8144_v22  ;;  %1821 = vmatpush.msrb.mxu1 %v8145_v50 }
 0x255   :  { %1841 = vmatpush.msra.mxu2 %v8146_v24  ;;  %1861 = vmatpush.msra.mxu3 %v8147_v27  ;;  %v8181_v27 = vld [vmem:[#allocation60_spill] sm:$0xff] }
 0x256   :  { %1802 = vmatpush.msrb.mxu0 %v8148_v54  ;;  %1822 = vmatpush.msrb.mxu1 %v8149_v25  ;;  %v8182_v54 = vld [vmem:[#allocation24_spill] sm:$0xff] }
 0x257   :  { %1842 = vmatpush.msra.mxu2 %v8150_v52  ;;  %1862 = vmatpush.msra.mxu3 %v8151_v49  ;;  %v381_v25 = vadd.f32 %v8182_v54, %v8181_v27 }
 0x258   :  { %1803 = vmatpush.msrb.mxu0 %v8152_v23  ;;  %1823 = vmatpush.msrb.mxu1 %v8153_v3  ;;  %v8183_v23 = vld [vmem:[#allocation50_spill] sm:$0xff]  ;;  %v8184_v3 = vld [vmem:[#allocation48_spill] sm:$0xff] }
 0x259   :  { %1843 = vmatpush.msra.mxu2 %v8154_v56  ;;  %1863 = vmatpush.msra.mxu3 %v8155_v45  ;;  %v431_v56 = vadd.f32 %v8184_v3, %v8183_v23  ;;  %v8185_v45 = vld [vmem:[#allocation53_spill] sm:$0xff] }
 0x25a   :  { %1804 = vmatpush.msrb.mxu0 %v8156_v11  ;;  %1824 = vmatpush.msrb.mxu1 %v8157_v32  ;;  %v8186_v11 = vld [vmem:[#allocation38_spill] sm:$0xff] }
 0x25b   :  { %1844 = vmatpush.msra.mxu2 %v8158_v15  ;;  %1864 = vmatpush.msra.mxu3 %v8159_v57  ;;  %v472_v32 = vadd.f32 %v8186_v11, %v8185_v45 }
 0x25c   :  { %1805 = vmatpush.msrb.mxu0 %v8160_v20  ;;  %1825 = vmatpush.msrb.mxu1 %v8161_v59 }
 0x25d   :  { %1845 = vmatpush.msra.mxu2 %v8162_v46  ;;  %1865 = vmatpush.msra.mxu3 %v8163_v28 }
 0x25e   :  { %1806 = vmatpush.msrb.mxu0 %v5748_v42  ;;  %1826 = vmatpush.msrb.mxu1 %v8164_v17  ;;  %v6010_v42 = vld [vmem:[#allocation12 + $0xf0] sm:$0xff] }
 0x25f   :  { %1846 = vmatpush.msra.mxu2 %v8165_v39  ;;  %1866 = vmatpush.msra.mxu3 %v5757_v16  ;;  %v6013_v16 = vld [vmem:[#allocation12 + $0xf8] sm:$0xff] }
 0x260   :  { %1807 = vmatpush.msrb.mxu0 %v8166_v63  ;;  %1827 = vmatpush.msrb.mxu1 %v8167_v51 }
 0x261   :  { %1847 = vmatpush.msra.mxu2 %v6002_v41  ;;  %1867 = vmatpush.msra.mxu3 %v6005_v9 }
 0x262   :  { %1808 = vmatpush.msrb.mxu0 %v5768_v48  ;;  %1828 = vmatpush.msrb.mxu1 %v5771_v43  ;;  %v6026_v43 = vld [vmem:[#allocation12 + $0xb0] sm:$0xff]  ;;  %v6029_v48 = vld [vmem:[#allocation12 + $0xb8] sm:$0xff] }
 0x263   :  { %1848 = vmatpush.msra.mxu2 %v6010_v42  ;;  %1868 = vmatpush.msra.mxu3 %v6013_v16 }
 0x264   :  { %1809 = vmatpush.msrb.mxu0 %v5776_v33  ;;  %1829 = vmatpush.msrb.mxu1 %v5779_v53  ;;  %v8168_v33 = vld [vmem:[#allocation145_spill] sm:$0xff]  ;;  %v6034_v53 = vld [vmem:[#allocation12 + $0x90] sm:$0xff] }
 0x265   :  { %1849 = vmatpush.msra.mxu2 %v6018_v30  ;;  %1869 = vmatpush.msra.mxu3 %v6021_v44 }
 0x266   :  { %1810 = vmatpush.msrb.mxu0 %v5784_v36  ;;  %1830 = vmatpush.msrb.mxu1 %v5787_v61  ;;  %v8169_v36 = vld [vmem:[#allocation146_spill] sm:$0xff]  ;;  %v8170_v61 = vld [vmem:[#allocation147_spill] sm:$0xff] }
 0x267   :  { %1850 = vmatpush.msra.mxu2 %v6026_v43  ;;  %1870 = vmatpush.msra.mxu3 %v6029_v48 }
 0x268   :  { %1811 = vmatpush.msrb.mxu0 %v5792_v21  ;;  %1831 = vmatpush.msrb.mxu1 %v8168_v33  ;;  %v8171_v21 = vld [vmem:[#allocation148_spill] sm:$0xff] }
 0x269   :  { %1851 = vmatpush.msra.mxu2 %v6034_v53  ;;  %1871 = vmatpush.msra.mxu3 %v6037_v26 }
 0x26a   :  { %1812 = vmatpush.msrb.mxu0 %v8169_v36  ;;  %1832 = vmatpush.msrb.mxu1 %v8170_v61  ;;  %v8187_v61 = vld [vmem:[#allocation61_spill] sm:$0xff] }
 0x26b   :  { %1852 = vmatpush.msra.mxu2 %v6042_v47  ;;  %1872 = vmatpush.msra.mxu3 %v6045_v29 }
 0x26c   :  { %1813 = vmatpush.msrb.mxu0 %v8171_v21  ;;  %1833 = vmatpush.msrb.mxu1 %v8172_v4  ;;  %v8188_v21 = vld [vmem:[#allocation21_spill] sm:$0xff] }
 0x26d   :  { %1853 = vmatpush.msra.mxu2 %v6050_v60  ;;  %1873 = vmatpush.msra.mxu3 %v6053_v40  ;;  %v340_v4 = vadd.f32 %v8188_v21, %v8187_v61 }
 0x26e   :  { %1814 = vmatpush.msrb.mxu0 %v8173_v62  ;;  %1834 = vmatpush.msrb.mxu1 %v8174_v13 }
 0x26f   :  { %1854 = vmatpush.msra.mxu2 %v6058_v38  ;;  %1874 = vmatpush.msra.mxu3 %v6061_v1 }
 0x270   :  { %1815 = vmatpush.msrb.mxu0 %v8175_v31  ;;  %1835 = vmatpush.msrb.mxu1 %v8176_v35  ;;  %v8189_v31 = vld [vmem:[#allocation65_spill] sm:$0xff] }
 0x271   :  { %1855 = vmatpush.msra.mxu2 %v6066_v10  ;;  %1875 = vmatpush.msra.mxu3 %v6069_v55 }
 0x2ab   :  { %v1410_v37 = vpop.f32.mrf.mxu0  ;;  %v1430_v34 = vpop.f32.mrf.mxu1 }
 0x2ac   :  { %v1473_v18 = vadd.f32 %v1410_v37, %v258_v19  ;;  %v1474_v22 = vadd.f32 %v1430_v34, %v299_v8 }
 0x2ae   :  { %v3576_v50 = vmul.f32 -1.442695, %v1473_v18  ;;  %v3577_v24 = vmul.f32 -1.442695, %v1474_v22 }
 0x2b0   :  { %3707 = vpow2.f32 %v3576_v50 }
 0x2b1   :  { %3709 = vpow2.f32 %v3577_v24 }
 0x2b2   :  { %v1470_v52 = vpop.f32.mrf.mxu3  ;;  %v1450_v36 = vpop.f32.mrf.mxu2 }
 0x2b3   :  { %v1476_v49 = vadd.f32 %v1470_v52, %v381_v25  ;;  %v1475_v58 = vadd.f32 %v1450_v36, %v340_v4  ;;  %v8190_v4 = vld [vmem:[#allocation64_spill] sm:$0xff] }
 0x2b5   :  { %v3578_v15 = vmul.f32 -1.442695, %v1476_v49  ;;  %v1501_v57 = vpop.f32.mrf.mxu0  ;;  %v1521_v20 = vpop.f32.mrf.mxu1 }
 0x2b6   :  { %v3708_v59 = vpop.eup %3707  ;;  %v1564_v46 = vadd.f32 %v1501_v57, %v431_v56  ;;  %v1565_v28 = vadd.f32 %v1521_v20, %v472_v32 }
 0x2b7   :  { %v3710_v17 = vpop.eup %3709  ;;  %v1571_v39 = vadd.f32 1.0, %v3708_v59  ;;  %3711 = vpow2.f32 %v3578_v15 }
 0x2b8   :  { %v1590_v63 = vadd.f32 1.0, %v3710_v17  ;;  %v3579_v51 = vmul.f32 -1.442695, %v1564_v46  ;;  %v3580_v33 = vmul.f32 -1.442695, %v1565_v28 }
 0x2b9   :  { %3713 = vrcp.f32 %v1571_v39  ;;  %v1581_v52 = vand.u32 2147483647, %v1571_v39  ;;  %v1583_v49 = vand.u32 2147483648, %v1571_v39  ;;  %vm1577_vm4 = vweird.f32 %v1571_v39 }
 0x2ba   :  { %3715 = vrcp.f32 %v1590_v63  ;;  %v1602_v56 = vand.u32 2147483648, %v1590_v63  ;;  %v1600_v15 = vand.u32 2147483647, %v1590_v63  ;;  %vm1596_vm3 = vweird.f32 %v1590_v63 }
 0x2bb   :  { %3717 = vpow2.f32 %v3579_v51  ;;  %vm1582_vm6 = vcmp.eq.f32.partialorder %v1581_v52, 8.507059e+37  ;;  %v1584_v28 = vor.u32 1.1754944e-38, %v1583_v49 }
 0x2bc   :  { %3719 = vpow2.f32 %v3580_v33  ;;  %v1561_v62 = vpop.f32.mrf.mxu3  ;;  %v1541_v57 = vpop.f32.mrf.mxu2  ;;  %v1603_v36 = vor.u32 1.1754944e-38, %v1602_v56  ;;  %vm1601_vm8 = vcmp.eq.f32.partialorder %v1600_v15, 8.507059e+37 }
 0x2bd   :  { %v3712_v13 = vpop.eup %3711  ;;  %v1567_v35 = vadd.f32 %v1561_v62, %v8189_v31  ;;  %v1566_v62 = vadd.f32 %v1541_v57, %v8190_v4 }
 0x2be   :  { %v6085_v19 = vadd.f32 1.0, %v3712_v13 }
 0x2bf   :  { %v3714_v5 = vpop.eup %3713  ;;  %v3581_v8 = vmul.f32 -1.442695, %v1567_v35 }
 0x2c0   :  { %v3716_v37 = vpop.eup %3715  ;;  %v1573_v34 = vmul.f32 %v3714_v5, %v1571_v39  ;;  %3721 = vrcp.f32 %v6085_v19  ;;  %vm1578_vm1 = vweird.f32 %v3714_v5  ;;  %vm1616_vm9 = vweird.f32 %v6085_v19 }
 0x2c1   :  { %v3718_v18 = vpop.eup %3717  ;;  %v1592_v22 = vmul.f32 %v3716_v37, %v1590_v63  ;;  %3723 = vpow2.f32 %v3581_v8  ;;  %vm1597_vm2 = vweird.f32 %v3716_v37  ;;  %vm1579_vm5 = vmor %vm1577_vm4, %vm1578_vm1 }
 0x2c2   :  { %v3720_v50 = vpop.eup %3719  ;;  %v1574_v24 = vsub.f32 1.0, %v1573_v34  ;;  %3725 = vtanh.f32 %v1475_v58  ;;  %v6088_v54 = vadd.f32 1.0, %v3718_v18  ;;  %vm1598_vm7 = vmor %vm1596_vm3, %vm1597_vm2 }
 0x2c3   :  { %v1593_v25 = vsub.f32 1.0, %v1592_v22  ;;  %v6090_v3 = vadd.f32 1.0, %v3720_v50 }
 0x2c4   :  { %v1575_v11 = vmul.f32 %v3714_v5, %v1574_v24  ;;  %3727 = vrcp.f32 %v6088_v54  ;;  %v1622_v24 = vand.u32 2147483648, %v6085_v19  ;;  %v1644_v52 = vand.u32 2147483647, %v6088_v54 }
 0x2c5   :  { %v1594_v32 = vmul.f32 %v3716_v37, %v1593_v25  ;;  %3729 = vrcp.f32 %v6090_v3  ;;  %vm1640_vm14 = vweird.f32 %v6088_v54  ;;  %vm1659_vm15 = vweird.f32 %v6090_v3 }
 0x2c6   :  { %v6094_v20 = vpop.eup %3721  ;;  %v1576_v59 = vadd.f32 %v3714_v5, %v1575_v11  ;;  %v1665_v11 = vand.u32 2147483648, %v6090_v3  ;;  %vm1645_vm2 = vcmp.eq.f32.partialorder %v1644_v52, 8.507059e+37  ;;  %v6156_v52 = vld [vmem:[#allocation10 + $0x1f0] sm:$0xff] }
 0x2c7   :  { %v3724_v46 = vpop.eup %3723  ;;  %v1595_v17 = vadd.f32 %v3716_v37, %v1594_v32  ;;  %v1612_v51 = vmul.f32 %v6094_v20, %v6085_v19  ;;  %vm1617_vm10 = vweird.f32 %v6094_v20 }
 0x2c8   :  { %v3726_v33 = vpop.eup %3725  ;;  %v1580_v21 = vsel %vm1579_vm5, %v3714_v5, %v1576_v59  ;;  %v6100_v13 = vadd.f32 1.0, %v3724_v46  ;;  %v1663_v59 = vand.u32 2147483647, %v6090_v3  ;;  %v1620_v46 = vand.u32 2147483647, %v6085_v19  ;;  %vm6123_vm13 = vmor %vm1616_vm9, %vm1617_vm10 }
 0x2c9   :  { %v1585_v63 = vsel %vm1582_vm6, %v1584_v28, %v1580_v21  ;;  %v1599_v31 = vsel %vm1598_vm7, %v3716_v37, %v1595_v17  ;;  %v1613_v39 = vsub.f32 1.0, %v1612_v51  ;;  %v1623_v17 = vor.u32 1.1754944e-38, %v1622_v24  ;;  %v6151_v24 = vld [vmem:[#allocation10 + $0x1e8] sm:$0xff] }
 0x2ca   :  { %v3728_v35 = vpop.eup %3727  ;;  %v1604_v58 = vsel %vm1601_vm8, %v1603_v36, %v1599_v31  ;;  %v1627_v8 = vmul.f32 %v3726_v33, %v1585_v63  ;;  %3731 = vrcp.f32 %v6100_v13  ;;  %vm1664_vm3 = vcmp.eq.f32.partialorder %v1663_v59, 8.507059e+37  ;;  %v6186_v28 = vld [vmem:[#allocation10 + $0x1a8] sm:$0xff] }
 0x2cb   :  { %v3730_v34 = vpop.eup %3729  ;;  %v1626_v18 = vmul.f32 %v1604_v58, %v5869_v0  ;;  %v1614_v22 = vmul.f32 %v6094_v20, %v1613_v39  ;;  %v1636_v5 = vmul.f32 %v3728_v35, %v6088_v54  ;;  %3733 = vtanh.f32 %v1566_v62 }
 0x2cc   :  { %v1655_v50 = vmul.f32 %v3730_v34, %v6090_v3  ;;  %v1646_v0 = vand.u32 2147483648, %v6088_v54  ;;  %vm1641_vm11 = vweird.f32 %v3728_v35  ;;  %vm1660_vm12 = vweird.f32 %v3730_v34 }
 0x2cd   :  { %v6108_v37 = vadd.f32 %v1627_v8, %v1626_v18  ;;  %v1637_v25 = vsub.f32 1.0, %v1636_v5  ;;  %v1615_v56 = vadd.f32 %v6094_v20, %v1614_v22  ;;  %vm1642_vm0 = vmor %vm1640_vm14, %vm1641_vm11  ;;  %v1666_v62 = vor.u32 1.1754944e-38, %v1665_v11  ;;  %v6171_v11 = vld [vmem:[#allocation10 + $0x1c8] sm:$0xff] }
 0x2ce   :  { %v1656_v49 = vsub.f32 1.0, %v1655_v50  ;;  %v1647_v21 = vor.u32 1.1754944e-38, %v1646_v0  ;;  %vm1661_vm1 = vmor %vm1659_vm15, %vm1660_vm12  ;;  %vm1621_vm4 = vcmp.eq.f32.partialorder %v1620_v46, 8.507059e+37  ;;  %vm1679_vm6 = vweird.f32 %v6100_v13  ;;  %v6183_v46 = vld [vmem:[#allocation10 + $0x1a0] sm:$0xff]  ;;  %v6252_v0 = vld [vmem:[#allocation10 + $0x108] sm:$0xff] }
 0x2cf   :  { %3735 = vtanh.f32 %v6108_v37  ;;  %v1638_v32 = vmul.f32 %v3728_v35, %v1637_v25  ;;  %v1619_v19 = vsel %vm6123_vm13, %v6094_v20, %v1615_v56  ;;  %v1683_v25 = vand.u32 2147483647, %v6100_v13  ;;  %v6168_v56 = vld [vmem:[#allocation10 + $0x1c0] sm:$0xff] }
 0x2d0   :  { %v6117_v15 = vpop.eup %3731  ;;  %v1657_v57 = vmul.f32 %v3730_v34, %v1656_v49  ;;  %v1624_v22 = vsel %vm1621_vm4, %v1623_v17, %v1619_v19  ;;  %v6159_v49 = vld [vmem:[#allocation10 + $0x1f8] sm:$0xff]  ;;  %v6189_v17 = vld [vmem:[#allocation10 + $0x1b0] sm:$0xff] }
 0x2d1   :  { %v1639_v51 = vadd.f32 %v3728_v35, %v1638_v32  ;;  %v1675_v33 = vmul.f32 %v6117_v15, %v6100_v13  ;;  %v3734_v36 = vpop.eup %3733  ;;  %vm1680_vm5 = vweird.f32 %v6117_v15  ;;  %v6177_v32 = vld [vmem:[#allocation10 + $0x1d0] sm:$0xff]  ;;  %vm1684_vm8 = vcmp.eq.f32.partialorder %v1683_v25, 8.507059e+37  ;;  %v6249_v25 = vld [vmem:[#allocation10 + $0x100] sm:$0xff] }
 0x2d2   :  { %v1658_v4 = vadd.f32 %v3730_v34, %v1657_v57  ;;  %vm6164_vm7 = vmor %vm1679_vm6, %vm1680_vm5  ;;  %v6180_v57 = vld [vmem:[#allocation10 + $0x1d8] sm:$0xff]  ;;  %v6203_v19 = vld [vmem:[#allocation10 + $0x190] sm:$0xff] }
 0x2d3   :  { %v1643_v63 = vsel %vm1642_vm0, %v3728_v35, %v1639_v51  ;;  %v1676_v31 = vsub.f32 1.0, %v1675_v33 }
 0x2d4   :  { %v1648_v39 = vsel %vm1645_vm2, %v1647_v21, %v1643_v63  ;;  %v1662_v54 = vsel %vm1661_vm1, %v3730_v34, %v1658_v4  ;;  %v6148_v34 = vld [vmem:[#allocation10 + $0x1e0] sm:$0xff]  ;;  %v6198_v21 = vld [vmem:[#allocation10 + $0x188] sm:$0xff] }
 0x2d5   :  { %v3736_v58 = vpop.eup %3735  ;;  %v1667_v8 = vsel %vm1664_vm3, %v1666_v62, %v1662_v54  ;;  %v1690_v18 = vmul.f32 %v3734_v36, %v1648_v39  ;;  %v1677_v3 = vmul.f32 %v6117_v15, %v1676_v31  ;;  %v6195_v36 = vld [vmem:[#allocation10 + $0x180] sm:$0xff]  ;;  %v6206_v62 = vld [vmem:[#allocation10 + $0x198] sm:$0xff]  ;;  %v6212_v31 = vld [vmem:[#allocation10 + $0x168] sm:$0xff] }
 0x2d6   :  { %v1689_v5 = vmul.f32 %v1667_v8, %v5892_v6  ;;  %v6136_v50 = vmul.f32 %v3736_v58, %v1624_v22  ;;  %v1685_v6 = vand.u32 2147483648, %v6100_v13  ;;  %v6209_v63 = vld [vmem:[#allocation10 + $0x160] sm:$0xff]  ;;  %v6219_v39 = vld [vmem:[#allocation10 + $0x170] sm:$0xff]  ;;  %v6222_v54 = vld [vmem:[#allocation10 + $0x178] sm:$0xff] }
 0x2d7   :  { %v1678_v35 = vadd.f32 %v6117_v15, %v1677_v3  ;;  %v6225_v58 = vld [vmem:[#allocation10 + $0x140] sm:$0xff]  ;;  %v6228_v8 = vld [vmem:[#allocation10 + $0x148] sm:$0xff]  ;;  %v6234_v3 = vld [vmem:[#allocation10 + $0x158] sm:$0xff] }
 0x2d8   :  { %8193 = vst [vmem:[#allocation66_spill] sm:$0xff] %v6136_v50  ;;  %v6138_v20 = vadd.f32 %v1690_v18, %v1689_v5  ;;  %1725 = vmatmul.f32.vlgmr.msra.gmra.mxu0 %v6136_v50  ;;  %1745 = vmatmul.f32.vlgmr.msra.gmra.mxu1 %v6136_v50  ;;  %v1686_v59 = vor.u32 1.1754944e-38, %v1685_v6  ;;  %v6231_v18 = vld [vmem:[#allocation10 + $0x150] sm:$0xff]  ;;  %v6237_v22 = vld [vmem:[#allocation10 + $0x120] sm:$0xff]  ;;  %v6240_v5 = vld [vmem:[#allocation10 + $0x128] sm:$0xff] }
 0x2d9   :  { %1765 = vmatmul.f32.vlgmr.msrb.gmra.mxu2 %v6136_v50  ;;  %1785 = vmatmul.f32.vlgmr.msrb.gmra.mxu3 %v6136_v50  ;;  %v1682_v13 = vsel %vm6164_vm7, %v6117_v15, %v1678_v35  ;;  %v6192_v15 = vld [vmem:[#allocation10 + $0x1b8] sm:$0xff]  ;;  %v6243_v35 = vld [vmem:[#allocation10 + $0x130] sm:$0xff]  ;;  %v6273_v50 = vld [vmem:[#allocation10 + $0xc0] sm:$0xff] }
 0x2da   :  { %3737 = vtanh.f32 %v6138_v20  ;;  %2022 = vmatpush.msra.mxu0 %v6148_v34  ;;  %2042 = vmatpush.msra.mxu1 %v6151_v24  ;;  %v1687_v33 = vsel %vm1684_vm8, %v1686_v59, %v1682_v13  ;;  %v6246_v6 = vld [vmem:[#allocation10 + $0x138] sm:$0xff]  ;;  %v6255_v13 = vld [vmem:[#allocation10 + $0x110] sm:$0xff]  ;;  %8201 = vst [vmem:[#allocation84_spill] sm:$0xff] %v6273_v50 }
 0x2db   :  { %2062 = vmatpush.msrb.mxu2 %v6156_v52  ;;  %2082 = vmatpush.msrb.mxu3 %v6159_v49  ;;  %v6258_v59 = vld [vmem:[#allocation10 + $0x118] sm:$0xff] }
 0x2dc   :  { %2023 = vmatpush.msra.mxu0 %v6168_v56  ;;  %2043 = vmatpush.msra.mxu1 %v6171_v11 }
 0x2dd   :  { %2063 = vmatpush.msrb.mxu2 %v6177_v32  ;;  %2083 = vmatpush.msrb.mxu3 %v6180_v57 }
 0x2de   :  { %2024 = vmatpush.msra.mxu0 %v6183_v46  ;;  %2044 = vmatpush.msra.mxu1 %v6186_v28 }
 0x2df   :  { %2064 = vmatpush.msrb.mxu2 %v6189_v17  ;;  %2084 = vmatpush.msrb.mxu3 %v6192_v15 }
 0x2e0   :  { %v3738_v51 = vpop.eup %3737  ;;  %2025 = vmatpush.msra.mxu0 %v6195_v36  ;;  %2045 = vmatpush.msra.mxu1 %v6198_v21 }
 0x2e1   :  { %v6201_v4 = vmul.f32 %v3738_v51, %v1687_v33  ;;  %2065 = vmatpush.msrb.mxu2 %v6203_v19  ;;  %2085 = vmatpush.msrb.mxu3 %v6206_v62  ;;  %v6261_v51 = vld [vmem:[#allocation10 + $0xe0] sm:$0xff]  ;;  %v6264_v33 = vld [vmem:[#allocation10 + $0xe8] sm:$0xff] }
 0x2e2   :  { %2026 = vmatpush.msra.mxu0 %v6209_v63  ;;  %2046 = vmatpush.msra.mxu1 %v6212_v31  ;;  %8197 = vst [vmem:[#allocation67_spill] sm:$0xff] %v6261_v51 }
 0x2e3   :  { %8196 = vst [vmem:[#allocation68_spill] sm:$0xff] %v6201_v4  ;;  %1816 = vmatmul.f32.vlgmr.msrb.gmra.mxu0 %v6201_v4  ;;  %1836 = vmatmul.f32.vlgmr.msrb.gmra.mxu1 %v6201_v4 }
 0x2e4   :  { %1856 = vmatmul.f32.vlgmr.msra.gmra.mxu2 %v6201_v4  ;;  %1876 = vmatmul.f32.vlgmr.msra.gmra.mxu3 %v6201_v4  ;;  %8198 = vst [vmem:[#allocation69_spill] sm:$0xff] %v6264_v33  ;;  %v6270_v4 = vld [vmem:[#allocation10 + $0xf8] sm:$0xff] }
 0x2e5   :  { %2066 = vmatpush.msrb.mxu2 %v6219_v39  ;;  %2086 = vmatpush.msrb.mxu3 %v6222_v54  ;;  %8200 = vst [vmem:[#allocation77_spill] sm:$0xff] %v6270_v4 }
 0x2e6   :  { %2027 = vmatpush.msra.mxu0 %v6225_v58  ;;  %2047 = vmatpush.msra.mxu1 %v6228_v8 }
 0x2e7   :  { %2067 = vmatpush.msrb.mxu2 %v6231_v18  ;;  %2087 = vmatpush.msrb.mxu3 %v6234_v3 }
 0x2e8   :  { %2028 = vmatpush.msra.mxu0 %v6237_v22  ;;  %2048 = vmatpush.msra.mxu1 %v6240_v5 }
 0x2e9   :  { %2068 = vmatpush.msrb.mxu2 %v6243_v35  ;;  %2088 = vmatpush.msrb.mxu3 %v6246_v6 }
 0x2ea   :  { %2029 = vmatpush.msra.mxu0 %v6249_v25  ;;  %2049 = vmatpush.msra.mxu1 %v6252_v0 }
 0x2eb   :  { %2069 = vmatpush.msrb.mxu2 %v6255_v13  ;;  %2089 = vmatpush.msrb.mxu3 %v6258_v59 }
 0x2ec   :  { %2030 = vmatpush.msra.mxu0 %v6261_v51  ;;  %2050 = vmatpush.msra.mxu1 %v6264_v33  ;;  %v6279_v51 = vld [vmem:[#allocation10 + $0xd0] sm:$0xff]  ;;  %v6282_v33 = vld [vmem:[#allocation10 + $0xd8] sm:$0xff] }
 0x2ed   :  { %2070 = vmatpush.msrb.mxu2 %v6267_v12  ;;  %2090 = vmatpush.msrb.mxu3 %v6270_v4  ;;  %8203 = vst [vmem:[#allocation86_spill] sm:$0xff] %v6279_v51  ;;  %v6285_v12 = vld [vmem:[#allocation10 + $0xa0] sm:$0xff]  ;;  %v6288_v4 = vld [vmem:[#allocation10 + $0xa8] sm:$0xff] }
 0x2ee   :  { %2031 = vmatpush.msra.mxu0 %v6273_v50  ;;  %2051 = vmatpush.msra.mxu1 %v6276_v7  ;;  %8204 = vst [vmem:[#allocation87_spill] sm:$0xff] %v6282_v33  ;;  %v6291_v50 = vld [vmem:[#allocation10 + $0xb0] sm:$0xff]  ;;  %v6294_v7 = vld [vmem:[#allocation10 + $0xb8] sm:$0xff] }
 0x2ef   :  { %2071 = vmatpush.msrb.mxu2 %v6279_v51  ;;  %2091 = vmatpush.msrb.mxu3 %v6282_v33  ;;  %8205 = vst [vmem:[#allocation88_spill] sm:$0xff] %v6285_v12  ;;  %v6297_v51 = vld [vmem:[#allocation10 + $0x80] sm:$0xff]  ;;  %v6300_v33 = vld [vmem:[#allocation10 + $0x88] sm:$0xff] }
 0x2f0   :  { %2032 = vmatpush.msra.mxu0 %v6285_v12  ;;  %8206 = vst [vmem:[#allocation89_spill] sm:$0xff] %v6288_v4  ;;  %2052 = vmatpush.msra.mxu1 %v6288_v4  ;;  %v6303_v12 = vld [vmem:[#allocation10 + $0x90] sm:$0xff]  ;;  %v6306_v4 = vld [vmem:[#allocation10 + $0x98] sm:$0xff] }
 0x2f1   :  { %8207 = vst [vmem:[#allocation90_spill] sm:$0xff] %v6291_v50  ;;  %2072 = vmatpush.msrb.mxu2 %v6291_v50  ;;  %2092 = vmatpush.msrb.mxu3 %v6294_v7  ;;  %v6309_v50 = vld [vmem:[#allocation10 + $0x60] sm:$0xff] }
 0x2f2   :  { %8208 = vst [vmem:[#allocation91_spill] sm:$0xff] %v6294_v7  ;;  %2033 = vmatpush.msra.mxu0 %v6297_v51  ;;  %2053 = vmatpush.msra.mxu1 %v6300_v33  ;;  %v6312_v7 = vld [vmem:[#allocation10 + $0x68] sm:$0xff] }
 0x2f3   :  { %8209 = vst [vmem:[#allocation92_spill] sm:$0xff] %v6297_v51  ;;  %2073 = vmatpush.msrb.mxu2 %v6303_v12  ;;  %2093 = vmatpush.msrb.mxu3 %v6306_v4  ;;  %v6315_v51 = vld [vmem:[#allocation10 + $0x70] sm:$0xff] }
 0x2f4   :  { %8210 = vst [vmem:[#allocation93_spill] sm:$0xff] %v6300_v33  ;;  %2034 = vmatpush.msra.mxu0 %v6309_v50  ;;  %2054 = vmatpush.msra.mxu1 %v6312_v7  ;;  %v6318_v33 = vld [vmem:[#allocation10 + $0x78] sm:$0xff] }
 0x2f5   :  { %8211 = vst [vmem:[#allocation94_spill] sm:$0xff] %v6303_v12  ;;  %2074 = vmatpush.msrb.mxu2 %v6315_v51  ;;  %2094 = vmatpush.msrb.mxu3 %v6318_v33  ;;  %v6321_v12 = vld [vmem:[#allocation10 + $0x40] sm:$0xff] }
 0x2f6   :  { %8212 = vst [vmem:[#allocation95_spill] sm:$0xff] %v6306_v4  ;;  %2035 = vmatpush.msra.mxu0 %v6321_v12  ;;  %v6324_v4 = vld [vmem:[#allocation10 + $0x48] sm:$0xff] }
 0x2f7   :  { %8213 = vst [vmem:[#allocation96_spill] sm:$0xff] %v6309_v50  ;;  %2055 = vmatpush.msra.mxu1 %v6324_v4  ;;  %v6327_v50 = vld [vmem:[#allocation10 + $0x50] sm:$0xff] }
 0x2f8   :  { %8214 = vst [vmem:[#allocation97_spill] sm:$0xff] %v6312_v7  ;;  %2075 = vmatpush.msrb.mxu2 %v6327_v50  ;;  %v6330_v7 = vld [vmem:[#allocation10 + $0x58] sm:$0xff] }
 0x2f9   :  { %8215 = vst [vmem:[#allocation98_spill] sm:$0xff] %v6315_v51  ;;  %2095 = vmatpush.msrb.mxu3 %v6330_v7  ;;  %v6333_v51 = vld [vmem:[#allocation10 + $0x20] sm:$0xff] }
 0x2fa   :  { %8216 = vst [vmem:[#allocation99_spill] sm:$0xff] %v6318_v33  ;;  %2036 = vmatpush.msra.mxu0 %v6333_v51  ;;  %v6336_v33 = vld [vmem:[#allocation10 + $0x28] sm:$0xff] }
 0x2fb   :  { %8217 = vst [vmem:[#allocation100_spill] sm:$0xff] %v6321_v12  ;;  %2056 = vmatpush.msra.mxu1 %v6336_v33  ;;  %v6339_v12 = vld [vmem:[#allocation10 + $0x30] sm:$0xff] }
 0x2fc   :  { %8218 = vst [vmem:[#allocation101_spill] sm:$0xff] %v6324_v4  ;;  %2076 = vmatpush.msrb.mxu2 %v6339_v12  ;;  %v6342_v4 = vld [vmem:[#allocation10 + $0x38] sm:$0xff] }
 0x2fd   :  { %8219 = vst [vmem:[#allocation102_spill] sm:$0xff] %v6327_v50  ;;  %2096 = vmatpush.msrb.mxu3 %v6342_v4  ;;  %v6345_v50 = vld [vmem:[#allocation10] sm:$0xff] }
 0x2fe   :  { %8220 = vst [vmem:[#allocation103_spill] sm:$0xff] %v6330_v7  ;;  %2037 = vmatpush.msra.mxu0 %v6345_v50  ;;  %v6348_v7 = vld [vmem:[#allocation10 + $0x8] sm:$0xff] }
 0x2ff   :  { %8221 = vst [vmem:[#allocation104_spill] sm:$0xff] %v6333_v51  ;;  %2057 = vmatpush.msra.mxu1 %v6348_v7  ;;  %v6351_v51 = vld [vmem:[#allocation10 + $0x10] sm:$0xff] }
 0x300   :  { %8222 = vst [vmem:[#allocation105_spill] sm:$0xff] %v6336_v33  ;;  %2077 = vmatpush.msrb.mxu2 %v6351_v51  ;;  %v6354_v33 = vld [vmem:[#allocation10 + $0x18] sm:$0xff] }
 0x301   :  { %8223 = vst [vmem:[#allocation106_spill] sm:$0xff] %v6339_v12  ;;  %2097 = vmatpush.msrb.mxu3 %v6354_v33  ;;  %v6357_v12 = vld [vmem:[#allocation12 + $0x1e0] sm:$0xff] }
 0x302   :  { %8224 = vst [vmem:[#allocation107_spill] sm:$0xff] %v6342_v4  ;;  %2110 = vmatpush.msrb.mxu0 %v6357_v12  ;;  %v6360_v4 = vld [vmem:[#allocation12 + $0x1e8] sm:$0xff] }
 0x303   :  { %8225 = vst [vmem:[#allocation108_spill] sm:$0xff] %v6345_v50  ;;  %2130 = vmatpush.msrb.mxu1 %v6360_v4  ;;  %v6363_v50 = vld [vmem:[#allocation12 + $0x1f0] sm:$0xff] }
 0x304   :  { %8226 = vst [vmem:[#allocation109_spill] sm:$0xff] %v6348_v7  ;;  %2150 = vmatpush.msra.mxu2 %v6363_v50  ;;  %v6366_v7 = vld [vmem:[#allocation12 + $0x1f8] sm:$0xff] }
 0x305   :  { %8227 = vst [vmem:[#allocation110_spill] sm:$0xff] %v6351_v51  ;;  %2170 = vmatpush.msra.mxu3 %v6366_v7  ;;  %v6369_v51 = vld [vmem:[#allocation12 + $0x1c0] sm:$0xff] }
 0x306   :  { %8228 = vst [vmem:[#allocation111_spill] sm:$0xff] %v6354_v33  ;;  %2111 = vmatpush.msrb.mxu0 %v6369_v51  ;;  %v6372_v33 = vld [vmem:[#allocation12 + $0x1c8] sm:$0xff] }
 0x307   :  { %8229 = vst [vmem:[#allocation112_spill] sm:$0xff] %v6357_v12  ;;  %2131 = vmatpush.msrb.mxu1 %v6372_v33  ;;  %v6375_v12 = vld [vmem:[#allocation12 + $0x1d0] sm:$0xff] }
 0x308   :  { %8230 = vst [vmem:[#allocation113_spill] sm:$0xff] %v6360_v4  ;;  %2151 = vmatpush.msra.mxu2 %v6375_v12  ;;  %v6378_v4 = vld [vmem:[#allocation12 + $0x1d8] sm:$0xff] }
 0x309   :  { %8231 = vst [vmem:[#allocation114_spill] sm:$0xff] %v6363_v50  ;;  %2171 = vmatpush.msra.mxu3 %v6378_v4  ;;  %v6381_v50 = vld [vmem:[#allocation12 + $0x1a0] sm:$0xff] }
 0x30a   :  { %8232 = vst [vmem:[#allocation115_spill] sm:$0xff] %v6366_v7  ;;  %2112 = vmatpush.msrb.mxu0 %v6381_v50  ;;  %v6384_v7 = vld [vmem:[#allocation12 + $0x1a8] sm:$0xff] }
 0x30b   :  { %8233 = vst [vmem:[#allocation116_spill] sm:$0xff] %v6369_v51  ;;  %2132 = vmatpush.msrb.mxu1 %v6384_v7  ;;  %v6387_v51 = vld [vmem:[#allocation12 + $0x1b0] sm:$0xff] }
 0x30c   :  { %8234 = vst [vmem:[#allocation117_spill] sm:$0xff] %v6372_v33  ;;  %2152 = vmatpush.msra.mxu2 %v6387_v51  ;;  %v6390_v33 = vld [vmem:[#allocation12 + $0x1b8] sm:$0xff] }
 0x30d   :  { %8235 = vst [vmem:[#allocation118_spill] sm:$0xff] %v6375_v12  ;;  %2172 = vmatpush.msra.mxu3 %v6390_v33  ;;  %v6393_v12 = vld [vmem:[#allocation12 + $0x180] sm:$0xff] }
 0x30e   :  { %8236 = vst [vmem:[#allocation119_spill] sm:$0xff] %v6378_v4  ;;  %2113 = vmatpush.msrb.mxu0 %v6393_v12  ;;  %v6396_v4 = vld [vmem:[#allocation12 + $0x188] sm:$0xff] }
 0x30f   :  { %8237 = vst [vmem:[#allocation120_spill] sm:$0xff] %v6381_v50  ;;  %2133 = vmatpush.msrb.mxu1 %v6396_v4  ;;  %v6399_v50 = vld [vmem:[#allocation12 + $0x190] sm:$0xff] }
 0x310   :  { %8238 = vst [vmem:[#allocation121_spill] sm:$0xff] %v6384_v7  ;;  %2153 = vmatpush.msra.mxu2 %v6399_v50  ;;  %v6402_v7 = vld [vmem:[#allocation12 + $0x198] sm:$0xff] }
 0x311   :  { %8239 = vst [vmem:[#allocation122_spill] sm:$0xff] %v6387_v51  ;;  %2173 = vmatpush.msra.mxu3 %v6402_v7  ;;  %v6405_v51 = vld [vmem:[#allocation12 + $0x160] sm:$0xff] }
 0x312   :  { %8240 = vst [vmem:[#allocation123_spill] sm:$0xff] %v6390_v33  ;;  %2114 = vmatpush.msrb.mxu0 %v6405_v51  ;;  %v6408_v33 = vld [vmem:[#allocation12 + $0x168] sm:$0xff] }
 0x313   :  { %8241 = vst [vmem:[#allocation124_spill] sm:$0xff] %v6393_v12  ;;  %2134 = vmatpush.msrb.mxu1 %v6408_v33  ;;  %v6411_v12 = vld [vmem:[#allocation12 + $0x170] sm:$0xff] }
 0x314   :  { %8242 = vst [vmem:[#allocation125_spill] sm:$0xff] %v6396_v4  ;;  %2154 = vmatpush.msra.mxu2 %v6411_v12  ;;  %v6414_v4 = vld [vmem:[#allocation12 + $0x178] sm:$0xff] }
 0x315   :  { %8243 = vst [vmem:[#allocation126_spill] sm:$0xff] %v6399_v50  ;;  %2174 = vmatpush.msra.mxu3 %v6414_v4  ;;  %v6417_v50 = vld [vmem:[#allocation12 + $0x140] sm:$0xff] }
 0x316   :  { %8244 = vst [vmem:[#allocation127_spill] sm:$0xff] %v6402_v7  ;;  %2115 = vmatpush.msrb.mxu0 %v6417_v50  ;;  %v6420_v7 = vld [vmem:[#allocation12 + $0x148] sm:$0xff] }
 0x317   :  { %8245 = vst [vmem:[#allocation128_spill] sm:$0xff] %v6405_v51  ;;  %2135 = vmatpush.msrb.mxu1 %v6420_v7  ;;  %v6423_v51 = vld [vmem:[#allocation12 + $0x150] sm:$0xff] }
 0x318   :  { %8246 = vst [vmem:[#allocation129_spill] sm:$0xff] %v6408_v33  ;;  %2155 = vmatpush.msra.mxu2 %v6423_v51  ;;  %v6426_v33 = vld [vmem:[#allocation12 + $0x158] sm:$0xff] }
 0x319   :  { %8247 = vst [vmem:[#allocation130_spill] sm:$0xff] %v6411_v12  ;;  %2175 = vmatpush.msra.mxu3 %v6426_v33  ;;  %v6429_v12 = vld [vmem:[#allocation12 + $0x120] sm:$0xff] }
 0x31a   :  { %8248 = vst [vmem:[#allocation131_spill] sm:$0xff] %v6414_v4  ;;  %2116 = vmatpush.msrb.mxu0 %v6429_v12  ;;  %v6432_v4 = vld [vmem:[#allocation12 + $0x128] sm:$0xff] }
 0x31b   :  { %8249 = vst [vmem:[#allocation132_spill] sm:$0xff] %v6417_v50  ;;  %2136 = vmatpush.msrb.mxu1 %v6432_v4  ;;  %v6435_v50 = vld [vmem:[#allocation12 + $0x130] sm:$0xff] }
 0x31c   :  { %8250 = vst [vmem:[#allocation133_spill] sm:$0xff] %v6420_v7  ;;  %2156 = vmatpush.msra.mxu2 %v6435_v50  ;;  %v6438_v7 = vld [vmem:[#allocation12 + $0x138] sm:$0xff] }
 0x31d   :  { %8251 = vst [vmem:[#allocation134_spill] sm:$0xff] %v6423_v51  ;;  %2176 = vmatpush.msra.mxu3 %v6438_v7  ;;  %v6441_v51 = vld [vmem:[#allocation12 + $0x100] sm:$0xff] }
 0x31e   :  { %8252 = vst [vmem:[#allocation135_spill] sm:$0xff] %v6426_v33  ;;  %2117 = vmatpush.msrb.mxu0 %v6441_v51  ;;  %v6444_v33 = vld [vmem:[#allocation12 + $0x108] sm:$0xff]  ;;  %2157 = vmatpush.msra.mxu2 %v6002_v41  ;;  %v6465_v41 = vld [vmem:[#allocation12 + $0xa0] sm:$0xff] }
 0x31f   :  { %8253 = vst [vmem:[#allocation136_spill] sm:$0xff] %v6432_v4  ;;  %2137 = vmatpush.msrb.mxu1 %v6444_v33  ;;  %2177 = vmatpush.msra.mxu3 %v6005_v9  ;;  %v6449_v4 = vld [vmem:[#allocation12 + $0xe0] sm:$0xff]  ;;  %v6468_v9 = vld [vmem:[#allocation12 + $0xa8] sm:$0xff] }
 0x320   :  { %8254 = vst [vmem:[#allocation137_spill] sm:$0xff] %v6435_v50  ;;  %2118 = vmatpush.msrb.mxu0 %v6449_v4  ;;  %v6452_v50 = vld [vmem:[#allocation12 + $0xe8] sm:$0xff]  ;;  %2158 = vmatpush.msra.mxu2 %v6010_v42  ;;  %v6473_v42 = vld [vmem:[#allocation12 + $0x80] sm:$0xff] }
 0x321   :  { %8255 = vst [vmem:[#allocation138_spill] sm:$0xff] %v6438_v7  ;;  %2138 = vmatpush.msrb.mxu1 %v6452_v50  ;;  %2178 = vmatpush.msra.mxu3 %v6013_v16  ;;  %v6476_v16 = vld [vmem:[#allocation12 + $0x88] sm:$0xff] }
 0x322   :  { %8256 = vst [vmem:[#allocation139_spill] sm:$0xff] %v6441_v51  ;;  %v6457_v51 = vld [vmem:[#allocation12 + $0xc0] sm:$0xff]  ;;  %2159 = vmatpush.msra.mxu2 %v6018_v30 }
 0x323   :  { %8257 = vst [vmem:[#allocation140_spill] sm:$0xff] %v6444_v33  ;;  %2119 = vmatpush.msrb.mxu0 %v6457_v51  ;;  %v6460_v33 = vld [vmem:[#allocation12 + $0xc8] sm:$0xff]  ;;  %2179 = vmatpush.msra.mxu3 %v6021_v44  ;;  %v6481_v30 = vld [vmem:[#allocation12 + $0x60] sm:$0xff] }
 0x324   :  { %8258 = vst [vmem:[#allocation141_spill] sm:$0xff] %v6449_v4  ;;  %2139 = vmatpush.msrb.mxu1 %v6460_v33  ;;  %2160 = vmatpush.msra.mxu2 %v6026_v43  ;;  %v6484_v44 = vld [vmem:[#allocation12 + $0x68] sm:$0xff]  ;;  %v6489_v43 = vld [vmem:[#allocation12 + $0x40] sm:$0xff]  ;;  %v8281_v4 = vld [vmem:[#allocation52_spill] sm:$0xff] }
 0x325   :  { %8259 = vst [vmem:[#allocation142_spill] sm:$0xff] %v6452_v50  ;;  %2120 = vmatpush.msrb.mxu0 %v6465_v41  ;;  %2180 = vmatpush.msra.mxu3 %v6029_v48  ;;  %v6492_v48 = vld [vmem:[#allocation12 + $0x48] sm:$0xff] }
 0x326   :  { %8260 = vst [vmem:[#allocation143_spill] sm:$0xff] %v6457_v51  ;;  %2140 = vmatpush.msrb.mxu1 %v6468_v9  ;;  %2161 = vmatpush.msra.mxu2 %v6034_v53  ;;  %v6497_v53 = vld [vmem:[#allocation12 + $0x20] sm:$0xff] }
 0x327   :  { %8261 = vst [vmem:[#allocation144_spill] sm:$0xff] %v6460_v33  ;;  %2121 = vmatpush.msrb.mxu0 %v6473_v42  ;;  %2181 = vmatpush.msra.mxu3 %v6037_v26  ;;  %v6500_v26 = vld [vmem:[#allocation12 + $0x28] sm:$0xff] }
 0x328   :  { %8262 = vst [vmem:[#allocation145_spill] sm:$0xff] %v6465_v41  ;;  %2141 = vmatpush.msrb.mxu1 %v6476_v16  ;;  %2162 = vmatpush.msra.mxu2 %v6042_v47  ;;  %v6505_v47 = vld [vmem:[#allocation12] sm:$0xff] }
 0x329   :  { %8263 = vst [vmem:[#allocation146_spill] sm:$0xff] %v6468_v9  ;;  %2122 = vmatpush.msrb.mxu0 %v6481_v30  ;;  %2182 = vmatpush.msra.mxu3 %v6045_v29  ;;  %v6508_v29 = vld [vmem:[#allocation12 + $0x8] sm:$0xff] }
 0x32a   :  { %8264 = vst [vmem:[#allocation147_spill] sm:$0xff] %v6473_v42  ;;  %2142 = vmatpush.msrb.mxu1 %v6484_v44  ;;  %2163 = vmatpush.msra.mxu2 %v6050_v60  ;;  %v8274_v60 = vld [vmem:[#allocation72_spill] sm:$0xff] }
 0x32b   :  { %8265 = vst [vmem:[#allocation148_spill] sm:$0xff] %v6476_v16  ;;  %2123 = vmatpush.msrb.mxu0 %v6489_v43  ;;  %2183 = vmatpush.msra.mxu3 %v6053_v40  ;;  %v261_v40 = vadd.f32 %v8274_v60, %v8177_v14  ;;  %v8278_v60 = vld [vmem:[#allocation35_spill] sm:$0xff] }
 0x32c   :  { %8266 = vst [vmem:[#allocation149_spill] sm:$0xff] %v6481_v30  ;;  %2143 = vmatpush.msrb.mxu1 %v6492_v48  ;;  %2164 = vmatpush.msra.mxu2 %v6058_v38  ;;  %v8276_v30 = vld [vmem:[#allocation25_spill] sm:$0xff]  ;;  %v469_v14 = vadd.f32 %v8278_v60, %v8185_v45 }
 0x32d   :  { %8267 = vst [vmem:[#allocation150_spill] sm:$0xff] %v6484_v44  ;;  %2124 = vmatpush.msrb.mxu0 %v6497_v53  ;;  %2184 = vmatpush.msra.mxu3 %v6061_v1 }
 0x32e   :  { %8268 = vst [vmem:[#allocation151_spill] sm:$0xff] %v6489_v43  ;;  %2144 = vmatpush.msrb.mxu1 %v6500_v26  ;;  %2165 = vmatpush.msra.mxu2 %v6066_v10 }
 0x32f   :  { %8269 = vst [vmem:[#allocation152_spill] sm:$0xff] %v6492_v48  ;;  %2125 = vmatpush.msrb.mxu0 %v6505_v47  ;;  %2185 = vmatpush.msra.mxu3 %v6069_v55  ;;  %v8277_v55 = vld [vmem:[#allocation43_spill] sm:$0xff] }
 0x330   :  { %8270 = vst [vmem:[#allocation153_spill] sm:$0xff] %v6497_v53  ;;  %2145 = vmatpush.msrb.mxu1 %v6508_v29  ;;  %v428_v42 = vadd.f32 %v8277_v55, %v8183_v23 }
 0x331   :  { %8271 = vst [vmem:[#allocation70_spill] sm:$0xff] %v6500_v26  ;;  %v8275_v26 = vld [vmem:[#allocation73_spill] sm:$0xff] }
 0x332   :  { %8272 = vst [vmem:[#allocation71_spill] sm:$0xff] %v6505_v47  ;;  %v302_v38 = vadd.f32 %v8275_v26, %v8179_v2 }
 0x333   :  { %8273 = vst [vmem:[#allocation24_spill] sm:$0xff] %v6508_v29  ;;  %v384_v29 = vadd.f32 %v8276_v30, %v8181_v27 }
 0x355   :  { %v1726_v53 = vpop.f32.mrf.mxu0  ;;  %v1746_v1 = vpop.f32.mrf.mxu1 }
 0x356   :  { %v1789_v48 = vadd.f32 %v1726_v53, %v261_v40  ;;  %v1790_v43 = vadd.f32 %v1746_v1, %v302_v38  ;;  %v8279_v1 = vld [vmem:[#allocation22_spill] sm:$0xff] }
 0x358   :  { %v3582_v44 = vmul.f32 -1.442695, %v1789_v48  ;;  %v3583_v47 = vmul.f32 -1.442695, %v1790_v43 }
 0x35a   :  { %3739 = vpow2.f32 %v3582_v44 }
 0x35b   :  { %3741 = vpow2.f32 %v3583_v47 }
 0x35c   :  { %v1786_v10 = vpop.f32.mrf.mxu3  ;;  %v1766_v30 = vpop.f32.mrf.mxu2 }
 0x35d   :  { %v1792_v16 = vadd.f32 %v1786_v10, %v384_v29  ;;  %v343_v10 = vadd.f32 %v8279_v1, %v8187_v61 }
 0x35f   :  { %v3584_v26 = vmul.f32 -1.442695, %v1792_v16  ;;  %v1791_v60 = vadd.f32 %v1766_v30, %v343_v10 }
 0x360   :  { %v3740_v2 = vpop.eup %3739  ;;  %v1817_v9 = vpop.f32.mrf.mxu0 }
 0x361   :  { %v1837_v53 = vpop.f32.mrf.mxu1  ;;  %v3742_v40 = vpop.eup %3741  ;;  %v1887_v48 = vadd.f32 1.0, %v3740_v2  ;;  %3743 = vpow2.f32 %v3584_v26  ;;  %v1880_v44 = vadd.f32 %v1817_v9, %v428_v42  ;;  %v8280_v2 = vld [vmem:[#allocation56_spill] sm:$0xff] }
 0x362   :  { %v1881_v43 = vadd.f32 %v1837_v53, %v469_v14  ;;  %v1906_v38 = vadd.f32 1.0, %v3742_v40 }
 0x363   :  { %3745 = vrcp.f32 %v1887_v48  ;;  %v3585_v47 = vmul.f32 -1.442695, %v1880_v44  ;;  %v1899_v23 = vand.u32 2147483648, %v1887_v48  ;;  %vm1893_vm12 = vweird.f32 %v1887_v48 }
 0x364   :  { %3747 = vrcp.f32 %v1906_v38  ;;  %v3586_v29 = vmul.f32 -1.442695, %v1881_v43  ;;  %v1918_v61 = vand.u32 2147483648, %v1906_v38  ;;  %vm1912_vm11 = vweird.f32 %v1906_v38 }
 0x365   :  { %3749 = vpow2.f32 %v3585_v47  ;;  %v1897_v47 = vand.u32 2147483647, %v1887_v48 }
 0x366   :  { %3751 = vpow2.f32 %v3586_v29 }
 0x367   :  { %v3744_v55 = vpop.eup %3743  ;;  %v1877_v16 = vpop.f32.mrf.mxu3  ;;  %vm1898_vm15 = vcmp.eq.f32.partialorder %v1897_v47, 8.507059e+37 }
 0x368   :  { %v6525_v45 = vadd.f32 1.0, %v3744_v55  ;;  %v1883_v26 = vadd.f32 %v1877_v16, %v8280_v2  ;;  %v1916_v16 = vand.u32 2147483647, %v1906_v38 }
 0x369   :  { %v3746_v9 = vpop.eup %3745 }
 0x36a   :  { %v3748_v14 = vpop.eup %3747  ;;  %v1889_v42 = vmul.f32 %v3746_v9, %v1887_v48  ;;  %3753 = vrcp.f32 %v6525_v45  ;;  %v3587_v44 = vmul.f32 -1.442695, %v1883_v26  ;;  %vm1894_vm9 = vweird.f32 %v3746_v9  ;;  %v1857_v48 = vpop.f32.mrf.mxu2 }
 0x36b   :  { %v1908_v53 = vmul.f32 %v3748_v14, %v1906_v38  ;;  %3755 = vtanh.f32 %v1791_v60  ;;  %v3750_v43 = vpop.eup %3749  ;;  %vm1913_vm10 = vweird.f32 %v3748_v14  ;;  %vm1895_vm13 = vmor %vm1893_vm12, %vm1894_vm9  ;;  %v1900_v26 = vor.u32 1.1754944e-38, %v1899_v23 }
 0x36c   :  { %v1890_v40 = vsub.f32 1.0, %v1889_v42  ;;  %v3752_v30 = vpop.eup %3751  ;;  %v6529_v29 = vadd.f32 1.0, %v3750_v43  ;;  %3757 = vpow2.f32 %v3587_v44  ;;  %vm1914_vm14 = vmor %vm1912_vm11, %vm1913_vm10  ;;  %v1919_v44 = vor.u32 1.1754944e-38, %v1918_v61 }
 0x36d   :  { %v1909_v1 = vsub.f32 1.0, %v1908_v53  ;;  %v6531_v2 = vadd.f32 1.0, %v3752_v30  ;;  %vm1917_vm0 = vcmp.eq.f32.partialorder %v1916_v16, 8.507059e+37  ;;  %v1882_v7 = vadd.f32 %v1857_v48, %v8281_v4 }
 0x36e   :  { %v1891_v10 = vmul.f32 %v3746_v9, %v1890_v40  ;;  %3759 = vrcp.f32 %v6529_v29  ;;  %vm1932_vm1 = vweird.f32 %v6525_v45  ;;  %vm1956_vm7 = vweird.f32 %v6529_v29 }
 0x36f   :  { %v1910_v55 = vmul.f32 %v3748_v14, %v1909_v1  ;;  %3761 = vrcp.f32 %v6531_v2  ;;  %vm1975_vm6 = vweird.f32 %v6531_v2 }
 0x370   :  { %v6533_v27 = vpop.eup %3753  ;;  %v1892_v60 = vadd.f32 %v3746_v9, %v1891_v10 }
 0x371   :  { %v1911_v42 = vadd.f32 %v3748_v14, %v1910_v55  ;;  %v1928_v53 = vmul.f32 %v6533_v27, %v6525_v45  ;;  %v3756_v40 = vpop.eup %3755  ;;  %vm1933_vm2 = vweird.f32 %v6533_v27 }
 0x372   :  { %v1896_v43 = vsel %vm1895_vm13, %v3746_v9, %v1892_v60  ;;  %v3758_v10 = vpop.eup %3757  ;;  %v1960_v60 = vand.u32 2147483647, %v6529_v29  ;;  %vm6557_vm3 = vmor %vm1932_vm1, %vm1933_vm2 }
 0x373   :  { %v1901_v1 = vsel %vm1898_vm15, %v1900_v26, %v1896_v43  ;;  %v1915_v30 = vsel %vm1914_vm14, %v3748_v14, %v1911_v42  ;;  %v1929_v38 = vsub.f32 1.0, %v1928_v53  ;;  %v6541_v51 = vadd.f32 1.0, %v3758_v10  ;;  %v8314_v42 = vld [vmem:[#allocation108_spill] sm:$0xff] }
 0x374   :  { %v1920_v41 = vsel %vm1917_vm0, %v1919_v44, %v1915_v30  ;;  %v1943_v33 = vmul.f32 %v3756_v40, %v1901_v1  ;;  %v3760_v50 = vpop.eup %3759  ;;  %v1962_v26 = vand.u32 2147483648, %v6529_v29  ;;  %v1981_v53 = vand.u32 2147483648, %v6531_v2 }
 0x375   :  { %v1942_v23 = vmul.f32 %v1920_v41, %v6108_v37  ;;  %v1930_v55 = vmul.f32 %v6533_v27, %v1929_v38  ;;  %v3762_v61 = vpop.eup %3761  ;;  %v1952_v14 = vmul.f32 %v3760_v50, %v6529_v29  ;;  %3763 = vrcp.f32 %v6541_v51 }
 0x376   :  { %v1938_v37 = vand.u32 2147483648, %v6525_v45  ;;  %v1971_v41 = vmul.f32 %v3762_v61, %v6531_v2  ;;  %vm1957_vm4 = vweird.f32 %v3760_v50  ;;  %v1979_v44 = vand.u32 2147483647, %v6531_v2 }
 0x377   :  { %v6544_v9 = vadd.f32 %v1943_v33, %v1942_v23  ;;  %v1953_v47 = vsub.f32 1.0, %v1952_v14  ;;  %v1931_v4 = vadd.f32 %v6533_v27, %v1930_v55  ;;  %v1936_v33 = vand.u32 2147483647, %v6525_v45  ;;  %vm1958_vm9 = vmor %vm1956_vm7, %vm1957_vm4 }
 0x378   :  { %v1972_v16 = vsub.f32 1.0, %v1971_v41  ;;  %v1939_v43 = vor.u32 1.1754944e-38, %v1938_v37  ;;  %vm1976_vm5 = vweird.f32 %v3762_v61  ;;  %vm1961_vm10 = vcmp.eq.f32.partialorder %v1960_v60, 8.507059e+37 }
 0x379   :  { %3765 = vtanh.f32 %v6544_v9  ;;  %v1954_v40 = vmul.f32 %v3760_v50, %v1953_v47  ;;  %v1935_v45 = vsel %vm6557_vm3, %v6533_v27, %v1931_v4  ;;  %vm1937_vm8 = vcmp.eq.f32.partialorder %v1936_v33, 8.507059e+37  ;;  %vm1977_vm11 = vmor %vm1975_vm6, %vm1976_vm5 }
 0x37a   :  { %3767 = vtanh.f32 %v1882_v7  ;;  %v1973_v1 = vmul.f32 %v3762_v61, %v1972_v16  ;;  %v1963_v38 = vor.u32 1.1754944e-38, %v1962_v26  ;;  %v1982_v55 = vor.u32 1.1754944e-38, %v1981_v53  ;;  %v8313_v26 = vld [vmem:[#allocation107_spill] sm:$0xff]  ;;  %v8315_v53 = vld [vmem:[#allocation109_spill] sm:$0xff] }
 0x37b   :  { %v3764_v30 = vpop.eup %3763  ;;  %v1955_v7 = vadd.f32 %v3760_v50, %v1954_v40  ;;  %vm1980_vm12 = vcmp.eq.f32.partialorder %v1979_v44, 8.507059e+37  ;;  %v1940_v37 = vsel %vm1937_vm8, %v1939_v43, %v1935_v45  ;;  %vm1995_vm14 = vweird.f32 %v6541_v51  ;;  %v8316_v40 = vld [vmem:[#allocation110_spill] sm:$0xff]  ;;  %v8317_v44 = vld [vmem:[#allocation111_spill] sm:$0xff]  ;;  %v8318_v43 = vld [vmem:[#allocation112_spill] sm:$0xff] }
 0x37c   :  { %v1974_v48 = vadd.f32 %v3762_v61, %v1973_v1  ;;  %v1991_v10 = vmul.f32 %v3764_v30, %v6541_v51  ;;  %vm1996_vm13 = vweird.f32 %v3764_v30  ;;  %v8319_v1 = vld [vmem:[#allocation113_spill] sm:$0xff]  ;;  %v8320_v45 = vld [vmem:[#allocation114_spill] sm:$0xff] }
 0x37d   :  { %v1959_v14 = vsel %vm1958_vm9, %v3760_v50, %v1955_v7  ;;  %vm1997_vm15 = vmor %vm1995_vm14, %vm1996_vm13  ;;  %v8322_v7 = vld [vmem:[#allocation116_spill] sm:$0xff] }
 0x37e   :  { %v1964_v41 = vsel %vm1961_vm10, %v1963_v38, %v1959_v14  ;;  %v1978_v47 = vsel %vm1977_vm11, %v3762_v61, %v1974_v48  ;;  %v1992_v2 = vsub.f32 1.0, %v1991_v10  ;;  %v8323_v38 = vld [vmem:[#allocation117_spill] sm:$0xff]  ;;  %v8324_v48 = vld [vmem:[#allocation118_spill] sm:$0xff]  ;;  %v8325_v10 = vld [vmem:[#allocation119_spill] sm:$0xff] }
 0x37f   :  { %v3766_v23 = vpop.eup %3765  ;;  %v1983_v29 = vsel %vm1980_vm12, %v1982_v55, %v1978_v47  ;;  %v8327_v55 = vld [vmem:[#allocation121_spill] sm:$0xff]  ;;  %v8328_v14 = vld [vmem:[#allocation122_spill] sm:$0xff] }
 0x380   :  { %v3768_v27 = vpop.eup %3767  ;;  %v6569_v4 = vmul.f32 %v3766_v23, %v1940_v37  ;;  %v2005_v16 = vmul.f32 %v1983_v29, %v6138_v20  ;;  %v1993_v60 = vmul.f32 %v3764_v30, %v1992_v2  ;;  %v2001_v20 = vand.u32 2147483648, %v6541_v51  ;;  %v8326_v23 = vld [vmem:[#allocation120_spill] sm:$0xff]  ;;  %v8329_v37 = vld [vmem:[#allocation123_spill] sm:$0xff]  ;;  %v8332_v47 = vld [vmem:[#allocation126_spill] sm:$0xff] }
 0x381   :  { %v2006_v33 = vmul.f32 %v3768_v27, %v1964_v41  ;;  %v8330_v27 = vld [vmem:[#allocation124_spill] sm:$0xff]  ;;  %v8331_v41 = vld [vmem:[#allocation125_spill] sm:$0xff]  ;;  %v8333_v2 = vld [vmem:[#allocation127_spill] sm:$0xff] }
 0x382   :  { %8284 = vst [vmem:[#allocation48_spill] sm:$0xff] %v6569_v4  ;;  %2038 = vmatmul.f32.vlgmr.msra.gmra.mxu0 %v6569_v4  ;;  %2058 = vmatmul.f32.vlgmr.msra.gmra.mxu1 %v6569_v4  ;;  %v1994_v61 = vadd.f32 %v3764_v30, %v1993_v60  ;;  %v8334_v29 = vld [vmem:[#allocation128_spill] sm:$0xff]  ;;  %v8337_v60 = vld [vmem:[#allocation131_spill] sm:$0xff] }
 0x383   :  { %2078 = vmatmul.f32.vlgmr.msrb.gmra.mxu2 %v6569_v4  ;;  %2098 = vmatmul.f32.vlgmr.msrb.gmra.mxu3 %v6569_v4  ;;  %v6576_v50 = vadd.f32 %v2006_v33, %v2005_v16  ;;  %v8335_v33 = vld [vmem:[#allocation129_spill] sm:$0xff]  ;;  %v8336_v16 = vld [vmem:[#allocation130_spill] sm:$0xff] }
 0x384   :  { %2326 = vmatpush.msra.mxu0 %v6148_v34  ;;  %2346 = vmatpush.msra.mxu1 %v6151_v24  ;;  %v1999_v34 = vand.u32 2147483647, %v6541_v51  ;;  %v1998_v24 = vsel %vm1997_vm15, %v3764_v30, %v1994_v61  ;;  %v8312_v51 = vld [vmem:[#allocation106_spill] sm:$0xff]  ;;  %v8321_v30 = vld [vmem:[#allocation115_spill] sm:$0xff]  ;;  %v8338_v61 = vld [vmem:[#allocation132_spill] sm:$0xff] }
 0x385   :  { %2366 = vmatpush.msrb.mxu2 %v6156_v52  ;;  %2386 = vmatpush.msrb.mxu3 %v6159_v49  ;;  %3769 = vtanh.f32 %v6576_v50  ;;  %v2002_v52 = vor.u32 1.1754944e-38, %v2001_v20  ;;  %v8339_v20 = vld [vmem:[#allocation133_spill] sm:$0xff]  ;;  %v6946_v4 = vld [vmem:[#allocation10 + $0xc8] sm:$0xff] }
 0x386   :  { %2327 = vmatpush.msra.mxu0 %v6168_v56  ;;  %2347 = vmatpush.msra.mxu1 %v6171_v11  ;;  %vm2000_vm0 = vcmp.eq.f32.partialorder %v1999_v34, 8.507059e+37  ;;  %v8340_v34 = vld [vmem:[#allocation134_spill] sm:$0xff]  ;;  %8388 = vst [vmem:[#allocation35_spill] sm:$0xff] %v6946_v4 }
 0x387   :  { %2367 = vmatpush.msrb.mxu2 %v6177_v32  ;;  %2387 = vmatpush.msrb.mxu3 %v6180_v57  ;;  %v2003_v56 = vsel %vm2000_vm0, %v2002_v52, %v1998_v24  ;;  %v8286_v32 = vld [vmem:[#allocation67_spill] sm:$0xff]  ;;  %v8287_v57 = vld [vmem:[#allocation69_spill] sm:$0xff]  ;;  %v8342_v52 = vld [vmem:[#allocation136_spill] sm:$0xff] }
 0x388   :  { %2328 = vmatpush.msra.mxu0 %v6183_v46  ;;  %2348 = vmatpush.msra.mxu1 %v6186_v28  ;;  %v8288_v46 = vld [vmem:[#allocation74_spill] sm:$0xff]  ;;  %v8289_v28 = vld [vmem:[#allocation77_spill] sm:$0xff]  ;;  %v8341_v24 = vld [vmem:[#allocation135_spill] sm:$0xff] }
 0x389   :  { %2368 = vmatpush.msrb.mxu2 %v6189_v17  ;;  %2388 = vmatpush.msrb.mxu3 %v6192_v15  ;;  %v8290_v17 = vld [vmem:[#allocation84_spill] sm:$0xff]  ;;  %v8291_v15 = vld [vmem:[#allocation85_spill] sm:$0xff] }
 0x38a   :  { %2329 = vmatpush.msra.mxu0 %v6195_v36  ;;  %2349 = vmatpush.msra.mxu1 %v6198_v21  ;;  %v8292_v36 = vld [vmem:[#allocation86_spill] sm:$0xff]  ;;  %v8293_v21 = vld [vmem:[#allocation87_spill] sm:$0xff] }
 0x38b   :  { %2369 = vmatpush.msrb.mxu2 %v6203_v19  ;;  %2389 = vmatpush.msrb.mxu3 %v6206_v62  ;;  %v3770_v49 = vpop.eup %3769  ;;  %v8294_v19 = vld [vmem:[#allocation88_spill] sm:$0xff]  ;;  %v8295_v62 = vld [vmem:[#allocation89_spill] sm:$0xff] }
 0x38c   :  { %2330 = vmatpush.msra.mxu0 %v6209_v63  ;;  %2350 = vmatpush.msra.mxu1 %v6212_v31  ;;  %v6600_v11 = vmul.f32 %v3770_v49, %v2003_v56  ;;  %v8296_v63 = vld [vmem:[#allocation90_spill] sm:$0xff]  ;;  %v8297_v31 = vld [vmem:[#allocation91_spill] sm:$0xff]  ;;  %v8343_v49 = vld [vmem:[#allocation137_spill] sm:$0xff] }
 0x38d   :  { %2370 = vmatpush.msrb.mxu2 %v6219_v39  ;;  %2390 = vmatpush.msrb.mxu3 %v6222_v54  ;;  %v8298_v39 = vld [vmem:[#allocation92_spill] sm:$0xff]  ;;  %v8299_v54 = vld [vmem:[#allocation93_spill] sm:$0xff]  ;;  %v8344_v56 = vld [vmem:[#allocation138_spill] sm:$0xff] }
 0x38e   :  { %8285 = vst [vmem:[#allocation38_spill] sm:$0xff] %v6600_v11  ;;  %2331 = vmatpush.msra.mxu0 %v6225_v58  ;;  %2351 = vmatpush.msra.mxu1 %v6228_v8  ;;  %v8300_v58 = vld [vmem:[#allocation94_spill] sm:$0xff]  ;;  %v8301_v8 = vld [vmem:[#allocation95_spill] sm:$0xff] }
 0x38f   :  { %2126 = vmatmul.f32.vlgmr.msrb.gmra.mxu0 %v6600_v11  ;;  %2146 = vmatmul.f32.vlgmr.msrb.gmra.mxu1 %v6600_v11 }
 0x390   :  { %2166 = vmatmul.f32.vlgmr.msra.gmra.mxu2 %v6600_v11  ;;  %2186 = vmatmul.f32.vlgmr.msra.gmra.mxu3 %v6600_v11  ;;  %v6937_v11 = vld [vmem:[#allocation10 + $0xf0] sm:$0xff] }
 0x391   :  { %2371 = vmatpush.msrb.mxu2 %v6231_v18  ;;  %2391 = vmatpush.msrb.mxu3 %v6234_v3  ;;  %v8302_v18 = vld [vmem:[#allocation96_spill] sm:$0xff]  ;;  %v8303_v3 = vld [vmem:[#allocation97_spill] sm:$0xff]  ;;  %8385 = vst [vmem:[#allocation73_spill] sm:$0xff] %v6937_v11 }
 0x392   :  { %2332 = vmatpush.msra.mxu0 %v6237_v22  ;;  %2352 = vmatpush.msra.mxu1 %v6240_v5  ;;  %v8304_v22 = vld [vmem:[#allocation98_spill] sm:$0xff]  ;;  %v8305_v5 = vld [vmem:[#allocation99_spill] sm:$0xff] }
 0x393   :  { %2372 = vmatpush.msrb.mxu2 %v6243_v35  ;;  %2392 = vmatpush.msrb.mxu3 %v6246_v6  ;;  %v8306_v35 = vld [vmem:[#allocation100_spill] sm:$0xff]  ;;  %v8307_v6 = vld [vmem:[#allocation101_spill] sm:$0xff] }
 0x394   :  { %2333 = vmatpush.msra.mxu0 %v6249_v25  ;;  %2353 = vmatpush.msra.mxu1 %v6252_v0  ;;  %v8308_v25 = vld [vmem:[#allocation102_spill] sm:$0xff]  ;;  %v8309_v0 = vld [vmem:[#allocation103_spill] sm:$0xff] }
 0x395   :  { %2373 = vmatpush.msrb.mxu2 %v6255_v13  ;;  %2393 = vmatpush.msrb.mxu3 %v6258_v59  ;;  %v8310_v13 = vld [vmem:[#allocation104_spill] sm:$0xff]  ;;  %v8311_v59 = vld [vmem:[#allocation105_spill] sm:$0xff] }
 0x396   :  { %2334 = vmatpush.msra.mxu0 %v8286_v32  ;;  %2354 = vmatpush.msra.mxu1 %v8287_v57  ;;  %v8345_v32 = vld [vmem:[#allocation139_spill] sm:$0xff]  ;;  %v8346_v57 = vld [vmem:[#allocation140_spill] sm:$0xff] }
 0x397   :  { %2374 = vmatpush.msrb.mxu2 %v8288_v46  ;;  %2394 = vmatpush.msrb.mxu3 %v8289_v28  ;;  %v6682_v46 = vld [vmem:[#allocation12 + $0x110] sm:$0xff]  ;;  %v6685_v28 = vld [vmem:[#allocation12 + $0x118] sm:$0xff] }
 0x398   :  { %2335 = vmatpush.msra.mxu0 %v8290_v17  ;;  %2355 = vmatpush.msra.mxu1 %v8291_v15  ;;  %v8347_v17 = vld [vmem:[#allocation141_spill] sm:$0xff]  ;;  %v6690_v15 = vld [vmem:[#allocation12 + $0xf0] sm:$0xff] }
 0x399   :  { %2375 = vmatpush.msrb.mxu2 %v8292_v36  ;;  %2395 = vmatpush.msrb.mxu3 %v8293_v21  ;;  %v6693_v36 = vld [vmem:[#allocation12 + $0xf8] sm:$0xff]  ;;  %v8349_v21 = vld [vmem:[#allocation143_spill] sm:$0xff] }
 0x39a   :  { %2336 = vmatpush.msra.mxu0 %v8294_v19  ;;  %2356 = vmatpush.msra.mxu1 %v8295_v62  ;;  %v8350_v19 = vld [vmem:[#allocation144_spill] sm:$0xff]  ;;  %v6698_v62 = vld [vmem:[#allocation12 + $0xd0] sm:$0xff] }
 0x39b   :  { %2376 = vmatpush.msrb.mxu2 %v8296_v63  ;;  %2396 = vmatpush.msrb.mxu3 %v8297_v31  ;;  %v6701_v63 = vld [vmem:[#allocation12 + $0xd8] sm:$0xff]  ;;  %v8351_v31 = vld [vmem:[#allocation145_spill] sm:$0xff] }
 0x39c   :  { %2337 = vmatpush.msra.mxu0 %v8298_v39  ;;  %2357 = vmatpush.msra.mxu1 %v8299_v54  ;;  %v8352_v39 = vld [vmem:[#allocation146_spill] sm:$0xff]  ;;  %v6706_v54 = vld [vmem:[#allocation12 + $0xb0] sm:$0xff] }
 0x39d   :  { %2377 = vmatpush.msrb.mxu2 %v8300_v58  ;;  %2397 = vmatpush.msrb.mxu3 %v8301_v8  ;;  %v6709_v58 = vld [vmem:[#allocation12 + $0xb8] sm:$0xff]  ;;  %v8353_v8 = vld [vmem:[#allocation147_spill] sm:$0xff] }
 0x39e   :  { %2338 = vmatpush.msra.mxu0 %v8302_v18  ;;  %2358 = vmatpush.msra.mxu1 %v8303_v3  ;;  %v8354_v18 = vld [vmem:[#allocation148_spill] sm:$0xff]  ;;  %v6714_v3 = vld [vmem:[#allocation12 + $0x90] sm:$0xff] }
 0x39f   :  { %2378 = vmatpush.msrb.mxu2 %v8304_v22  ;;  %2398 = vmatpush.msrb.mxu3 %v8305_v5  ;;  %v6717_v22 = vld [vmem:[#allocation12 + $0x98] sm:$0xff]  ;;  %v8355_v5 = vld [vmem:[#allocation149_spill] sm:$0xff] }
 0x3a0   :  { %2339 = vmatpush.msra.mxu0 %v8306_v35  ;;  %2359 = vmatpush.msra.mxu1 %v8307_v6  ;;  %v8356_v35 = vld [vmem:[#allocation150_spill] sm:$0xff]  ;;  %v6722_v6 = vld [vmem:[#allocation12 + $0x70] sm:$0xff] }
 0x3a1   :  { %2379 = vmatpush.msrb.mxu2 %v8308_v25  ;;  %2399 = vmatpush.msrb.mxu3 %v8309_v0  ;;  %v6725_v25 = vld [vmem:[#allocation12 + $0x78] sm:$0xff]  ;;  %v8357_v0 = vld [vmem:[#allocation151_spill] sm:$0xff] }
 0x3a2   :  { %2340 = vmatpush.msra.mxu0 %v8310_v13  ;;  %2360 = vmatpush.msra.mxu1 %v8311_v59  ;;  %v8358_v13 = vld [vmem:[#allocation152_spill] sm:$0xff]  ;;  %v6730_v59 = vld [vmem:[#allocation12 + $0x50] sm:$0xff] }
 0x3a3   :  { %2380 = vmatpush.msrb.mxu2 %v8312_v51  ;;  %2400 = vmatpush.msrb.mxu3 %v8313_v26  ;;  %v6733_v51 = vld [vmem:[#allocation12 + $0x58] sm:$0xff]  ;;  %v8359_v26 = vld [vmem:[#allocation153_spill] sm:$0xff] }
 0x3a4   :  { %2341 = vmatpush.msra.mxu0 %v8314_v42  ;;  %2361 = vmatpush.msra.mxu1 %v8315_v53  ;;  %v8360_v42 = vld [vmem:[#allocation70_spill] sm:$0xff]  ;;  %v6738_v53 = vld [vmem:[#allocation12 + $0x30] sm:$0xff] }
 0x3a5   :  { %2381 = vmatpush.msrb.mxu2 %v8316_v40  ;;  %2401 = vmatpush.msrb.mxu3 %v8317_v44  ;;  %v6741_v40 = vld [vmem:[#allocation12 + $0x38] sm:$0xff]  ;;  %v8361_v44 = vld [vmem:[#allocation71_spill] sm:$0xff] }
 0x3a6   :  { %2414 = vmatpush.msrb.mxu0 %v8318_v43  ;;  %2434 = vmatpush.msrb.mxu1 %v8319_v1  ;;  %v8362_v43 = vld [vmem:[#allocation24_spill] sm:$0xff]  ;;  %v6746_v1 = vld [vmem:[#allocation12 + $0x10] sm:$0xff] }
 0x3a7   :  { %2454 = vmatpush.msra.mxu2 %v8320_v45  ;;  %2474 = vmatpush.msra.mxu3 %v8321_v30  ;;  %v6749_v45 = vld [vmem:[#allocation12 + $0x18] sm:$0xff]  ;;  %v8363_v30 = vld [vmem:[#allocation46_spill] sm:$0xff] }
 0x3a8   :  { %2415 = vmatpush.msrb.mxu0 %v8322_v7  ;;  %2435 = vmatpush.msrb.mxu1 %v8323_v38  ;;  %v8364_v7 = vld [vmem:[#allocation75_spill] sm:$0xff] }
 0x3a9   :  { %2455 = vmatpush.msra.mxu2 %v8324_v48  ;;  %2475 = vmatpush.msra.mxu3 %v8325_v10  ;;  %v264_v38 = vadd.f32 %v8364_v7, %v8363_v30  ;;  %v8365_v48 = vld [vmem:[#allocation49_spill] sm:$0xff]  ;;  %v8366_v10 = vld [vmem:[#allocation76_spill] sm:$0xff] }
 0x3aa   :  { %2416 = vmatpush.msrb.mxu0 %v8326_v23  ;;  %2436 = vmatpush.msrb.mxu1 %v8327_v55  ;;  %v305_v23 = vadd.f32 %v8366_v10, %v8365_v48 }
 0x3ab   :  { %2456 = vmatpush.msra.mxu2 %v8328_v14  ;;  %2476 = vmatpush.msra.mxu3 %v8329_v37 }
 0x3ac   :  { %2417 = vmatpush.msrb.mxu0 %v8330_v27  ;;  %2437 = vmatpush.msrb.mxu1 %v8331_v41 }
 0x3ad   :  { %2457 = vmatpush.msra.mxu2 %v8332_v47  ;;  %2477 = vmatpush.msra.mxu3 %v8333_v2  ;;  %v8367_v2 = vld [vmem:[#allocation60_spill] sm:$0xff] }
 0x3ae   :  { %2418 = vmatpush.msrb.mxu0 %v8334_v29  ;;  %2438 = vmatpush.msrb.mxu1 %v8335_v33  ;;  %v8368_v29 = vld [vmem:[#allocation26_spill] sm:$0xff] }
 0x3af   :  { %2458 = vmatpush.msra.mxu2 %v8336_v16  ;;  %2478 = vmatpush.msra.mxu3 %v8337_v60  ;;  %v387_v33 = vadd.f32 %v8368_v29, %v8367_v2 }
 0x3b0   :  { %2419 = vmatpush.msrb.mxu0 %v8338_v61  ;;  %2439 = vmatpush.msrb.mxu1 %v8339_v20 }
 0x3b1   :  { %2459 = vmatpush.msra.mxu2 %v8340_v34  ;;  %2479 = vmatpush.msra.mxu3 %v8341_v24 }
 0x3b2   :  { %2420 = vmatpush.msrb.mxu0 %v6429_v12  ;;  %2440 = vmatpush.msrb.mxu1 %v8342_v52  ;;  %v8348_v12 = vld [vmem:[#allocation142_spill] sm:$0xff] }
 0x3b3   :  { %2460 = vmatpush.msra.mxu2 %v8343_v49  ;;  %2480 = vmatpush.msra.mxu3 %v8344_v56 }
 0x3b4   :  { %2421 = vmatpush.msrb.mxu0 %v8345_v32  ;;  %2441 = vmatpush.msrb.mxu1 %v8346_v57  ;;  %v8369_v32 = vld [vmem:[#allocation50_spill] sm:$0xff] }
 0x3b5   :  { %2461 = vmatpush.msra.mxu2 %v6682_v46  ;;  %2481 = vmatpush.msra.mxu3 %v6685_v28  ;;  %v8370_v57 = vld [vmem:[#allocation30_spill] sm:$0xff] }
 0x3b6   :  { %2422 = vmatpush.msrb.mxu0 %v8347_v17  ;;  %2442 = vmatpush.msrb.mxu1 %v8348_v12  ;;  %v425_v17 = vadd.f32 %v8370_v57, %v8369_v32  ;;  %v8371_v12 = vld [vmem:[#allocation53_spill] sm:$0xff] }
 0x3b7   :  { %2462 = vmatpush.msra.mxu2 %v6690_v15  ;;  %2482 = vmatpush.msra.mxu3 %v6693_v36 }
 0x3b8   :  { %2423 = vmatpush.msrb.mxu0 %v8349_v21  ;;  %2443 = vmatpush.msrb.mxu1 %v8350_v19  ;;  %v8372_v21 = vld [vmem:[#allocation40_spill] sm:$0xff] }
 0x3b9   :  { %2463 = vmatpush.msra.mxu2 %v6698_v62  ;;  %2483 = vmatpush.msra.mxu3 %v6701_v63  ;;  %v466_v19 = vadd.f32 %v8372_v21, %v8371_v12 }
 0x3ba   :  { %2424 = vmatpush.msrb.mxu0 %v8351_v31  ;;  %2444 = vmatpush.msrb.mxu1 %v8352_v39 }
 0x3bb   :  { %2464 = vmatpush.msra.mxu2 %v6706_v54  ;;  %2484 = vmatpush.msra.mxu3 %v6709_v58 }
 0x3bc   :  { %2425 = vmatpush.msrb.mxu0 %v8353_v8  ;;  %2445 = vmatpush.msrb.mxu1 %v8354_v18 }
 0x3bd   :  { %2465 = vmatpush.msra.mxu2 %v6714_v3  ;;  %2485 = vmatpush.msra.mxu3 %v6717_v22 }
 0x3be   :  { %2426 = vmatpush.msrb.mxu0 %v8355_v5  ;;  %2446 = vmatpush.msrb.mxu1 %v8356_v35  ;;  %v8373_v5 = vld [vmem:[#allocation61_spill] sm:$0xff]  ;;  %v8374_v35 = vld [vmem:[#allocation27_spill] sm:$0xff] }
 0x3bf   :  { %2466 = vmatpush.msra.mxu2 %v6722_v6  ;;  %2486 = vmatpush.msra.mxu3 %v6725_v25 }
 0x3c0   :  { %2427 = vmatpush.msrb.mxu0 %v8357_v0  ;;  %2447 = vmatpush.msrb.mxu1 %v8358_v13  ;;  %v346_v0 = vadd.f32 %v8374_v35, %v8373_v5 }
 0x3c1   :  { %2467 = vmatpush.msra.mxu2 %v6730_v59  ;;  %2487 = vmatpush.msra.mxu3 %v6733_v51 }
 0x3c2   :  { %2428 = vmatpush.msrb.mxu0 %v8359_v26  ;;  %2448 = vmatpush.msrb.mxu1 %v8360_v42 }
 0x3c3   :  { %2468 = vmatpush.msra.mxu2 %v6738_v53  ;;  %2488 = vmatpush.msra.mxu3 %v6741_v40 }
 0x3c4   :  { %2429 = vmatpush.msrb.mxu0 %v8361_v44  ;;  %2449 = vmatpush.msrb.mxu1 %v8362_v43 }
 0x3c5   :  { %2469 = vmatpush.msra.mxu2 %v6746_v1  ;;  %2489 = vmatpush.msra.mxu3 %v6749_v45 }
 0x3ff   :  { %v2039_v55 = vpop.f32.mrf.mxu0  ;;  %v2059_v14 = vpop.f32.mrf.mxu1 }
 0x400   :  { %v2102_v37 = vadd.f32 %v2039_v55, %v264_v38  ;;  %v2103_v27 = vadd.f32 %v2059_v14, %v305_v23  ;;  %v8375_v14 = vld [vmem:[#allocation59_spill] sm:$0xff] }
 0x402   :  { %v3588_v41 = vmul.f32 -1.442695, %v2102_v37  ;;  %v3589_v47 = vmul.f32 -1.442695, %v2103_v27 }
 0x404   :  { %3771 = vpow2.f32 %v3588_v41 }
 0x405   :  { %3773 = vpow2.f32 %v3589_v47 }
 0x406   :  { %v2099_v16 = vpop.f32.mrf.mxu3  ;;  %v2079_v8 = vpop.f32.mrf.mxu2 }
 0x407   :  { %v2105_v60 = vadd.f32 %v2099_v16, %v387_v33  ;;  %v2104_v43 = vadd.f32 %v2079_v8, %v346_v0 }
 0x409   :  { %v3590_v61 = vmul.f32 -1.442695, %v2105_v60 }
 0x40a   :  { %v3772_v20 = vpop.eup %3771 }
 0x40b   :  { %v3774_v34 = vpop.eup %3773  ;;  %v2197_v24 = vadd.f32 1.0, %v3772_v20  ;;  %3775 = vpow2.f32 %v3590_v61 }
 0x40c   :  { %v2216_v52 = vadd.f32 1.0, %v3774_v34  ;;  %v2127_v49 = vpop.f32.mrf.mxu0  ;;  %v2147_v56 = vpop.f32.mrf.mxu1 }
 0x40d   :  { %3777 = vrcp.f32 %v2197_v24  ;;  %v2190_v31 = vadd.f32 %v2127_v49, %v425_v17  ;;  %v2191_v39 = vadd.f32 %v2147_v56, %v466_v19  ;;  %v2207_v41 = vand.u32 2147483647, %v2197_v24 }
 0x40e   :  { %3779 = vrcp.f32 %v2216_v52  ;;  %v2209_v47 = vand.u32 2147483648, %v2197_v24  ;;  %v2228_v29 = vand.u32 2147483648, %v2216_v52  ;;  %vm2203_vm3 = vweird.f32 %v2197_v24 }
 0x40f   :  { %v3591_v13 = vmul.f32 -1.442695, %v2190_v31  ;;  %v3592_v26 = vmul.f32 -1.442695, %v2191_v39  ;;  %v2226_v20 = vand.u32 2147483647, %v2216_v52  ;;  %vm2222_vm4 = vweird.f32 %v2216_v52 }
 0x410   :  { %vm2208_vm6 = vcmp.eq.f32.partialorder %v2207_v41, 8.507059e+37  ;;  %v2210_v17 = vor.u32 1.1754944e-38, %v2209_v47  ;;  %v2229_v31 = vor.u32 1.1754944e-38, %v2228_v29  ;;  %v6827_v29 = vld [vmem:[#allocation10 + $0x1c8] sm:$0xff] }
 0x411   :  { %v3776_v18 = vpop.eup %3775  ;;  %3781 = vpow2.f32 %v3591_v13  ;;  %vm2227_vm8 = vcmp.eq.f32.partialorder %v2226_v20, 8.507059e+37 }
 0x412   :  { %v6764_v42 = vadd.f32 1.0, %v3776_v18 }
 0x413   :  { %v3778_v44 = vpop.eup %3777  ;;  %v2187_v7 = vpop.f32.mrf.mxu3 }
 0x414   :  { %v3780_v38 = vpop.eup %3779  ;;  %v2199_v10 = vmul.f32 %v3778_v44, %v2197_v24  ;;  %3783 = vrcp.f32 %v6764_v42  ;;  %v2193_v37 = vadd.f32 %v2187_v7, %v8375_v14  ;;  %vm2204_vm1 = vweird.f32 %v3778_v44  ;;  %v2167_v7 = vpop.f32.mrf.mxu2 }
 0x415   :  { %v2218_v23 = vmul.f32 %v3780_v38, %v2216_v52  ;;  %3785 = vpow2.f32 %v3592_v26  ;;  %vm2223_vm2 = vweird.f32 %v3780_v38  ;;  %vm2205_vm5 = vmor %vm2203_vm3, %vm2204_vm1  ;;  %v2248_v14 = vand.u32 2147483648, %v6764_v42 }
 0x416   :  { %v2200_v55 = vsub.f32 1.0, %v2199_v10  ;;  %3787 = vtanh.f32 %v2104_v43  ;;  %v3593_v16 = vmul.f32 -1.442695, %v2193_v37  ;;  %vm2224_vm7 = vmor %vm2222_vm4, %vm2223_vm2  ;;  %vm2242_vm10 = vweird.f32 %v6764_v42 }
 0x417   :  { %v2219_v27 = vsub.f32 1.0, %v2218_v23  ;;  %v3782_v60 = vpop.eup %3781 }
 0x418   :  { %v2201_v33 = vmul.f32 %v3778_v44, %v2200_v55  ;;  %v6768_v56 = vadd.f32 1.0, %v3782_v60  ;;  %3789 = vpow2.f32 %v3593_v16  ;;  %v2249_v60 = vor.u32 1.1754944e-38, %v2248_v14  ;;  %v6810_v14 = vld [vmem:[#allocation10 + $0x1e0] sm:$0xff] }
 0x419   :  { %v2220_v61 = vmul.f32 %v3780_v38, %v2219_v27 }
 0x41a   :  { %v3784_v34 = vpop.eup %3783  ;;  %v2202_v49 = vadd.f32 %v3778_v44, %v2201_v33  ;;  %3791 = vrcp.f32 %v6768_v56  ;;  %vm2266_vm13 = vweird.f32 %v6768_v56 }
 0x41b   :  { %v3786_v57 = vpop.eup %3785  ;;  %v2221_v21 = vadd.f32 %v3780_v38, %v2220_v61  ;;  %v2238_v19 = vmul.f32 %v3784_v34, %v6764_v42  ;;  %vm2243_vm9 = vweird.f32 %v3784_v34  ;;  %v2272_v61 = vand.u32 2147483648, %v6768_v56 }
 0x41c   :  { %v2206_v39 = vsel %vm2205_vm5, %v3778_v44, %v2202_v49  ;;  %v6772_v24 = vadd.f32 1.0, %v3786_v57  ;;  %v3788_v8 = vpop.eup %3787  ;;  %vm6787_vm11 = vmor %vm2242_vm10, %vm2243_vm9 }
 0x41d   :  { %v2211_v52 = vsel %vm2208_vm6, %v2210_v17, %v2206_v39  ;;  %v2225_v18 = vsel %vm2224_vm7, %v3780_v38, %v2221_v21  ;;  %v2239_v35 = vsub.f32 1.0, %v2238_v19  ;;  %v8376_v38 = vld [vmem:[#allocation58_spill] sm:$0xff]  ;;  %v2270_v17 = vand.u32 2147483647, %v6768_v56 }
 0x41e   :  { %v2230_v0 = vsel %vm2227_vm8, %v2229_v31, %v2225_v18  ;;  %v2253_v13 = vmul.f32 %v3788_v8, %v2211_v52  ;;  %3793 = vrcp.f32 %v6772_v24  ;;  %v3790_v10 = vpop.eup %3789  ;;  %v2192_v37 = vadd.f32 %v2167_v7, %v8376_v38  ;;  %v6813_v38 = vld [vmem:[#allocation10 + $0x1e8] sm:$0xff] }
 0x41f   :  { %v2252_v26 = vmul.f32 %v2230_v0, %v6544_v9  ;;  %v2240_v43 = vmul.f32 %v3784_v34, %v2239_v35  ;;  %v6778_v44 = vadd.f32 1.0, %v3790_v10  ;;  %v2246_v9 = vand.u32 2147483647, %v6764_v42 }
 0x420   :  { %v3792_v55 = vpop.eup %3791  ;;  %v2291_v42 = vand.u32 2147483648, %v6772_v24  ;;  %v2289_v21 = vand.u32 2147483647, %v6772_v24  ;;  %vm2285_vm0 = vweird.f32 %v6772_v24  ;;  %vm2271_vm2 = vcmp.eq.f32.partialorder %v2270_v17, 8.507059e+37  ;;  %v6851_v17 = vld [vmem:[#allocation10 + $0x1b8] sm:$0xff] }
 0x421   :  { %v6776_v23 = vadd.f32 %v2253_v13, %v2252_v26  ;;  %v2241_v27 = vadd.f32 %v3784_v34, %v2240_v43  ;;  %v2262_v41 = vmul.f32 %v3792_v55, %v6768_v56  ;;  %vm2267_vm12 = vweird.f32 %v3792_v55 }
 0x422   :  { %vm2247_vm14 = vcmp.eq.f32.partialorder %v2246_v9, 8.507059e+37  ;;  %vm2268_vm1 = vmor %vm2266_vm13, %vm2267_vm12  ;;  %v2292_v26 = vor.u32 1.1754944e-38, %v2291_v42  ;;  %vm2290_vm4 = vcmp.eq.f32.partialorder %v2289_v21, 8.507059e+37  ;;  %v6824_v9 = vld [vmem:[#allocation10 + $0x1c0] sm:$0xff]  ;;  %vm2305_vm6 = vweird.f32 %v6778_v44 }
 0x423   :  { %3795 = vtanh.f32 %v6776_v23  ;;  %v2263_v33 = vsub.f32 1.0, %v2262_v41  ;;  %v2245_v20 = vsel %vm6787_vm11, %v3784_v34, %v2241_v27  ;;  %v2273_v34 = vor.u32 1.1754944e-38, %v2272_v61  ;;  %v6818_v41 = vld [vmem:[#allocation10 + $0x1f0] sm:$0xff]  ;;  %v6840_v61 = vld [vmem:[#allocation10 + $0x1a0] sm:$0xff] }
 0x424   :  { %v3794_v47 = vpop.eup %3793  ;;  %3797 = vrcp.f32 %v6778_v44  ;;  %v2250_v8 = vsel %vm2247_vm14, %v2249_v60, %v2245_v20  ;;  %v6843_v20 = vld [vmem:[#allocation10 + $0x1a8] sm:$0xff]  ;;  %v2309_v42 = vand.u32 2147483647, %v6778_v44  ;;  %v6856_v21 = vld [vmem:[#allocation10 + $0x180] sm:$0xff] }
 0x425   :  { %v2281_v16 = vmul.f32 %v3794_v47, %v6772_v24  ;;  %3799 = vtanh.f32 %v2192_v37  ;;  %v2264_v57 = vmul.f32 %v3792_v55, %v2263_v33  ;;  %vm2286_vm15 = vweird.f32 %v3794_v47 }
 0x426   :  { %vm2287_vm3 = vmor %vm2285_vm0, %vm2286_vm15  ;;  %vm2310_vm8 = vcmp.eq.f32.partialorder %v2309_v42, 8.507059e+37  ;;  %v6919_v42 = vld [vmem:[#allocation10 + $0x100] sm:$0xff] }
 0x427   :  { %v2282_v49 = vsub.f32 1.0, %v2281_v16  ;;  %v2265_v39 = vadd.f32 %v3792_v55, %v2264_v57  ;;  %v6835_v16 = vld [vmem:[#allocation10 + $0x1d8] sm:$0xff]  ;;  %v6848_v57 = vld [vmem:[#allocation10 + $0x1b0] sm:$0xff] }
 0x429   :  { %v3796_v19 = vpop.eup %3795  ;;  %v2283_v31 = vmul.f32 %v3794_v47, %v2282_v49  ;;  %v2269_v35 = vsel %vm2268_vm1, %v3792_v55, %v2265_v39  ;;  %v2311_v49 = vand.u32 2147483648, %v6778_v44  ;;  %v6868_v39 = vld [vmem:[#allocation10 + $0x190] sm:$0xff] }
 0x42a   :  { %v6799_v52 = vpop.eup %3797  ;;  %v6802_v18 = vmul.f32 %v3796_v19, %v2250_v8  ;;  %v2274_v43 = vsel %vm2271_vm2, %v2273_v34, %v2269_v35  ;;  %v6859_v19 = vld [vmem:[#allocation10 + $0x188] sm:$0xff]  ;;  %v6871_v8 = vld [vmem:[#allocation10 + $0x198] sm:$0xff]  ;;  %v6877_v34 = vld [vmem:[#allocation10 + $0x160] sm:$0xff] }
 0x42b   :  { %v2284_v0 = vadd.f32 %v3794_v47, %v2283_v31  ;;  %v2301_v56 = vmul.f32 %v6799_v52, %v6778_v44  ;;  %v3800_v13 = vpop.eup %3799  ;;  %vm2306_vm5 = vweird.f32 %v6799_v52  ;;  %v6880_v35 = vld [vmem:[#allocation10 + $0x168] sm:$0xff] }
 0x42c   :  { %8379 = vst [vmem:[#allocation21_spill] sm:$0xff] %v6802_v18  ;;  %2342 = vmatmul.f32.vlgmr.msra.gmra.mxu0 %v6802_v18  ;;  %2362 = vmatmul.f32.vlgmr.msra.gmra.mxu1 %v6802_v18  ;;  %v2316_v24 = vmul.f32 %v3800_v13, %v2274_v43  ;;  %vm6864_vm7 = vmor %vm2305_vm6, %vm2306_vm5  ;;  %v6886_v13 = vld [vmem:[#allocation10 + $0x178] sm:$0xff]  ;;  %v6922_v31 = vld [vmem:[#allocation10 + $0x108] sm:$0xff] }
 0x42d   :  { %v2288_v7 = vsel %vm2287_vm3, %v3794_v47, %v2284_v0  ;;  %v2302_v10 = vsub.f32 1.0, %v2301_v56  ;;  %2382 = vmatmul.f32.vlgmr.msrb.gmra.mxu2 %v6802_v18  ;;  %2402 = vmatmul.f32.vlgmr.msrb.gmra.mxu3 %v6802_v18  ;;  %v6821_v47 = vld [vmem:[#allocation10 + $0x1f8] sm:$0xff]  ;;  %v2312_v0 = vor.u32 1.1754944e-38, %v2311_v49  ;;  %v6883_v56 = vld [vmem:[#allocation10 + $0x170] sm:$0xff]  ;;  %v6943_v18 = vld [vmem:[#allocation10 + $0xc0] sm:$0xff] }
 0x42e   :  { %v2293_v55 = vsel %vm2290_vm4, %v2292_v26, %v2288_v7  ;;  %2630 = vmatpush.msra.mxu0 %v6810_v14  ;;  %2650 = vmatpush.msra.mxu1 %v6813_v38  ;;  %v6889_v26 = vld [vmem:[#allocation10 + $0x140] sm:$0xff]  ;;  %v6912_v49 = vld [vmem:[#allocation10 + $0x138] sm:$0xff]  ;;  %8387 = vst [vmem:[#allocation43_spill] sm:$0xff] %v6943_v18 }
 0x42f   :  { %v2315_v37 = vmul.f32 %v2293_v55, %v6576_v50  ;;  %v2303_v27 = vmul.f32 %v6799_v52, %v2302_v10  ;;  %2670 = vmatpush.msrb.mxu2 %v6818_v41  ;;  %2690 = vmatpush.msrb.mxu3 %v6821_v47  ;;  %v6832_v50 = vld [vmem:[#allocation10 + $0x1d0] sm:$0xff]  ;;  %v6898_v10 = vld [vmem:[#allocation10 + $0x158] sm:$0xff] }
 0x430   :  { %2631 = vmatpush.msra.mxu0 %v6824_v9  ;;  %2651 = vmatpush.msra.mxu1 %v6827_v29 }
 0x431   :  { %v6830_v33 = vadd.f32 %v2316_v24, %v2315_v37  ;;  %2671 = vmatpush.msrb.mxu2 %v6832_v50  ;;  %2691 = vmatpush.msrb.mxu3 %v6835_v16  ;;  %v2304_v60 = vadd.f32 %v6799_v52, %v2303_v27  ;;  %v6895_v24 = vld [vmem:[#allocation10 + $0x150] sm:$0xff]  ;;  %v6903_v37 = vld [vmem:[#allocation10 + $0x120] sm:$0xff]  ;;  %v6906_v27 = vld [vmem:[#allocation10 + $0x128] sm:$0xff] }
 0x432   :  { %2632 = vmatpush.msra.mxu0 %v6840_v61  ;;  %2652 = vmatpush.msra.mxu1 %v6843_v20 }
 0x433   :  { %3801 = vtanh.f32 %v6830_v33  ;;  %2672 = vmatpush.msrb.mxu2 %v6848_v57  ;;  %2692 = vmatpush.msrb.mxu3 %v6851_v17  ;;  %v2308_v44 = vsel %vm6864_vm7, %v6799_v52, %v2304_v60  ;;  %v6892_v52 = vld [vmem:[#allocation10 + $0x148] sm:$0xff]  ;;  %v6909_v60 = vld [vmem:[#allocation10 + $0x130] sm:$0xff] }
 0x434   :  { %2633 = vmatpush.msra.mxu0 %v6856_v21  ;;  %2653 = vmatpush.msra.mxu1 %v6859_v19  ;;  %v2313_v7 = vsel %vm2310_vm8, %v2312_v0, %v2308_v44  ;;  %v6925_v44 = vld [vmem:[#allocation10 + $0x110] sm:$0xff]  ;;  %v6928_v0 = vld [vmem:[#allocation10 + $0x118] sm:$0xff] }
 0x435   :  { %2673 = vmatpush.msrb.mxu2 %v6868_v39  ;;  %2693 = vmatpush.msrb.mxu3 %v6871_v8  ;;  %8383 = vst [vmem:[#allocation64_spill] sm:$0xff] %v6928_v0 }
 0x436   :  { %2634 = vmatpush.msra.mxu0 %v6877_v34  ;;  %2654 = vmatpush.msra.mxu1 %v6880_v35 }
 0x437   :  { %2674 = vmatpush.msrb.mxu2 %v6883_v56  ;;  %2694 = vmatpush.msrb.mxu3 %v6886_v13 }
 0x438   :  { %2635 = vmatpush.msra.mxu0 %v6889_v26  ;;  %2655 = vmatpush.msra.mxu1 %v6892_v52 }
 0x439   :  { %v3802_v43 = vpop.eup %3801  ;;  %2675 = vmatpush.msrb.mxu2 %v6895_v24  ;;  %2695 = vmatpush.msrb.mxu3 %v6898_v10 }
 0x43a   :  { %v6901_v55 = vmul.f32 %v3802_v43, %v2313_v7  ;;  %2636 = vmatpush.msra.mxu0 %v6903_v37  ;;  %2656 = vmatpush.msra.mxu1 %v6906_v27  ;;  %v6931_v43 = vld [vmem:[#allocation10 + $0xe0] sm:$0xff]  ;;  %v6934_v7 = vld [vmem:[#allocation10 + $0xe8] sm:$0xff] }
 0x43b   :  { %2676 = vmatpush.msrb.mxu2 %v6909_v60  ;;  %2696 = vmatpush.msrb.mxu3 %v6912_v49  ;;  %8384 = vst [vmem:[#allocation72_spill] sm:$0xff] %v6934_v7 }
 0x43c   :  { %8382 = vst [vmem:[#allocation65_spill] sm:$0xff] %v6901_v55  ;;  %2430 = vmatmul.f32.vlgmr.msrb.gmra.mxu0 %v6901_v55  ;;  %2450 = vmatmul.f32.vlgmr.msrb.gmra.mxu1 %v6901_v55 }
 0x43d   :  { %2470 = vmatmul.f32.vlgmr.msra.gmra.mxu2 %v6901_v55  ;;  %2490 = vmatmul.f32.vlgmr.msra.gmra.mxu3 %v6901_v55  ;;  %v6940_v55 = vld [vmem:[#allocation10 + $0xf8] sm:$0xff] }
 0x43e   :  { %2637 = vmatpush.msra.mxu0 %v6919_v42  ;;  %2657 = vmatpush.msra.mxu1 %v6922_v31  ;;  %8386 = vst [vmem:[#allocation25_spill] sm:$0xff] %v6940_v55 }
 0x43f   :  { %2677 = vmatpush.msrb.mxu2 %v6925_v44  ;;  %2697 = vmatpush.msrb.mxu3 %v6928_v0  ;;  %v6949_v0 = vld [vmem:[#allocation10 + $0xd0] sm:$0xff] }
 0x440   :  { %2638 = vmatpush.msra.mxu0 %v6931_v43  ;;  %2658 = vmatpush.msra.mxu1 %v6934_v7  ;;  %8389 = vst [vmem:[#allocation22_spill] sm:$0xff] %v6949_v0  ;;  %v6952_v7 = vld [vmem:[#allocation10 + $0xd8] sm:$0xff] }
 0x441   :  { %2678 = vmatpush.msrb.mxu2 %v6937_v11  ;;  %2698 = vmatpush.msrb.mxu3 %v6940_v55  ;;  %8390 = vst [vmem:[#allocation56_spill] sm:$0xff] %v6952_v7  ;;  %v6955_v11 = vld [vmem:[#allocation10 + $0xa0] sm:$0xff]  ;;  %v6958_v55 = vld [vmem:[#allocation10 + $0xa8] sm:$0xff] }
 0x442   :  { %2639 = vmatpush.msra.mxu0 %v6943_v18  ;;  %2659 = vmatpush.msra.mxu1 %v6946_v4  ;;  %8391 = vst [vmem:[#allocation52_spill] sm:$0xff] %v6955_v11  ;;  %v6961_v18 = vld [vmem:[#allocation10 + $0xb0] sm:$0xff]  ;;  %v6964_v4 = vld [vmem:[#allocation10 + $0xb8] sm:$0xff] }
 0x443   :  { %2679 = vmatpush.msrb.mxu2 %v6949_v0  ;;  %2699 = vmatpush.msrb.mxu3 %v6952_v7  ;;  %8392 = vst [vmem:[#allocation67_spill] sm:$0xff] %v6958_v55  ;;  %v6967_v0 = vld [vmem:[#allocation10 + $0x80] sm:$0xff]  ;;  %v6970_v7 = vld [vmem:[#allocation10 + $0x88] sm:$0xff] }
 0x444   :  { %2640 = vmatpush.msra.mxu0 %v6955_v11  ;;  %2660 = vmatpush.msra.mxu1 %v6958_v55  ;;  %8393 = vst [vmem:[#allocation69_spill] sm:$0xff] %v6961_v18  ;;  %v6973_v11 = vld [vmem:[#allocation10 + $0x90] sm:$0xff]  ;;  %v6976_v55 = vld [vmem:[#allocation10 + $0x98] sm:$0xff] }
 0x445   :  { %2680 = vmatpush.msrb.mxu2 %v6961_v18  ;;  %8394 = vst [vmem:[#allocation74_spill] sm:$0xff] %v6964_v4  ;;  %2700 = vmatpush.msrb.mxu3 %v6964_v4  ;;  %v6979_v18 = vld [vmem:[#allocation10 + $0x60] sm:$0xff]  ;;  %v6982_v4 = vld [vmem:[#allocation10 + $0x68] sm:$0xff] }
 0x446   :  { %8395 = vst [vmem:[#allocation77_spill] sm:$0xff] %v6967_v0  ;;  %2641 = vmatpush.msra.mxu0 %v6967_v0  ;;  %2661 = vmatpush.msra.mxu1 %v6970_v7  ;;  %v6985_v0 = vld [vmem:[#allocation10 + $0x70] sm:$0xff] }
 0x447   :  { %8396 = vst [vmem:[#allocation84_spill] sm:$0xff] %v6970_v7  ;;  %2681 = vmatpush.msrb.mxu2 %v6973_v11  ;;  %2701 = vmatpush.msrb.mxu3 %v6976_v55  ;;  %v6988_v7 = vld [vmem:[#allocation10 + $0x78] sm:$0xff] }
 0x448   :  { %8397 = vst [vmem:[#allocation85_spill] sm:$0xff] %v6973_v11  ;;  %2642 = vmatpush.msra.mxu0 %v6979_v18  ;;  %2662 = vmatpush.msra.mxu1 %v6982_v4  ;;  %v6991_v11 = vld [vmem:[#allocation10 + $0x40] sm:$0xff] }
 0x449   :  { %8398 = vst [vmem:[#allocation86_spill] sm:$0xff] %v6976_v55  ;;  %2682 = vmatpush.msrb.mxu2 %v6985_v0  ;;  %2702 = vmatpush.msrb.mxu3 %v6988_v7  ;;  %v6994_v55 = vld [vmem:[#allocation10 + $0x48] sm:$0xff] }
 0x44a   :  { %8399 = vst [vmem:[#allocation87_spill] sm:$0xff] %v6979_v18  ;;  %2643 = vmatpush.msra.mxu0 %v6991_v11  ;;  %2663 = vmatpush.msra.mxu1 %v6994_v55  ;;  %v6997_v18 = vld [vmem:[#allocation10 + $0x50] sm:$0xff] }
 0x44b   :  { %8400 = vst [vmem:[#allocation88_spill] sm:$0xff] %v6982_v4  ;;  %2683 = vmatpush.msrb.mxu2 %v6997_v18  ;;  %v7000_v4 = vld [vmem:[#allocation10 + $0x58] sm:$0xff] }
 0x44c   :  { %8401 = vst [vmem:[#allocation89_spill] sm:$0xff] %v6985_v0  ;;  %2703 = vmatpush.msrb.mxu3 %v7000_v4  ;;  %v7003_v0 = vld [vmem:[#allocation10 + $0x20] sm:$0xff] }
 0x44d   :  { %8402 = vst [vmem:[#allocation90_spill] sm:$0xff] %v6988_v7  ;;  %2644 = vmatpush.msra.mxu0 %v7003_v0  ;;  %v7006_v7 = vld [vmem:[#allocation10 + $0x28] sm:$0xff] }
 0x44e   :  { %8403 = vst [vmem:[#allocation91_spill] sm:$0xff] %v6991_v11  ;;  %2664 = vmatpush.msra.mxu1 %v7006_v7  ;;  %v7009_v11 = vld [vmem:[#allocation10 + $0x30] sm:$0xff] }
 0x44f   :  { %8404 = vst [vmem:[#allocation92_spill] sm:$0xff] %v6994_v55  ;;  %2684 = vmatpush.msrb.mxu2 %v7009_v11  ;;  %v7012_v55 = vld [vmem:[#allocation10 + $0x38] sm:$0xff] }
 0x450   :  { %8405 = vst [vmem:[#allocation93_spill] sm:$0xff] %v6997_v18  ;;  %2704 = vmatpush.msrb.mxu3 %v7012_v55  ;;  %v7015_v18 = vld [vmem:[#allocation10] sm:$0xff] }
 0x451   :  { %8406 = vst [vmem:[#allocation94_spill] sm:$0xff] %v7000_v4  ;;  %2645 = vmatpush.msra.mxu0 %v7015_v18  ;;  %v7018_v4 = vld [vmem:[#allocation10 + $0x8] sm:$0xff] }
 0x452   :  { %8407 = vst [vmem:[#allocation95_spill] sm:$0xff] %v7003_v0  ;;  %2665 = vmatpush.msra.mxu1 %v7018_v4  ;;  %v7021_v0 = vld [vmem:[#allocation10 + $0x10] sm:$0xff] }
 0x453   :  { %8408 = vst [vmem:[#allocation96_spill] sm:$0xff] %v7006_v7  ;;  %2685 = vmatpush.msrb.mxu2 %v7021_v0  ;;  %v7024_v7 = vld [vmem:[#allocation10 + $0x18] sm:$0xff] }
 0x454   :  { %8409 = vst [vmem:[#allocation97_spill] sm:$0xff] %v7009_v11  ;;  %2705 = vmatpush.msrb.mxu3 %v7024_v7  ;;  %v7027_v11 = vld [vmem:[#allocation12 + $0x1e0] sm:$0xff] }
 0x455   :  { %8410 = vst [vmem:[#allocation98_spill] sm:$0xff] %v7012_v55  ;;  %2718 = vmatpush.msrb.mxu0 %v7027_v11  ;;  %v7030_v55 = vld [vmem:[#allocation12 + $0x1e8] sm:$0xff] }
 0x456   :  { %8411 = vst [vmem:[#allocation99_spill] sm:$0xff] %v7015_v18  ;;  %2738 = vmatpush.msrb.mxu1 %v7030_v55  ;;  %v7033_v18 = vld [vmem:[#allocation12 + $0x1f0] sm:$0xff] }
 0x457   :  { %8412 = vst [vmem:[#allocation100_spill] sm:$0xff] %v7018_v4  ;;  %2758 = vmatpush.msra.mxu2 %v7033_v18  ;;  %v7036_v4 = vld [vmem:[#allocation12 + $0x1f8] sm:$0xff] }
 0x458   :  { %8413 = vst [vmem:[#allocation101_spill] sm:$0xff] %v7021_v0  ;;  %2778 = vmatpush.msra.mxu3 %v7036_v4  ;;  %v7039_v0 = vld [vmem:[#allocation12 + $0x1c0] sm:$0xff] }
 0x459   :  { %8414 = vst [vmem:[#allocation102_spill] sm:$0xff] %v7024_v7  ;;  %2719 = vmatpush.msrb.mxu0 %v7039_v0  ;;  %v7042_v7 = vld [vmem:[#allocation12 + $0x1c8] sm:$0xff] }
 0x45a   :  { %8415 = vst [vmem:[#allocation103_spill] sm:$0xff] %v7027_v11  ;;  %2739 = vmatpush.msrb.mxu1 %v7042_v7  ;;  %v7045_v11 = vld [vmem:[#allocation12 + $0x1d0] sm:$0xff] }
 0x45b   :  { %8416 = vst [vmem:[#allocation104_spill] sm:$0xff] %v7030_v55  ;;  %2759 = vmatpush.msra.mxu2 %v7045_v11  ;;  %v7048_v55 = vld [vmem:[#allocation12 + $0x1d8] sm:$0xff] }
 0x45c   :  { %8417 = vst [vmem:[#allocation105_spill] sm:$0xff] %v7033_v18  ;;  %2779 = vmatpush.msra.mxu3 %v7048_v55  ;;  %v7051_v18 = vld [vmem:[#allocation12 + $0x1a0] sm:$0xff] }
 0x45d   :  { %8418 = vst [vmem:[#allocation106_spill] sm:$0xff] %v7036_v4  ;;  %2720 = vmatpush.msrb.mxu0 %v7051_v18  ;;  %v7054_v4 = vld [vmem:[#allocation12 + $0x1a8] sm:$0xff] }
 0x45e   :  { %8419 = vst [vmem:[#allocation107_spill] sm:$0xff] %v7039_v0  ;;  %2740 = vmatpush.msrb.mxu1 %v7054_v4  ;;  %v7057_v0 = vld [vmem:[#allocation12 + $0x1b0] sm:$0xff] }
 0x45f   :  { %8420 = vst [vmem:[#allocation108_spill] sm:$0xff] %v7042_v7  ;;  %2760 = vmatpush.msra.mxu2 %v7057_v0  ;;  %v7060_v7 = vld [vmem:[#allocation12 + $0x1b8] sm:$0xff] }
 0x460   :  { %8421 = vst [vmem:[#allocation109_spill] sm:$0xff] %v7045_v11  ;;  %2780 = vmatpush.msra.mxu3 %v7060_v7  ;;  %v7063_v11 = vld [vmem:[#allocation12 + $0x180] sm:$0xff] }
 0x461   :  { %8422 = vst [vmem:[#allocation110_spill] sm:$0xff] %v7048_v55  ;;  %2721 = vmatpush.msrb.mxu0 %v7063_v11  ;;  %v7066_v55 = vld [vmem:[#allocation12 + $0x188] sm:$0xff] }
 0x462   :  { %8423 = vst [vmem:[#allocation111_spill] sm:$0xff] %v7051_v18  ;;  %2741 = vmatpush.msrb.mxu1 %v7066_v55  ;;  %v7069_v18 = vld [vmem:[#allocation12 + $0x190] sm:$0xff] }
 0x463   :  { %8424 = vst [vmem:[#allocation112_spill] sm:$0xff] %v7054_v4  ;;  %2761 = vmatpush.msra.mxu2 %v7069_v18  ;;  %v7072_v4 = vld [vmem:[#allocation12 + $0x198] sm:$0xff] }
 0x464   :  { %8425 = vst [vmem:[#allocation113_spill] sm:$0xff] %v7057_v0  ;;  %2781 = vmatpush.msra.mxu3 %v7072_v4  ;;  %v7075_v0 = vld [vmem:[#allocation12 + $0x160] sm:$0xff] }
 0x465   :  { %8426 = vst [vmem:[#allocation114_spill] sm:$0xff] %v7060_v7  ;;  %2722 = vmatpush.msrb.mxu0 %v7075_v0  ;;  %v7078_v7 = vld [vmem:[#allocation12 + $0x168] sm:$0xff] }
 0x466   :  { %8427 = vst [vmem:[#allocation115_spill] sm:$0xff] %v7063_v11  ;;  %2742 = vmatpush.msrb.mxu1 %v7078_v7  ;;  %v7081_v11 = vld [vmem:[#allocation12 + $0x170] sm:$0xff] }
 0x467   :  { %8428 = vst [vmem:[#allocation116_spill] sm:$0xff] %v7066_v55  ;;  %2762 = vmatpush.msra.mxu2 %v7081_v11  ;;  %v7084_v55 = vld [vmem:[#allocation12 + $0x178] sm:$0xff] }
 0x468   :  { %8429 = vst [vmem:[#allocation117_spill] sm:$0xff] %v7069_v18  ;;  %2782 = vmatpush.msra.mxu3 %v7084_v55  ;;  %v7087_v18 = vld [vmem:[#allocation12 + $0x140] sm:$0xff] }
 0x469   :  { %8430 = vst [vmem:[#allocation118_spill] sm:$0xff] %v7072_v4  ;;  %2723 = vmatpush.msrb.mxu0 %v7087_v18  ;;  %v7090_v4 = vld [vmem:[#allocation12 + $0x148] sm:$0xff] }
 0x46a   :  { %8431 = vst [vmem:[#allocation119_spill] sm:$0xff] %v7075_v0  ;;  %2743 = vmatpush.msrb.mxu1 %v7090_v4  ;;  %v7093_v0 = vld [vmem:[#allocation12 + $0x150] sm:$0xff] }
 0x46b   :  { %8432 = vst [vmem:[#allocation120_spill] sm:$0xff] %v7078_v7  ;;  %2763 = vmatpush.msra.mxu2 %v7093_v0  ;;  %v7096_v7 = vld [vmem:[#allocation12 + $0x158] sm:$0xff] }
 0x46c   :  { %8433 = vst [vmem:[#allocation121_spill] sm:$0xff] %v7081_v11  ;;  %2783 = vmatpush.msra.mxu3 %v7096_v7  ;;  %v7099_v11 = vld [vmem:[#allocation12 + $0x120] sm:$0xff] }
 0x46d   :  { %8434 = vst [vmem:[#allocation122_spill] sm:$0xff] %v7084_v55  ;;  %2724 = vmatpush.msrb.mxu0 %v7099_v11  ;;  %v7102_v55 = vld [vmem:[#allocation12 + $0x128] sm:$0xff] }
 0x46e   :  { %8435 = vst [vmem:[#allocation123_spill] sm:$0xff] %v7087_v18  ;;  %2744 = vmatpush.msrb.mxu1 %v7102_v55  ;;  %v7105_v18 = vld [vmem:[#allocation12 + $0x130] sm:$0xff] }
 0x46f   :  { %8436 = vst [vmem:[#allocation124_spill] sm:$0xff] %v7090_v4  ;;  %2764 = vmatpush.msra.mxu2 %v7105_v18  ;;  %v7108_v4 = vld [vmem:[#allocation12 + $0x138] sm:$0xff] }
 0x470   :  { %8437 = vst [vmem:[#allocation125_spill] sm:$0xff] %v7093_v0  ;;  %2784 = vmatpush.msra.mxu3 %v7108_v4  ;;  %v7111_v0 = vld [vmem:[#allocation12 + $0x100] sm:$0xff] }
 0x471   :  { %8438 = vst [vmem:[#allocation126_spill] sm:$0xff] %v7096_v7  ;;  %2725 = vmatpush.msrb.mxu0 %v7111_v0  ;;  %v7114_v7 = vld [vmem:[#allocation12 + $0x108] sm:$0xff]  ;;  %2765 = vmatpush.msra.mxu2 %v6682_v46  ;;  %v7135_v46 = vld [vmem:[#allocation12 + $0xa0] sm:$0xff] }
 0x472   :  { %8439 = vst [vmem:[#allocation127_spill] sm:$0xff] %v7102_v55  ;;  %2745 = vmatpush.msrb.mxu1 %v7114_v7  ;;  %2785 = vmatpush.msra.mxu3 %v6685_v28  ;;  %v7119_v55 = vld [vmem:[#allocation12 + $0xe0] sm:$0xff]  ;;  %v7138_v28 = vld [vmem:[#allocation12 + $0xa8] sm:$0xff] }
 0x473   :  { %8440 = vst [vmem:[#allocation128_spill] sm:$0xff] %v7105_v18  ;;  %2726 = vmatpush.msrb.mxu0 %v7119_v55  ;;  %v7122_v18 = vld [vmem:[#allocation12 + $0xe8] sm:$0xff]  ;;  %2766 = vmatpush.msra.mxu2 %v6690_v15  ;;  %v7143_v15 = vld [vmem:[#allocation12 + $0x80] sm:$0xff] }
 0x474   :  { %8441 = vst [vmem:[#allocation129_spill] sm:$0xff] %v7108_v4  ;;  %2746 = vmatpush.msrb.mxu1 %v7122_v18  ;;  %2786 = vmatpush.msra.mxu3 %v6693_v36  ;;  %v7127_v4 = vld [vmem:[#allocation12 + $0xc0] sm:$0xff]  ;;  %v7146_v36 = vld [vmem:[#allocation12 + $0x88] sm:$0xff] }
 0x475   :  { %8442 = vst [vmem:[#allocation130_spill] sm:$0xff] %v7114_v7  ;;  %2727 = vmatpush.msrb.mxu0 %v7127_v4  ;;  %v7130_v7 = vld [vmem:[#allocation12 + $0xc8] sm:$0xff]  ;;  %2767 = vmatpush.msra.mxu2 %v6698_v62  ;;  %v7151_v62 = vld [vmem:[#allocation12 + $0x60] sm:$0xff] }
 0x476   :  { %8443 = vst [vmem:[#allocation131_spill] sm:$0xff] %v7122_v18  ;;  %2747 = vmatpush.msrb.mxu1 %v7130_v7  ;;  %2787 = vmatpush.msra.mxu3 %v6701_v63  ;;  %v7154_v63 = vld [vmem:[#allocation12 + $0x68] sm:$0xff] }
 0x477   :  { %8444 = vst [vmem:[#allocation132_spill] sm:$0xff] %v7127_v4  ;;  %2728 = vmatpush.msrb.mxu0 %v7135_v46  ;;  %2768 = vmatpush.msra.mxu2 %v6706_v54  ;;  %v7159_v54 = vld [vmem:[#allocation12 + $0x40] sm:$0xff] }
 0x478   :  { %8445 = vst [vmem:[#allocation133_spill] sm:$0xff] %v7130_v7  ;;  %2748 = vmatpush.msrb.mxu1 %v7138_v28  ;;  %2788 = vmatpush.msra.mxu3 %v6709_v58  ;;  %v7162_v58 = vld [vmem:[#allocation12 + $0x48] sm:$0xff] }
 0x479   :  { %8446 = vst [vmem:[#allocation134_spill] sm:$0xff] %v7135_v46  ;;  %2729 = vmatpush.msrb.mxu0 %v7143_v15  ;;  %2769 = vmatpush.msra.mxu2 %v6714_v3  ;;  %v7167_v3 = vld [vmem:[#allocation12 + $0x20] sm:$0xff] }
 0x47a   :  { %8447 = vst [vmem:[#allocation135_spill] sm:$0xff] %v7138_v28  ;;  %2749 = vmatpush.msrb.mxu1 %v7146_v36  ;;  %2789 = vmatpush.msra.mxu3 %v6717_v22  ;;  %v7170_v22 = vld [vmem:[#allocation12 + $0x28] sm:$0xff] }
 0x47b   :  { %8448 = vst [vmem:[#allocation136_spill] sm:$0xff] %v7143_v15  ;;  %2730 = vmatpush.msrb.mxu0 %v7151_v62  ;;  %2770 = vmatpush.msra.mxu2 %v6722_v6  ;;  %v7175_v6 = vld [vmem:[#allocation12] sm:$0xff] }
 0x47c   :  { %8449 = vst [vmem:[#allocation137_spill] sm:$0xff] %v7146_v36  ;;  %2750 = vmatpush.msrb.mxu1 %v7154_v63  ;;  %2790 = vmatpush.msra.mxu3 %v6725_v25  ;;  %v7178_v25 = vld [vmem:[#allocation12 + $0x8] sm:$0xff]  ;;  %v8460_v36 = vld [vmem:[#allocation31_spill] sm:$0xff] }
 0x47d   :  { %8450 = vst [vmem:[#allocation138_spill] sm:$0xff] %v7151_v62  ;;  %2731 = vmatpush.msrb.mxu0 %v7159_v54  ;;  %2771 = vmatpush.msra.mxu2 %v6730_v59  ;;  %v8458_v59 = vld [vmem:[#allocation78_spill] sm:$0xff] }
 0x47e   :  { %8451 = vst [vmem:[#allocation139_spill] sm:$0xff] %v7154_v63  ;;  %2751 = vmatpush.msrb.mxu1 %v7162_v58  ;;  %2791 = vmatpush.msra.mxu3 %v6733_v51  ;;  %v267_v51 = vadd.f32 %v8458_v59, %v8363_v30 }
 0x47f   :  { %8452 = vst [vmem:[#allocation140_spill] sm:$0xff] %v7159_v54  ;;  %2732 = vmatpush.msrb.mxu0 %v7167_v3  ;;  %2772 = vmatpush.msra.mxu2 %v6738_v53 }
 0x480   :  { %8453 = vst [vmem:[#allocation141_spill] sm:$0xff] %v7162_v58  ;;  %2752 = vmatpush.msrb.mxu1 %v7170_v22  ;;  %2792 = vmatpush.msra.mxu3 %v6741_v40 }
 0x481   :  { %8454 = vst [vmem:[#allocation142_spill] sm:$0xff] %v7167_v3  ;;  %2733 = vmatpush.msrb.mxu0 %v7175_v6  ;;  %2773 = vmatpush.msra.mxu2 %v6746_v1 }
 0x482   :  { %8455 = vst [vmem:[#allocation143_spill] sm:$0xff] %v7170_v22  ;;  %2753 = vmatpush.msrb.mxu1 %v7178_v25  ;;  %2793 = vmatpush.msra.mxu3 %v6749_v45  ;;  %v8459_v22 = vld [vmem:[#allocation79_spill] sm:$0xff] }
 0x483   :  { %8456 = vst [vmem:[#allocation144_spill] sm:$0xff] %v7175_v6  ;;  %v308_v53 = vadd.f32 %v8459_v22, %v8365_v48  ;;  %v8461_v22 = vld [vmem:[#allocation36_spill] sm:$0xff] }
 0x484   :  { %8457 = vst [vmem:[#allocation145_spill] sm:$0xff] %v7178_v25  ;;  %v390_v25 = vadd.f32 %v8460_v36, %v8367_v2 }
 0x4a9   :  { %v2343_v58 = vpop.f32.mrf.mxu0  ;;  %v2363_v40 = vpop.f32.mrf.mxu1 }
 0x4aa   :  { %v2406_v3 = vadd.f32 %v2343_v58, %v267_v51  ;;  %v2407_v63 = vadd.f32 %v2363_v40, %v308_v53  ;;  %v422_v58 = vadd.f32 %v8461_v22, %v8369_v32 }
 0x4ac   :  { %v3594_v54 = vmul.f32 -1.442695, %v2406_v3  ;;  %v3595_v6 = vmul.f32 -1.442695, %v2407_v63  ;;  %v8462_v3 = vld [vmem:[#allocation23_spill] sm:$0xff] }
 0x4ad   :  { %v463_v63 = vadd.f32 %v8462_v3, %v8371_v12 }
 0x4ae   :  { %3803 = vpow2.f32 %v3594_v54 }
 0x4af   :  { %3805 = vpow2.f32 %v3595_v6 }
 0x4b0   :  { %v2403_v1 = vpop.f32.mrf.mxu3  ;;  %v2383_v36 = vpop.f32.mrf.mxu2 }
 0x4b1   :  { %v2409_v62 = vadd.f32 %v2403_v1, %v390_v25 }
 0x4b3   :  { %v3596_v45 = vmul.f32 -1.442695, %v2409_v62  ;;  %v8463_v62 = vld [vmem:[#allocation39_spill] sm:$0xff] }
 0x4b4   :  { %v3804_v28 = vpop.eup %3803  ;;  %v349_v40 = vadd.f32 %v8463_v62, %v8373_v5 }
 0x4b5   :  { %v3806_v15 = vpop.eup %3805  ;;  %v2501_v59 = vadd.f32 1.0, %v3804_v28  ;;  %3807 = vpow2.f32 %v3596_v45 }
 0x4b6   :  { %v2520_v30 = vadd.f32 1.0, %v3806_v15  ;;  %v2408_v2 = vadd.f32 %v2383_v36, %v349_v40 }
 0x4b7   :  { %3809 = vrcp.f32 %v2501_v59  ;;  %v2511_v48 = vand.u32 2147483647, %v2501_v59  ;;  %vm2507_vm12 = vweird.f32 %v2501_v59 }
 0x4b8   :  { %3811 = vrcp.f32 %v2520_v30  ;;  %v2532_v62 = vand.u32 2147483648, %v2520_v30  ;;  %vm2526_vm11 = vweird.f32 %v2520_v30 }
 0x4b9   :  { %v2431_v54 = vpop.f32.mrf.mxu0  ;;  %v2451_v51 = vpop.f32.mrf.mxu1  ;;  %vm2512_vm13 = vcmp.eq.f32.partialorder %v2511_v48, 8.507059e+37 }
 0x4ba   :  { %v2494_v6 = vadd.f32 %v2431_v54, %v422_v58  ;;  %v2495_v53 = vadd.f32 %v2451_v51, %v463_v63  ;;  %v2513_v54 = vand.u32 2147483648, %v2501_v59  ;;  %v8464_v51 = vld [vmem:[#allocation55_spill] sm:$0xff] }
 0x4bb   :  { %v3808_v25 = vpop.eup %3807 }
 0x4bc   :  { %v7195_v28 = vadd.f32 1.0, %v3808_v25  ;;  %v3597_v15 = vmul.f32 -1.442695, %v2494_v6  ;;  %v3598_v1 = vmul.f32 -1.442695, %v2495_v53 }
 0x4bd   :  { %v3810_v45 = vpop.eup %3809  ;;  %v2530_v53 = vand.u32 2147483647, %v2520_v30 }
 0x4be   :  { %v3812_v22 = vpop.eup %3811  ;;  %v2503_v32 = vmul.f32 %v3810_v45, %v2501_v59  ;;  %3813 = vrcp.f32 %v7195_v28  ;;  %vm2508_vm9 = vweird.f32 %v3810_v45  ;;  %vm2546_vm2 = vweird.f32 %v7195_v28 }
 0x4bf   :  { %v2522_v3 = vmul.f32 %v3812_v22, %v2520_v30  ;;  %3815 = vpow2.f32 %v3597_v15  ;;  %vm2527_vm10 = vweird.f32 %v3812_v22  ;;  %vm2509_vm14 = vmor %vm2507_vm12, %vm2508_vm9  ;;  %v2514_v15 = vor.u32 1.1754944e-38, %v2513_v54 }
 0x4c0   :  { %v2504_v12 = vsub.f32 1.0, %v2503_v32  ;;  %3817 = vpow2.f32 %v3598_v1  ;;  %v2491_v58 = vpop.f32.mrf.mxu3  ;;  %vm2528_vm15 = vmor %vm2526_vm11, %vm2527_vm10  ;;  %vm2531_vm0 = vcmp.eq.f32.partialorder %v2530_v53, 8.507059e+37  ;;  %v2471_v4 = vpop.f32.mrf.mxu2 }
 0x4c1   :  { %v2523_v63 = vsub.f32 1.0, %v2522_v3  ;;  %3819 = vtanh.f32 %v2408_v2  ;;  %v2497_v25 = vadd.f32 %v2491_v58, %v8464_v51 }
 0x4c2   :  { %v2505_v6 = vmul.f32 %v3810_v45, %v2504_v12  ;;  %v2533_v12 = vor.u32 1.1754944e-38, %v2532_v62 }
 0x4c3   :  { %v2524_v36 = vmul.f32 %v3812_v22, %v2523_v63  ;;  %v3599_v40 = vmul.f32 -1.442695, %v2497_v25 }
 0x4c4   :  { %v3814_v5 = vpop.eup %3813  ;;  %v2506_v7 = vadd.f32 %v3810_v45, %v2505_v6 }
 0x4c5   :  { %v3816_v32 = vpop.eup %3815  ;;  %v2525_v1 = vadd.f32 %v3812_v22, %v2524_v36  ;;  %v2542_v2 = vmul.f32 %v3814_v5, %v7195_v28  ;;  %3821 = vpow2.f32 %v3599_v40  ;;  %vm2547_vm1 = vweird.f32 %v3814_v5 }
 0x4c6   :  { %v3818_v3 = vpop.eup %3817  ;;  %v2510_v58 = vsel %vm2509_vm14, %v3810_v45, %v2506_v7  ;;  %v2564_v63 = vadd.f32 1.0, %v3816_v32  ;;  %v2552_v45 = vand.u32 2147483648, %v7195_v28  ;;  %vm7210_vm3 = vmor %vm2546_vm2, %vm2547_vm1 }
 0x4c7   :  { %v3820_v51 = vpop.eup %3819  ;;  %v2515_v25 = vsel %vm2512_vm13, %v2514_v15, %v2510_v58  ;;  %v2529_v46 = vsel %vm2528_vm15, %v3812_v22, %v2525_v1  ;;  %v2543_v30 = vsub.f32 1.0, %v2542_v2  ;;  %v2583_v6 = vadd.f32 1.0, %v3818_v3 }
 0x4c8   :  { %v2534_v59 = vsel %vm2531_vm0, %v2533_v12, %v2529_v46  ;;  %v2557_v48 = vmul.f32 %v3820_v51, %v2515_v25  ;;  %3823 = vrcp.f32 %v2564_v63  ;;  %v2550_v46 = vand.u32 2147483647, %v7195_v28 }
 0x4c9   :  { %v2556_v54 = vmul.f32 %v2534_v59, %v6776_v23  ;;  %v2544_v36 = vmul.f32 %v3814_v5, %v2543_v30  ;;  %3825 = vrcp.f32 %v2583_v6  ;;  %v8465_v23 = vld [vmem:[#allocation54_spill] sm:$0xff]  ;;  %v2553_v3 = vor.u32 1.1754944e-38, %v2552_v45 }
 0x4ca   :  { %v2496_v53 = vadd.f32 %v2471_v4, %v8465_v23  ;;  %vm2551_vm4 = vcmp.eq.f32.partialorder %v2550_v46, 8.507059e+37  ;;  %v2595_v51 = vand.u32 2147483648, %v2583_v6  ;;  %v2576_v28 = vand.u32 2147483648, %v2564_v63 }
 0x4cb   :  { %v3822_v18 = vpop.eup %3821  ;;  %v7201_v40 = vadd.f32 %v2557_v48, %v2556_v54  ;;  %v2545_v7 = vadd.f32 %v3814_v5, %v2544_v36  ;;  %v2574_v30 = vand.u32 2147483647, %v2564_v63  ;;  %v2593_v54 = vand.u32 2147483647, %v2583_v6 }
 0x4cc   :  { %v7205_v22 = vadd.f32 1.0, %v3822_v18  ;;  %vm2570_vm7 = vweird.f32 %v2564_v63  ;;  %vm2589_vm8 = vweird.f32 %v2583_v6 }
 0x4cd   :  { %3827 = vtanh.f32 %v7201_v40  ;;  %v2549_v18 = vsel %vm7210_vm3, %v3814_v5, %v2545_v7  ;;  %v2577_v7 = vor.u32 1.1754944e-38, %v2576_v28  ;;  %vm2575_vm11 = vcmp.eq.f32.partialorder %v2574_v30, 8.507059e+37  ;;  %v8496_v28 = vld [vmem:[#allocation103_spill] sm:$0xff]  ;;  %v8499_v30 = vld [vmem:[#allocation101_spill] sm:$0xff] }
 0x4ce   :  { %v3824_v62 = vpop.eup %3823  ;;  %3829 = vrcp.f32 %v7205_v22  ;;  %v2554_v59 = vsel %vm2551_vm4, %v2553_v3, %v2549_v18  ;;  %vm2594_vm12 = vcmp.eq.f32.partialorder %v2593_v54, 8.507059e+37  ;;  %vm2609_vm14 = vweird.f32 %v7205_v22  ;;  %v8502_v54 = vld [vmem:[#allocation104_spill] sm:$0xff] }
 0x4cf   :  { %v3826_v32 = vpop.eup %3825  ;;  %v2566_v1 = vmul.f32 %v3824_v62, %v2564_v63  ;;  %3831 = vtanh.f32 %v2496_v53  ;;  %vm2571_vm5 = vweird.f32 %v3824_v62  ;;  %v2596_v53 = vor.u32 1.1754944e-38, %v2595_v51  ;;  %v8495_v51 = vld [vmem:[#allocation97_spill] sm:$0xff] }
 0x4d0   :  { %v2585_v2 = vmul.f32 %v3826_v32, %v2583_v6  ;;  %vm2590_vm6 = vweird.f32 %v3826_v32  ;;  %vm2572_vm9 = vmor %vm2570_vm7, %vm2571_vm5 }
 0x4d1   :  { %v2567_v12 = vsub.f32 1.0, %v2566_v1  ;;  %vm2591_vm10 = vmor %vm2589_vm8, %vm2590_vm6 }
 0x4d2   :  { %v2586_v58 = vsub.f32 1.0, %v2585_v2 }
 0x4d3   :  { %v3828_v4 = vpop.eup %3827  ;;  %v2568_v25 = vmul.f32 %v3824_v62, %v2567_v12 }
 0x4d4   :  { %v2587_v48 = vmul.f32 %v3826_v32, %v2586_v58  ;;  %v7217_v36 = vmul.f32 %v3828_v4, %v2554_v59  ;;  %v7219_v23 = vpop.eup %3829  ;;  %v8494_v58 = vld [vmem:[#allocation99_spill] sm:$0xff]  ;;  %v8497_v4 = vld [vmem:[#allocation98_spill] sm:$0xff] }
 0x4d5   :  { %v2569_v5 = vadd.f32 %v3824_v62, %v2568_v25  ;;  %v2605_v46 = vmul.f32 %v7219_v23, %v7205_v22  ;;  %v3832_v63 = vpop.eup %3831  ;;  %vm2610_vm13 = vweird.f32 %v7219_v23  ;;  %v8498_v25 = vld [vmem:[#allocation100_spill] sm:$0xff]  ;;  %v8500_v59 = vld [vmem:[#allocation107_spill] sm:$0xff] }
 0x4d6   :  { %v2588_v45 = vadd.f32 %v3826_v32, %v2587_v48  ;;  %2646 = vmatmul.f32.vlgmr.msra.gmra.mxu0 %v7217_v36  ;;  %2666 = vmatmul.f32.vlgmr.msra.gmra.mxu1 %v7217_v36  ;;  %vm2611_vm15 = vmor %vm2609_vm14, %vm2610_vm13  ;;  %v8501_v48 = vld [vmem:[#allocation102_spill] sm:$0xff] }
 0x4d7   :  { %v2573_v15 = vsel %vm2572_vm9, %v3824_v62, %v2569_v5  ;;  %2686 = vmatmul.f32.vlgmr.msrb.gmra.mxu2 %v7217_v36  ;;  %2706 = vmatmul.f32.vlgmr.msrb.gmra.mxu3 %v7217_v36  ;;  %v2606_v2 = vsub.f32 1.0, %v2605_v46  ;;  %v8504_v5 = vld [vmem:[#allocation111_spill] sm:$0xff]  ;;  %v8507_v46 = vld [vmem:[#allocation109_spill] sm:$0xff] }
 0x4d8   :  { %v2578_v6 = vsel %vm2575_vm11, %v2577_v7, %v2573_v15  ;;  %v2592_v1 = vsel %vm2591_vm10, %v3826_v32, %v2588_v45  ;;  %2934 = vmatpush.msra.mxu0 %v6810_v14  ;;  %2954 = vmatpush.msra.mxu1 %v6813_v38  ;;  %v8493_v32 = vld [vmem:[#allocation96_spill] sm:$0xff]  ;;  %v8505_v7 = vld [vmem:[#allocation106_spill] sm:$0xff] }
 0x4d9   :  { %v2597_v18 = vsel %vm2594_vm12, %v2596_v53, %v2592_v1  ;;  %v2620_v3 = vmul.f32 %v3832_v63, %v2578_v6  ;;  %2974 = vmatpush.msrb.mxu2 %v6818_v41  ;;  %2994 = vmatpush.msrb.mxu3 %v6821_v47  ;;  %v2607_v12 = vmul.f32 %v7219_v23, %v2606_v2  ;;  %v2615_v41 = vand.u32 2147483648, %v7205_v22  ;;  %v8506_v45 = vld [vmem:[#allocation108_spill] sm:$0xff]  ;;  %v8508_v53 = vld [vmem:[#allocation115_spill] sm:$0xff]  ;;  %v8509_v15 = vld [vmem:[#allocation110_spill] sm:$0xff] }
 0x4da   :  { %v2619_v62 = vmul.f32 %v2597_v18, %v6830_v33  ;;  %2935 = vmatpush.msra.mxu0 %v6824_v9  ;;  %2955 = vmatpush.msra.mxu1 %v6827_v29  ;;  %v2613_v47 = vand.u32 2147483647, %v7205_v22  ;;  %v8492_v22 = vld [vmem:[#allocation94_spill] sm:$0xff]  ;;  %v8510_v63 = vld [vmem:[#allocation112_spill] sm:$0xff]  ;;  %v8511_v6 = vld [vmem:[#allocation113_spill] sm:$0xff] }
 0x4db   :  { %2975 = vmatpush.msrb.mxu2 %v6832_v50  ;;  %2995 = vmatpush.msrb.mxu3 %v6835_v16  ;;  %v2608_v38 = vadd.f32 %v7219_v23, %v2607_v12  ;;  %v2616_v29 = vor.u32 1.1754944e-38, %v2615_v41  ;;  %v8512_v1 = vld [vmem:[#allocation119_spill] sm:$0xff]  ;;  %v8513_v2 = vld [vmem:[#allocation114_spill] sm:$0xff]  ;;  %v8514_v18 = vld [vmem:[#allocation116_spill] sm:$0xff] }
 0x4dc   :  { %v7237_v14 = vadd.f32 %v2620_v3, %v2619_v62  ;;  %2936 = vmatpush.msra.mxu0 %v6840_v61  ;;  %2956 = vmatpush.msra.mxu1 %v6843_v20  ;;  %vm2614_vm0 = vcmp.eq.f32.partialorder %v2613_v47, 8.507059e+37  ;;  %v8468_v61 = vld [vmem:[#allocation64_spill] sm:$0xff]  ;;  %v8515_v3 = vld [vmem:[#allocation117_spill] sm:$0xff]  ;;  %v8516_v62 = vld [vmem:[#allocation123_spill] sm:$0xff] }
 0x4dd   :  { %2976 = vmatpush.msrb.mxu2 %v6848_v57  ;;  %2996 = vmatpush.msrb.mxu3 %v6851_v17  ;;  %v2612_v9 = vsel %vm2611_vm15, %v7219_v23, %v2608_v38  ;;  %v8469_v20 = vld [vmem:[#allocation72_spill] sm:$0xff]  ;;  %v8470_v57 = vld [vmem:[#allocation43_spill] sm:$0xff]  ;;  %v8471_v17 = vld [vmem:[#allocation73_spill] sm:$0xff] }
 0x4de   :  { %3833 = vtanh.f32 %v7237_v14  ;;  %2937 = vmatpush.msra.mxu0 %v6856_v21  ;;  %2957 = vmatpush.msra.mxu1 %v6859_v19  ;;  %v2617_v50 = vsel %vm2614_vm0, %v2616_v29, %v2612_v9  ;;  %v8472_v21 = vld [vmem:[#allocation25_spill] sm:$0xff]  ;;  %v8473_v19 = vld [vmem:[#allocation35_spill] sm:$0xff]  ;;  %v8517_v12 = vld [vmem:[#allocation118_spill] sm:$0xff] }
 0x4df   :  { %2977 = vmatpush.msrb.mxu2 %v6868_v39  ;;  %2997 = vmatpush.msrb.mxu3 %v6871_v8  ;;  %v8474_v39 = vld [vmem:[#allocation52_spill] sm:$0xff]  ;;  %v8475_v8 = vld [vmem:[#allocation22_spill] sm:$0xff]  ;;  %v8503_v23 = vld [vmem:[#allocation105_spill] sm:$0xff] }
 0x4e0   :  { %2938 = vmatpush.msra.mxu0 %v6877_v34  ;;  %2958 = vmatpush.msra.mxu1 %v6880_v35  ;;  %v8476_v34 = vld [vmem:[#allocation56_spill] sm:$0xff]  ;;  %v8477_v35 = vld [vmem:[#allocation67_spill] sm:$0xff]  ;;  %v8519_v41 = vld [vmem:[#allocation121_spill] sm:$0xff] }
 0x4e1   :  { %2978 = vmatpush.msrb.mxu2 %v6883_v56  ;;  %2998 = vmatpush.msrb.mxu3 %v6886_v13  ;;  %v8478_v56 = vld [vmem:[#allocation77_spill] sm:$0xff]  ;;  %v8518_v38 = vld [vmem:[#allocation120_spill] sm:$0xff]  ;;  %v8520_v47 = vld [vmem:[#allocation122_spill] sm:$0xff] }
 0x4e2   :  { %2939 = vmatpush.msra.mxu0 %v6889_v26  ;;  %2959 = vmatpush.msra.mxu1 %v6892_v52  ;;  %v8479_v13 = vld [vmem:[#allocation69_spill] sm:$0xff]  ;;  %v8480_v26 = vld [vmem:[#allocation74_spill] sm:$0xff]  ;;  %v8481_v52 = vld [vmem:[#allocation84_spill] sm:$0xff] }
 0x4e3   :  { %2979 = vmatpush.msrb.mxu2 %v6895_v24  ;;  %2999 = vmatpush.msrb.mxu3 %v6898_v10  ;;  %v8482_v24 = vld [vmem:[#allocation87_spill] sm:$0xff]  ;;  %v8483_v10 = vld [vmem:[#allocation85_spill] sm:$0xff]  ;;  %v8521_v9 = vld [vmem:[#allocation124_spill] sm:$0xff] }
 0x4e4   :  { %v3834_v33 = vpop.eup %3833  ;;  %2940 = vmatpush.msra.mxu0 %v6903_v37  ;;  %2960 = vmatpush.msra.mxu1 %v6906_v27  ;;  %v8484_v37 = vld [vmem:[#allocation86_spill] sm:$0xff]  ;;  %v8485_v27 = vld [vmem:[#allocation88_spill] sm:$0xff]  ;;  %v8522_v29 = vld [vmem:[#allocation125_spill] sm:$0xff] }
 0x4e5   :  { %v7264_v16 = vmul.f32 %v3834_v33, %v2617_v50  ;;  %2980 = vmatpush.msrb.mxu2 %v6909_v60  ;;  %3000 = vmatpush.msrb.mxu3 %v6912_v49  ;;  %v8486_v60 = vld [vmem:[#allocation91_spill] sm:$0xff]  ;;  %v8487_v49 = vld [vmem:[#allocation89_spill] sm:$0xff]  ;;  %v8523_v33 = vld [vmem:[#allocation126_spill] sm:$0xff] }
 0x4e6   :  { %2941 = vmatpush.msra.mxu0 %v6919_v42  ;;  %2961 = vmatpush.msra.mxu1 %v6922_v31  ;;  %v8488_v42 = vld [vmem:[#allocation90_spill] sm:$0xff]  ;;  %v8489_v31 = vld [vmem:[#allocation92_spill] sm:$0xff]  ;;  %v8524_v50 = vld [vmem:[#allocation127_spill] sm:$0xff] }
 0x4e7   :  { %2734 = vmatmul.f32.vlgmr.msrb.gmra.mxu0 %v7264_v16  ;;  %2754 = vmatmul.f32.vlgmr.msrb.gmra.mxu1 %v7264_v16 }
 0x4e8   :  { %2774 = vmatmul.f32.vlgmr.msra.gmra.mxu2 %v7264_v16  ;;  %2794 = vmatmul.f32.vlgmr.msra.gmra.mxu3 %v7264_v16 }
 0x4e9   :  { %2942 = vmatpush.msra.mxu0 %v6931_v43  ;;  %2981 = vmatpush.msrb.mxu2 %v6925_v44  ;;  %v8490_v44 = vld [vmem:[#allocation95_spill] sm:$0xff]  ;;  %v8491_v43 = vld [vmem:[#allocation93_spill] sm:$0xff] }
 0x4ea   :  { %3001 = vmatpush.msrb.mxu3 %v8468_v61  ;;  %2962 = vmatpush.msra.mxu1 %v8469_v20  ;;  %v8525_v61 = vld [vmem:[#allocation128_spill] sm:$0xff]  ;;  %v8526_v20 = vld [vmem:[#allocation129_spill] sm:$0xff] }
 0x4eb   :  { %2943 = vmatpush.msra.mxu0 %v8470_v57  ;;  %2982 = vmatpush.msrb.mxu2 %v8471_v17  ;;  %v8527_v57 = vld [vmem:[#allocation130_spill] sm:$0xff]  ;;  %v8528_v17 = vld [vmem:[#allocation132_spill] sm:$0xff] }
 0x4ec   :  { %3002 = vmatpush.msrb.mxu3 %v8472_v21  ;;  %2963 = vmatpush.msra.mxu1 %v8473_v19  ;;  %v4298_v21 = vld [vmem:[#allocation12 + $0x118] sm:$0xff]  ;;  %v8529_v19 = vld [vmem:[#allocation131_spill] sm:$0xff] }
 0x4ed   :  { %2944 = vmatpush.msra.mxu0 %v8474_v39  ;;  %2983 = vmatpush.msrb.mxu2 %v8475_v8  ;;  %v8530_v39 = vld [vmem:[#allocation134_spill] sm:$0xff]  ;;  %v4300_v8 = vld [vmem:[#allocation12 + $0xf8] sm:$0xff] }
 0x4ee   :  { %3003 = vmatpush.msrb.mxu3 %v8476_v34  ;;  %2964 = vmatpush.msra.mxu1 %v8477_v35  ;;  %v8531_v34 = vld [vmem:[#allocation133_spill] sm:$0xff]  ;;  %v8532_v35 = vld [vmem:[#allocation136_spill] sm:$0xff] }
 0x4ef   :  { %2945 = vmatpush.msra.mxu0 %v8478_v56  ;;  %2984 = vmatpush.msrb.mxu2 %v8479_v13  ;;  %v4302_v56 = vld [vmem:[#allocation12 + $0xd8] sm:$0xff]  ;;  %v8533_v13 = vld [vmem:[#allocation135_spill] sm:$0xff] }
 0x4f0   :  { %3004 = vmatpush.msrb.mxu3 %v8480_v26  ;;  %2965 = vmatpush.msra.mxu1 %v8481_v52  ;;  %v4303_v26 = vld [vmem:[#allocation12 + $0xb0] sm:$0xff]  ;;  %v8534_v52 = vld [vmem:[#allocation138_spill] sm:$0xff] }
 0x4f1   :  { %2946 = vmatpush.msra.mxu0 %v8482_v24  ;;  %2985 = vmatpush.msrb.mxu2 %v8483_v10  ;;  %v4304_v24 = vld [vmem:[#allocation12 + $0xb8] sm:$0xff]  ;;  %v8535_v10 = vld [vmem:[#allocation137_spill] sm:$0xff] }
 0x4f2   :  { %3005 = vmatpush.msrb.mxu3 %v8484_v37  ;;  %2966 = vmatpush.msra.mxu1 %v8485_v27  ;;  %v4305_v37 = vld [vmem:[#allocation12 + $0x90] sm:$0xff]  ;;  %v8536_v27 = vld [vmem:[#allocation140_spill] sm:$0xff] }
 0x4f3   :  { %2947 = vmatpush.msra.mxu0 %v8486_v60  ;;  %2986 = vmatpush.msrb.mxu2 %v8487_v49  ;;  %v4306_v60 = vld [vmem:[#allocation12 + $0x98] sm:$0xff]  ;;  %v8537_v49 = vld [vmem:[#allocation139_spill] sm:$0xff] }
 0x4f4   :  { %3006 = vmatpush.msrb.mxu3 %v8488_v42  ;;  %2967 = vmatpush.msra.mxu1 %v8489_v31  ;;  %v4307_v42 = vld [vmem:[#allocation12 + $0x70] sm:$0xff]  ;;  %v8538_v31 = vld [vmem:[#allocation142_spill] sm:$0xff] }
 0x4f5   :  { %2948 = vmatpush.msra.mxu0 %v8490_v44  ;;  %2987 = vmatpush.msrb.mxu2 %v8491_v43  ;;  %v4308_v44 = vld [vmem:[#allocation12 + $0x78] sm:$0xff]  ;;  %v8539_v43 = vld [vmem:[#allocation141_spill] sm:$0xff] }
 0x4f6   :  { %3007 = vmatpush.msrb.mxu3 %v8492_v22  ;;  %2968 = vmatpush.msra.mxu1 %v8493_v32  ;;  %v4309_v22 = vld [vmem:[#allocation12 + $0x50] sm:$0xff]  ;;  %v8540_v32 = vld [vmem:[#allocation144_spill] sm:$0xff] }
 0x4f7   :  { %2949 = vmatpush.msra.mxu0 %v8494_v58  ;;  %2988 = vmatpush.msrb.mxu2 %v8495_v51  ;;  %v4310_v58 = vld [vmem:[#allocation12 + $0x58] sm:$0xff]  ;;  %v8541_v51 = vld [vmem:[#allocation143_spill] sm:$0xff] }
 0x4f8   :  { %3008 = vmatpush.msrb.mxu3 %v8497_v4  ;;  %2969 = vmatpush.msra.mxu1 %v8498_v25  ;;  %v4312_v4 = vld [vmem:[#allocation12 + $0x38] sm:$0xff]  ;;  %v8542_v25 = vld [vmem:[#allocation145_spill] sm:$0xff] }
 0x4f9   :  { %3022 = vmatpush.msrb.mxu0 %v8496_v28  ;;  %2989 = vmatpush.msrb.mxu2 %v8499_v30  ;;  %v4311_v28 = vld [vmem:[#allocation12 + $0x30] sm:$0xff] }
 0x4fa   :  { %3009 = vmatpush.msrb.mxu3 %v8501_v48  ;;  %3042 = vmatpush.msrb.mxu1 %v8502_v54  ;;  %v4313_v30 = vld [vmem:[#allocation12 + $0x10] sm:$0xff]  ;;  %v8543_v48 = vld [vmem:[#allocation46_spill] sm:$0xff]  ;;  %v8544_v54 = vld [vmem:[#allocation80_spill] sm:$0xff] }
 0x4fb   :  { %3023 = vmatpush.msrb.mxu0 %v8500_v59  ;;  %3062 = vmatpush.msra.mxu2 %v8503_v23  ;;  %v4314_v59 = vld [vmem:[#allocation12 + $0x18] sm:$0xff]  ;;  %v270_v23 = vadd.f32 %v8544_v54, %v8543_v48 }
 0x4fc   :  { %3082 = vmatpush.msra.mxu3 %v8505_v7  ;;  %3043 = vmatpush.msrb.mxu1 %v8506_v45  ;;  %v8546_v7 = vld [vmem:[#allocation81_spill] sm:$0xff] }
 0x4fd   :  { %3024 = vmatpush.msrb.mxu0 %v8504_v5  ;;  %3063 = vmatpush.msra.mxu2 %v8507_v46  ;;  %v8545_v5 = vld [vmem:[#allocation49_spill] sm:$0xff] }
 0x4fe   :  { %3083 = vmatpush.msra.mxu3 %v8509_v15  ;;  %3044 = vmatpush.msrb.mxu1 %v8510_v63  ;;  %v311_v45 = vadd.f32 %v8546_v7, %v8545_v5 }
 0x4ff   :  { %3025 = vmatpush.msrb.mxu0 %v8508_v53  ;;  %3064 = vmatpush.msra.mxu2 %v8511_v6 }
 0x500   :  { %3084 = vmatpush.msra.mxu3 %v8513_v2  ;;  %3045 = vmatpush.msrb.mxu1 %v8514_v18  ;;  %v8547_v2 = vld [vmem:[#allocation60_spill] sm:$0xff] }
 0x501   :  { %3026 = vmatpush.msrb.mxu0 %v8512_v1  ;;  %3065 = vmatpush.msra.mxu2 %v8515_v3  ;;  %v8548_v18 = vld [vmem:[#allocation44_spill] sm:$0xff] }
 0x502   :  { %3085 = vmatpush.msra.mxu3 %v8517_v12  ;;  %3046 = vmatpush.msrb.mxu1 %v8518_v38  ;;  %v393_v3 = vadd.f32 %v8548_v18, %v8547_v2 }
 0x503   :  { %3027 = vmatpush.msrb.mxu0 %v8516_v62  ;;  %3066 = vmatpush.msra.mxu2 %v8519_v41 }
 0x504   :  { %3086 = vmatpush.msra.mxu3 %v8520_v47  ;;  %3047 = vmatpush.msrb.mxu1 %v8521_v9 }
 0x505   :  { %3028 = vmatpush.msrb.mxu0 %v7099_v11  ;;  %3067 = vmatpush.msra.mxu2 %v8522_v29  ;;  %v4297_v11 = vld [vmem:[#allocation12 + $0x110] sm:$0xff] }
 0x506   :  { %3087 = vmatpush.msra.mxu3 %v8523_v33  ;;  %3048 = vmatpush.msrb.mxu1 %v8524_v50  ;;  %v8549_v33 = vld [vmem:[#allocation50_spill] sm:$0xff]  ;;  %v8550_v50 = vld [vmem:[#allocation32_spill] sm:$0xff] }
 0x507   :  { %3029 = vmatpush.msrb.mxu0 %v7111_v0  ;;  %3068 = vmatpush.msra.mxu2 %v8525_v61  ;;  %v4299_v0 = vld [vmem:[#allocation12 + $0xf0] sm:$0xff]  ;;  %v419_v61 = vadd.f32 %v8550_v50, %v8549_v33 }
 0x508   :  { %3088 = vmatpush.msra.mxu3 %v8526_v20  ;;  %3049 = vmatpush.msrb.mxu1 %v8527_v57  ;;  %v8551_v20 = vld [vmem:[#allocation53_spill] sm:$0xff] }
 0x509   :  { %3030 = vmatpush.msrb.mxu0 %v7119_v55  ;;  %3069 = vmatpush.msra.mxu2 %v4297_v11  ;;  %v4301_v55 = vld [vmem:[#allocation12 + $0xd0] sm:$0xff]  ;;  %v8552_v57 = vld [vmem:[#allocation33_spill] sm:$0xff] }
 0x50a   :  { %3089 = vmatpush.msra.mxu3 %v4298_v21  ;;  %3050 = vmatpush.msrb.mxu1 %v8529_v19  ;;  %v460_v11 = vadd.f32 %v8552_v57, %v8551_v20 }
 0x50b   :  { %3031 = vmatpush.msrb.mxu0 %v8528_v17  ;;  %3070 = vmatpush.msra.mxu2 %v4299_v0 }
 0x50c   :  { %3090 = vmatpush.msra.mxu3 %v4300_v8  ;;  %3051 = vmatpush.msrb.mxu1 %v8531_v34  ;;  %v8554_v8 = vld [vmem:[#allocation34_spill] sm:$0xff] }
 0x50d   :  { %3032 = vmatpush.msrb.mxu0 %v8530_v39  ;;  %3071 = vmatpush.msra.mxu2 %v4301_v55  ;;  %v8553_v39 = vld [vmem:[#allocation61_spill] sm:$0xff] }
 0x50e   :  { %3091 = vmatpush.msra.mxu3 %v4302_v56  ;;  %3052 = vmatpush.msrb.mxu1 %v8533_v13  ;;  %v352_v34 = vadd.f32 %v8554_v8, %v8553_v39 }
 0x50f   :  { %3033 = vmatpush.msrb.mxu0 %v8532_v35  ;;  %3072 = vmatpush.msra.mxu2 %v4303_v26 }
 0x510   :  { %3092 = vmatpush.msra.mxu3 %v4304_v24  ;;  %3053 = vmatpush.msrb.mxu1 %v8535_v10 }
 0x511   :  { %3034 = vmatpush.msrb.mxu0 %v8534_v52  ;;  %3073 = vmatpush.msra.mxu2 %v4305_v37 }
 0x512   :  { %3093 = vmatpush.msra.mxu3 %v4306_v60  ;;  %3054 = vmatpush.msrb.mxu1 %v8537_v49 }
 0x513   :  { %3035 = vmatpush.msrb.mxu0 %v8536_v27  ;;  %3074 = vmatpush.msra.mxu2 %v4307_v42 }
 0x514   :  { %3094 = vmatpush.msra.mxu3 %v4308_v44  ;;  %3055 = vmatpush.msrb.mxu1 %v8539_v43 }
 0x515   :  { %3036 = vmatpush.msrb.mxu0 %v8538_v31  ;;  %3075 = vmatpush.msra.mxu2 %v4309_v22 }
 0x516   :  { %3095 = vmatpush.msra.mxu3 %v4310_v58  ;;  %3056 = vmatpush.msrb.mxu1 %v8541_v51  ;;  %v8555_v58 = vld [vmem:[#allocation45_spill] sm:$0xff] }
 0x517   :  { %3037 = vmatpush.msrb.mxu0 %v8540_v32  ;;  %3076 = vmatpush.msra.mxu2 %v4311_v28 }
 0x518   :  { %3096 = vmatpush.msra.mxu3 %v4312_v4  ;;  %3057 = vmatpush.msrb.mxu1 %v8542_v25 }
 0x519   :  { %3077 = vmatpush.msra.mxu2 %v4313_v30 }
 0x51a   :  { %3097 = vmatpush.msra.mxu3 %v4314_v59 }
 0x553   :  { %v2647_v46 = vpop.f32.mrf.mxu0  ;;  %v2667_v53 = vpop.f32.mrf.mxu1 }
 0x554   :  { %v2710_v15 = vadd.f32 %v2647_v46, %v270_v23  ;;  %v2711_v63 = vadd.f32 %v2667_v53, %v311_v45 }
 0x556   :  { %v3600_v6 = vmul.f32 -1.442695, %v2710_v15  ;;  %v3601_v1 = vmul.f32 -1.442695, %v2711_v63 }
 0x558   :  { %3835 = vpow2.f32 %v3600_v6 }
 0x559   :  { %3837 = vpow2.f32 %v3601_v1 }
 0x55a   :  { %v2707_v62 = vpop.f32.mrf.mxu3  ;;  %v2687_v17 = vpop.f32.mrf.mxu2 }
 0x55b   :  { %v2713_v12 = vadd.f32 %v2707_v62, %v393_v3  ;;  %v2712_v26 = vadd.f32 %v2687_v17, %v352_v34 }
 0x55d   :  { %v3602_v38 = vmul.f32 -1.442695, %v2713_v12 }
 0x55e   :  { %v3836_v41 = vpop.eup %3835 }
 0x55f   :  { %v3838_v47 = vpop.eup %3837  ;;  %v2805_v9 = vadd.f32 1.0, %v3836_v41  ;;  %3839 = vpow2.f32 %v3602_v38 }
 0x560   :  { %v2824_v29 = vadd.f32 1.0, %v3838_v47 }
 0x561   :  { %3841 = vrcp.f32 %v2805_v9  ;;  %v2815_v49 = vand.u32 2147483647, %v2805_v9  ;;  %v2817_v44 = vand.u32 2147483648, %v2805_v9  ;;  %vm2811_vm3 = vweird.f32 %v2805_v9 }
 0x562   :  { %3843 = vrcp.f32 %v2824_v29  ;;  %v2836_v31 = vand.u32 2147483648, %v2824_v29  ;;  %v2834_v32 = vand.u32 2147483647, %v2824_v29  ;;  %vm2830_vm4 = vweird.f32 %v2824_v29 }
 0x563   :  { %vm2816_vm5 = vcmp.eq.f32.partialorder %v2815_v49, 8.507059e+37  ;;  %v2818_v23 = vor.u32 1.1754944e-38, %v2817_v44 }
 0x564   :  { %v2735_v21 = vpop.f32.mrf.mxu0  ;;  %v2755_v19 = vpop.f32.mrf.mxu1  ;;  %v2837_v54 = vor.u32 1.1754944e-38, %v2836_v31  ;;  %vm2835_vm8 = vcmp.eq.f32.partialorder %v2834_v32, 8.507059e+37 }
 0x565   :  { %v3840_v0 = vpop.eup %3839  ;;  %v2798_v55 = vadd.f32 %v2735_v21, %v419_v61  ;;  %v2799_v35 = vadd.f32 %v2755_v19, %v460_v11 }
 0x566   :  { %v7366_v56 = vadd.f32 1.0, %v3840_v0  ;;  %v3250_v0 = vld [vmem:[#allocation13] sm:$0xff] }
 0x567   :  { %v3842_v13 = vpop.eup %3841  ;;  %v3603_v52 = vmul.f32 -1.442695, %v2798_v55  ;;  %v3604_v24 = vmul.f32 -1.442695, %v2799_v35 }
 0x568   :  { %v3844_v10 = vpop.eup %3843  ;;  %v2807_v37 = vmul.f32 %v3842_v13, %v2805_v9  ;;  %3845 = vrcp.f32 %v7366_v56  ;;  %vm2812_vm1 = vweird.f32 %v3842_v13  ;;  %v2856_v61 = vand.u32 2147483648, %v7366_v56 }
 0x569   :  { %v2826_v27 = vmul.f32 %v3844_v10, %v2824_v29  ;;  %3847 = vpow2.f32 %v3603_v52  ;;  %vm2831_vm2 = vweird.f32 %v3844_v10  ;;  %vm2813_vm6 = vmor %vm2811_vm3, %vm2812_vm1  ;;  %v2854_v11 = vand.u32 2147483647, %v7366_v56 }
 0x56a   :  { %v2808_v60 = vsub.f32 1.0, %v2807_v37  ;;  %3849 = vpow2.f32 %v3604_v24  ;;  %vm2832_vm7 = vmor %vm2830_vm4, %vm2831_vm2  ;;  %vm2850_vm10 = vweird.f32 %v7366_v56  ;;  %v2857_v35 = vor.u32 1.1754944e-38, %v2856_v61  ;;  %v3257_v61 = vld [vmem:[#allocation13 + $0x38] sm:$0xff] }
 0x56b   :  { %v2827_v42 = vsub.f32 1.0, %v2826_v27  ;;  %3851 = vtanh.f32 %v2712_v26  ;;  %v2795_v43 = vpop.f32.mrf.mxu3  ;;  %v2775_v9 = vpop.f32.mrf.mxu2  ;;  %vm2855_vm12 = vcmp.eq.f32.partialorder %v2854_v11, 8.507059e+37  ;;  %v3255_v11 = vld [vmem:[#allocation13 + $0x28] sm:$0xff] }
 0x56c   :  { %v2809_v22 = vmul.f32 %v3842_v13, %v2808_v60  ;;  %v2801_v51 = vadd.f32 %v2795_v43, %v8555_v58  ;;  %v3265_v43 = vld [vmem:[#allocation13 + $0x78] sm:$0xff] }
 0x56d   :  { %v2828_v28 = vmul.f32 %v3844_v10, %v2827_v42 }
 0x56e   :  { %v3846_v4 = vpop.eup %3845  ;;  %v2810_v25 = vadd.f32 %v3842_v13, %v2809_v22  ;;  %v3605_v30 = vmul.f32 -1.442695, %v2801_v51 }
 0x56f   :  { %v3848_v59 = vpop.eup %3847  ;;  %v2829_v7 = vadd.f32 %v3844_v10, %v2828_v28  ;;  %v2846_v45 = vmul.f32 %v3846_v4, %v7366_v56  ;;  %vm2851_vm9 = vweird.f32 %v3846_v4 }
 0x570   :  { %v3850_v46 = vpop.eup %3849  ;;  %v2814_v53 = vsel %vm2813_vm6, %v3842_v13, %v2810_v25  ;;  %v2868_v15 = vadd.f32 1.0, %v3848_v59  ;;  %3853 = vpow2.f32 %v3605_v30  ;;  %vm7384_vm11 = vmor %vm2850_vm10, %vm2851_vm9 }
 0x571   :  { %v3852_v63 = vpop.eup %3851  ;;  %v2819_v6 = vsel %vm2816_vm5, %v2818_v23, %v2814_v53  ;;  %v2833_v1 = vsel %vm2832_vm7, %v3844_v10, %v2829_v7  ;;  %v2847_v18 = vsub.f32 1.0, %v2846_v45  ;;  %v7371_v3 = vadd.f32 1.0, %v3850_v46  ;;  %v3263_v45 = vld [vmem:[#allocation13 + $0x68] sm:$0xff] }
 0x572   :  { %v2838_v62 = vsel %vm2835_vm8, %v2837_v54, %v2833_v1  ;;  %v2861_v12 = vmul.f32 %v3852_v63, %v2819_v6  ;;  %3855 = vrcp.f32 %v2868_v15  ;;  %v2880_v52 = vand.u32 2147483648, %v2868_v15  ;;  %v3261_v1 = vld [vmem:[#allocation13 + $0x58] sm:$0xff] }
 0x573   :  { %v2860_v38 = vmul.f32 %v2838_v62, %v7201_v40  ;;  %v2848_v41 = vmul.f32 %v3846_v4, %v2847_v18  ;;  %3857 = vrcp.f32 %v7371_v3  ;;  %v8556_v40 = vld [vmem:[#allocation42_spill] sm:$0xff]  ;;  %v2899_v56 = vand.u32 2147483648, %v7371_v3  ;;  %v3260_v62 = vld [vmem:[#allocation13 + $0x50] sm:$0xff] }
 0x574   :  { %v2800_v21 = vadd.f32 %v2775_v9, %v8556_v40  ;;  %v2878_v37 = vand.u32 2147483647, %v2868_v15  ;;  %v2897_v49 = vand.u32 2147483647, %v7371_v3  ;;  %vm2874_vm15 = vweird.f32 %v2868_v15  ;;  %v3253_v40 = vld [vmem:[#allocation13 + $0x18] sm:$0xff] }
 0x575   :  { %v7375_v47 = vadd.f32 %v2861_v12, %v2860_v38  ;;  %v2849_v50 = vadd.f32 %v3846_v4, %v2848_v41  ;;  %vm2893_vm0 = vweird.f32 %v7371_v3  ;;  %v2881_v22 = vor.u32 1.1754944e-38, %v2880_v52  ;;  %v3259_v12 = vld [vmem:[#allocation13 + $0x48] sm:$0xff]  ;;  %v3258_v41 = vld [vmem:[#allocation13 + $0x40] sm:$0xff]  ;;  %v8565_v52 = vld [vmem:[#allocation83_spill] sm:$0xff] }
 0x576   :  { %v3854_v29 = vpop.eup %3853  ;;  %v2900_v51 = vor.u32 1.1754944e-38, %v2899_v56  ;;  %vm2879_vm3 = vcmp.eq.f32.partialorder %v2878_v37, 8.507059e+37  ;;  %vm2898_vm4 = vcmp.eq.f32.partialorder %v2897_v49, 8.507059e+37 }
 0x577   :  { %3859 = vtanh.f32 %v7375_v47  ;;  %v7379_v57 = vadd.f32 1.0, %v3854_v29  ;;  %v2853_v55 = vsel %vm7384_vm11, %v3846_v4, %v2849_v50  ;;  %v3264_v4 = vld [vmem:[#allocation13 + $0x70] sm:$0xff] }
 0x578   :  { %v3856_v17 = vpop.eup %3855  ;;  %v2858_v27 = vsel %vm2855_vm12, %v2857_v35, %v2853_v55  ;;  %v8561_v55 = vld [vmem:[#allocation66_spill] sm:$0xff]  ;;  %v8562_v35 = vld [vmem:[#allocation48_spill] sm:$0xff] }
 0x579   :  { %v3858_v19 = vpop.eup %3857  ;;  %v2870_v8 = vmul.f32 %v3856_v17, %v2868_v15  ;;  %3861 = vrcp.f32 %v7379_v57  ;;  %vm2875_vm13 = vweird.f32 %v3856_v17  ;;  %v3262_v15 = vld [vmem:[#allocation13 + $0x60] sm:$0xff]  ;;  %v2919_v18 = vand.u32 2147483648, %v7379_v57 }
 0x57a   :  { %v2889_v34 = vmul.f32 %v3858_v19, %v7371_v3  ;;  %3863 = vtanh.f32 %v2800_v21  ;;  %vm2894_vm14 = vweird.f32 %v3858_v19  ;;  %vm2876_vm1 = vmor %vm2874_vm15, %vm2875_vm13  ;;  %vm2913_vm6 = vweird.f32 %v7379_v57  ;;  %v3252_v21 = vld [vmem:[#allocation13 + $0x10] sm:$0xff] }
 0x57b   :  { %v2871_v13 = vsub.f32 1.0, %v2870_v8  ;;  %vm2895_vm2 = vmor %vm2893_vm0, %vm2894_vm14  ;;  %v2917_v3 = vand.u32 2147483647, %v7379_v57  ;;  %v2920_v38 = vor.u32 1.1754944e-38, %v2919_v18  ;;  %v8559_v8 = vld [vmem:[#allocation62_spill] sm:$0xff]  ;;  %v3272_v18 = vld [vmem:[#allocation13 + $0xb0] sm:$0xff] }
 0x57c   :  { %v2890_v26 = vsub.f32 1.0, %v2889_v34  ;;  %v8560_v34 = vld [vmem:[#allocation57_spill] sm:$0xff] }
 0x57d   :  { %v3860_v24 = vpop.eup %3859  ;;  %v2872_v10 = vmul.f32 %v3856_v17, %v2871_v13  ;;  %vm2918_vm8 = vcmp.eq.f32.partialorder %v2917_v3, 8.507059e+37  ;;  %v8563_v13 = vld [vmem:[#allocation21_spill] sm:$0xff] }
 0x57e   :  { %v2891_v60 = vmul.f32 %v3858_v19, %v2890_v26  ;;  %v7394_v42 = vmul.f32 %v3860_v24, %v2858_v27  ;;  %v8564_v26 = vld [vmem:[#allocation82_spill] sm:$0xff]  ;;  %v314_v24 = vadd.f32 %v8565_v52, %v8545_v5 }
 0x57f   :  { %v3862_v31 = vpop.eup %3861  ;;  %v2873_v44 = vadd.f32 %v3856_v17, %v2872_v10  ;;  %v273_v56 = vadd.f32 %v8564_v26, %v8543_v48  ;;  %v3281_v10 = vld [vmem:[#allocation13 + $0xf8] sm:$0xff] }
 0x580   :  { %v2892_v32 = vadd.f32 %v3858_v19, %v2891_v60  ;;  %v2909_v58 = vmul.f32 %v3862_v31, %v7379_v57  ;;  %2950 = vmatmul.f32.vlgmr.msra.gmra.mxu0 %v7394_v42  ;;  %2970 = vmatmul.f32.vlgmr.msra.gmra.mxu1 %v7394_v42  ;;  %v3864_v25 = vpop.eup %3863  ;;  %vm2914_vm5 = vweird.f32 %v3862_v31  ;;  %v3256_v57 = vld [vmem:[#allocation13 + $0x30] sm:$0xff] }
 0x581   :  { %v2877_v28 = vsel %vm2876_vm1, %v3856_v17, %v2873_v44  ;;  %2990 = vmatmul.f32.vlgmr.msrb.gmra.mxu2 %v7394_v42  ;;  %3010 = vmatmul.f32.vlgmr.msrb.gmra.mxu3 %v7394_v42  ;;  %vm2915_vm7 = vmor %vm2913_vm6, %vm2914_vm5  ;;  %v3254_v17 = vld [vmem:[#allocation13 + $0x20] sm:$0xff] }
 0x582   :  { %v2882_v30 = vsel %vm2879_vm3, %v2881_v22, %v2877_v28  ;;  %v2896_v59 = vsel %vm2895_vm2, %v3858_v19, %v2892_v32  ;;  %v2910_v54 = vsub.f32 1.0, %v2909_v58  ;;  %3286 = vmatpush.msra.mxu0 %v3265_v43  ;;  %v3251_v19 = vld [vmem:[#allocation13 + $0x8] sm:$0xff]  ;;  %3327 = vmatpush.msra.mxu1 %v3281_v10  ;;  %v3277_v32 = vld [vmem:[#allocation13 + $0xd8] sm:$0xff] }
 0x583   :  { %v2901_v23 = vsel %vm2898_vm4, %v2900_v51, %v2896_v59  ;;  %v2924_v7 = vmul.f32 %v3864_v25, %v2882_v30  ;;  %v3279_v22 = vld [vmem:[#allocation13 + $0xe8] sm:$0xff]  ;;  %v3276_v51 = vld [vmem:[#allocation13 + $0xd0] sm:$0xff] }
 0x584   :  { %v2923_v46 = vmul.f32 %v2901_v23, %v7237_v14  ;;  %v2911_v53 = vmul.f32 %v3862_v31, %v2910_v54  ;;  %3287 = vmatpush.msra.mxu0 %v3264_v4  ;;  %v3275_v25 = vld [vmem:[#allocation13 + $0xc8] sm:$0xff]  ;;  %v3274_v23 = vld [vmem:[#allocation13 + $0xc0] sm:$0xff] }
 0x586   :  { %v7403_v63 = vadd.f32 %v2924_v7, %v2923_v46  ;;  %3288 = vmatpush.msra.mxu0 %v3263_v45  ;;  %v2912_v6 = vadd.f32 %v3862_v31, %v2911_v53  ;;  %v8567_v7 = vld [vmem:[#allocation28_spill] sm:$0xff]  ;;  %v8568_v46 = vld [vmem:[#allocation29_spill] sm:$0xff] }
 0x587   :  { %v416_v45 = vadd.f32 %v8567_v7, %v8549_v33  ;;  %v457_v53 = vadd.f32 %v8568_v46, %v8551_v20 }
 0x588   :  { %3865 = vtanh.f32 %v7403_v63  ;;  %3289 = vmatpush.msra.mxu0 %v3262_v15  ;;  %v2916_v14 = vsel %vm2915_vm7, %v3862_v31, %v2912_v6  ;;  %v3280_v31 = vld [vmem:[#allocation13 + $0xf0] sm:$0xff] }
 0x589   :  { %v2921_v29 = vsel %vm2918_vm8, %v2920_v38, %v2916_v14  ;;  %3328 = vmatpush.msra.mxu1 %v3280_v31  ;;  %v3266_v31 = vld [vmem:[#allocation13 + $0x80] sm:$0xff] }
 0x58a   :  { %3290 = vmatpush.msra.mxu0 %v3261_v1 }
 0x58b   :  { %3329 = vmatpush.msra.mxu1 %v3279_v22 }
 0x58c   :  { %3291 = vmatpush.msra.mxu0 %v3260_v62  ;;  %v8569_v62 = vld [vmem:[#allocation37_spill] sm:$0xff] }
 0x58d   :  { %v355_v14 = vadd.f32 %v8569_v62, %v8553_v39 }
 0x58e   :  { %v3866_v9 = vpop.eup %3865  ;;  %3292 = vmatpush.msra.mxu0 %v3259_v12 }
 0x58f   :  { %v7409_v50 = vmul.f32 %v3866_v9, %v2921_v29  ;;  %v3271_v9 = vld [vmem:[#allocation13 + $0xa8] sm:$0xff] }
 0x590   :  { %3293 = vmatpush.msra.mxu0 %v3258_v41 }
 0x591   :  { %3038 = vmatmul.f32.vlgmr.msrb.gmra.mxu0 %v7409_v50  ;;  %3058 = vmatmul.f32.vlgmr.msrb.gmra.mxu1 %v7409_v50 }
 0x592   :  { %3078 = vmatmul.f32.vlgmr.msra.gmra.mxu2 %v7409_v50  ;;  %3098 = vmatmul.f32.vlgmr.msra.gmra.mxu3 %v7409_v50 }
 0x593   :  { %3294 = vmatpush.msra.mxu0 %v3257_v61 }
 0x595   :  { %3295 = vmatpush.msra.mxu0 %v3256_v57 }
 0x597   :  { %3296 = vmatpush.msra.mxu0 %v3255_v11 }
 0x599   :  { %3297 = vmatpush.msra.mxu0 %v3254_v17  ;;  %v3270_v17 = vld [vmem:[#allocation13 + $0xa0] sm:$0xff] }
 0x59b   :  { %3298 = vmatpush.msra.mxu0 %v3253_v40  ;;  %v3269_v40 = vld [vmem:[#allocation13 + $0x98] sm:$0xff] }
 0x59d   :  { %3299 = vmatpush.msra.mxu0 %v3252_v21 }
 0x59f   :  { %3300 = vmatpush.msra.mxu0 %v3251_v19 }
 0x5a1   :  { %3301 = vmatpush.msra.mxu0 %v3250_v0  ;;  %v3268_v0 = vld [vmem:[#allocation13 + $0x90] sm:$0xff] }
 0x5a2   :  { %3302 = vmatmul.f32.vlgmr.msra.gmra.mxu0 %v8559_v8 }
 0x5aa   :  { %3305 = vmatmul.f32.gmra.mxu0 %v8560_v34 }
 0x5b2   :  { %3308 = vmatmul.f32.gmra.mxu0 %v8561_v55 }
 0x5ba   :  { %3311 = vmatmul.f32.gmra.mxu0 %v8562_v35 }
 0x5c2   :  { %3314 = vmatmul.f32.gmra.mxu0 %v8563_v13 }
 0x5ca   :  { %3317 = vmatmul.f32.gmra.mxu0 %v7217_v36  ;;  %v3278_v36 = vld [vmem:[#allocation13 + $0xe0] sm:$0xff] }
 0x5cb   :  { %3330 = vmatpush.msra.mxu1 %v3278_v36 }
 0x5cd   :  { %3331 = vmatpush.msra.mxu1 %v3277_v32 }
 0x5cf   :  { %3332 = vmatpush.msra.mxu1 %v3276_v51 }
 0x5d1   :  { %3333 = vmatpush.msra.mxu1 %v3275_v25 }
 0x5d2   :  { %3320 = vmatmul.f32.gmra.mxu0 %v7394_v42  ;;  %v8566_v42 = vld [vmem:[#allocation47_spill] sm:$0xff] }
 0x5d3   :  { %v396_v48 = vadd.f32 %v8566_v42, %v8547_v2  ;;  %3334 = vmatpush.msra.mxu1 %v3274_v23  ;;  %v3273_v2 = vld [vmem:[#allocation13 + $0xb8] sm:$0xff] }
 0x5d5   :  { %3335 = vmatpush.msra.mxu1 %v3273_v2 }
 0x5d7   :  { %3336 = vmatpush.msra.mxu1 %v3272_v18  ;;  %v8573_v18 = vld [vmem:[#allocation41_spill] sm:$0xff] }
 0x5d9   :  { %3337 = vmatpush.msra.mxu1 %v3271_v9 }
 0x5db   :  { %3338 = vmatpush.msra.mxu1 %v3270_v17 }
 0x5dd   :  { %3339 = vmatpush.msra.mxu1 %v3269_v40 }
 0x5df   :  { %3340 = vmatpush.msra.mxu1 %v3268_v0 }
 0x5fd   :  { %v2951_v37 = vpop.f32.mrf.mxu0  ;;  %v2971_v27 = vpop.f32.mrf.mxu1 }
 0x5fe   :  { %v3014_v60 = vadd.f32 %v2951_v37, %v273_v56  ;;  %v3015_v49 = vadd.f32 %v2971_v27, %v314_v24  ;;  %v8570_v56 = vld [vmem:[#allocation51_spill] sm:$0xff]  ;;  %v3267_v24 = vld [vmem:[#allocation13 + $0x88] sm:$0xff] }
 0x5ff   :  { %3341 = vmatpush.msra.mxu1 %v3267_v24 }
 0x600   :  { %v3606_v44 = vmul.f32 -1.442695, %v3014_v60  ;;  %v3607_v43 = vmul.f32 -1.442695, %v3015_v49 }
 0x601   :  { %3342 = vmatpush.msra.mxu1 %v3266_v31 }
 0x602   :  { %3867 = vpow2.f32 %v3606_v44 }
 0x603   :  { %3869 = vpow2.f32 %v3607_v43 }
 0x604   :  { %v3011_v5 = vpop.f32.mrf.mxu3  ;;  %v2991_v15 = vpop.f32.mrf.mxu2 }
 0x605   :  { %v3017_v58 = vadd.f32 %v3011_v5, %v396_v48  ;;  %v3016_v33 = vadd.f32 %v2991_v15, %v355_v14 }
 0x607   :  { %v3608_v28 = vmul.f32 -1.442695, %v3017_v58 }
 0x608   :  { %v3868_v4 = vpop.eup %3867 }
 0x609   :  { %v3870_v30 = vpop.eup %3869  ;;  %v7428_v59 = vadd.f32 1.0, %v3868_v4  ;;  %3871 = vpow2.f32 %v3608_v28 }
 0x60a   :  { %v7430_v54 = vadd.f32 1.0, %v3870_v30 }
 0x60b   :  { %3873 = vrcp.f32 %v7428_v59  ;;  %v3119_v19 = vand.u32 2147483647, %v7428_v59  ;;  %v3121_v55 = vand.u32 2147483648, %v7428_v59  ;;  %vm3115_vm11 = vweird.f32 %v7428_v59 }
 0x60c   :  { %3875 = vrcp.f32 %v7430_v54  ;;  %v3140_v34 = vand.u32 2147483648, %v7430_v54  ;;  %v3138_v26 = vand.u32 2147483647, %v7430_v54  ;;  %vm3134_vm12 = vweird.f32 %v7430_v54 }
 0x60d   :  { %vm7452_vm13 = vcmp.eq.f32.partialorder %v3119_v19, 8.507059e+37  ;;  %v3122_v22 = vor.u32 1.1754944e-38, %v3121_v55 }
 0x60e   :  { %v3039_v6 = vpop.f32.mrf.mxu0  ;;  %v3059_v1 = vpop.f32.mrf.mxu1  ;;  %v3141_v43 = vor.u32 1.1754944e-38, %v3140_v34  ;;  %vm3139_vm0 = vcmp.eq.f32.partialorder %v3138_v26, 8.507059e+37 }
 0x60f   :  { %v3872_v3 = vpop.eup %3871  ;;  %v3102_v12 = vadd.f32 %v3039_v6, %v416_v45  ;;  %v3103_v38 = vadd.f32 %v3059_v1, %v457_v53 }
 0x610   :  { %v7440_v41 = vadd.f32 1.0, %v3872_v3 }
 0x611   :  { %v3874_v29 = vpop.eup %3873  ;;  %v3609_v61 = vmul.f32 -1.442695, %v3102_v12  ;;  %v3610_v57 = vmul.f32 -1.442695, %v3103_v38 }
 0x612   :  { %v3876_v20 = vpop.eup %3875  ;;  %v3111_v11 = vmul.f32 %v3874_v29, %v7428_v59  ;;  %3877 = vrcp.f32 %v7440_v41  ;;  %vm3116_vm9 = vweird.f32 %v3874_v29  ;;  %v3158_v46 = vand.u32 2147483647, %v7440_v41 }
 0x613   :  { %v3130_v39 = vmul.f32 %v3876_v20, %v7430_v54  ;;  %3879 = vpow2.f32 %v3609_v61  ;;  %vm3135_vm10 = vweird.f32 %v3876_v20  ;;  %vm3117_vm14 = vmor %vm3115_vm11, %vm3116_vm9  ;;  %v3160_v6 = vand.u32 2147483648, %v7440_v41 }
 0x614   :  { %v3112_v21 = vsub.f32 1.0, %v3111_v11  ;;  %3881 = vpow2.f32 %v3610_v57  ;;  %vm3136_vm15 = vmor %vm3134_vm12, %vm3135_vm10  ;;  %vm3154_vm2 = vweird.f32 %v7440_v41  ;;  %vm3159_vm4 = vcmp.eq.f32.partialorder %v3158_v46, 8.507059e+37 }
 0x615   :  { %v3131_v8 = vsub.f32 1.0, %v3130_v39  ;;  %3883 = vtanh.f32 %v3016_v33  ;;  %v3099_v35 = vpop.f32.mrf.mxu3  ;;  %v3079_v7 = vpop.f32.mrf.mxu2  ;;  %v3161_v9 = vor.u32 1.1754944e-38, %v3160_v6 }
 0x616   :  { %v3113_v13 = vmul.f32 %v3874_v29, %v3112_v21  ;;  %v3105_v52 = vadd.f32 %v3099_v35, %v8570_v56  ;;  %v3104_v3 = vadd.f32 %v3079_v7, %v8573_v18 }
 0x617   :  { %v3132_v10 = vmul.f32 %v3876_v20, %v3131_v8 }
 0x618   :  { %v3878_v37 = vpop.eup %3877  ;;  %v3114_v27 = vadd.f32 %v3874_v29, %v3113_v13  ;;  %v3611_v49 = vmul.f32 -1.442695, %v3105_v52 }
 0x619   :  { %v3880_v44 = vpop.eup %3879  ;;  %v3133_v36 = vadd.f32 %v3876_v20, %v3132_v10  ;;  %v3150_v42 = vmul.f32 %v3878_v37, %v7440_v41  ;;  %vm3155_vm1 = vweird.f32 %v3878_v37 }
 0x61a   :  { %v3882_v48 = vpop.eup %3881  ;;  %v3118_v5 = vsel %vm3117_vm14, %v3874_v29, %v3114_v27  ;;  %v3172_v32 = vadd.f32 1.0, %v3880_v44  ;;  %3885 = vpow2.f32 %v3611_v49  ;;  %vm3156_vm3 = vmor %vm3154_vm2, %vm3155_vm1 }
 0x61b   :  { %v3884_v58 = vpop.eup %3883  ;;  %v3123_v51 = vsel %vm7452_vm13, %v3122_v22, %v3118_v5  ;;  %v3137_v28 = vsel %vm3136_vm15, %v3876_v20, %v3133_v36  ;;  %v3191_v4 = vadd.f32 1.0, %v3882_v48  ;;  %v3151_v25 = vsub.f32 1.0, %v3150_v42  ;;  %v8575_v5 = vld [vmem:[#allocation38_spill] sm:$0xff] }
 0x61c   :  { %v3142_v30 = vsel %vm3139_vm0, %v3141_v43, %v3137_v28  ;;  %v3165_v59 = vmul.f32 %v3884_v58, %v3123_v51  ;;  %3887 = vrcp.f32 %v3172_v32  ;;  %v3184_v61 = vand.u32 2147483648, %v3172_v32  ;;  %v8577_v58 = vld [vmem:[#allocation154_spill] sm:$0xff]  ;;  %v8578_v51 = vld [vmem:[#allocation63_spill] sm:$0xff] }
 0x61d   :  { %v3164_v54 = vmul.f32 %v3142_v30, %v7375_v47  ;;  %3889 = vrcp.f32 %v3191_v4  ;;  %v3152_v23 = vmul.f32 %v3878_v37, %v3151_v25  ;;  %v3203_v33 = vand.u32 2147483648, %v3191_v4  ;;  %v3642_v25 = vld [vmem:[%s7533_s6] ss:$0 sm:$0xff]  ;;  %s4506_s6 = smov [#allocation15]  }
 0x61e   :  { %v3182_v11 = vand.u32 2147483647, %v3172_v32  ;;  %v3201_v41 = vand.u32 2147483647, %v3191_v4  ;;  %vm3178_vm7 = vweird.f32 %v3172_v32  ;;  %vm3197_vm8 = vweird.f32 %v3191_v4  ;;  %s3468_s10 = sshll.u32 %s4506_s6, 4  ;;  %s3469_s10 = int_to_ptr.vmem [resolvable:$true] %s3468_s10 }
 0x61f   :  { %v3166_v2 = vadd.f32 %v3165_v59, %v3164_v54  ;;  %v3153_v15 = vadd.f32 %v3878_v37, %v3152_v23  ;;  %v3185_v0 = vor.u32 1.1754944e-38, %v3184_v61  ;;  %v3204_v55 = vor.u32 1.1754944e-38, %v3203_v33  ;;  %v3303_v28 = vpop.f32.mrf.mxu0 }
 0x620   :  { %v3886_v45 = vpop.eup %3885  ;;  %vm3183_vm11 = vcmp.eq.f32.partialorder %v3182_v11, 8.507059e+37  ;;  %vm3202_vm12 = vcmp.eq.f32.partialorder %v3201_v41, 8.507059e+37  ;;  %v3304_v30 = vadd.f32 %v3642_v25, %v3303_v28 }
 0x621   :  { %3891 = vtanh.f32 %v3166_v2  ;;  %v3211_v53 = vadd.f32 1.0, %v3886_v45  ;;  %v3157_v12 = vsel %vm3156_vm3, %v3878_v37, %v3153_v15 }
 0x622   :  { %v3888_v1 = vpop.eup %3887  ;;  %v3162_v17 = vsel %vm3159_vm4, %v3161_v9, %v3157_v12 }
 0x623   :  { %v3890_v62 = vpop.eup %3889  ;;  %v3174_v47 = vmul.f32 %v3888_v1, %v3172_v32  ;;  %3893 = vrcp.f32 %v3211_v53  ;;  %vm3179_vm5 = vweird.f32 %v3888_v1  ;;  %v3223_v31 = vand.u32 2147483648, %v3211_v53  ;;  %v8576_v32 = vld [vmem:[#allocation68_spill] sm:$0xff] }
 0x624   :  { %v3193_v14 = vmul.f32 %v3890_v62, %v3191_v4  ;;  %3895 = vtanh.f32 %v3104_v3  ;;  %vm3198_vm6 = vweird.f32 %v3890_v62  ;;  %vm3180_vm9 = vmor %vm3178_vm7, %vm3179_vm5  ;;  %vm3217_vm14 = vweird.f32 %v3211_v53 }
 0x625   :  { %v3175_v38 = vsub.f32 1.0, %v3174_v47  ;;  %vm3199_vm10 = vmor %vm3197_vm8, %vm3198_vm6  ;;  %v3221_v44 = vand.u32 2147483647, %v3211_v53  ;;  %v3224_v22 = vor.u32 1.1754944e-38, %v3223_v31 }
 0x626   :  { %v3194_v29 = vsub.f32 1.0, %v3193_v14 }
 0x627   :  { %v3892_v57 = vpop.eup %3891  ;;  %v3176_v20 = vmul.f32 %v3888_v1, %v3175_v38  ;;  %vm3222_vm0 = vcmp.eq.f32.partialorder %v3221_v44, 8.507059e+37  ;;  %v3306_v4 = vpop.f32.mrf.mxu0 }
 0x628   :  { %v3195_v40 = vmul.f32 %v3890_v62, %v3194_v29  ;;  %v3168_v39 = vmul.f32 %v3892_v57, %v3162_v17  ;;  %v3307_v54 = vadd.f32 %v3642_v25, %v3306_v4 }
 0x629   :  { %v3894_v21 = vpop.eup %3893  ;;  %v3177_v19 = vadd.f32 %v3888_v1, %v3176_v20 }
 0x62a   :  { %v3196_v8 = vadd.f32 %v3890_v62, %v3195_v40  ;;  %v3213_v34 = vmul.f32 %v3894_v21, %v3211_v53  ;;  %3323 = vmatmul.f32.gmra.mxu0 %v3168_v39  ;;  %v3896_v13 = vpop.eup %3895  ;;  %vm3218_vm13 = vweird.f32 %v3894_v21 }
 0x62b   :  { %v3181_v35 = vsel %vm3180_vm9, %v3888_v1, %v3177_v19  ;;  %vm3219_vm15 = vmor %vm3217_vm14, %vm3218_vm13 }
 0x62c   :  { %v3186_v26 = vsel %vm3183_vm11, %v3185_v0, %v3181_v35  ;;  %v3200_v56 = vsel %vm3199_vm10, %v3890_v62, %v3196_v8  ;;  %v3214_v52 = vsub.f32 1.0, %v3213_v34 }
 0x62d   :  { %v3205_v24 = vsel %vm3202_vm12, %v3204_v55, %v3200_v56  ;;  %v3228_v10 = vmul.f32 %v3896_v13, %v3186_v26 }
 0x62e   :  { %v3227_v37 = vmul.f32 %v3205_v24, %v7403_v63  ;;  %v3215_v27 = vmul.f32 %v3894_v21, %v3214_v52  ;;  %v8574_v63 = vld [vmem:[#allocation65_spill] sm:$0xff] }
 0x630   :  { %v3229_v60 = vadd.f32 %v3228_v10, %v3227_v37  ;;  %v3216_v49 = vadd.f32 %v3894_v21, %v3215_v27 }
 0x632   :  { %3897 = vtanh.f32 %v3229_v60  ;;  %v3220_v43 = vsel %vm3219_vm15, %v3894_v21, %v3216_v49 }
 0x633   :  { %v3225_v42 = vsel %vm3222_vm0, %v3224_v22, %v3220_v43 }
 0x638   :  { %v3898_v36 = vpop.eup %3897 }
 0x639   :  { %v3231_v48 = vmul.f32 %v3898_v36, %v3225_v42 }
 0x63b   :  { %3343 = vmatmul.f32.vlgmr.msra.gmra.mxu1 %v3231_v48 }
 0x643   :  { %3346 = vmatmul.f32.gmra.mxu1 %v7409_v50 }
 0x64b   :  { %3349 = vmatmul.f32.gmra.mxu1 %v7264_v16  ;;  %v3309_v16 = vpop.f32.mrf.mxu0 }
 0x64c   :  { %v3310_v45 = vadd.f32 %v3642_v25, %v3309_v16 }
 0x653   :  { %3352 = vmatmul.f32.gmra.mxu1 %v8574_v63  ;;  %v3312_v7 = vpop.f32.mrf.mxu0 }
 0x654   :  { %v3313_v15 = vadd.f32 %v3642_v25, %v3312_v7 }
 0x65b   :  { %3355 = vmatmul.f32.gmra.mxu1 %v8575_v5  ;;  %v3315_v6 = vpop.f32.mrf.mxu0 }
 0x65c   :  { %v3316_v3 = vadd.f32 %v3642_v25, %v3315_v6 }
 0x663   :  { %3358 = vmatmul.f32.gmra.mxu1 %v8576_v32  ;;  %v3318_v14 = vpop.f32.mrf.mxu0 }
 0x664   :  { %v3319_v12 = vadd.f32 %v3642_v25, %v3318_v14 }
 0x66b   :  { %3361 = vmatmul.f32.gmra.mxu1 %v8577_v58  ;;  %v3321_v29 = vpop.f32.mrf.mxu0 }
 0x66c   :  { %v3322_v33 = vadd.f32 %v3642_v25, %v3321_v29 }
 0x673   :  { %3364 = vmatmul.f32.gmra.mxu1 %v8578_v51 }
 0x6a7   :  { %v3324_v20 = vpop.f32.mrf.mxu0 }
 0x6a8   :  { %v3325_v11 = vadd.f32 %v3642_v25, %v3324_v20 }
 0x6b8   :  { %v3344_v50 = vpop.f32.mrf.mxu1 }
 0x6b9   :  { %v7477_v59 = vadd.f32 %v3344_v50, %v3304_v30 }
 0x6bb   :  { %3368 = vmax.xlane.f32.xlu0 %v7477_v59 }
 0x6c0   :  { %v3347_v23 = vpop.f32.mrf.mxu1 }
 0x6c1   :  { %v7480_v2 = vadd.f32 %v3347_v23, %v3307_v54 }
 0x6c3   :  { %3370 = vmax.xlane.f32.xlu0 %v7480_v2 }
 0x6c8   :  { %v3350_v46 = vpop.f32.mrf.mxu1 }
 0x6c9   :  { %v7483_v53 = vadd.f32 %v3350_v46, %v3310_v45 }
 0x6cb   :  { %3372 = vmax.xlane.f32.xlu1 %v7483_v53 }
 0x6d0   :  { %v3353_v1 = vpop.f32.mrf.mxu1 }
 0x6d1   :  { %v7486_v18 = vadd.f32 %v3353_v1, %v3313_v15 }
 0x6d3   :  { %3374 = vmax.xlane.f32.xlu1 %v7486_v18 }
 0x6d8   :  { %v3356_v62 = vpop.f32.mrf.mxu1 }
 0x6d9   :  { %v7489_v47 = vadd.f32 %v3356_v62, %v3316_v3 }
 0x6db   :  { %3376 = vmax.xlane.f32.xlu2 %v7489_v47 }
 0x6e0   :  { %v3359_v38 = vpop.f32.mrf.mxu1 }
 0x6e1   :  { %v7492_v9 = vadd.f32 %v3359_v38, %v3319_v12 }
 0x6e3   :  { %3378 = vmax.xlane.f32.xlu2 %v7492_v9 }
 0x6e8   :  { %v3362_v61 = vpop.f32.mrf.mxu1 }
 0x6e9   :  { %v7495_v57 = vadd.f32 %v3362_v61, %v3322_v33 }
 0x6eb   :  { %3380 = vmax.xlane.f32.xlu0 %v7495_v57 }
 0x6f0   :  { %v3365_v17 = vpop.f32.mrf.mxu1 }
 0x6f1   :  { %v7498_v40 = vadd.f32 %v3365_v17, %v3325_v11 }
 0x6f3   :  { %3382 = vmax.xlane.f32.xlu1 %v7498_v40 }
 0x72e   :  { %v3369_v41 = vpop.xlane.xlu0 %3368 }
 0x72f   :  { %v3384_v39 = vsub.f32 %v7477_v59, %v3369_v41 }
 0x731   :  { %v3392_v21 = vmul.f32 1.442695, %v3384_v39 }
 0x733   :  { %3899 = vpow2.f32 %v3392_v21 }
 0x736   :  { %v3371_v19 = vpop.xlane.xlu0 %3370 }
 0x737   :  { %v3385_v0 = vsub.f32 %v7480_v2, %v3371_v19 }
 0x739   :  { %v3900_v8 = vpop.eup %3899  ;;  %v3394_v34 = vmul.f32 1.442695, %v3385_v0 }
 0x73a   :  { %3408 = vadd.xlane.f32.xlu2 %v3900_v8 }
 0x73b   :  { %3901 = vpow2.f32 %v3394_v34 }
 0x73e   :  { %v3373_v55 = vpop.xlane.xlu1 %3372 }
 0x73f   :  { %v3386_v35 = vsub.f32 %v7483_v53, %v3373_v55 }
 0x741   :  { %v3902_v13 = vpop.eup %3901  ;;  %v3396_v26 = vmul.f32 1.442695, %v3386_v35 }
 0x742   :  { %3410 = vadd.xlane.f32.xlu0 %v3902_v13 }
 0x743   :  { %3903 = vpow2.f32 %v3396_v26 }
 0x746   :  { %v3375_v56 = vpop.xlane.xlu1 %3374 }
 0x747   :  { %v3387_v52 = vsub.f32 %v7486_v18, %v3375_v56 }
 0x749   :  { %v3904_v24 = vpop.eup %3903  ;;  %v3398_v10 = vmul.f32 1.442695, %v3387_v52 }
 0x74a   :  { %3412 = vadd.xlane.f32.xlu1 %v3904_v24 }
 0x74b   :  { %3905 = vpow2.f32 %v3398_v10 }
 0x74e   :  { %v3377_v37 = vpop.xlane.xlu2 %3376 }
 0x74f   :  { %v3388_v27 = vsub.f32 %v7489_v47, %v3377_v37 }
 0x751   :  { %v3906_v60 = vpop.eup %3905  ;;  %v3400_v49 = vmul.f32 1.442695, %v3388_v27 }
 0x752   :  { %3414 = vadd.xlane.f32.xlu2 %v3906_v60 }
 0x753   :  { %3907 = vpow2.f32 %v3400_v49 }
 0x756   :  { %v3379_v31 = vpop.xlane.xlu2 %3378 }
 0x757   :  { %v3389_v44 = vsub.f32 %v7492_v9, %v3379_v31 }
 0x759   :  { %v3908_v43 = vpop.eup %3907  ;;  %v3402_v22 = vmul.f32 1.442695, %v3389_v44 }
 0x75a   :  { %3416 = vadd.xlane.f32.xlu0 %v3908_v43 }
 0x75b   :  { %3909 = vpow2.f32 %v3402_v22 }
 0x75e   :  { %v3381_v36 = vpop.xlane.xlu0 %3380 }
 0x75f   :  { %v3390_v42 = vsub.f32 %v7495_v57, %v3381_v36 }
 0x761   :  { %v3910_v48 = vpop.eup %3909  ;;  %v3404_v63 = vmul.f32 1.442695, %v3390_v42 }
 0x762   :  { %3418 = vadd.xlane.f32.xlu1 %v3910_v48 }
 0x763   :  { %3911 = vpow2.f32 %v3404_v63 }
 0x766   :  { %v7508_v5 = vpop.xlane.xlu1 %3382 }
 0x767   :  { %v3391_v32 = vsub.f32 %v7498_v40, %v7508_v5 }
 0x769   :  { %v3912_v58 = vpop.eup %3911  ;;  %v3406_v51 = vmul.f32 1.442695, %v3391_v32 }
 0x76a   :  { %3420 = vadd.xlane.f32.xlu2 %v3912_v58 }
 0x76b   :  { %3913 = vpow2.f32 %v3406_v51 }
 0x771   :  { %v3914_v28 = vpop.eup %3913 }
 0x772   :  { %3422 = vadd.xlane.f32.xlu0 %v3914_v28 }
 0x7ad   :  { %v3409_v4 = vpop.xlane.xlu2 %3408 }
 0x7ae   :  { %3915 = vlog2.f32 %v3409_v4 }
 0x7b4   :  { %v3916_v25 = vpop.eup %3915 }
 0x7b5   :  { %v3425_v30 = vmul.f32 0.6931472, %v3916_v25  ;;  %v3411_v50 = vpop.xlane.xlu0 %3410 }
 0x7b6   :  { %3917 = vlog2.f32 %v3411_v50 }
 0x7b7   :  { %v3440_v16 = vadd.f32 %v3425_v30, %v3369_v41 }
 0x7b9   :  { %v3448_v54 = vsub.f32 %v7477_v59, %v3440_v16 }
 0x7bb   :  { %3456 = vst [vmem:[#allocation15] sm:$0xff] %v3448_v54 }
 0x7bc   :  { %v3918_v23 = vpop.eup %3917 }
 0x7bd   :  { %v3427_v7 = vmul.f32 0.6931472, %v3918_v23  ;;  %v3413_v45 = vpop.xlane.xlu1 %3412 }
 0x7be   :  { %3919 = vlog2.f32 %v3413_v45 }
 0x7bf   :  { %v3441_v46 = vadd.f32 %v3427_v7, %v3371_v19 }
 0x7c1   :  { %v3449_v15 = vsub.f32 %v7480_v2, %v3441_v46 }
 0x7c3   :  { %3457 = vst [vmem:[#allocation15 + $0x8] sm:$0xff] %v3449_v15 }
 0x7c4   :  { %v3920_v6 = vpop.eup %3919 }
 0x7c5   :  { %v3429_v1 = vmul.f32 0.6931472, %v3920_v6  ;;  %v3415_v3 = vpop.xlane.xlu2 %3414 }
 0x7c6   :  { %3921 = vlog2.f32 %v3415_v3 }
 0x7c7   :  { %v3442_v62 = vadd.f32 %v3429_v1, %v3373_v55 }
 0x7c9   :  { %v3450_v14 = vsub.f32 %v7483_v53, %v3442_v62 }
 0x7cb   :  { %3458 = vst [vmem:[#allocation15 + $0x10] sm:$0xff] %v3450_v14 }
 0x7cc   :  { %v3922_v12 = vpop.eup %3921 }
 0x7cd   :  { %v3431_v38 = vmul.f32 0.6931472, %v3922_v12  ;;  %v3417_v59 = vpop.xlane.xlu0 %3416 }
 0x7ce   :  { %3923 = vlog2.f32 %v3417_v59 }
 0x7cf   :  { %v3443_v29 = vadd.f32 %v3431_v38, %v3375_v56 }
 0x7d1   :  { %v3451_v33 = vsub.f32 %v7486_v18, %v3443_v29 }
 0x7d3   :  { %3459 = vst [vmem:[#allocation15 + $0x18] sm:$0xff] %v3451_v33 }
 0x7d4   :  { %v3924_v61 = vpop.eup %3923 }
 0x7d5   :  { %v3433_v20 = vmul.f32 0.6931472, %v3924_v61  ;;  %v3419_v2 = vpop.xlane.xlu1 %3418 }
 0x7d6   :  { %3925 = vlog2.f32 %v3419_v2 }
 0x7d7   :  { %v3444_v11 = vadd.f32 %v3433_v20, %v3377_v37 }
 0x7d9   :  { %v3452_v17 = vsub.f32 %v7489_v47, %v3444_v11 }
 0x7db   :  { %3460 = vst [vmem:[#allocation15 + $0x20] sm:$0xff] %v3452_v17 }
 0x7dc   :  { %v3926_v41 = vpop.eup %3925 }
 0x7dd   :  { %v3435_v39 = vmul.f32 0.6931472, %v3926_v41  ;;  %v3421_v53 = vpop.xlane.xlu2 %3420 }
 0x7de   :  { %3927 = vlog2.f32 %v3421_v53 }
 0x7df   :  { %v3445_v21 = vadd.f32 %v3435_v39, %v3379_v31 }
 0x7e1   :  { %v3453_v19 = vsub.f32 %v7492_v9, %v3445_v21 }
 0x7e3   :  { %3461 = vst [vmem:[#allocation15 + $0x28] sm:$0xff] %v3453_v19 }
 0x7e4   :  { %v3928_v0 = vpop.eup %3927 }
 0x7e5   :  { %v3437_v8 = vmul.f32 0.6931472, %v3928_v0  ;;  %v3423_v18 = vpop.xlane.xlu0 %3422 }
 0x7e6   :  { %3929 = vlog2.f32 %v3423_v18 }
 0x7e7   :  { %v3446_v34 = vadd.f32 %v3437_v8, %v3381_v36 }
 0x7e9   :  { %v3454_v55 = vsub.f32 %v7495_v57, %v3446_v34 }
 0x7eb   :  { %3462 = vst [vmem:[#allocation15 + $0x30] sm:$0xff] %v3454_v55 }
 0x7ec   :  { %v3930_v35 = vpop.eup %3929 }
 0x7ed   :  { %v3439_v13 = vmul.f32 0.6931472, %v3930_v35 }
 0x7ef   :  { %v3447_v47 = vadd.f32 %v3439_v13, %v7508_v5 }
 0x7f1   :  { %v3455_v9 = vsub.f32 %v7498_v40, %v3447_v47 }
 0x7f3   :  { %3463 = vst [vmem:[#allocation15 + $0x38] sm:$0xff] %v3455_v9 }
 0x7f4   :  { %3476 = dma.vmem_to_hbm [thread:$0]  %s3469_s10, 1024, %s3471_s13, [#allocation6], %s4500_s21, %s4500_s21, %s4501_s22  }
 0x7f5   :  { %4491 = dma.done.wait [#allocation6], 1024  }
 0x7f6   :  { %4492 = vsyncadd [#allocation6], 4294966272 }
 0x7f7   :  { %3481 = vsyncpa [#allocation5], 1 }
 0x7f8   :  { %3482 = vsyncpa [#allocation8], 1 }
 0x7f9   :  { %3483 = vsyncpa [#allocation11], 1 }
 0x7fa   :  { %3484 = vsyncpa [#allocation14], 1 }
 0x7fb   :  { %3485 = vsyncpa [#allocation6], 1 }

</bundles_post_ra>
